<compile_context>
chip_gen: v7x
topology: tpu7x:2x2x1
jax: 0.10.0
libtpu: 0.0.40
codegen_flags: <defaults>
</compile_context>

<pallas_src>
import math
from typing import NamedTuple, Tuple

import jax
import jax.numpy as jnp
import numpy as np
from jax.experimental import pallas as pl
from jax.experimental.pallas import tpu as pltpu

_SQRT2_INV = 0.7071067811865476


class Config(NamedTuple):
    input_dims: int
    output_dims: int
    seq_len: int
    pred_len: int
    patch_lens: Tuple[int, ...]
    strides: Tuple[int, ...]
    hidden_dims: int
    depth: int
    use_bf16_matmul: bool = True


def _gelu_exact(x):
    # PyTorch F.gelu default = exact (erf) formulation.
    return 0.5 * x * (1.0 + jax.lax.erf(x * _SQRT2_INV))


def _block_structure(cfg):
    """Static (cin, cout, dilation, use_proj) per ConvBlock of DilatedConvEncoder."""
    channels = [cfg.hidden_dims] * cfg.depth + [cfg.output_dims]
    out = []
    cin = cfg.hidden_dims
    for i, cout in enumerate(channels):
        final = i == len(channels) - 1
        out.append((cin, cout, 2 ** i, (cin != cout) or final))
        cin = cout
    return tuple(out)


def _patch_num(T, patch_len, stride):
    return (T + stride - patch_len) // stride + 1


def _device_kind():
    try:
        return jax.devices()[0].device_kind.lower()
    except Exception:  # pragma: no cover - defensive (e.g. interpret mode)
        return ""


def _has_two_tensorcores():
    # v7x has 2 TensorCores per chip and only 64 MiB VMEM; v5e/v6e have 1 TC / 128 MiB.
    return "v7" in _device_kind()


# ---------------------------------------------------------------------------
# fused patch-embedding + DilatedConvEncoder kernel (one pallas_call / scale)
# ---------------------------------------------------------------------------
def _make_encoder_kernel(block_cfgs, rows, P, mm_dtype):
    def _mm(a, w):
        return jnp.dot(a.astype(mm_dtype), w, preferred_element_type=jnp.float32)

    def kernel(*refs):
        i = 0
        patches_ref = refs[i]; i += 1            # (rows, patch_len)
        pe_ref = refs[i]; i += 1                 # (rows, H) pre-tiled positional embedding (f32)
        wemb_ref = refs[i]; i += 1               # (patch_len, H)
        blk_refs = []
        for (_, _, _, use_proj) in block_cfgs:
            w1, b1, w2, b2 = refs[i], refs[i + 1], refs[i + 2], refs[i + 3]
            i += 4
            if use_proj:
                wp, bp = refs[i], refs[i + 1]
                i += 2
            else:
                wp = bp = None
            blk_refs.append((w1, b1, w2, b2, wp, bp))
        out_ref = refs[i]

        # patch index within its own sequence (block = bb sequences x P patches)
        tmod = jax.lax.broadcasted_iota(jnp.int32, (rows, 1), 0) % P

        # value embedding (Linear(patch_len, H, bias=False)) + positional embedding
        h = _mm(patches_ref[...], wemb_ref[...]) + pe_ref[...]

        def dilated_conv(a, w_ref, b_ref, d, cout):
            # y[t] = a[t-d]@W_m + a[t]@W_c + a[t+d]@W_p + b, zeros outside each sequence.
            if d >= P:
                # Side taps always fall outside a length-P sequence: centre tap only.
                y = _mm(a, w_ref[:, cout:2 * cout])
            else:
                # One dense matmul against the column-stacked taps, then shift/mask the
                # f32 OUTPUT slices (no shifted-input copies, no lane-axis concat).
                z = _mm(a, w_ref[...])                     # (rows, 3*cout) f32
                z_m = z[:, :cout]
                z_c = z[:, cout:2 * cout]
                z_p = z[:, 2 * cout:]
                y_m = jnp.where(tmod >= d,
                                pltpu.roll(z_m, shift=d, axis=0), 0.0)
                y_p = jnp.where(tmod < (P - d),
                                pltpu.roll(z_p, shift=rows - d, axis=0), 0.0)
                y = y_m + z_c + y_p
            return y + b_ref[...]

        # ConvBlock stack, fully unrolled; activation `h` never leaves VMEM.
        for (cin, cout, d, use_proj), (w1, b1, w2, b2, wp, bp) in zip(block_cfgs, blk_refs):
            residual = (_mm(h, wp[...]) + bp[...]) if use_proj else h
            a = _gelu_exact(h)
            a = dilated_conv(a, w1, b1, d, cout)
            a = _gelu_exact(a)
            a = dilated_conv(a, w2, b2, d, cout)
            h = a + residual

        out_ref[...] = h.astype(out_ref.dtype)

    return kernel


def _choose_bb(n_seq, P, chan_max, two_cores):
    """Sequences per grid step.  Block sublane dim (bb*P) must be 8-aligned unless the block
    covers the whole array.  Single-TC chips (v5e/v6e): biggest block that fits the activation
    budget (per-step overhead ~0.35us, so bigger wins; grid=1 allowed).  v7x (2 TCs): prefer an
    even number of >=2 grid steps so both cores get equal work under 'parallel' semantics."""
    budget_bytes = (6 << 20) if two_cores else (20 << 20)
    budget_rows = max(8, budget_bytes // max(1, 40 * chan_max))
    cands = [bb for bb in range(1, n_seq + 1) if n_seq % bb == 0]

    def ok(bb):
        return (bb == n_seq or (bb * P) % 8 == 0) and bb * P <= budget_rows

    if two_cores:
        even = [bb for bb in cands if ok(bb) and (n_seq // bb) >= 2 and (n_seq // bb) % 2 == 0]
        if even:
            return max(even)
        multi = [bb for bb in cands if ok(bb) and (n_seq // bb) >= 2]
        if multi:
            return max(multi)
    good = [bb for bb in cands if ok(bb)]
    return max(good) if good else n_seq


def dilated_conv_encoder(patches2, scale_p, blocks, block_cfgs, cfg, P, Lp, two_cores):
    NP = patches2.shape[0]
    n_seq = NP // P
    H, O = cfg.hidden_dims, cfg.output_dims
    mm_dtype = jnp.bfloat16 if cfg.use_bf16_matmul else jnp.float32

    bb = _choose_bb(n_seq, P, max(H, O), two_cores)
    rows = bb * P
    pe_big = jnp.tile(scale_p["pe"], (bb, 1))            # (rows, H) f32

    args = [patches2, pe_big, scale_p["w_emb"]]
    in_specs = [
        pl.BlockSpec((rows, Lp), lambda i: (i, 0)),
        pl.BlockSpec((rows, H), lambda i: (0, 0)),
        pl.BlockSpec((Lp, H), lambda i: (0, 0)),
    ]
    for blk, (cin, cout, _, use_proj) in zip(blocks, block_cfgs):
        args += [blk["w1"], blk["b1"], blk["w2"], blk["b2"]]
        in_specs += [
            pl.BlockSpec((cin, 3 * cout), lambda i: (0, 0)),
            pl.BlockSpec((1, cout), lambda i: (0, 0)),
            pl.BlockSpec((cout, 3 * cout), lambda i: (0, 0)),
            pl.BlockSpec((1, cout), lambda i: (0, 0)),
        ]
        if use_proj:
            args += [blk["wp"], blk["bp"]]
            in_specs += [pl.BlockSpec((cin, cout), lambda i: (0, 0)),
                         pl.BlockSpec((1, cout), lambda i: (0, 0))]

    # Advisory cost estimate for XLA's scheduler.
    flops = 2 * NP * Lp * H
    trans = 0
    for cin, cout, d, use_proj in block_cfgs:
        taps = 1 if d >= P else 3
        flops += 2 * NP * cin * (taps * cout) + 2 * NP * cout * (taps * cout)
        if use_proj:
            flops += 2 * NP * cin * cout
        trans += NP * (cin + cout)
    w_bytes = sum(int(np.prod(a.shape)) * a.dtype.itemsize for a in args[1:])
    cost = pl.CostEstimate(flops=int(flops), transcendentals=int(trans),
                           bytes_accessed=int(4 * NP * Lp + 4 * NP * O + w_bytes))

    # v7x: 64 MiB physical VMEM -> keep the scoped limit well below it; v5e/v6e have 128 MiB.
    vmem_limit = (48 << 20) if two_cores else (64 << 20)

    kernel = _make_encoder_kernel(tuple(block_cfgs), rows, P, mm_dtype)
    return pl.pallas_call(
        kernel,
        out_shape=jax.ShapeDtypeStruct((NP, O), jnp.float32),
        grid=(n_seq // bb,),
        in_specs=in_specs,
        out_specs=pl.BlockSpec((rows, O), lambda i: (i, 0)),
        compiler_params=pltpu.CompilerParams(
            dimension_semantics=("parallel",),
            vmem_limit_bytes=int(vmem_limit),
        ),
        cost_estimate=cost,
    )(*args)


# ---------------------------------------------------------------------------
# Flatten_Head linear + gate-weighted MOE accumulation, batched over all (b, d) rows.
# (out_fc hoisted out of the scale loop; accumulator is (B*D, pred_len), in-place.)
# ---------------------------------------------------------------------------
def _head_moe_kernel(f_ref, wh_ref, bh_ref, g_ref, acc_ref, out_ref):
    t1 = jnp.dot(f_ref[...].astype(wh_ref.dtype), wh_ref[...],
                 preferred_element_type=jnp.float32) + bh_ref[...]      # (R, Tp)
    out_ref[...] = acc_ref[...] + g_ref[...] * t1


def head_accumulate(feats2, w_head_t, b_head, g_col, acc):
    R, PO = feats2.shape
    Tp = acc.shape[1]
    return pl.pallas_call(
        _head_moe_kernel,
        out_shape=jax.ShapeDtypeStruct((R, Tp), jnp.float32),
        grid=(1,),
        in_specs=[
            pl.BlockSpec((R, PO), lambda i: (0, 0)),
            pl.BlockSpec((PO, Tp), lambda i: (0, 0)),
            pl.BlockSpec((1, Tp), lambda i: (0, 0)),
            pl.BlockSpec((R, 1), lambda i: (0, 0)),
            pl.BlockSpec((R, Tp), lambda i: (0, 0)),      # running MOE accumulator
        ],
        out_specs=pl.BlockSpec((R, Tp), lambda i: (0, 0)),
        input_output_aliases={4: 0},                      # accumulate in place
    )(feats2, w_head_t, b_head, g_col, acc)


# ---------------------------------------------------------------------------
# Final out_fc (applied once, after the gate-weighted sum across scales).
# ---------------------------------------------------------------------------
def _out_fc_kernel(t_ref, w_ref, b_ref, o_ref):
    o_ref[...] = (jnp.dot(t_ref[...], w_ref[...], preferred_element_type=jnp.float32)
                  + b_ref[...])


def out_fc_apply(t1, w, b):
    R, D = t1.shape
    O = w.shape[1]
    return pl.pallas_call(
        _out_fc_kernel,
        out_shape=jax.ShapeDtypeStruct((R, O), jnp.float32),
        grid=(1,),
        in_specs=[pl.BlockSpec((R, D), lambda i: (0, 0)),
                  pl.BlockSpec((D, O), lambda i: (0, 0)),
                  pl.BlockSpec((1, O), lambda i: (0, 0))],
        out_specs=pl.BlockSpec((R, O), lambda i: (0, 0)),
    )(t1, w, b)


# ---------------------------------------------------------------------------
# Parameters + full forward
# ---------------------------------------------------------------------------
def _positional_embedding(P, H):
    pos = np.arange(P, dtype=np.float32)[:, None]
    div = np.exp(np.arange(0, H, 2, dtype=np.float32) * -(math.log(10000.0) / H))
    pe = np.zeros((P, H), np.float32)
    pe[:, 0::2] = np.sin(pos * div)
    pe[:, 1::2] = np.cos(pos * div)
    return jnp.asarray(pe)


def init_params(key, cfg):
    D, T, Tp = cfg.input_dims, cfg.seq_len, cfg.pred_len
    H, O, depth = cfg.hidden_dims, cfg.output_dims, cfg.depth
    M = len(cfg.patch_lens)
    wdt = jnp.bfloat16 if cfg.use_bf16_matmul else jnp.float32
    keys = iter(jax.random.split(key, 4 + 6 * (depth + 1) + 4 * M))

    def u(shape, fan_in, dtype=jnp.float32):
        b = 1.0 / math.sqrt(fan_in)
        return jax.random.uniform(next(keys), shape, jnp.float32, -b, b).astype(dtype)

    params = {
        "w_gate": u((D * T, M), D * T),        # nn.Linear(D*T, M, bias=False), stored transposed
        "out_fc_w": u((D, O), D),              # nn.Linear(D, O), stored transposed
        "out_fc_b": u((1, O), D),
        "blocks": [],
        "scales": [],
    }
    for cin, cout, _, use_proj in _block_structure(cfg):
        blk = {
            # conv taps column-stacked: [W(t-d) | W(t) | W(t+d)] -> (cin, 3*cout), pre-cast bf16
            "w1": u((cin, 3 * cout), 3 * cin, wdt), "b1": u((1, cout), 3 * cin),
            "w2": u((cout, 3 * cout), 3 * cout, wdt), "b2": u((1, cout), 3 * cout),
        }
        if use_proj:
            blk["wp"] = u((cin, cout), cin, wdt)
            blk["bp"] = u((1, cout), cin)
        params["blocks"].append(blk)
    for Lp, st in zip(cfg.patch_lens, cfg.strides):
        P = _patch_num(T, Lp, st)
        assert P == int((T - Lp) / st + 2), "patch_num formulas must agree"
        nf = O * P
        params["scales"].append({
            "w_emb": u((Lp, H), Lp, wdt),       # PatchEmbedding value embedding (bias=False)
            "pe": _positional_embedding(P, H),
            "w_head_t": u((nf, Tp), nf, wdt),   # Flatten_Head linear, stored transposed
            "b_head": u((1, Tp), nf),
        })
    return params


def mimo_ts_encoder_moe_forward(params, x, cfg):
    """x: (B, seq_len, input_dims) f32 (may contain NaN rows) -> (B, pred_len, output_dims)."""
    B, T, D = x.shape
    O, Tp = cfg.output_dims, cfg.pred_len
    block_cfgs = _block_structure(cfg)
    two_cores = _has_two_tensorcores()

    # Eval-mode masking ('all_true'): only NaN rows are zeroed.  Plain jnp so XLA fuses it with
    # the transpose + patch gather (a Pallas kernel here would be masked-store launch overhead).
    valid = jnp.logical_not(jnp.any(jnp.isnan(x), axis=-1, keepdims=True))
    z = jnp.where(valid, x, 0.0)
    z_perm = jnp.transpose(z, (0, 2, 1))                    # (B, D, T)  (torch NCW layout)

    # gate = softmax(w_gate(flatten(z_perm)))  -- tiny (B x n_scales), plain jnp.
    gate = jax.nn.softmax(z_perm.reshape(B, D * T) @ params["w_gate"], axis=-1)

    # MOE accumulator holds gate-weighted Flatten_Head outputs; out_fc is applied once at
    # the end (softmax gates sum to 1, so the bias term factors out of the sum).
    acc = jnp.zeros((B * D, Tp), jnp.float32)
    for m, scale_p in enumerate(params["scales"]):
        Lp, st = cfg.patch_lens[m], cfg.strides[m]
        P = _patch_num(T, Lp, st)
        # ReplicationPad1d((0, stride)) + unfold(patch_len, stride): pure gather with static
        # indices -> layout glue in the wrapper.
        idx = np.minimum(np.arange(P)[:, None] * st + np.arange(Lp)[None, :], T - 1)
        patches = jnp.take(z_perm, jnp.asarray(idx.reshape(-1)), axis=2)   # (B, D, P*Lp)
        patches = patches.reshape(B * D * P, Lp)
        feats = dilated_conv_encoder(patches, scale_p, params["blocks"], block_cfgs,
                                     cfg, P, Lp, two_cores)                # (B*D*P, O)
        feats2 = feats.reshape(B * D, P * O)        # row-major => flatten order p*O+o (torch)
        g_col = jnp.repeat(gate[:, m], D)[:, None]  # per-(b, d) gate weight, (B*D, 1)
        acc = head_accumulate(feats2, scale_p["w_head_t"], scale_p["b_head"], g_col, acc)

    # Hoisted out_fc: (B, Tp, D) @ (D, O) + b
    t1 = acc.reshape(B, D, Tp).transpose(0, 2, 1).reshape(B * Tp, D)
    out = out_fc_apply(t1, params["out_fc_w"], params["out_fc_b"])
    return out.reshape(B, Tp, O)


if __name__ == "__main__":
    cfg = Config(
        input_dims=4, output_dims=128, seq_len=16, pred_len=8,
        patch_lens=(4, 8), strides=(2, 4),
        hidden_dims=128, depth=3, use_bf16_matmul=True,
    )
    key = jax.random.PRNGKey(0)
    k_param, k_x = jax.random.split(key)
    params = init_params(k_param, cfg)

    x = jax.random.normal(k_x, (2, cfg.seq_len, cfg.input_dims), jnp.float32)
    # Inject a NaN to exercise the nan_mask path deterministically.
    x = x.at[0, 5, 1].set(jnp.nan)

    fwd = jax.jit(mimo_ts_encoder_moe_forward, static_argnames=("cfg",))
    out = fwd(params, x, cfg=cfg)
    out = jax.block_until_ready(out)

    assert out.shape == (2, cfg.pred_len, cfg.output_dims), out.shape
    assert not bool(jnp.any(jnp.isnan(out)))
    print("KERNEL_OK")
</pallas_src>

<mosaic_0001>
module attributes {stable_mosaic.version = 11 : i64} {
  func.func @_head_moe_kernel(%arg0: i32, %arg1: memref<8x1024xf32, #tpu.memory_space<vmem>>, %arg2: memref<1024x8xbf16, #tpu.memory_space<vmem>>, %arg3: memref<1x8xf32, #tpu.memory_space<vmem>>, %arg4: memref<8x1xf32, #tpu.memory_space<vmem>>, %arg5: memref<8x8xf32, #tpu.memory_space<vmem>>, %arg6: memref<8x8xf32, #tpu.memory_space<vmem>>) attributes {dimension_semantics = [#tpu.dimension_semantics<arbitrary>], iteration_bounds = array<i64: 1>, scalar_prefetch = 0 : i64, scratch_operands = 0 : i64, tpu.core_type = #tpu.core_type<tc>, window_params = [{pipeline_mode = #tpu.pipeline_mode<synchronous>, transform_indices = @transform_0, window_bounds = array<i64: 8, 1024>}, {pipeline_mode = #tpu.pipeline_mode<synchronous>, transform_indices = @transform_1, window_bounds = array<i64: 1024, 8>}, {pipeline_mode = #tpu.pipeline_mode<synchronous>, transform_indices = @transform_2, window_bounds = array<i64: 1, 8>}, {pipeline_mode = #tpu.pipeline_mode<synchronous>, transform_indices = @transform_3, window_bounds = array<i64: 8, 1>}, {pipeline_mode = #tpu.pipeline_mode<synchronous>, transform_indices = @transform_4, window_bounds = array<i64: 8, 8>}, {pipeline_mode = #tpu.pipeline_mode<synchronous>, transform_indices = @transform_5, window_bounds = array<i64: 8, 8>}]} {
    %c0 = arith.constant 0 : index
    %c0_0 = arith.constant 0 : index
    %0 = vector.load %arg1[%c0, %c0_0] : memref<8x1024xf32, #tpu.memory_space<vmem>>, vector<8x1024xf32>
    %1 = arith.truncf %0 : vector<8x1024xf32> to vector<8x1024xbf16>
    %c0_1 = arith.constant 0 : index
    %c0_2 = arith.constant 0 : index
    %2 = vector.load %arg2[%c0_1, %c0_2] : memref<1024x8xbf16, #tpu.memory_space<vmem>>, vector<1024x8xbf16>
    %cst = arith.constant dense<0.000000e+00> : vector<8x8xf32>
    %3 = tpu.matmul %1, %2, %cst {dimension_numbers = #tpu.dot_dimension_numbers<[1], [0], [0], [1], [0, 0, 1, 1], [], []>} : vector<8x1024xbf16>, vector<1024x8xbf16>, vector<8x8xf32> -> vector<8x8xf32>
    %c0_3 = arith.constant 0 : index
    %c0_4 = arith.constant 0 : index
    %4 = vector.load %arg3[%c0_3, %c0_4] : memref<1x8xf32, #tpu.memory_space<vmem>>, vector<1x8xf32>
    %5 = vector.broadcast %4 : vector<1x8xf32> to vector<8x8xf32>
    %6 = arith.addf %3, %5 : vector<8x8xf32>
    %c0_5 = arith.constant 0 : index
    %c0_6 = arith.constant 0 : index
    %7 = vector.load %arg5[%c0_5, %c0_6] : memref<8x8xf32, #tpu.memory_space<vmem>>, vector<8x8xf32>
    %c0_7 = arith.constant 0 : index
    %c0_8 = arith.constant 0 : index
    %8 = vector.load %arg4[%c0_7, %c0_8] : memref<8x1xf32, #tpu.memory_space<vmem>>, vector<8x1xf32>
    %9 = vector.broadcast %8 : vector<8x1xf32> to vector<8x8xf32>
    %10 = arith.mulf %9, %6 : vector<8x8xf32>
    %11 = arith.addf %7, %10 : vector<8x8xf32>
    %c0_9 = arith.constant 0 : index
    %c0_10 = arith.constant 0 : index
    %12 = vector.load %arg6[%c0_9, %c0_10] : memref<8x8xf32, #tpu.memory_space<vmem>>, vector<8x8xf32>
    tpu.vector_store %arg6[%c0_9, %c0_10], %11 {strides = array<i32>} : memref<8x8xf32, #tpu.memory_space<vmem>>, vector<8x8xf32>,
    return
  }
  func.func @transform_0(%arg0: i32) -> (i32, i32) {
    %c0_i32 = arith.constant 0 : i32
    %c0_i32_0 = arith.constant 0 : i32
    %c0_i32_1 = arith.constant 0 : i32
    return %c0_i32, %c0_i32_0 : i32, i32
  }
  func.func @transform_1(%arg0: i32) -> (i32, i32) {
    %c0_i32 = arith.constant 0 : i32
    %c0_i32_0 = arith.constant 0 : i32
    %c0_i32_1 = arith.constant 0 : i32
    return %c0_i32, %c0_i32_0 : i32, i32
  }
  func.func @transform_2(%arg0: i32) -> (i32, i32) {
    %c0_i32 = arith.constant 0 : i32
    %c0_i32_0 = arith.constant 0 : i32
    %c0_i32_1 = arith.constant 0 : i32
    return %c0_i32, %c0_i32_0 : i32, i32
  }
  func.func @transform_3(%arg0: i32) -> (i32, i32) {
    %c0_i32 = arith.constant 0 : i32
    %c0_i32_0 = arith.constant 0 : i32
    %c0_i32_1 = arith.constant 0 : i32
    return %c0_i32, %c0_i32_0 : i32, i32
  }
  func.func @transform_4(%arg0: i32) -> (i32, i32) {
    %c0_i32 = arith.constant 0 : i32
    %c0_i32_0 = arith.constant 0 : i32
    %c0_i32_1 = arith.constant 0 : i32
    return %c0_i32, %c0_i32_0 : i32, i32
  }
  func.func @transform_5(%arg0: i32) -> (i32, i32) {
    %c0_i32 = arith.constant 0 : i32
    %c0_i32_0 = arith.constant 0 : i32
    %c0_i32_1 = arith.constant 0 : i32
    return %c0_i32, %c0_i32_0 : i32, i32
  }
}

module attributes {stable_mosaic.version = 11 : i64} {
  func.func @kernel(%arg0: i32, %arg1: memref<64x4xf32, #tpu.memory_space<vmem>>, %arg2: memref<64x128xf32, #tpu.memory_space<vmem>>, %arg3: memref<4x128xbf16, #tpu.memory_space<vmem>>, %arg4: memref<128x384xbf16, #tpu.memory_space<vmem>>, %arg5: memref<1x128xf32, #tpu.memory_space<vmem>>, %arg6: memref<128x384xbf16, #tpu.memory_space<vmem>>, %arg7: memref<1x128xf32, #tpu.memory_space<vmem>>, %arg8: memref<128x384xbf16, #tpu.memory_space<vmem>>, %arg9: memref<1x128xf32, #tpu.memory_space<vmem>>, %arg10: memref<128x384xbf16, #tpu.memory_space<vmem>>, %arg11: memref<1x128xf32, #tpu.memory_space<vmem>>, %arg12: memref<128x384xbf16, #tpu.memory_space<vmem>>, %arg13: memref<1x128xf32, #tpu.memory_space<vmem>>, %arg14: memref<128x384xbf16, #tpu.memory_space<vmem>>, %arg15: memref<1x128xf32, #tpu.memory_space<vmem>>, %arg16: memref<128x384xbf16, #tpu.memory_space<vmem>>, %arg17: memref<1x128xf32, #tpu.memory_space<vmem>>, %arg18: memref<128x384xbf16, #tpu.memory_space<vmem>>, %arg19: memref<1x128xf32, #tpu.memory_space<vmem>>, %arg20: memref<128x128xbf16, #tpu.memory_space<vmem>>, %arg21: memref<1x128xf32, #tpu.memory_space<vmem>>, %arg22: memref<64x128xf32, #tpu.memory_space<vmem>>) attributes {dimension_semantics = [#tpu.dimension_semantics<parallel>], iteration_bounds = array<i64: 1>, scalar_prefetch = 0 : i64, scratch_operands = 0 : i64, tpu.core_type = #tpu.core_type<tc>, window_params = [{transform_indices = @transform_0, window_bounds = array<i64: 64, 4>}, {pipeline_mode = #tpu.pipeline_mode<synchronous>, transform_indices = @transform_1, window_bounds = array<i64: 64, 128>}, {pipeline_mode = #tpu.pipeline_mode<synchronous>, transform_indices = @transform_2, window_bounds = array<i64: 4, 128>}, {pipeline_mode = #tpu.pipeline_mode<synchronous>, transform_indices = @transform_3, window_bounds = array<i64: 128, 384>}, {pipeline_mode = #tpu.pipeline_mode<synchronous>, transform_indices = @transform_4, window_bounds = array<i64: 1, 128>}, {pipeline_mode = #tpu.pipeline_mode<synchronous>, transform_indices = @transform_5, window_bounds = array<i64: 128, 384>}, {pipeline_mode = #tpu.pipeline_mode<synchronous>, transform_indices = @transform_6, window_bounds = array<i64: 1, 128>}, {pipeline_mode = #tpu.pipeline_mode<synchronous>, transform_indices = @transform_7, window_bounds = array<i64: 128, 384>}, {pipeline_mode = #tpu.pipeline_mode<synchronous>, transform_indices = @transform_8, window_bounds = array<i64: 1, 128>}, {pipeline_mode = #tpu.pipeline_mode<synchronous>, transform_indices = @transform_9, window_bounds = array<i64: 128, 384>}, {pipeline_mode = #tpu.pipeline_mode<synchronous>, transform_indices = @transform_10, window_bounds = array<i64: 1, 128>}, {pipeline_mode = #tpu.pipeline_mode<synchronous>, transform_indices = @transform_11, window_bounds = array<i64: 128, 384>}, {pipeline_mode = #tpu.pipeline_mode<synchronous>, transform_indices = @transform_12, window_bounds = array<i64: 1, 128>}, {pipeline_mode = #tpu.pipeline_mode<synchronous>, transform_indices = @transform_13, window_bounds = array<i64: 128, 384>}, {pipeline_mode = #tpu.pipeline_mode<synchronous>, transform_indices = @transform_14, window_bounds = array<i64: 1, 128>}, {pipeline_mode = #tpu.pipeline_mode<synchronous>, transform_indices = @transform_15, window_bounds = array<i64: 128, 384>}, {pipeline_mode = #tpu.pipeline_mode<synchronous>, transform_indices = @transform_16, window_bounds = array<i64: 1, 128>}, {pipeline_mode = #tpu.pipeline_mode<synchronous>, transform_indices = @transform_17, window_bounds = array<i64: 128, 384>}, {pipeline_mode = #tpu.pipeline_mode<synchronous>, transform_indices = @transform_18, window_bounds = array<i64: 1, 128>}, {pipeline_mode = #tpu.pipeline_mode<synchronous>, transform_indices = @transform_19, window_bounds = array<i64: 128, 128>}, {pipeline_mode = #tpu.pipeline_mode<synchronous>, transform_indices = @transform_20, window_bounds = array<i64: 1, 128>}, {transform_indices = @transform_21, window_bounds = array<i64: 64, 128>}]} {
    %0 = tpu.iota {dimensions = array<i32: 0>} : vector<64x1xi32>
    %c8_i32 = arith.constant 8 : i32
    %c0_i32 = arith.constant 0 : i32
    %1 = arith.cmpi eq, %c8_i32, %c0_i32 : i32
    %c1_i32 = arith.constant 1 : i32
    %2 = arith.select %1, %c1_i32, %c8_i32 : i32
    %3 = vector.broadcast %2 : i32 to vector<64x1xi32>
    %4 = arith.remsi %0, %3 : vector<64x1xi32>
    %c0_i32_0 = arith.constant 0 : i32
    %5 = vector.broadcast %c0_i32_0 : i32 to vector<64x1xi32>
    %6 = arith.cmpi ne, %4, %5 : vector<64x1xi32>
    %c0_i32_1 = arith.constant 0 : i32
    %7 = vector.broadcast %c0_i32_1 : i32 to vector<64x1xi32>
    %8 = arith.cmpi slt, %4, %7 : vector<64x1xi32>
    %c0_i32_2 = arith.constant 0 : i32
    %9 = arith.cmpi slt, %2, %c0_i32_2 : i32
    %10 = vector.broadcast %9 : i1 to vector<64x1xi1>
    %11 = vector.broadcast %10 : vector<64x1xi1> to vector<64x1xi1>
    %12 = arith.xori %8, %11 : vector<64x1xi1>
    %13 = arith.andi %12, %6 : vector<64x1xi1>
    %14 = vector.broadcast %2 : i32 to vector<64x1xi32>
    %15 = arith.addi %4, %14 : vector<64x1xi32>
    %16 = arith.select %13, %15, %4 : vector<64x1xi1>, vector<64x1xi32>
    %c0 = arith.constant 0 : index
    %c0_3 = arith.constant 0 : index
    %17 = vector.load %arg1[%c0, %c0_3] : memref<64x4xf32, #tpu.memory_space<vmem>>, vector<64x4xf32>
    %c0_4 = arith.constant 0 : index
    %c0_5 = arith.constant 0 : index
    %18 = vector.load %arg3[%c0_4, %c0_5] : memref<4x128xbf16, #tpu.memory_space<vmem>>, vector<4x128xbf16>
    %19 = arith.truncf %17 : vector<64x4xf32> to vector<64x4xbf16>
    %cst = arith.constant dense<0.000000e+00> : vector<64x128xf32>
    %20 = tpu.matmul %19, %18, %cst {dimension_numbers = #tpu.dot_dimension_numbers<[1], [0], [0], [1], [0, 0, 1, 1], [], []>} : vector<64x4xbf16>, vector<4x128xbf16>, vector<64x128xf32> -> vector<64x128xf32>
    %c0_6 = arith.constant 0 : index
    %c0_7 = arith.constant 0 : index
    %21 = vector.load %arg2[%c0_6, %c0_7] : memref<64x128xf32, #tpu.memory_space<vmem>>, vector<64x128xf32>
    %22 = arith.addf %20, %21 : vector<64x128xf32>
    %cst_8 = arith.constant 5.000000e-01 : f32
    %23 = vector.broadcast %cst_8 : f32 to vector<64x128xf32>
    %24 = arith.mulf %23, %22 : vector<64x128xf32>
    %cst_9 = arith.constant 0.707106769 : f32
    %25 = vector.broadcast %cst_9 : f32 to vector<64x128xf32>
    %26 = arith.mulf %22, %25 : vector<64x128xf32>
    %27 = math.erf %26 : vector<64x128xf32>
    %cst_10 = arith.constant 1.000000e+00 : f32
    %28 = vector.broadcast %cst_10 : f32 to vector<64x128xf32>
    %29 = arith.addf %28, %27 : vector<64x128xf32>
    %30 = arith.mulf %24, %29 : vector<64x128xf32>
    %c0_11 = arith.constant 0 : index
    %c0_12 = arith.constant 0 : index
    %31 = vector.load %arg4[%c0_11, %c0_12] : memref<128x384xbf16, #tpu.memory_space<vmem>>, vector<128x384xbf16>
    %32 = arith.truncf %30 : vector<64x128xf32> to vector<64x128xbf16>
    %cst_13 = arith.constant dense<0.000000e+00> : vector<64x384xf32>
    %33 = tpu.matmul %32, %31, %cst_13 {dimension_numbers = #tpu.dot_dimension_numbers<[1], [0], [0], [1], [0, 0, 1, 1], [], []>} : vector<64x128xbf16>, vector<128x384xbf16>, vector<64x384xf32> -> vector<64x384xf32>
    %34 = vector.extract_strided_slice %33 {offsets = [0, 0], sizes = [64, 128], strides = [1, 1]} : vector<64x384xf32> to vector<64x128xf32>
    %35 = vector.extract_strided_slice %33 {offsets = [0, 128], sizes = [64, 128], strides = [1, 1]} : vector<64x384xf32> to vector<64x128xf32>
    %36 = vector.extract_strided_slice %33 {offsets = [0, 256], sizes = [64, 128], strides = [1, 1]} : vector<64x384xf32> to vector<64x128xf32>
    %c1_i32_14 = arith.constant 1 : i32
    %37 = vector.broadcast %c1_i32_14 : i32 to vector<64x1xi32>
    %38 = arith.cmpi sge, %16, %37 : vector<64x1xi32>
    %c1_i32_15 = arith.constant 1 : i32
    %39 = tpu.dynamic_rotate %34 by %c1_i32_15 dim 0 : vector<64x128xf32>, i32 -> vector<64x128xf32>
    %cst_16 = arith.constant 0.000000e+00 : f32
    %40 = vector.shape_cast %38 : vector<64x1xi1> to vector<64x1xi1>
    %41 = vector.broadcast %40 : vector<64x1xi1> to vector<64x128xi1>
    %42 = vector.broadcast %cst_16 : f32 to vector<64x128xf32>
    %43 = arith.select %41, %39, %42 : vector<64x128xi1>, vector<64x128xf32>
    %c7_i32 = arith.constant 7 : i32
    %44 = vector.broadcast %c7_i32 : i32 to vector<64x1xi32>
    %45 = arith.cmpi slt, %16, %44 : vector<64x1xi32>
    %c63_i32 = arith.constant 63 : i32
    %46 = tpu.dynamic_rotate %36 by %c63_i32 dim 0 : vector<64x128xf32>, i32 -> vector<64x128xf32>
    %cst_17 = arith.constant 0.000000e+00 : f32
    %47 = vector.shape_cast %45 : vector<64x1xi1> to vector<64x1xi1>
    %48 = vector.broadcast %47 : vector<64x1xi1> to vector<64x128xi1>
    %49 = vector.broadcast %cst_17 : f32 to vector<64x128xf32>
    %50 = arith.select %48, %46, %49 : vector<64x128xi1>, vector<64x128xf32>
    %51 = arith.addf %43, %35 : vector<64x128xf32>
    %52 = arith.addf %51, %50 : vector<64x128xf32>
    %c0_18 = arith.constant 0 : index
    %c0_19 = arith.constant 0 : index
    %53 = vector.load %arg5[%c0_18, %c0_19] : memref<1x128xf32, #tpu.memory_space<vmem>>, vector<1x128xf32>
    %54 = vector.broadcast %53 : vector<1x128xf32> to vector<64x128xf32>
    %55 = arith.addf %52, %54 : vector<64x128xf32>
    %cst_20 = arith.constant 5.000000e-01 : f32
    %56 = vector.broadcast %cst_20 : f32 to vector<64x128xf32>
    %57 = arith.mulf %56, %55 : vector<64x128xf32>
    %cst_21 = arith.constant 0.707106769 : f32
    %58 = vector.broadcast %cst_21 : f32 to vector<64x128xf32>
    %59 = arith.mulf %55, %58 : vector<64x128xf32>
    %60 = math.erf %59 : vector<64x128xf32>
    %cst_22 = arith.constant 1.000000e+00 : f32
    %61 = vector.broadcast %cst_22 : f32 to vector<64x128xf32>
    %62 = arith.addf %61, %60 : vector<64x128xf32>
    %63 = arith.mulf %57, %62 : vector<64x128xf32>
    %c0_23 = arith.constant 0 : index
    %c0_24 = arith.constant 0 : index
    %64 = vector.load %arg6[%c0_23, %c0_24] : memref<128x384xbf16, #tpu.memory_space<vmem>>, vector<128x384xbf16>
    %65 = arith.truncf %63 : vector<64x128xf32> to vector<64x128xbf16>
    %cst_25 = arith.constant dense<0.000000e+00> : vector<64x384xf32>
    %66 = tpu.matmul %65, %64, %cst_25 {dimension_numbers = #tpu.dot_dimension_numbers<[1], [0], [0], [1], [0, 0, 1, 1], [], []>} : vector<64x128xbf16>, vector<128x384xbf16>, vector<64x384xf32> -> vector<64x384xf32>
    %67 = vector.extract_strided_slice %66 {offsets = [0, 0], sizes = [64, 128], strides = [1, 1]} : vector<64x384xf32> to vector<64x128xf32>
    %68 = vector.extract_strided_slice %66 {offsets = [0, 128], sizes = [64, 128], strides = [1, 1]} : vector<64x384xf32> to vector<64x128xf32>
    %69 = vector.extract_strided_slice %66 {offsets = [0, 256], sizes = [64, 128], strides = [1, 1]} : vector<64x384xf32> to vector<64x128xf32>
    %c1_i32_26 = arith.constant 1 : i32
    %70 = vector.broadcast %c1_i32_26 : i32 to vector<64x1xi32>
    %71 = arith.cmpi sge, %16, %70 : vector<64x1xi32>
    %c1_i32_27 = arith.constant 1 : i32
    %72 = tpu.dynamic_rotate %67 by %c1_i32_27 dim 0 : vector<64x128xf32>, i32 -> vector<64x128xf32>
    %cst_28 = arith.constant 0.000000e+00 : f32
    %73 = vector.shape_cast %71 : vector<64x1xi1> to vector<64x1xi1>
    %74 = vector.broadcast %73 : vector<64x1xi1> to vector<64x128xi1>
    %75 = vector.broadcast %cst_28 : f32 to vector<64x128xf32>
    %76 = arith.select %74, %72, %75 : vector<64x128xi1>, vector<64x128xf32>
    %c7_i32_29 = arith.constant 7 : i32
    %77 = vector.broadcast %c7_i32_29 : i32 to vector<64x1xi32>
    %78 = arith.cmpi slt, %16, %77 : vector<64x1xi32>
    %c63_i32_30 = arith.constant 63 : i32
    %79 = tpu.dynamic_rotate %69 by %c63_i32_30 dim 0 : vector<64x128xf32>, i32 -> vector<64x128xf32>
    %cst_31 = arith.constant 0.000000e+00 : f32
    %80 = vector.shape_cast %78 : vector<64x1xi1> to vector<64x1xi1>
    %81 = vector.broadcast %80 : vector<64x1xi1> to vector<64x128xi1>
    %82 = vector.broadcast %cst_31 : f32 to vector<64x128xf32>
    %83 = arith.select %81, %79, %82 : vector<64x128xi1>, vector<64x128xf32>
    %84 = arith.addf %76, %68 : vector<64x128xf32>
    %85 = arith.addf %84, %83 : vector<64x128xf32>
    %c0_32 = arith.constant 0 : index
    %c0_33 = arith.constant 0 : index
    %86 = vector.load %arg7[%c0_32, %c0_33] : memref<1x128xf32, #tpu.memory_space<vmem>>, vector<1x128xf32>
    %87 = vector.broadcast %86 : vector<1x128xf32> to vector<64x128xf32>
    %88 = arith.addf %85, %87 : vector<64x128xf32>
    %89 = arith.addf %88, %22 : vector<64x128xf32>
    %cst_34 = arith.constant 5.000000e-01 : f32
    %90 = vector.broadcast %cst_34 : f32 to vector<64x128xf32>
    %91 = arith.mulf %90, %89 : vector<64x128xf32>
    %cst_35 = arith.constant 0.707106769 : f32
    %92 = vector.broadcast %cst_35 : f32 to vector<64x128xf32>
    %93 = arith.mulf %89, %92 : vector<64x128xf32>
    %94 = math.erf %93 : vector<64x128xf32>
    %cst_36 = arith.constant 1.000000e+00 : f32
    %95 = vector.broadcast %cst_36 : f32 to vector<64x128xf32>
    %96 = arith.addf %95, %94 : vector<64x128xf32>
    %97 = arith.mulf %91, %96 : vector<64x128xf32>
    %c0_37 = arith.constant 0 : index
    %c0_38 = arith.constant 0 : index
    %98 = vector.load %arg8[%c0_37, %c0_38] : memref<128x384xbf16, #tpu.memory_space<vmem>>, vector<128x384xbf16>
    %99 = arith.truncf %97 : vector<64x128xf32> to vector<64x128xbf16>
    %cst_39 = arith.constant dense<0.000000e+00> : vector<64x384xf32>
    %100 = tpu.matmul %99, %98, %cst_39 {dimension_numbers = #tpu.dot_dimension_numbers<[1], [0], [0], [1], [0, 0, 1, 1], [], []>} : vector<64x128xbf16>, vector<128x384xbf16>, vector<64x384xf32> -> vector<64x384xf32>
    %101 = vector.extract_strided_slice %100 {offsets = [0, 0], sizes = [64, 128], strides = [1, 1]} : vector<64x384xf32> to vector<64x128xf32>
    %102 = vector.extract_strided_slice %100 {offsets = [0, 128], sizes = [64, 128], strides = [1, 1]} : vector<64x384xf32> to vector<64x128xf32>
    %103 = vector.extract_strided_slice %100 {offsets = [0, 256], sizes = [64, 128], strides = [1, 1]} : vector<64x384xf32> to vector<64x128xf32>
    %c2_i32 = arith.constant 2 : i32
    %104 = vector.broadcast %c2_i32 : i32 to vector<64x1xi32>
    %105 = arith.cmpi sge, %16, %104 : vector<64x1xi32>
    %c2_i32_40 = arith.constant 2 : i32
    %106 = tpu.dynamic_rotate %101 by %c2_i32_40 dim 0 : vector<64x128xf32>, i32 -> vector<64x128xf32>
    %cst_41 = arith.constant 0.000000e+00 : f32
    %107 = vector.shape_cast %105 : vector<64x1xi1> to vector<64x1xi1>
    %108 = vector.broadcast %107 : vector<64x1xi1> to vector<64x128xi1>
    %109 = vector.broadcast %cst_41 : f32 to vector<64x128xf32>
    %110 = arith.select %108, %106, %109 : vector<64x128xi1>, vector<64x128xf32>
    %c6_i32 = arith.constant 6 : i32
    %111 = vector.broadcast %c6_i32 : i32 to vector<64x1xi32>
    %112 = arith.cmpi slt, %16, %111 : vector<64x1xi32>
    %c62_i32 = arith.constant 62 : i32
    %113 = tpu.dynamic_rotate %103 by %c62_i32 dim 0 : vector<64x128xf32>, i32 -> vector<64x128xf32>
    %cst_42 = arith.constant 0.000000e+00 : f32
    %114 = vector.shape_cast %112 : vector<64x1xi1> to vector<64x1xi1>
    %115 = vector.broadcast %114 : vector<64x1xi1> to vector<64x128xi1>
    %116 = vector.broadcast %cst_42 : f32 to vector<64x128xf32>
    %117 = arith.select %115, %113, %116 : vector<64x128xi1>, vector<64x128xf32>
    %118 = arith.addf %110, %102 : vector<64x128xf32>
    %119 = arith.addf %118, %117 : vector<64x128xf32>
    %c0_43 = arith.constant 0 : index
    %c0_44 = arith.constant 0 : index
    %120 = vector.load %arg9[%c0_43, %c0_44] : memref<1x128xf32, #tpu.memory_space<vmem>>, vector<1x128xf32>
    %121 = vector.broadcast %120 : vector<1x128xf32> to vector<64x128xf32>
    %122 = arith.addf %119, %121 : vector<64x128xf32>
    %cst_45 = arith.constant 5.000000e-01 : f32
    %123 = vector.broadcast %cst_45 : f32 to vector<64x128xf32>
    %124 = arith.mulf %123, %122 : vector<64x128xf32>
    %cst_46 = arith.constant 0.707106769 : f32
    %125 = vector.broadcast %cst_46 : f32 to vector<64x128xf32>
    %126 = arith.mulf %122, %125 : vector<64x128xf32>
    %127 = math.erf %126 : vector<64x128xf32>
    %cst_47 = arith.constant 1.000000e+00 : f32
    %128 = vector.broadcast %cst_47 : f32 to vector<64x128xf32>
    %129 = arith.addf %128, %127 : vector<64x128xf32>
    %130 = arith.mulf %124, %129 : vector<64x128xf32>
    %c0_48 = arith.constant 0 : index
    %c0_49 = arith.constant 0 : index
    %131 = vector.load %arg10[%c0_48, %c0_49] : memref<128x384xbf16, #tpu.memory_space<vmem>>, vector<128x384xbf16>
    %132 = arith.truncf %130 : vector<64x128xf32> to vector<64x128xbf16>
    %cst_50 = arith.constant dense<0.000000e+00> : vector<64x384xf32>
    %133 = tpu.matmul %132, %131, %cst_50 {dimension_numbers = #tpu.dot_dimension_numbers<[1], [0], [0], [1], [0, 0, 1, 1], [], []>} : vector<64x128xbf16>, vector<128x384xbf16>, vector<64x384xf32> -> vector<64x384xf32>
    %134 = vector.extract_strided_slice %133 {offsets = [0, 0], sizes = [64, 128], strides = [1, 1]} : vector<64x384xf32> to vector<64x128xf32>
    %135 = vector.extract_strided_slice %133 {offsets = [0, 128], sizes = [64, 128], strides = [1, 1]} : vector<64x384xf32> to vector<64x128xf32>
    %136 = vector.extract_strided_slice %133 {offsets = [0, 256], sizes = [64, 128], strides = [1, 1]} : vector<64x384xf32> to vector<64x128xf32>
    %c2_i32_51 = arith.constant 2 : i32
    %137 = vector.broadcast %c2_i32_51 : i32 to vector<64x1xi32>
    %138 = arith.cmpi sge, %16, %137 : vector<64x1xi32>
    %c2_i32_52 = arith.constant 2 : i32
    %139 = tpu.dynamic_rotate %134 by %c2_i32_52 dim 0 : vector<64x128xf32>, i32 -> vector<64x128xf32>
    %cst_53 = arith.constant 0.000000e+00 : f32
    %140 = vector.shape_cast %138 : vector<64x1xi1> to vector<64x1xi1>
    %141 = vector.broadcast %140 : vector<64x1xi1> to vector<64x128xi1>
    %142 = vector.broadcast %cst_53 : f32 to vector<64x128xf32>
    %143 = arith.select %141, %139, %142 : vector<64x128xi1>, vector<64x128xf32>
    %c6_i32_54 = arith.constant 6 : i32
    %144 = vector.broadcast %c6_i32_54 : i32 to vector<64x1xi32>
    %145 = arith.cmpi slt, %16, %144 : vector<64x1xi32>
    %c62_i32_55 = arith.constant 62 : i32
    %146 = tpu.dynamic_rotate %136 by %c62_i32_55 dim 0 : vector<64x128xf32>, i32 -> vector<64x128xf32>
    %cst_56 = arith.constant 0.000000e+00 : f32
    %147 = vector.shape_cast %145 : vector<64x1xi1> to vector<64x1xi1>
    %148 = vector.broadcast %147 : vector<64x1xi1> to vector<64x128xi1>
    %149 = vector.broadcast %cst_56 : f32 to vector<64x128xf32>
    %150 = arith.select %148, %146, %149 : vector<64x128xi1>, vector<64x128xf32>
    %151 = arith.addf %143, %135 : vector<64x128xf32>
    %152 = arith.addf %151, %150 : vector<64x128xf32>
    %c0_57 = arith.constant 0 : index
    %c0_58 = arith.constant 0 : index
    %153 = vector.load %arg11[%c0_57, %c0_58] : memref<1x128xf32, #tpu.memory_space<vmem>>, vector<1x128xf32>
    %154 = vector.broadcast %153 : vector<1x128xf32> to vector<64x128xf32>
    %155 = arith.addf %152, %154 : vector<64x128xf32>
    %156 = arith.addf %155, %89 : vector<64x128xf32>
    %cst_59 = arith.constant 5.000000e-01 : f32
    %157 = vector.broadcast %cst_59 : f32 to vector<64x128xf32>
    %158 = arith.mulf %157, %156 : vector<64x128xf32>
    %cst_60 = arith.constant 0.707106769 : f32
    %159 = vector.broadcast %cst_60 : f32 to vector<64x128xf32>
    %160 = arith.mulf %156, %159 : vector<64x128xf32>
    %161 = math.erf %160 : vector<64x128xf32>
    %cst_61 = arith.constant 1.000000e+00 : f32
    %162 = vector.broadcast %cst_61 : f32 to vector<64x128xf32>
    %163 = arith.addf %162, %161 : vector<64x128xf32>
    %164 = arith.mulf %158, %163 : vector<64x128xf32>
    %c0_62 = arith.constant 0 : index
    %c0_63 = arith.constant 0 : index
    %165 = vector.load %arg12[%c0_62, %c0_63] : memref<128x384xbf16, #tpu.memory_space<vmem>>, vector<128x384xbf16>
    %166 = arith.truncf %164 : vector<64x128xf32> to vector<64x128xbf16>
    %cst_64 = arith.constant dense<0.000000e+00> : vector<64x384xf32>
    %167 = tpu.matmul %166, %165, %cst_64 {dimension_numbers = #tpu.dot_dimension_numbers<[1], [0], [0], [1], [0, 0, 1, 1], [], []>} : vector<64x128xbf16>, vector<128x384xbf16>, vector<64x384xf32> -> vector<64x384xf32>
    %168 = vector.extract_strided_slice %167 {offsets = [0, 0], sizes = [64, 128], strides = [1, 1]} : vector<64x384xf32> to vector<64x128xf32>
    %169 = vector.extract_strided_slice %167 {offsets = [0, 128], sizes = [64, 128], strides = [1, 1]} : vector<64x384xf32> to vector<64x128xf32>
    %170 = vector.extract_strided_slice %167 {offsets = [0, 256], sizes = [64, 128], strides = [1, 1]} : vector<64x384xf32> to vector<64x128xf32>
    %c4_i32 = arith.constant 4 : i32
    %171 = vector.broadcast %c4_i32 : i32 to vector<64x1xi32>
    %172 = arith.cmpi sge, %16, %171 : vector<64x1xi32>
    %c4_i32_65 = arith.constant 4 : i32
    %173 = tpu.dynamic_rotate %168 by %c4_i32_65 dim 0 : vector<64x128xf32>, i32 -> vector<64x128xf32>
    %cst_66 = arith.constant 0.000000e+00 : f32
    %174 = vector.shape_cast %172 : vector<64x1xi1> to vector<64x1xi1>
    %175 = vector.broadcast %174 : vector<64x1xi1> to vector<64x128xi1>
    %176 = vector.broadcast %cst_66 : f32 to vector<64x128xf32>
    %177 = arith.select %175, %173, %176 : vector<64x128xi1>, vector<64x128xf32>
    %c4_i32_67 = arith.constant 4 : i32
    %178 = vector.broadcast %c4_i32_67 : i32 to vector<64x1xi32>
    %179 = arith.cmpi slt, %16, %178 : vector<64x1xi32>
    %c60_i32 = arith.constant 60 : i32
    %180 = tpu.dynamic_rotate %170 by %c60_i32 dim 0 : vector<64x128xf32>, i32 -> vector<64x128xf32>
    %cst_68 = arith.constant 0.000000e+00 : f32
    %181 = vector.shape_cast %179 : vector<64x1xi1> to vector<64x1xi1>
    %182 = vector.broadcast %181 : vector<64x1xi1> to vector<64x128xi1>
    %183 = vector.broadcast %cst_68 : f32 to vector<64x128xf32>
    %184 = arith.select %182, %180, %183 : vector<64x128xi1>, vector<64x128xf32>
    %185 = arith.addf %177, %169 : vector<64x128xf32>
    %186 = arith.addf %185, %184 : vector<64x128xf32>
    %c0_69 = arith.constant 0 : index
    %c0_70 = arith.constant 0 : index
    %187 = vector.load %arg13[%c0_69, %c0_70] : memref<1x128xf32, #tpu.memory_space<vmem>>, vector<1x128xf32>
    %188 = vector.broadcast %187 : vector<1x128xf32> to vector<64x128xf32>
    %189 = arith.addf %186, %188 : vector<64x128xf32>
    %cst_71 = arith.constant 5.000000e-01 : f32
    %190 = vector.broadcast %cst_71 : f32 to vector<64x128xf32>
    %191 = arith.mulf %190, %189 : vector<64x128xf32>
    %cst_72 = arith.constant 0.707106769 : f32
    %192 = vector.broadcast %cst_72 : f32 to vector<64x128xf32>
    %193 = arith.mulf %189, %192 : vector<64x128xf32>
    %194 = math.erf %193 : vector<64x128xf32>
    %cst_73 = arith.constant 1.000000e+00 : f32
    %195 = vector.broadcast %cst_73 : f32 to vector<64x128xf32>
    %196 = arith.addf %195, %194 : vector<64x128xf32>
    %197 = arith.mulf %191, %196 : vector<64x128xf32>
    %c0_74 = arith.constant 0 : index
    %c0_75 = arith.constant 0 : index
    %198 = vector.load %arg14[%c0_74, %c0_75] : memref<128x384xbf16, #tpu.memory_space<vmem>>, vector<128x384xbf16>
    %199 = arith.truncf %197 : vector<64x128xf32> to vector<64x128xbf16>
    %cst_76 = arith.constant dense<0.000000e+00> : vector<64x384xf32>
    %200 = tpu.matmul %199, %198, %cst_76 {dimension_numbers = #tpu.dot_dimension_numbers<[1], [0], [0], [1], [0, 0, 1, 1], [], []>} : vector<64x128xbf16>, vector<128x384xbf16>, vector<64x384xf32> -> vector<64x384xf32>
    %201 = vector.extract_strided_slice %200 {offsets = [0, 0], sizes = [64, 128], strides = [1, 1]} : vector<64x384xf32> to vector<64x128xf32>
    %202 = vector.extract_strided_slice %200 {offsets = [0, 128], sizes = [64, 128], strides = [1, 1]} : vector<64x384xf32> to vector<64x128xf32>
    %203 = vector.extract_strided_slice %200 {offsets = [0, 256], sizes = [64, 128], strides = [1, 1]} : vector<64x384xf32> to vector<64x128xf32>
    %c4_i32_77 = arith.constant 4 : i32
    %204 = vector.broadcast %c4_i32_77 : i32 to vector<64x1xi32>
    %205 = arith.cmpi sge, %16, %204 : vector<64x1xi32>
    %c4_i32_78 = arith.constant 4 : i32
    %206 = tpu.dynamic_rotate %201 by %c4_i32_78 dim 0 : vector<64x128xf32>, i32 -> vector<64x128xf32>
    %cst_79 = arith.constant 0.000000e+00 : f32
    %207 = vector.shape_cast %205 : vector<64x1xi1> to vector<64x1xi1>
    %208 = vector.broadcast %207 : vector<64x1xi1> to vector<64x128xi1>
    %209 = vector.broadcast %cst_79 : f32 to vector<64x128xf32>
    %210 = arith.select %208, %206, %209 : vector<64x128xi1>, vector<64x128xf32>
    %c4_i32_80 = arith.constant 4 : i32
    %211 = vector.broadcast %c4_i32_80 : i32 to vector<64x1xi32>
    %212 = arith.cmpi slt, %16, %211 : vector<64x1xi32>
    %c60_i32_81 = arith.constant 60 : i32
    %213 = tpu.dynamic_rotate %203 by %c60_i32_81 dim 0 : vector<64x128xf32>, i32 -> vector<64x128xf32>
    %cst_82 = arith.constant 0.000000e+00 : f32
    %214 = vector.shape_cast %212 : vector<64x1xi1> to vector<64x1xi1>
    %215 = vector.broadcast %214 : vector<64x1xi1> to vector<64x128xi1>
    %216 = vector.broadcast %cst_82 : f32 to vector<64x128xf32>
    %217 = arith.select %215, %213, %216 : vector<64x128xi1>, vector<64x128xf32>
    %218 = arith.addf %210, %202 : vector<64x128xf32>
    %219 = arith.addf %218, %217 : vector<64x128xf32>
    %c0_83 = arith.constant 0 : index
    %c0_84 = arith.constant 0 : index
    %220 = vector.load %arg15[%c0_83, %c0_84] : memref<1x128xf32, #tpu.memory_space<vmem>>, vector<1x128xf32>
    %221 = vector.broadcast %220 : vector<1x128xf32> to vector<64x128xf32>
    %222 = arith.addf %219, %221 : vector<64x128xf32>
    %223 = arith.addf %222, %156 : vector<64x128xf32>
    %c0_85 = arith.constant 0 : index
    %c0_86 = arith.constant 0 : index
    %224 = vector.load %arg20[%c0_85, %c0_86] : memref<128x128xbf16, #tpu.memory_space<vmem>>, vector<128x128xbf16>
    %225 = arith.truncf %223 : vector<64x128xf32> to vector<64x128xbf16>
    %cst_87 = arith.constant dense<0.000000e+00> : vector<64x128xf32>
    %226 = tpu.matmul %225, %224, %cst_87 {dimension_numbers = #tpu.dot_dimension_numbers<[1], [0], [0], [1], [0, 0, 1, 1], [], []>} : vector<64x128xbf16>, vector<128x128xbf16>, vector<64x128xf32> -> vector<64x128xf32>
    %c0_88 = arith.constant 0 : index
    %c0_89 = arith.constant 0 : index
    %227 = vector.load %arg21[%c0_88, %c0_89] : memref<1x128xf32, #tpu.memory_space<vmem>>, vector<1x128xf32>
    %228 = vector.broadcast %227 : vector<1x128xf32> to vector<64x128xf32>
    %229 = arith.addf %226, %228 : vector<64x128xf32>
    %cst_90 = arith.constant 5.000000e-01 : f32
    %230 = vector.broadcast %cst_90 : f32 to vector<64x128xf32>
    %231 = arith.mulf %230, %223 : vector<64x128xf32>
    %cst_91 = arith.constant 0.707106769 : f32
    %232 = vector.broadcast %cst_91 : f32 to vector<64x128xf32>
    %233 = arith.mulf %223, %232 : vector<64x128xf32>
    %234 = math.erf %233 : vector<64x128xf32>
    %cst_92 = arith.constant 1.000000e+00 : f32
    %235 = vector.broadcast %cst_92 : f32 to vector<64x128xf32>
    %236 = arith.addf %235, %234 : vector<64x128xf32>
    %237 = arith.mulf %231, %236 : vector<64x128xf32>
    %c0_93 = arith.constant 0 : index
    %c128 = arith.constant 128 : index
    %238 = vector.load %arg16[%c0_93, %c128] : memref<128x384xbf16, #tpu.memory_space<vmem>>, vector<128x128xbf16>
    %239 = arith.truncf %237 : vector<64x128xf32> to vector<64x128xbf16>
    %cst_94 = arith.constant dense<0.000000e+00> : vector<64x128xf32>
    %240 = tpu.matmul %239, %238, %cst_94 {dimension_numbers = #tpu.dot_dimension_numbers<[1], [0], [0], [1], [0, 0, 1, 1], [], []>} : vector<64x128xbf16>, vector<128x128xbf16>, vector<64x128xf32> -> vector<64x128xf32>
    %c0_95 = arith.constant 0 : index
    %c0_96 = arith.constant 0 : index
    %241 = vector.load %arg17[%c0_95, %c0_96] : memref<1x128xf32, #tpu.memory_space<vmem>>, vector<1x128xf32>
    %242 = vector.broadcast %241 : vector<1x128xf32> to vector<64x128xf32>
    %243 = arith.addf %240, %242 : vector<64x128xf32>
    %cst_97 = arith.constant 5.000000e-01 : f32
    %244 = vector.broadcast %cst_97 : f32 to vector<64x128xf32>
    %245 = arith.mulf %244, %243 : vector<64x128xf32>
    %cst_98 = arith.constant 0.707106769 : f32
    %246 = vector.broadcast %cst_98 : f32 to vector<64x128xf32>
    %247 = arith.mulf %243, %246 : vector<64x128xf32>
    %248 = math.erf %247 : vector<64x128xf32>
    %cst_99 = arith.constant 1.000000e+00 : f32
    %249 = vector.broadcast %cst_99 : f32 to vector<64x128xf32>
    %250 = arith.addf %249, %248 : vector<64x128xf32>
    %251 = arith.mulf %245, %250 : vector<64x128xf32>
    %c0_100 = arith.constant 0 : index
    %c128_101 = arith.constant 128 : index
    %252 = vector.load %arg18[%c0_100, %c128_101] : memref<128x384xbf16, #tpu.memory_space<vmem>>, vector<128x128xbf16>
    %253 = arith.truncf %251 : vector<64x128xf32> to vector<64x128xbf16>
    %cst_102 = arith.constant dense<0.000000e+00> : vector<64x128xf32>
    %254 = tpu.matmul %253, %252, %cst_102 {dimension_numbers = #tpu.dot_dimension_numbers<[1], [0], [0], [1], [0, 0, 1, 1], [], []>} : vector<64x128xbf16>, vector<128x128xbf16>, vector<64x128xf32> -> vector<64x128xf32>
    %c0_103 = arith.constant 0 : index
    %c0_104 = arith.constant 0 : index
    %255 = vector.load %arg19[%c0_103, %c0_104] : memref<1x128xf32, #tpu.memory_space<vmem>>, vector<1x128xf32>
    %256 = vector.broadcast %255 : vector<1x128xf32> to vector<64x128xf32>
    %257 = arith.addf %254, %256 : vector<64x128xf32>
    %258 = arith.addf %257, %229 : vector<64x128xf32>
    %c0_105 = arith.constant 0 : index
    %c0_106 = arith.constant 0 : index
    %259 = vector.load %arg22[%c0_105, %c0_106] : memref<64x128xf32, #tpu.memory_space<vmem>>, vector<64x128xf32>
    tpu.vector_store %arg22[%c0_105, %c0_106], %258 {strides = array<i32>} : memref<64x128xf32, #tpu.memory_space<vmem>>, vector<64x128xf32>,
    return
  }
  func.func @transform_0(%arg0: i32) -> (i32, i32) {
    %c0_i32 = arith.constant 0 : i32
    %c0_i32_0 = arith.constant 0 : i32
    return %arg0, %c0_i32 : i32, i32
  }
  func.func @transform_1(%arg0: i32) -> (i32, i32) {
    %c0_i32 = arith.constant 0 : i32
    %c0_i32_0 = arith.constant 0 : i32
    %c0_i32_1 = arith.constant 0 : i32
    return %c0_i32, %c0_i32_0 : i32, i32
  }
  func.func @transform_2(%arg0: i32) -> (i32, i32) {
    %c0_i32 = arith.constant 0 : i32
    %c0_i32_0 = arith.constant 0 : i32
    %c0_i32_1 = arith.constant 0 : i32
    return %c0_i32, %c0_i32_0 : i32, i32
  }
  func.func @transform_3(%arg0: i32) -> (i32, i32) {
    %c0_i32 = arith.constant 0 : i32
    %c0_i32_0 = arith.constant 0 : i32
    %c0_i32_1 = arith.constant 0 : i32
    return %c0_i32, %c0_i32_0 : i32, i32
  }
  func.func @transform_4(%arg0: i32) -> (i32, i32) {
    %c0_i32 = arith.constant 0 : i32
    %c0_i32_0 = arith.constant 0 : i32
    %c0_i32_1 = arith.constant 0 : i32
    return %c0_i32, %c0_i32_0 : i32, i32
  }
  func.func @transform_5(%arg0: i32) -> (i32, i32) {
    %c0_i32 = arith.constant 0 : i32
    %c0_i32_0 = arith.constant 0 : i32
    %c0_i32_1 = arith.constant 0 : i32
    return %c0_i32, %c0_i32_0 : i32, i32
  }
  func.func @transform_6(%arg0: i32) -> (i32, i32) {
    %c0_i32 = arith.constant 0 : i32
    %c0_i32_0 = arith.constant 0 : i32
    %c0_i32_1 = arith.constant 0 : i32
    return %c0_i32, %c0_i32_0 : i32, i32
  }
  func.func @transform_7(%arg0: i32) -> (i32, i32) {
    %c0_i32 = arith.constant 0 : i32
    %c0_i32_0 = arith.constant 0 : i32
    %c0_i32_1 = arith.constant 0 : i32
    return %c0_i32, %c0_i32_0 : i32, i32
  }
  func.func @transform_8(%arg0: i32) -> (i32, i32) {
    %c0_i32 = arith.constant 0 : i32
    %c0_i32_0 = arith.constant 0 : i32
    %c0_i32_1 = arith.constant 0 : i32
    return %c0_i32, %c0_i32_0 : i32, i32
  }
  func.func @transform_9(%arg0: i32) -> (i32, i32) {
    %c0_i32 = arith.constant 0 : i32
    %c0_i32_0 = arith.constant 0 : i32
    %c0_i32_1 = arith.constant 0 : i32
    return %c0_i32, %c0_i32_0 : i32, i32
  }
  func.func @transform_10(%arg0: i32) -> (i32, i32) {
    %c0_i32 = arith.constant 0 : i32
    %c0_i32_0 = arith.constant 0 : i32
    %c0_i32_1 = arith.constant 0 : i32
    return %c0_i32, %c0_i32_0 : i32, i32
  }
  func.func @transform_11(%arg0: i32) -> (i32, i32) {
    %c0_i32 = arith.constant 0 : i32
    %c0_i32_0 = arith.constant 0 : i32
    %c0_i32_1 = arith.constant 0 : i32
    return %c0_i32, %c0_i32_0 : i32, i32
  }
  func.func @transform_12(%arg0: i32) -> (i32, i32) {
    %c0_i32 = arith.constant 0 : i32
    %c0_i32_0 = arith.constant 0 : i32
    %c0_i32_1 = arith.constant 0 : i32
    return %c0_i32, %c0_i32_0 : i32, i32
  }
  func.func @transform_13(%arg0: i32) -> (i32, i32) {
    %c0_i32 = arith.constant 0 : i32
    %c0_i32_0 = arith.constant 0 : i32
    %c0_i32_1 = arith.constant 0 : i32
    return %c0_i32, %c0_i32_0 : i32, i32
  }
  func.func @transform_14(%arg0: i32) -> (i32, i32) {
    %c0_i32 = arith.constant 0 : i32
    %c0_i32_0 = arith.constant 0 : i32
    %c0_i32_1 = arith.constant 0 : i32
    return %c0_i32, %c0_i32_0 : i32, i32
  }
  func.func @transform_15(%arg0: i32) -> (i32, i32) {
    %c0_i32 = arith.constant 0 : i32
    %c0_i32_0 = arith.constant 0 : i32
    %c0_i32_1 = arith.constant 0 : i32
    return %c0_i32, %c0_i32_0 : i32, i32
  }
  func.func @transform_16(%arg0: i32) -> (i32, i32) {
    %c0_i32 = arith.constant 0 : i32
    %c0_i32_0 = arith.constant 0 : i32
    %c0_i32_1 = arith.constant 0 : i32
    return %c0_i32, %c0_i32_0 : i32, i32
  }
  func.func @transform_17(%arg0: i32) -> (i32, i32) {
    %c0_i32 = arith.constant 0 : i32
    %c0_i32_0 = arith.constant 0 : i32
    %c0_i32_1 = arith.constant 0 : i32
    return %c0_i32, %c0_i32_0 : i32, i32
  }
  func.func @transform_18(%arg0: i32) -> (i32, i32) {
    %c0_i32 = arith.constant 0 : i32
    %c0_i32_0 = arith.constant 0 : i32
    %c0_i32_1 = arith.constant 0 : i32
    return %c0_i32, %c0_i32_0 : i32, i32
  }
  func.func @transform_19(%arg0: i32) -> (i32, i32) {
    %c0_i32 = arith.constant 0 : i32
    %c0_i32_0 = arith.constant 0 : i32
    %c0_i32_1 = arith.constant 0 : i32
    return %c0_i32, %c0_i32_0 : i32, i32
  }
  func.func @transform_20(%arg0: i32) -> (i32, i32) {
    %c0_i32 = arith.constant 0 : i32
    %c0_i32_0 = arith.constant 0 : i32
    %c0_i32_1 = arith.constant 0 : i32
    return %c0_i32, %c0_i32_0 : i32, i32
  }
  func.func @transform_21(%arg0: i32) -> (i32, i32) {
    %c0_i32 = arith.constant 0 : i32
    %c0_i32_0 = arith.constant 0 : i32
    return %arg0, %c0_i32 : i32, i32
  }
}

module attributes {stable_mosaic.version = 11 : i64} {
  func.func @kernel(%arg0: i32, %arg1: memref<32x8xf32, #tpu.memory_space<vmem>>, %arg2: memref<32x128xf32, #tpu.memory_space<vmem>>, %arg3: memref<8x128xbf16, #tpu.memory_space<vmem>>, %arg4: memref<128x384xbf16, #tpu.memory_space<vmem>>, %arg5: memref<1x128xf32, #tpu.memory_space<vmem>>, %arg6: memref<128x384xbf16, #tpu.memory_space<vmem>>, %arg7: memref<1x128xf32, #tpu.memory_space<vmem>>, %arg8: memref<128x384xbf16, #tpu.memory_space<vmem>>, %arg9: memref<1x128xf32, #tpu.memory_space<vmem>>, %arg10: memref<128x384xbf16, #tpu.memory_space<vmem>>, %arg11: memref<1x128xf32, #tpu.memory_space<vmem>>, %arg12: memref<128x384xbf16, #tpu.memory_space<vmem>>, %arg13: memref<1x128xf32, #tpu.memory_space<vmem>>, %arg14: memref<128x384xbf16, #tpu.memory_space<vmem>>, %arg15: memref<1x128xf32, #tpu.memory_space<vmem>>, %arg16: memref<128x384xbf16, #tpu.memory_space<vmem>>, %arg17: memref<1x128xf32, #tpu.memory_space<vmem>>, %arg18: memref<128x384xbf16, #tpu.memory_space<vmem>>, %arg19: memref<1x128xf32, #tpu.memory_space<vmem>>, %arg20: memref<128x128xbf16, #tpu.memory_space<vmem>>, %arg21: memref<1x128xf32, #tpu.memory_space<vmem>>, %arg22: memref<32x128xf32, #tpu.memory_space<vmem>>) attributes {dimension_semantics = [#tpu.dimension_semantics<parallel>], iteration_bounds = array<i64: 1>, scalar_prefetch = 0 : i64, scratch_operands = 0 : i64, tpu.core_type = #tpu.core_type<tc>, window_params = [{transform_indices = @transform_0, window_bounds = array<i64: 32, 8>}, {pipeline_mode = #tpu.pipeline_mode<synchronous>, transform_indices = @transform_1, window_bounds = array<i64: 32, 128>}, {pipeline_mode = #tpu.pipeline_mode<synchronous>, transform_indices = @transform_2, window_bounds = array<i64: 8, 128>}, {pipeline_mode = #tpu.pipeline_mode<synchronous>, transform_indices = @transform_3, window_bounds = array<i64: 128, 384>}, {pipeline_mode = #tpu.pipeline_mode<synchronous>, transform_indices = @transform_4, window_bounds = array<i64: 1, 128>}, {pipeline_mode = #tpu.pipeline_mode<synchronous>, transform_indices = @transform_5, window_bounds = array<i64: 128, 384>}, {pipeline_mode = #tpu.pipeline_mode<synchronous>, transform_indices = @transform_6, window_bounds = array<i64: 1, 128>}, {pipeline_mode = #tpu.pipeline_mode<synchronous>, transform_indices = @transform_7, window_bounds = array<i64: 128, 384>}, {pipeline_mode = #tpu.pipeline_mode<synchronous>, transform_indices = @transform_8, window_bounds = array<i64: 1, 128>}, {pipeline_mode = #tpu.pipeline_mode<synchronous>, transform_indices = @transform_9, window_bounds = array<i64: 128, 384>}, {pipeline_mode = #tpu.pipeline_mode<synchronous>, transform_indices = @transform_10, window_bounds = array<i64: 1, 128>}, {pipeline_mode = #tpu.pipeline_mode<synchronous>, transform_indices = @transform_11, window_bounds = array<i64: 128, 384>}, {pipeline_mode = #tpu.pipeline_mode<synchronous>, transform_indices = @transform_12, window_bounds = array<i64: 1, 128>}, {pipeline_mode = #tpu.pipeline_mode<synchronous>, transform_indices = @transform_13, window_bounds = array<i64: 128, 384>}, {pipeline_mode = #tpu.pipeline_mode<synchronous>, transform_indices = @transform_14, window_bounds = array<i64: 1, 128>}, {pipeline_mode = #tpu.pipeline_mode<synchronous>, transform_indices = @transform_15, window_bounds = array<i64: 128, 384>}, {pipeline_mode = #tpu.pipeline_mode<synchronous>, transform_indices = @transform_16, window_bounds = array<i64: 1, 128>}, {pipeline_mode = #tpu.pipeline_mode<synchronous>, transform_indices = @transform_17, window_bounds = array<i64: 128, 384>}, {pipeline_mode = #tpu.pipeline_mode<synchronous>, transform_indices = @transform_18, window_bounds = array<i64: 1, 128>}, {pipeline_mode = #tpu.pipeline_mode<synchronous>, transform_indices = @transform_19, window_bounds = array<i64: 128, 128>}, {pipeline_mode = #tpu.pipeline_mode<synchronous>, transform_indices = @transform_20, window_bounds = array<i64: 1, 128>}, {transform_indices = @transform_21, window_bounds = array<i64: 32, 128>}]} {
    %0 = tpu.iota {dimensions = array<i32: 0>} : vector<32x1xi32>
    %c4_i32 = arith.constant 4 : i32
    %c0_i32 = arith.constant 0 : i32
    %1 = arith.cmpi eq, %c4_i32, %c0_i32 : i32
    %c1_i32 = arith.constant 1 : i32
    %2 = arith.select %1, %c1_i32, %c4_i32 : i32
    %3 = vector.broadcast %2 : i32 to vector<32x1xi32>
    %4 = arith.remsi %0, %3 : vector<32x1xi32>
    %c0_i32_0 = arith.constant 0 : i32
    %5 = vector.broadcast %c0_i32_0 : i32 to vector<32x1xi32>
    %6 = arith.cmpi ne, %4, %5 : vector<32x1xi32>
    %c0_i32_1 = arith.constant 0 : i32
    %7 = vector.broadcast %c0_i32_1 : i32 to vector<32x1xi32>
    %8 = arith.cmpi slt, %4, %7 : vector<32x1xi32>
    %c0_i32_2 = arith.constant 0 : i32
    %9 = arith.cmpi slt, %2, %c0_i32_2 : i32
    %10 = vector.broadcast %9 : i1 to vector<32x1xi1>
    %11 = vector.broadcast %10 : vector<32x1xi1> to vector<32x1xi1>
    %12 = arith.xori %8, %11 : vector<32x1xi1>
    %13 = arith.andi %12, %6 : vector<32x1xi1>
    %14 = vector.broadcast %2 : i32 to vector<32x1xi32>
    %15 = arith.addi %4, %14 : vector<32x1xi32>
    %16 = arith.select %13, %15, %4 : vector<32x1xi1>, vector<32x1xi32>
    %c0 = arith.constant 0 : index
    %c0_3 = arith.constant 0 : index
    %17 = vector.load %arg1[%c0, %c0_3] : memref<32x8xf32, #tpu.memory_space<vmem>>, vector<32x8xf32>
    %c0_4 = arith.constant 0 : index
    %c0_5 = arith.constant 0 : index
    %18 = vector.load %arg3[%c0_4, %c0_5] : memref<8x128xbf16, #tpu.memory_space<vmem>>, vector<8x128xbf16>
    %19 = arith.truncf %17 : vector<32x8xf32> to vector<32x8xbf16>
    %cst = arith.constant dense<0.000000e+00> : vector<32x128xf32>
    %20 = tpu.matmul %19, %18, %cst {dimension_numbers = #tpu.dot_dimension_numbers<[1], [0], [0], [1], [0, 0, 1, 1], [], []>} : vector<32x8xbf16>, vector<8x128xbf16>, vector<32x128xf32> -> vector<32x128xf32>
    %c0_6 = arith.constant 0 : index
    %c0_7 = arith.constant 0 : index
    %21 = vector.load %arg2[%c0_6, %c0_7] : memref<32x128xf32, #tpu.memory_space<vmem>>, vector<32x128xf32>
    %22 = arith.addf %20, %21 : vector<32x128xf32>
    %cst_8 = arith.constant 5.000000e-01 : f32
    %23 = vector.broadcast %cst_8 : f32 to vector<32x128xf32>
    %24 = arith.mulf %23, %22 : vector<32x128xf32>
    %cst_9 = arith.constant 0.707106769 : f32
    %25 = vector.broadcast %cst_9 : f32 to vector<32x128xf32>
    %26 = arith.mulf %22, %25 : vector<32x128xf32>
    %27 = math.erf %26 : vector<32x128xf32>
    %cst_10 = arith.constant 1.000000e+00 : f32
    %28 = vector.broadcast %cst_10 : f32 to vector<32x128xf32>
    %29 = arith.addf %28, %27 : vector<32x128xf32>
    %30 = arith.mulf %24, %29 : vector<32x128xf32>
    %c0_11 = arith.constant 0 : index
    %c0_12 = arith.constant 0 : index
    %31 = vector.load %arg4[%c0_11, %c0_12] : memref<128x384xbf16, #tpu.memory_space<vmem>>, vector<128x384xbf16>
    %32 = arith.truncf %30 : vector<32x128xf32> to vector<32x128xbf16>
    %cst_13 = arith.constant dense<0.000000e+00> : vector<32x384xf32>
    %33 = tpu.matmul %32, %31, %cst_13 {dimension_numbers = #tpu.dot_dimension_numbers<[1], [0], [0], [1], [0, 0, 1, 1], [], []>} : vector<32x128xbf16>, vector<128x384xbf16>, vector<32x384xf32> -> vector<32x384xf32>
    %34 = vector.extract_strided_slice %33 {offsets = [0, 0], sizes = [32, 128], strides = [1, 1]} : vector<32x384xf32> to vector<32x128xf32>
    %35 = vector.extract_strided_slice %33 {offsets = [0, 128], sizes = [32, 128], strides = [1, 1]} : vector<32x384xf32> to vector<32x128xf32>
    %36 = vector.extract_strided_slice %33 {offsets = [0, 256], sizes = [32, 128], strides = [1, 1]} : vector<32x384xf32> to vector<32x128xf32>
    %c1_i32_14 = arith.constant 1 : i32
    %37 = vector.broadcast %c1_i32_14 : i32 to vector<32x1xi32>
    %38 = arith.cmpi sge, %16, %37 : vector<32x1xi32>
    %c1_i32_15 = arith.constant 1 : i32
    %39 = tpu.dynamic_rotate %34 by %c1_i32_15 dim 0 : vector<32x128xf32>, i32 -> vector<32x128xf32>
    %cst_16 = arith.constant 0.000000e+00 : f32
    %40 = vector.shape_cast %38 : vector<32x1xi1> to vector<32x1xi1>
    %41 = vector.broadcast %40 : vector<32x1xi1> to vector<32x128xi1>
    %42 = vector.broadcast %cst_16 : f32 to vector<32x128xf32>
    %43 = arith.select %41, %39, %42 : vector<32x128xi1>, vector<32x128xf32>
    %c3_i32 = arith.constant 3 : i32
    %44 = vector.broadcast %c3_i32 : i32 to vector<32x1xi32>
    %45 = arith.cmpi slt, %16, %44 : vector<32x1xi32>
    %c31_i32 = arith.constant 31 : i32
    %46 = tpu.dynamic_rotate %36 by %c31_i32 dim 0 : vector<32x128xf32>, i32 -> vector<32x128xf32>
    %cst_17 = arith.constant 0.000000e+00 : f32
    %47 = vector.shape_cast %45 : vector<32x1xi1> to vector<32x1xi1>
    %48 = vector.broadcast %47 : vector<32x1xi1> to vector<32x128xi1>
    %49 = vector.broadcast %cst_17 : f32 to vector<32x128xf32>
    %50 = arith.select %48, %46, %49 : vector<32x128xi1>, vector<32x128xf32>
    %51 = arith.addf %43, %35 : vector<32x128xf32>
    %52 = arith.addf %51, %50 : vector<32x128xf32>
    %c0_18 = arith.constant 0 : index
    %c0_19 = arith.constant 0 : index
    %53 = vector.load %arg5[%c0_18, %c0_19] : memref<1x128xf32, #tpu.memory_space<vmem>>, vector<1x128xf32>
    %54 = vector.broadcast %53 : vector<1x128xf32> to vector<32x128xf32>
    %55 = arith.addf %52, %54 : vector<32x128xf32>
    %cst_20 = arith.constant 5.000000e-01 : f32
    %56 = vector.broadcast %cst_20 : f32 to vector<32x128xf32>
    %57 = arith.mulf %56, %55 : vector<32x128xf32>
    %cst_21 = arith.constant 0.707106769 : f32
    %58 = vector.broadcast %cst_21 : f32 to vector<32x128xf32>
    %59 = arith.mulf %55, %58 : vector<32x128xf32>
    %60 = math.erf %59 : vector<32x128xf32>
    %cst_22 = arith.constant 1.000000e+00 : f32
    %61 = vector.broadcast %cst_22 : f32 to vector<32x128xf32>
    %62 = arith.addf %61, %60 : vector<32x128xf32>
    %63 = arith.mulf %57, %62 : vector<32x128xf32>
    %c0_23 = arith.constant 0 : index
    %c0_24 = arith.constant 0 : index
    %64 = vector.load %arg6[%c0_23, %c0_24] : memref<128x384xbf16, #tpu.memory_space<vmem>>, vector<128x384xbf16>
    %65 = arith.truncf %63 : vector<32x128xf32> to vector<32x128xbf16>
    %cst_25 = arith.constant dense<0.000000e+00> : vector<32x384xf32>
    %66 = tpu.matmul %65, %64, %cst_25 {dimension_numbers = #tpu.dot_dimension_numbers<[1], [0], [0], [1], [0, 0, 1, 1], [], []>} : vector<32x128xbf16>, vector<128x384xbf16>, vector<32x384xf32> -> vector<32x384xf32>
    %67 = vector.extract_strided_slice %66 {offsets = [0, 0], sizes = [32, 128], strides = [1, 1]} : vector<32x384xf32> to vector<32x128xf32>
    %68 = vector.extract_strided_slice %66 {offsets = [0, 128], sizes = [32, 128], strides = [1, 1]} : vector<32x384xf32> to vector<32x128xf32>
    %69 = vector.extract_strided_slice %66 {offsets = [0, 256], sizes = [32, 128], strides = [1, 1]} : vector<32x384xf32> to vector<32x128xf32>
    %c1_i32_26 = arith.constant 1 : i32
    %70 = vector.broadcast %c1_i32_26 : i32 to vector<32x1xi32>
    %71 = arith.cmpi sge, %16, %70 : vector<32x1xi32>
    %c1_i32_27 = arith.constant 1 : i32
    %72 = tpu.dynamic_rotate %67 by %c1_i32_27 dim 0 : vector<32x128xf32>, i32 -> vector<32x128xf32>
    %cst_28 = arith.constant 0.000000e+00 : f32
    %73 = vector.shape_cast %71 : vector<32x1xi1> to vector<32x1xi1>
    %74 = vector.broadcast %73 : vector<32x1xi1> to vector<32x128xi1>
    %75 = vector.broadcast %cst_28 : f32 to vector<32x128xf32>
    %76 = arith.select %74, %72, %75 : vector<32x128xi1>, vector<32x128xf32>
    %c3_i32_29 = arith.constant 3 : i32
    %77 = vector.broadcast %c3_i32_29 : i32 to vector<32x1xi32>
    %78 = arith.cmpi slt, %16, %77 : vector<32x1xi32>
    %c31_i32_30 = arith.constant 31 : i32
    %79 = tpu.dynamic_rotate %69 by %c31_i32_30 dim 0 : vector<32x128xf32>, i32 -> vector<32x128xf32>
    %cst_31 = arith.constant 0.000000e+00 : f32
    %80 = vector.shape_cast %78 : vector<32x1xi1> to vector<32x1xi1>
    %81 = vector.broadcast %80 : vector<32x1xi1> to vector<32x128xi1>
    %82 = vector.broadcast %cst_31 : f32 to vector<32x128xf32>
    %83 = arith.select %81, %79, %82 : vector<32x128xi1>, vector<32x128xf32>
    %84 = arith.addf %76, %68 : vector<32x128xf32>
    %85 = arith.addf %84, %83 : vector<32x128xf32>
    %c0_32 = arith.constant 0 : index
    %c0_33 = arith.constant 0 : index
    %86 = vector.load %arg7[%c0_32, %c0_33] : memref<1x128xf32, #tpu.memory_space<vmem>>, vector<1x128xf32>
    %87 = vector.broadcast %86 : vector<1x128xf32> to vector<32x128xf32>
    %88 = arith.addf %85, %87 : vector<32x128xf32>
    %89 = arith.addf %88, %22 : vector<32x128xf32>
    %cst_34 = arith.constant 5.000000e-01 : f32
    %90 = vector.broadcast %cst_34 : f32 to vector<32x128xf32>
    %91 = arith.mulf %90, %89 : vector<32x128xf32>
    %cst_35 = arith.constant 0.707106769 : f32
    %92 = vector.broadcast %cst_35 : f32 to vector<32x128xf32>
    %93 = arith.mulf %89, %92 : vector<32x128xf32>
    %94 = math.erf %93 : vector<32x128xf32>
    %cst_36 = arith.constant 1.000000e+00 : f32
    %95 = vector.broadcast %cst_36 : f32 to vector<32x128xf32>
    %96 = arith.addf %95, %94 : vector<32x128xf32>
    %97 = arith.mulf %91, %96 : vector<32x128xf32>
    %c0_37 = arith.constant 0 : index
    %c0_38 = arith.constant 0 : index
    %98 = vector.load %arg8[%c0_37, %c0_38] : memref<128x384xbf16, #tpu.memory_space<vmem>>, vector<128x384xbf16>
    %99 = arith.truncf %97 : vector<32x128xf32> to vector<32x128xbf16>
    %cst_39 = arith.constant dense<0.000000e+00> : vector<32x384xf32>
    %100 = tpu.matmul %99, %98, %cst_39 {dimension_numbers = #tpu.dot_dimension_numbers<[1], [0], [0], [1], [0, 0, 1, 1], [], []>} : vector<32x128xbf16>, vector<128x384xbf16>, vector<32x384xf32> -> vector<32x384xf32>
    %101 = vector.extract_strided_slice %100 {offsets = [0, 0], sizes = [32, 128], strides = [1, 1]} : vector<32x384xf32> to vector<32x128xf32>
    %102 = vector.extract_strided_slice %100 {offsets = [0, 128], sizes = [32, 128], strides = [1, 1]} : vector<32x384xf32> to vector<32x128xf32>
    %103 = vector.extract_strided_slice %100 {offsets = [0, 256], sizes = [32, 128], strides = [1, 1]} : vector<32x384xf32> to vector<32x128xf32>
    %c2_i32 = arith.constant 2 : i32
    %104 = vector.broadcast %c2_i32 : i32 to vector<32x1xi32>
    %105 = arith.cmpi sge, %16, %104 : vector<32x1xi32>
    %c2_i32_40 = arith.constant 2 : i32
    %106 = tpu.dynamic_rotate %101 by %c2_i32_40 dim 0 : vector<32x128xf32>, i32 -> vector<32x128xf32>
    %cst_41 = arith.constant 0.000000e+00 : f32
    %107 = vector.shape_cast %105 : vector<32x1xi1> to vector<32x1xi1>
    %108 = vector.broadcast %107 : vector<32x1xi1> to vector<32x128xi1>
    %109 = vector.broadcast %cst_41 : f32 to vector<32x128xf32>
    %110 = arith.select %108, %106, %109 : vector<32x128xi1>, vector<32x128xf32>
    %c2_i32_42 = arith.constant 2 : i32
    %111 = vector.broadcast %c2_i32_42 : i32 to vector<32x1xi32>
    %112 = arith.cmpi slt, %16, %111 : vector<32x1xi32>
    %c30_i32 = arith.constant 30 : i32
    %113 = tpu.dynamic_rotate %103 by %c30_i32 dim 0 : vector<32x128xf32>, i32 -> vector<32x128xf32>
    %cst_43 = arith.constant 0.000000e+00 : f32
    %114 = vector.shape_cast %112 : vector<32x1xi1> to vector<32x1xi1>
    %115 = vector.broadcast %114 : vector<32x1xi1> to vector<32x128xi1>
    %116 = vector.broadcast %cst_43 : f32 to vector<32x128xf32>
    %117 = arith.select %115, %113, %116 : vector<32x128xi1>, vector<32x128xf32>
    %118 = arith.addf %110, %102 : vector<32x128xf32>
    %119 = arith.addf %118, %117 : vector<32x128xf32>
    %c0_44 = arith.constant 0 : index
    %c0_45 = arith.constant 0 : index
    %120 = vector.load %arg9[%c0_44, %c0_45] : memref<1x128xf32, #tpu.memory_space<vmem>>, vector<1x128xf32>
    %121 = vector.broadcast %120 : vector<1x128xf32> to vector<32x128xf32>
    %122 = arith.addf %119, %121 : vector<32x128xf32>
    %cst_46 = arith.constant 5.000000e-01 : f32
    %123 = vector.broadcast %cst_46 : f32 to vector<32x128xf32>
    %124 = arith.mulf %123, %122 : vector<32x128xf32>
    %cst_47 = arith.constant 0.707106769 : f32
    %125 = vector.broadcast %cst_47 : f32 to vector<32x128xf32>
    %126 = arith.mulf %122, %125 : vector<32x128xf32>
    %127 = math.erf %126 : vector<32x128xf32>
    %cst_48 = arith.constant 1.000000e+00 : f32
    %128 = vector.broadcast %cst_48 : f32 to vector<32x128xf32>
    %129 = arith.addf %128, %127 : vector<32x128xf32>
    %130 = arith.mulf %124, %129 : vector<32x128xf32>
    %c0_49 = arith.constant 0 : index
    %c0_50 = arith.constant 0 : index
    %131 = vector.load %arg10[%c0_49, %c0_50] : memref<128x384xbf16, #tpu.memory_space<vmem>>, vector<128x384xbf16>
    %132 = arith.truncf %130 : vector<32x128xf32> to vector<32x128xbf16>
    %cst_51 = arith.constant dense<0.000000e+00> : vector<32x384xf32>
    %133 = tpu.matmul %132, %131, %cst_51 {dimension_numbers = #tpu.dot_dimension_numbers<[1], [0], [0], [1], [0, 0, 1, 1], [], []>} : vector<32x128xbf16>, vector<128x384xbf16>, vector<32x384xf32> -> vector<32x384xf32>
    %134 = vector.extract_strided_slice %133 {offsets = [0, 0], sizes = [32, 128], strides = [1, 1]} : vector<32x384xf32> to vector<32x128xf32>
    %135 = vector.extract_strided_slice %133 {offsets = [0, 128], sizes = [32, 128], strides = [1, 1]} : vector<32x384xf32> to vector<32x128xf32>
    %136 = vector.extract_strided_slice %133 {offsets = [0, 256], sizes = [32, 128], strides = [1, 1]} : vector<32x384xf32> to vector<32x128xf32>
    %c2_i32_52 = arith.constant 2 : i32
    %137 = vector.broadcast %c2_i32_52 : i32 to vector<32x1xi32>
    %138 = arith.cmpi sge, %16, %137 : vector<32x1xi32>
    %c2_i32_53 = arith.constant 2 : i32
    %139 = tpu.dynamic_rotate %134 by %c2_i32_53 dim 0 : vector<32x128xf32>, i32 -> vector<32x128xf32>
    %cst_54 = arith.constant 0.000000e+00 : f32
    %140 = vector.shape_cast %138 : vector<32x1xi1> to vector<32x1xi1>
    %141 = vector.broadcast %140 : vector<32x1xi1> to vector<32x128xi1>
    %142 = vector.broadcast %cst_54 : f32 to vector<32x128xf32>
    %143 = arith.select %141, %139, %142 : vector<32x128xi1>, vector<32x128xf32>
    %c2_i32_55 = arith.constant 2 : i32
    %144 = vector.broadcast %c2_i32_55 : i32 to vector<32x1xi32>
    %145 = arith.cmpi slt, %16, %144 : vector<32x1xi32>
    %c30_i32_56 = arith.constant 30 : i32
    %146 = tpu.dynamic_rotate %136 by %c30_i32_56 dim 0 : vector<32x128xf32>, i32 -> vector<32x128xf32>
    %cst_57 = arith.constant 0.000000e+00 : f32
    %147 = vector.shape_cast %145 : vector<32x1xi1> to vector<32x1xi1>
    %148 = vector.broadcast %147 : vector<32x1xi1> to vector<32x128xi1>
    %149 = vector.broadcast %cst_57 : f32 to vector<32x128xf32>
    %150 = arith.select %148, %146, %149 : vector<32x128xi1>, vector<32x128xf32>
    %151 = arith.addf %143, %135 : vector<32x128xf32>
    %152 = arith.addf %151, %150 : vector<32x128xf32>
    %c0_58 = arith.constant 0 : index
    %c0_59 = arith.constant 0 : index
    %153 = vector.load %arg11[%c0_58, %c0_59] : memref<1x128xf32, #tpu.memory_space<vmem>>, vector<1x128xf32>
    %154 = vector.broadcast %153 : vector<1x128xf32> to vector<32x128xf32>
    %155 = arith.addf %152, %154 : vector<32x128xf32>
    %156 = arith.addf %155, %89 : vector<32x128xf32>
    %cst_60 = arith.constant 5.000000e-01 : f32
    %157 = vector.broadcast %cst_60 : f32 to vector<32x128xf32>
    %158 = arith.mulf %157, %156 : vector<32x128xf32>
    %cst_61 = arith.constant 0.707106769 : f32
    %159 = vector.broadcast %cst_61 : f32 to vector<32x128xf32>
    %160 = arith.mulf %156, %159 : vector<32x128xf32>
    %161 = math.erf %160 : vector<32x128xf32>
    %cst_62 = arith.constant 1.000000e+00 : f32
    %162 = vector.broadcast %cst_62 : f32 to vector<32x128xf32>
    %163 = arith.addf %162, %161 : vector<32x128xf32>
    %164 = arith.mulf %158, %163 : vector<32x128xf32>
    %c0_63 = arith.constant 0 : index
    %c128 = arith.constant 128 : index
    %165 = vector.load %arg12[%c0_63, %c128] : memref<128x384xbf16, #tpu.memory_space<vmem>>, vector<128x128xbf16>
    %166 = arith.truncf %164 : vector<32x128xf32> to vector<32x128xbf16>
    %cst_64 = arith.constant dense<0.000000e+00> : vector<32x128xf32>
    %167 = tpu.matmul %166, %165, %cst_64 {dimension_numbers = #tpu.dot_dimension_numbers<[1], [0], [0], [1], [0, 0, 1, 1], [], []>} : vector<32x128xbf16>, vector<128x128xbf16>, vector<32x128xf32> -> vector<32x128xf32>
    %c0_65 = arith.constant 0 : index
    %c0_66 = arith.constant 0 : index
    %168 = vector.load %arg13[%c0_65, %c0_66] : memref<1x128xf32, #tpu.memory_space<vmem>>, vector<1x128xf32>
    %169 = vector.broadcast %168 : vector<1x128xf32> to vector<32x128xf32>
    %170 = arith.addf %167, %169 : vector<32x128xf32>
    %cst_67 = arith.constant 5.000000e-01 : f32
    %171 = vector.broadcast %cst_67 : f32 to vector<32x128xf32>
    %172 = arith.mulf %171, %170 : vector<32x128xf32>
    %cst_68 = arith.constant 0.707106769 : f32
    %173 = vector.broadcast %cst_68 : f32 to vector<32x128xf32>
    %174 = arith.mulf %170, %173 : vector<32x128xf32>
    %175 = math.erf %174 : vector<32x128xf32>
    %cst_69 = arith.constant 1.000000e+00 : f32
    %176 = vector.broadcast %cst_69 : f32 to vector<32x128xf32>
    %177 = arith.addf %176, %175 : vector<32x128xf32>
    %178 = arith.mulf %172, %177 : vector<32x128xf32>
    %c0_70 = arith.constant 0 : index
    %c128_71 = arith.constant 128 : index
    %179 = vector.load %arg14[%c0_70, %c128_71] : memref<128x384xbf16, #tpu.memory_space<vmem>>, vector<128x128xbf16>
    %180 = arith.truncf %178 : vector<32x128xf32> to vector<32x128xbf16>
    %cst_72 = arith.constant dense<0.000000e+00> : vector<32x128xf32>
    %181 = tpu.matmul %180, %179, %cst_72 {dimension_numbers = #tpu.dot_dimension_numbers<[1], [0], [0], [1], [0, 0, 1, 1], [], []>} : vector<32x128xbf16>, vector<128x128xbf16>, vector<32x128xf32> -> vector<32x128xf32>
    %c0_73 = arith.constant 0 : index
    %c0_74 = arith.constant 0 : index
    %182 = vector.load %arg15[%c0_73, %c0_74] : memref<1x128xf32, #tpu.memory_space<vmem>>, vector<1x128xf32>
    %183 = vector.broadcast %182 : vector<1x128xf32> to vector<32x128xf32>
    %184 = arith.addf %181, %183 : vector<32x128xf32>
    %185 = arith.addf %184, %156 : vector<32x128xf32>
    %c0_75 = arith.constant 0 : index
    %c0_76 = arith.constant 0 : index
    %186 = vector.load %arg20[%c0_75, %c0_76] : memref<128x128xbf16, #tpu.memory_space<vmem>>, vector<128x128xbf16>
    %187 = arith.truncf %185 : vector<32x128xf32> to vector<32x128xbf16>
    %cst_77 = arith.constant dense<0.000000e+00> : vector<32x128xf32>
    %188 = tpu.matmul %187, %186, %cst_77 {dimension_numbers = #tpu.dot_dimension_numbers<[1], [0], [0], [1], [0, 0, 1, 1], [], []>} : vector<32x128xbf16>, vector<128x128xbf16>, vector<32x128xf32> -> vector<32x128xf32>
    %c0_78 = arith.constant 0 : index
    %c0_79 = arith.constant 0 : index
    %189 = vector.load %arg21[%c0_78, %c0_79] : memref<1x128xf32, #tpu.memory_space<vmem>>, vector<1x128xf32>
    %190 = vector.broadcast %189 : vector<1x128xf32> to vector<32x128xf32>
    %191 = arith.addf %188, %190 : vector<32x128xf32>
    %cst_80 = arith.constant 5.000000e-01 : f32
    %192 = vector.broadcast %cst_80 : f32 to vector<32x128xf32>
    %193 = arith.mulf %192, %185 : vector<32x128xf32>
    %cst_81 = arith.constant 0.707106769 : f32
    %194 = vector.broadcast %cst_81 : f32 to vector<32x128xf32>
    %195 = arith.mulf %185, %194 : vector<32x128xf32>
    %196 = math.erf %195 : vector<32x128xf32>
    %cst_82 = arith.constant 1.000000e+00 : f32
    %197 = vector.broadcast %cst_82 : f32 to vector<32x128xf32>
    %198 = arith.addf %197, %196 : vector<32x128xf32>
    %199 = arith.mulf %193, %198 : vector<32x128xf32>
    %c0_83 = arith.constant 0 : index
    %c128_84 = arith.constant 128 : index
    %200 = vector.load %arg16[%c0_83, %c128_84] : memref<128x384xbf16, #tpu.memory_space<vmem>>, vector<128x128xbf16>
    %201 = arith.truncf %199 : vector<32x128xf32> to vector<32x128xbf16>
    %cst_85 = arith.constant dense<0.000000e+00> : vector<32x128xf32>
    %202 = tpu.matmul %201, %200, %cst_85 {dimension_numbers = #tpu.dot_dimension_numbers<[1], [0], [0], [1], [0, 0, 1, 1], [], []>} : vector<32x128xbf16>, vector<128x128xbf16>, vector<32x128xf32> -> vector<32x128xf32>
    %c0_86 = arith.constant 0 : index
    %c0_87 = arith.constant 0 : index
    %203 = vector.load %arg17[%c0_86, %c0_87] : memref<1x128xf32, #tpu.memory_space<vmem>>, vector<1x128xf32>
    %204 = vector.broadcast %203 : vector<1x128xf32> to vector<32x128xf32>
    %205 = arith.addf %202, %204 : vector<32x128xf32>
    %cst_88 = arith.constant 5.000000e-01 : f32
    %206 = vector.broadcast %cst_88 : f32 to vector<32x128xf32>
    %207 = arith.mulf %206, %205 : vector<32x128xf32>
    %cst_89 = arith.constant 0.707106769 : f32
    %208 = vector.broadcast %cst_89 : f32 to vector<32x128xf32>
    %209 = arith.mulf %205, %208 : vector<32x128xf32>
    %210 = math.erf %209 : vector<32x128xf32>
    %cst_90 = arith.constant 1.000000e+00 : f32
    %211 = vector.broadcast %cst_90 : f32 to vector<32x128xf32>
    %212 = arith.addf %211, %210 : vector<32x128xf32>
    %213 = arith.mulf %207, %212 : vector<32x128xf32>
    %c0_91 = arith.constant 0 : index
    %c128_92 = arith.constant 128 : index
    %214 = vector.load %arg18[%c0_91, %c128_92] : memref<128x384xbf16, #tpu.memory_space<vmem>>, vector<128x128xbf16>
    %215 = arith.truncf %213 : vector<32x128xf32> to vector<32x128xbf16>
    %cst_93 = arith.constant dense<0.000000e+00> : vector<32x128xf32>
    %216 = tpu.matmul %215, %214, %cst_93 {dimension_numbers = #tpu.dot_dimension_numbers<[1], [0], [0], [1], [0, 0, 1, 1], [], []>} : vector<32x128xbf16>, vector<128x128xbf16>, vector<32x128xf32> -> vector<32x128xf32>
    %c0_94 = arith.constant 0 : index
    %c0_95 = arith.constant 0 : index
    %217 = vector.load %arg19[%c0_94, %c0_95] : memref<1x128xf32, #tpu.memory_space<vmem>>, vector<1x128xf32>
    %218 = vector.broadcast %217 : vector<1x128xf32> to vector<32x128xf32>
    %219 = arith.addf %216, %218 : vector<32x128xf32>
    %220 = arith.addf %219, %191 : vector<32x128xf32>
    %c0_96 = arith.constant 0 : index
    %c0_97 = arith.constant 0 : index
    %221 = vector.load %arg22[%c0_96, %c0_97] : memref<32x128xf32, #tpu.memory_space<vmem>>, vector<32x128xf32>
    tpu.vector_store %arg22[%c0_96, %c0_97], %220 {strides = array<i32>} : memref<32x128xf32, #tpu.memory_space<vmem>>, vector<32x128xf32>,
    return
  }
  func.func @transform_0(%arg0: i32) -> (i32, i32) {
    %c0_i32 = arith.constant 0 : i32
    %c0_i32_0 = arith.constant 0 : i32
    return %arg0, %c0_i32 : i32, i32
  }
  func.func @transform_1(%arg0: i32) -> (i32, i32) {
    %c0_i32 = arith.constant 0 : i32
    %c0_i32_0 = arith.constant 0 : i32
    %c0_i32_1 = arith.constant 0 : i32
    return %c0_i32, %c0_i32_0 : i32, i32
  }
  func.func @transform_2(%arg0: i32) -> (i32, i32) {
    %c0_i32 = arith.constant 0 : i32
    %c0_i32_0 = arith.constant 0 : i32
    %c0_i32_1 = arith.constant 0 : i32
    return %c0_i32, %c0_i32_0 : i32, i32
  }
  func.func @transform_3(%arg0: i32) -> (i32, i32) {
    %c0_i32 = arith.constant 0 : i32
    %c0_i32_0 = arith.constant 0 : i32
    %c0_i32_1 = arith.constant 0 : i32
    return %c0_i32, %c0_i32_0 : i32, i32
  }
  func.func @transform_4(%arg0: i32) -> (i32, i32) {
    %c0_i32 = arith.constant 0 : i32
    %c0_i32_0 = arith.constant 0 : i32
    %c0_i32_1 = arith.constant 0 : i32
    return %c0_i32, %c0_i32_0 : i32, i32
  }
  func.func @transform_5(%arg0: i32) -> (i32, i32) {
    %c0_i32 = arith.constant 0 : i32
    %c0_i32_0 = arith.constant 0 : i32
    %c0_i32_1 = arith.constant 0 : i32
    return %c0_i32, %c0_i32_0 : i32, i32
  }
  func.func @transform_6(%arg0: i32) -> (i32, i32) {
    %c0_i32 = arith.constant 0 : i32
    %c0_i32_0 = arith.constant 0 : i32
    %c0_i32_1 = arith.constant 0 : i32
    return %c0_i32, %c0_i32_0 : i32, i32
  }
  func.func @transform_7(%arg0: i32) -> (i32, i32) {
    %c0_i32 = arith.constant 0 : i32
    %c0_i32_0 = arith.constant 0 : i32
    %c0_i32_1 = arith.constant 0 : i32
    return %c0_i32, %c0_i32_0 : i32, i32
  }
  func.func @transform_8(%arg0: i32) -> (i32, i32) {
    %c0_i32 = arith.constant 0 : i32
    %c0_i32_0 = arith.constant 0 : i32
    %c0_i32_1 = arith.constant 0 : i32
    return %c0_i32, %c0_i32_0 : i32, i32
  }
  func.func @transform_9(%arg0: i32) -> (i32, i32) {
    %c0_i32 = arith.constant 0 : i32
    %c0_i32_0 = arith.constant 0 : i32
    %c0_i32_1 = arith.constant 0 : i32
    return %c0_i32, %c0_i32_0 : i32, i32
  }
  func.func @transform_10(%arg0: i32) -> (i32, i32) {
    %c0_i32 = arith.constant 0 : i32
    %c0_i32_0 = arith.constant 0 : i32
    %c0_i32_1 = arith.constant 0 : i32
    return %c0_i32, %c0_i32_0 : i32, i32
  }
  func.func @transform_11(%arg0: i32) -> (i32, i32) {
    %c0_i32 = arith.constant 0 : i32
    %c0_i32_0 = arith.constant 0 : i32
    %c0_i32_1 = arith.constant 0 : i32
    return %c0_i32, %c0_i32_0 : i32, i32
  }
  func.func @transform_12(%arg0: i32) -> (i32, i32) {
    %c0_i32 = arith.constant 0 : i32
    %c0_i32_0 = arith.constant 0 : i32
    %c0_i32_1 = arith.constant 0 : i32
    return %c0_i32, %c0_i32_0 : i32, i32
  }
  func.func @transform_13(%arg0: i32) -> (i32, i32) {
    %c0_i32 = arith.constant 0 : i32
    %c0_i32_0 = arith.constant 0 : i32
    %c0_i32_1 = arith.constant 0 : i32
    return %c0_i32, %c0_i32_0 : i32, i32
  }
  func.func @transform_14(%arg0: i32) -> (i32, i32) {
    %c0_i32 = arith.constant 0 : i32
    %c0_i32_0 = arith.constant 0 : i32
    %c0_i32_1 = arith.constant 0 : i32
    return %c0_i32, %c0_i32_0 : i32, i32
  }
  func.func @transform_15(%arg0: i32) -> (i32, i32) {
    %c0_i32 = arith.constant 0 : i32
    %c0_i32_0 = arith.constant 0 : i32
    %c0_i32_1 = arith.constant 0 : i32
    return %c0_i32, %c0_i32_0 : i32, i32
  }
  func.func @transform_16(%arg0: i32) -> (i32, i32) {
    %c0_i32 = arith.constant 0 : i32
    %c0_i32_0 = arith.constant 0 : i32
    %c0_i32_1 = arith.constant 0 : i32
    return %c0_i32, %c0_i32_0 : i32, i32
  }
  func.func @transform_17(%arg0: i32) -> (i32, i32) {
    %c0_i32 = arith.constant 0 : i32
    %c0_i32_0 = arith.constant 0 : i32
    %c0_i32_1 = arith.constant 0 : i32
    return %c0_i32, %c0_i32_0 : i32, i32
  }
  func.func @transform_18(%arg0: i32) -> (i32, i32) {
    %c0_i32 = arith.constant 0 : i32
    %c0_i32_0 = arith.constant 0 : i32
    %c0_i32_1 = arith.constant 0 : i32
    return %c0_i32, %c0_i32_0 : i32, i32
  }
  func.func @transform_19(%arg0: i32) -> (i32, i32) {
    %c0_i32 = arith.constant 0 : i32
    %c0_i32_0 = arith.constant 0 : i32
    %c0_i32_1 = arith.constant 0 : i32
    return %c0_i32, %c0_i32_0 : i32, i32
  }
  func.func @transform_20(%arg0: i32) -> (i32, i32) {
    %c0_i32 = arith.constant 0 : i32
    %c0_i32_0 = arith.constant 0 : i32
    %c0_i32_1 = arith.constant 0 : i32
    return %c0_i32, %c0_i32_0 : i32, i32
  }
  func.func @transform_21(%arg0: i32) -> (i32, i32) {
    %c0_i32 = arith.constant 0 : i32
    %c0_i32_0 = arith.constant 0 : i32
    return %arg0, %c0_i32 : i32, i32
  }
}

module attributes {stable_mosaic.version = 11 : i64} {
  func.func @_head_moe_kernel(%arg0: i32, %arg1: memref<8x512xf32, #tpu.memory_space<vmem>>, %arg2: memref<512x8xbf16, #tpu.memory_space<vmem>>, %arg3: memref<1x8xf32, #tpu.memory_space<vmem>>, %arg4: memref<8x1xf32, #tpu.memory_space<vmem>>, %arg5: memref<8x8xf32, #tpu.memory_space<vmem>>, %arg6: memref<8x8xf32, #tpu.memory_space<vmem>>) attributes {dimension_semantics = [#tpu.dimension_semantics<arbitrary>], iteration_bounds = array<i64: 1>, scalar_prefetch = 0 : i64, scratch_operands = 0 : i64, tpu.core_type = #tpu.core_type<tc>, window_params = [{pipeline_mode = #tpu.pipeline_mode<synchronous>, transform_indices = @transform_0, window_bounds = array<i64: 8, 512>}, {pipeline_mode = #tpu.pipeline_mode<synchronous>, transform_indices = @transform_1, window_bounds = array<i64: 512, 8>}, {pipeline_mode = #tpu.pipeline_mode<synchronous>, transform_indices = @transform_2, window_bounds = array<i64: 1, 8>}, {pipeline_mode = #tpu.pipeline_mode<synchronous>, transform_indices = @transform_3, window_bounds = array<i64: 8, 1>}, {pipeline_mode = #tpu.pipeline_mode<synchronous>, transform_indices = @transform_4, window_bounds = array<i64: 8, 8>}, {pipeline_mode = #tpu.pipeline_mode<synchronous>, transform_indices = @transform_5, window_bounds = array<i64: 8, 8>}]} {
    %c0 = arith.constant 0 : index
    %c0_0 = arith.constant 0 : index
    %0 = vector.load %arg1[%c0, %c0_0] : memref<8x512xf32, #tpu.memory_space<vmem>>, vector<8x512xf32>
    %1 = arith.truncf %0 : vector<8x512xf32> to vector<8x512xbf16>
    %c0_1 = arith.constant 0 : index
    %c0_2 = arith.constant 0 : index
    %2 = vector.load %arg2[%c0_1, %c0_2] : memref<512x8xbf16, #tpu.memory_space<vmem>>, vector<512x8xbf16>
    %cst = arith.constant dense<0.000000e+00> : vector<8x8xf32>
    %3 = tpu.matmul %1, %2, %cst {dimension_numbers = #tpu.dot_dimension_numbers<[1], [0], [0], [1], [0, 0, 1, 1], [], []>} : vector<8x512xbf16>, vector<512x8xbf16>, vector<8x8xf32> -> vector<8x8xf32>
    %c0_3 = arith.constant 0 : index
    %c0_4 = arith.constant 0 : index
    %4 = vector.load %arg3[%c0_3, %c0_4] : memref<1x8xf32, #tpu.memory_space<vmem>>, vector<1x8xf32>
    %5 = vector.broadcast %4 : vector<1x8xf32> to vector<8x8xf32>
    %6 = arith.addf %3, %5 : vector<8x8xf32>
    %c0_5 = arith.constant 0 : index
    %c0_6 = arith.constant 0 : index
    %7 = vector.load %arg5[%c0_5, %c0_6] : memref<8x8xf32, #tpu.memory_space<vmem>>, vector<8x8xf32>
    %c0_7 = arith.constant 0 : index
    %c0_8 = arith.constant 0 : index
    %8 = vector.load %arg4[%c0_7, %c0_8] : memref<8x1xf32, #tpu.memory_space<vmem>>, vector<8x1xf32>
    %9 = vector.broadcast %8 : vector<8x1xf32> to vector<8x8xf32>
    %10 = arith.mulf %9, %6 : vector<8x8xf32>
    %11 = arith.addf %7, %10 : vector<8x8xf32>
    %c0_9 = arith.constant 0 : index
    %c0_10 = arith.constant 0 : index
    %12 = vector.load %arg6[%c0_9, %c0_10] : memref<8x8xf32, #tpu.memory_space<vmem>>, vector<8x8xf32>
    tpu.vector_store %arg6[%c0_9, %c0_10], %11 {strides = array<i32>} : memref<8x8xf32, #tpu.memory_space<vmem>>, vector<8x8xf32>,
    return
  }
  func.func @transform_0(%arg0: i32) -> (i32, i32) {
    %c0_i32 = arith.constant 0 : i32
    %c0_i32_0 = arith.constant 0 : i32
    %c0_i32_1 = arith.constant 0 : i32
    return %c0_i32, %c0_i32_0 : i32, i32
  }
  func.func @transform_1(%arg0: i32) -> (i32, i32) {
    %c0_i32 = arith.constant 0 : i32
    %c0_i32_0 = arith.constant 0 : i32
    %c0_i32_1 = arith.constant 0 : i32
    return %c0_i32, %c0_i32_0 : i32, i32
  }
  func.func @transform_2(%arg0: i32) -> (i32, i32) {
    %c0_i32 = arith.constant 0 : i32
    %c0_i32_0 = arith.constant 0 : i32
    %c0_i32_1 = arith.constant 0 : i32
    return %c0_i32, %c0_i32_0 : i32, i32
  }
  func.func @transform_3(%arg0: i32) -> (i32, i32) {
    %c0_i32 = arith.constant 0 : i32
    %c0_i32_0 = arith.constant 0 : i32
    %c0_i32_1 = arith.constant 0 : i32
    return %c0_i32, %c0_i32_0 : i32, i32
  }
  func.func @transform_4(%arg0: i32) -> (i32, i32) {
    %c0_i32 = arith.constant 0 : i32
    %c0_i32_0 = arith.constant 0 : i32
    %c0_i32_1 = arith.constant 0 : i32
    return %c0_i32, %c0_i32_0 : i32, i32
  }
  func.func @transform_5(%arg0: i32) -> (i32, i32) {
    %c0_i32 = arith.constant 0 : i32
    %c0_i32_0 = arith.constant 0 : i32
    %c0_i32_1 = arith.constant 0 : i32
    return %c0_i32, %c0_i32_0 : i32, i32
  }
}

module attributes {stable_mosaic.version = 11 : i64} {
  func.func @_out_fc_kernel(%arg0: i32, %arg1: memref<16x4xf32, #tpu.memory_space<vmem>>, %arg2: memref<4x128xf32, #tpu.memory_space<vmem>>, %arg3: memref<1x128xf32, #tpu.memory_space<vmem>>, %arg4: memref<16x128xf32, #tpu.memory_space<vmem>>) attributes {dimension_semantics = [#tpu.dimension_semantics<arbitrary>], iteration_bounds = array<i64: 1>, scalar_prefetch = 0 : i64, scratch_operands = 0 : i64, tpu.core_type = #tpu.core_type<tc>, window_params = [{pipeline_mode = #tpu.pipeline_mode<synchronous>, transform_indices = @transform_0, window_bounds = array<i64: 16, 4>}, {pipeline_mode = #tpu.pipeline_mode<synchronous>, transform_indices = @transform_1, window_bounds = array<i64: 4, 128>}, {pipeline_mode = #tpu.pipeline_mode<synchronous>, transform_indices = @transform_2, window_bounds = array<i64: 1, 128>}, {pipeline_mode = #tpu.pipeline_mode<synchronous>, transform_indices = @transform_3, window_bounds = array<i64: 16, 128>}]} {
    %c0 = arith.constant 0 : index
    %c0_0 = arith.constant 0 : index
    %0 = vector.load %arg1[%c0, %c0_0] : memref<16x4xf32, #tpu.memory_space<vmem>>, vector<16x4xf32>
    %c0_1 = arith.constant 0 : index
    %c0_2 = arith.constant 0 : index
    %1 = vector.load %arg2[%c0_1, %c0_2] : memref<4x128xf32, #tpu.memory_space<vmem>>, vector<4x128xf32>
    %cst = arith.constant dense<0.000000e+00> : vector<16x128xf32>
    %2 = tpu.matmul %0, %1, %cst {dimension_numbers = #tpu.dot_dimension_numbers<[1], [0], [0], [1], [0, 0, 1, 1], [], []>} : vector<16x4xf32>, vector<4x128xf32>, vector<16x128xf32> -> vector<16x128xf32>
    %c0_3 = arith.constant 0 : index
    %c0_4 = arith.constant 0 : index
    %3 = vector.load %arg3[%c0_3, %c0_4] : memref<1x128xf32, #tpu.memory_space<vmem>>, vector<1x128xf32>
    %4 = vector.broadcast %3 : vector<1x128xf32> to vector<16x128xf32>
    %5 = arith.addf %2, %4 : vector<16x128xf32>
    %c0_5 = arith.constant 0 : index
    %c0_6 = arith.constant 0 : index
    %6 = vector.load %arg4[%c0_5, %c0_6] : memref<16x128xf32, #tpu.memory_space<vmem>>, vector<16x128xf32>
    tpu.vector_store %arg4[%c0_5, %c0_6], %5 {strides = array<i32>} : memref<16x128xf32, #tpu.memory_space<vmem>>, vector<16x128xf32>,
    return
  }
  func.func @transform_0(%arg0: i32) -> (i32, i32) {
    %c0_i32 = arith.constant 0 : i32
    %c0_i32_0 = arith.constant 0 : i32
    %c0_i32_1 = arith.constant 0 : i32
    return %c0_i32, %c0_i32_0 : i32, i32
  }
  func.func @transform_1(%arg0: i32) -> (i32, i32) {
    %c0_i32 = arith.constant 0 : i32
    %c0_i32_0 = arith.constant 0 : i32
    %c0_i32_1 = arith.constant 0 : i32
    return %c0_i32, %c0_i32_0 : i32, i32
  }
  func.func @transform_2(%arg0: i32) -> (i32, i32) {
    %c0_i32 = arith.constant 0 : i32
    %c0_i32_0 = arith.constant 0 : i32
    %c0_i32_1 = arith.constant 0 : i32
    return %c0_i32, %c0_i32_0 : i32, i32
  }
  func.func @transform_3(%arg0: i32) -> (i32, i32) {
    %c0_i32 = arith.constant 0 : i32
    %c0_i32_0 = arith.constant 0 : i32
    %c0_i32_1 = arith.constant 0 : i32
    return %c0_i32, %c0_i32_0 : i32, i32
  }
}

</mosaic_0001>

<bundles_post_ra>
// kernel: mimo_ts_encoder_moe_forward.6
= control target key start
LH: loop header
LB: loop body
LE: loop exit
PB: predicated region body
PF: predicated region fallthrough
CT: control target
= control target key end

     0   :  { %v950_v1 = vmov 0   ;;  %vm725_vm0 = vcmask 64512   ;;  %s1209_s1 = inlined_call_operand.vmem [shape: bf16[1024,8], index: 1, kind: input, shape index: {}]   ;;  %s1210_s0 = inlined_call_operand.vmem [shape: f32[8,1024], index: 0, kind: input, shape index: {}]   ;;  %s1211_s3 = inlined_call_operand.vmem [shape: f32[8,1], index: 3, kind: input, shape index: {}]   ;;  %s1212_s2 = inlined_call_operand.vmem [shape: f32[1,8], index: 2, kind: input, shape index: {}]   ;;  %s1213_s4 = inlined_call_operand.vmem [shape: f32[8,8], index: 4, kind: input, shape index: {}, may-alias: {4,5}]   ;;  %s1214_s5 = inlined_call_operand.vmem [shape: f32[8,8], index: 5, kind: output, shape index: {}, may-alias: {4,5}]  }
   0x1   :  { %v886_v0 = vld [vmem:[%s1209_s1 + $0x40] sm:$0xff]   ;;  %885 = vset.pattern.permute.xlu0 %v950_v1  ;;  %v890_v5 = vld [vmem:[%s1209_s1 + $0x48] sm:$0xff]   ;;  %v894_v9 = vld [vmem:[%s1209_s1 + $0x50] sm:$0xff]  }
   0x2   :  { %v887_v2 = vld [vmem:[%s1209_s1 + $0xc0] sm:$0xff]   ;;  %796 = vmatprep.subr.bf16.mxu0 %v886_v0  ;;  %v891_v6 = vld [vmem:[%s1209_s1 + $0xc8] sm:$0xff]   ;;  %v895_v10 = vld [vmem:[%s1209_s1 + $0xd0] sm:$0xff]  }
   0x3   :  { %v888_v3 = vld [vmem:[%s1209_s1] sm:$0xff]   ;;  %818 = vmatprep.subr.bf16.mxu1 %v887_v2  ;;  %v892_v7 = vld [vmem:[%s1209_s1 + $0x8] sm:$0xff]   ;;  %v896_v11 = vld [vmem:[%s1209_s1 + $0x10] sm:$0xff]  }
   0x4   :  { %v889_v4 = vld [vmem:[%s1209_s1 + $0x80] sm:$0xff]   ;;  %797 = vmatpush3.bf16.msra.mxu0 %v888_v3  ;;  %v893_v8 = vld [vmem:[%s1209_s1 + $0x88] sm:$0xff]   ;;  %v897_v12 = vld [vmem:[%s1209_s1 + $0x90] sm:$0xff]  }
   0x5   :  { %819 = vmatpush3.bf16.msra.mxu1 %v889_v4  ;;  %798 = vmatprep.subr.bf16.mxu0 %v890_v5  ;;  %v898_v13 = vld [vmem:[%s1209_s1 + $0x58] sm:$0xff]   ;;  %v902_v17 = vld [vmem:[%s1209_s1 + $0x60] sm:$0xff]   ;;  %v906_v21 = vld [vmem:[%s1209_s1 + $0x68] sm:$0xff]  }
   0x6   :  { %820 = vmatprep.subr.bf16.mxu1 %v891_v6  ;;  %v899_v14 = vld [vmem:[%s1209_s1 + $0xd8] sm:$0xff]   ;;  %v903_v18 = vld [vmem:[%s1209_s1 + $0xe0] sm:$0xff]   ;;  %v907_v22 = vld [vmem:[%s1209_s1 + $0xe8] sm:$0xff]  }
   0x7   :  { %v900_v15 = vld [vmem:[%s1209_s1 + $0x18] sm:$0xff]   ;;  %v904_v19 = vld [vmem:[%s1209_s1 + $0x20] sm:$0xff]   ;;  %v908_v23 = vld [vmem:[%s1209_s1 + $0x28] sm:$0xff]  }
   0x8   :  { %799 = vmatpush3.bf16.msra.mxu0 %v892_v7  ;;  %v901_v16 = vld [vmem:[%s1209_s1 + $0x98] sm:$0xff]   ;;  %v905_v20 = vld [vmem:[%s1209_s1 + $0xa0] sm:$0xff]   ;;  %v909_v24 = vld [vmem:[%s1209_s1 + $0xa8] sm:$0xff]  }
   0x9   :  { %821 = vmatpush3.bf16.msra.mxu1 %v893_v8  ;;  %800 = vmatprep.subr.bf16.mxu0 %v894_v9  ;;  %v910_v25 = vld [vmem:[%s1209_s1 + $0x70] sm:$0xff]   ;;  %v914_v29 = vld [vmem:[%s1209_s1 + $0x78] sm:$0xff]   ;;  %v22_v33 = vld [vmem:[%s1210_s0 + $0x8] sm:$0xff] }
   0xa   :  { %822 = vmatprep.subr.bf16.mxu1 %v895_v10  ;;  %v911_v26 = vld [vmem:[%s1209_s1 + $0xf0] sm:$0xff]   ;;  %v915_v30 = vld [vmem:[%s1209_s1 + $0xf8] sm:$0xff]   ;;  %v21_v35 = vld [vmem:[%s1210_s0] sm:$0xff]  ;;  %v30_v36 = vpack.c.bf16 %v22_v33, %v22_v33 }
   0xb   :  { %v912_v27 = vld [vmem:[%s1209_s1 + $0x30] sm:$0xff]   ;;  %v916_v31 = vld [vmem:[%s1209_s1 + $0x38] sm:$0xff]   ;;  %v29_v38 = vpack.c.bf16 %v21_v35, %v21_v35  ;;  %v918_v41 = vld [vmem:[%s1209_s1 + $0x140] sm:$0xff]  }
   0xc   :  { %801 = vmatpush3.bf16.msra.mxu0 %v896_v11  ;;  %v913_v28 = vld [vmem:[%s1209_s1 + $0xb0] sm:$0xff]   ;;  %v917_v32 = vld [vmem:[%s1209_s1 + $0xb8] sm:$0xff]   ;;  %588 = vmatprep.mubr.bf16.mxu0 %v30_v36  ;;  %v919_v42 = vld [vmem:[%s1209_s1 + $0x1c0] sm:$0xff]  }
   0xd   :  { %823 = vmatpush3.bf16.msra.mxu1 %v897_v12  ;;  %802 = vmatprep.subr.bf16.mxu0 %v898_v13  ;;  %v24_v34 = vld [vmem:[%s1210_s0 + $0x18] sm:$0xff]  ;;  %v23_v39 = vld [vmem:[%s1210_s0 + $0x10] sm:$0xff]  ;;  %v920_v43 = vld [vmem:[%s1209_s1 + $0x100] sm:$0xff]  }
   0xe   :  { %824 = vmatprep.subr.bf16.mxu1 %v899_v14  ;;  %v32_v37 = vpack.c.bf16 %v24_v34, %v24_v34  ;;  %v31_v40 = vpack.c.bf16 %v23_v39, %v23_v39  ;;  %v921_v44 = vld [vmem:[%s1209_s1 + $0x180] sm:$0xff]   ;;  %v922_v45 = vld [vmem:[%s1209_s1 + $0x148] sm:$0xff]   ;;  %v926_v49 = vld [vmem:[%s1209_s1 + $0x150] sm:$0xff]  }
   0xf   :  { %v923_v46 = vld [vmem:[%s1209_s1 + $0x1c8] sm:$0xff]   ;;  %v927_v50 = vld [vmem:[%s1209_s1 + $0x1d0] sm:$0xff]   ;;  %v930_v53 = vld [vmem:[%s1209_s1 + $0x158] sm:$0xff]  }
  0x10   :  { %803 = vmatpush3.bf16.msra.mxu0 %v900_v15  ;;  %628 = vmatprep.mubr.bf16.mxu1 %v32_v37  ;;  %v924_v47 = vld [vmem:[%s1209_s1 + $0x108] sm:$0xff]   ;;  %v928_v51 = vld [vmem:[%s1209_s1 + $0x110] sm:$0xff]   ;;  %v931_v54 = vld [vmem:[%s1209_s1 + $0x1d8] sm:$0xff]  }
  0x11   :  { %825 = vmatpush3.bf16.msra.mxu1 %v901_v16  ;;  %804 = vmatprep.subr.bf16.mxu0 %v902_v17  ;;  %v925_v48 = vld [vmem:[%s1209_s1 + $0x188] sm:$0xff]   ;;  %v929_v52 = vld [vmem:[%s1209_s1 + $0x190] sm:$0xff]   ;;  %v932_v55 = vld [vmem:[%s1209_s1 + $0x118] sm:$0xff]  }
  0x12   :  { %826 = vmatprep.subr.bf16.mxu1 %v903_v18  ;;  %v933_v56 = vld [vmem:[%s1209_s1 + $0x198] sm:$0xff]   ;;  %v934_v57 = vld [vmem:[%s1209_s1 + $0x160] sm:$0xff]   ;;  %v938_v61 = vld [vmem:[%s1209_s1 + $0x168] sm:$0xff]  }
  0x13   :  { %v935_v58 = vld [vmem:[%s1209_s1 + $0x1e0] sm:$0xff]   ;;  %v939_v62 = vld [vmem:[%s1209_s1 + $0x1e8] sm:$0xff]   ;;  %v942_v1 = vld [vmem:[%s1209_s1 + $0x170] sm:$0xff]  }
  0x14   :  { %805 = vmatpush3.bf16.msra.mxu0 %v904_v19  ;;  %v936_v59 = vld [vmem:[%s1209_s1 + $0x120] sm:$0xff]   ;;  %v940_v63 = vld [vmem:[%s1209_s1 + $0x128] sm:$0xff]   ;;  %v943_v2 = vld [vmem:[%s1209_s1 + $0x1f0] sm:$0xff]  }
  0x15   :  { %827 = vmatpush3.bf16.msra.mxu1 %v905_v20  ;;  %806 = vmatprep.subr.bf16.mxu0 %v906_v21  ;;  %v937_v60 = vld [vmem:[%s1209_s1 + $0x1a0] sm:$0xff]   ;;  %v941_v0 = vld [vmem:[%s1209_s1 + $0x1a8] sm:$0xff]   ;;  %v944_v3 = vld [vmem:[%s1209_s1 + $0x130] sm:$0xff]  }
  0x16   :  { %828 = vmatprep.subr.bf16.mxu1 %v907_v22  ;;  %v945_v4 = vld [vmem:[%s1209_s1 + $0x1b0] sm:$0xff]   ;;  %v946_v5 = vld [vmem:[%s1209_s1 + $0x178] sm:$0xff]   ;;  %v26_v9 = vld [vmem:[%s1210_s0 + $0x28] sm:$0xff] }
  0x17   :  { %v947_v6 = vld [vmem:[%s1209_s1 + $0x1f8] sm:$0xff]   ;;  %v34_v11 = vpack.c.bf16 %v26_v9, %v26_v9  ;;  %v25_v13 = vld [vmem:[%s1210_s0 + $0x20] sm:$0xff]  ;;  %v27_v14 = vld [vmem:[%s1210_s0 + $0x30] sm:$0xff] }
  0x18   :  { %807 = vmatpush3.bf16.msra.mxu0 %v908_v23  ;;  %v948_v7 = vld [vmem:[%s1209_s1 + $0x138] sm:$0xff]   ;;  %v717_v15 = vld [vmem:[%s1211_s3] sm:$0xff]  ;;  %v33_v16 = vpack.c.bf16 %v25_v13, %v25_v13  ;;  %v35_v17 = vpack.c.bf16 %v27_v14, %v27_v14 }
  0x19   :  { %829 = vmatpush3.bf16.msra.mxu1 %v909_v24  ;;  %808 = vmatprep.subr.bf16.mxu0 %v910_v25  ;;  %v949_v8 = vld [vmem:[%s1209_s1 + $0x1b8] sm:$0xff]   ;;  %v731_v20 = vld [vmem:[%s1212_s2] ss:$0 sm:$0xff] }
  0x1a   :  { %830 = vmatprep.subr.bf16.mxu1 %v911_v26  ;;  %v28_v10 = vld [vmem:[%s1210_s0 + $0x38] sm:$0xff]  ;;  %720 = vperm.xlu0 %885, %v717_v15  }
  0x1b   :  { %v36_v12 = vpack.c.bf16 %v28_v10, %v28_v10 }
  0x1c   :  { %809 = vmatpush3.bf16.msra.mxu0 %v912_v27 }
  0x1d   :  { %831 = vmatpush3.bf16.msra.mxu1 %v913_v28  ;;  %810 = vmatprep.subr.bf16.mxu0 %v914_v29 }
  0x1e   :  { %832 = vmatprep.subr.bf16.mxu1 %v915_v30 }
  0x20   :  { %811 = vmatpush3.bf16.msra.mxu0 %v916_v31 }
  0x21   :  { %833 = vmatpush3.bf16.msra.mxu1 %v917_v32  ;;  %840 = vmatprep.subr.bf16.mxu0 %v918_v41 }
  0x22   :  { %862 = vmatprep.subr.bf16.mxu1 %v919_v42 }
  0x23   :  { %589 = vmatmul.mubr.bf16.vlgmr.msra.gmra.mrb[0].mxu0 %v29_v38 }
  0x24   :  { %629 = vmatmul.mubr.bf16.vlgmr.msra.gmra.mrb[0].mxu1 %v31_v40  ;;  %841 = vmatpush3.bf16.msra.mxu0 %v920_v43 }
  0x25   :  { %863 = vmatpush3.bf16.msra.mxu1 %v921_v44  ;;  %842 = vmatprep.subr.bf16.mxu0 %v922_v45  ;;  %v716_v44 = vld [vmem:[%s1213_s4] sm:$0xff] }
  0x26   :  { %864 = vmatprep.subr.bf16.mxu1 %v923_v46  ;;  %668 = vmatprep.mubr.bf16.mxu0 %v34_v11 }
  0x27   :  { %708 = vmatprep.mubr.bf16.mxu1 %v36_v12 }
  0x28   :  { %843 = vmatpush3.bf16.msra.mxu0 %v924_v47 }
  0x29   :  { %865 = vmatpush3.bf16.msra.mxu1 %v925_v48  ;;  %844 = vmatprep.subr.bf16.mxu0 %v926_v49 }
  0x2a   :  { %866 = vmatprep.subr.bf16.mxu1 %v927_v50 }
  0x2c   :  { %845 = vmatpush3.bf16.msra.mxu0 %v928_v51 }
  0x2d   :  { %867 = vmatpush3.bf16.msra.mxu1 %v929_v52  ;;  %846 = vmatprep.subr.bf16.mxu0 %v930_v53 }
  0x2e   :  { %868 = vmatprep.subr.bf16.mxu1 %v931_v54 }
  0x30   :  { %847 = vmatpush3.bf16.msra.mxu0 %v932_v55 }
  0x31   :  { %869 = vmatpush3.bf16.msra.mxu1 %v933_v56  ;;  %848 = vmatprep.subr.bf16.mxu0 %v934_v57 }
  0x32   :  { %870 = vmatprep.subr.bf16.mxu1 %v935_v58 }
  0x34   :  { %849 = vmatpush3.bf16.msra.mxu0 %v936_v59 }
  0x35   :  { %871 = vmatpush3.bf16.msra.mxu1 %v937_v60  ;;  %850 = vmatprep.subr.bf16.mxu0 %v938_v61 }
  0x36   :  { %872 = vmatprep.subr.bf16.mxu1 %v939_v62 }
  0x38   :  { %851 = vmatpush3.bf16.msra.mxu0 %v940_v63 }
  0x39   :  { %873 = vmatpush3.bf16.msra.mxu1 %v941_v0  ;;  %852 = vmatprep.subr.bf16.mxu0 %v942_v1 }
  0x3a   :  { %874 = vmatprep.subr.bf16.mxu1 %v943_v2 }
  0x3c   :  { %853 = vmatpush3.bf16.msra.mxu0 %v944_v3 }
  0x3d   :  { %875 = vmatpush3.bf16.msra.mxu1 %v945_v4  ;;  %854 = vmatprep.subr.bf16.mxu0 %v946_v5 }
  0x3e   :  { %876 = vmatprep.subr.bf16.mxu1 %v947_v6 }
  0x40   :  { %855 = vmatpush3.bf16.msra.mxu0 %v948_v7 }
  0x41   :  { %877 = vmatpush3.bf16.msra.mxu1 %v949_v8 }
  0x43   :  { %669 = vmatmul.mubr.bf16.vlgmr.msra.gmra.mrb[4].mxu0 %v33_v16 }
  0x44   :  { %709 = vmatmul.mubr.bf16.vlgmr.msra.gmra.mrb[4].mxu1 %v35_v17 }
  0x99   :  { %v721_v42 = vpop.permute.xlu0 %720 }
  0xf6   :  { %v812_v18 = vpop.f32.mrb[0].mxu0 }
  0xf7   :  { %v834_v19 = vpop.f32.mrb[0].mxu1  ;;  %v813_v21 = vpop.f32.mrb[1].mxu0 }
  0xf8   :  { %v835_v22 = vpop.f32.mrb[1].mxu1  ;;  %v814_v23 = vadd.f32 %v813_v21, %v812_v18  ;;  %v815_v25 = vpop.f32.mrb[2].mxu0 }
  0xf9   :  { %v836_v24 = vadd.f32 %v835_v22, %v834_v19  ;;  %v837_v26 = vpop.f32.mrb[2].mxu1  ;;  %v816_v27 = vpop.f32.mrb[3].mxu0 }
  0xfa   :  { %v838_v28 = vpop.f32.mrb[3].mxu1  ;;  %v591_v29 = vadd.f32 %v814_v23, %v731_v20 }
  0xfc   :  { %v631_v30 = vadd.f32 %v836_v24, %v591_v29 }
 0x116   :  { %v856_v31 = vpop.f32.mrb[4].mxu0 }
 0x117   :  { %v878_v32 = vpop.f32.mrb[4].mxu1  ;;  %v857_v33 = vpop.f32.mrb[5].mxu0 }
 0x118   :  { %v858_v34 = vadd.f32 %v857_v33, %v856_v31  ;;  %v879_v35 = vpop.f32.mrb[5].mxu1  ;;  %v859_v36 = vpop.f32.mrb[6].mxu0 }
 0x119   :  { %v880_v37 = vadd.f32 %v879_v35, %v878_v32  ;;  %v881_v38 = vpop.f32.mrb[6].mxu1  ;;  %v860_v39 = vpop.f32.mrb[7].mxu0 }
 0x11a   :  { %v671_v40 = vadd.f32 %v858_v34, %v631_v30  ;;  %v882_v41 = vpop.f32.mrb[7].mxu1 }
 0x11c   :  { %v711_v43 = vadd.f32 %v880_v37, %v671_v40 }
 0x11e   :  { %v723_v45 = vmul.f32 %v721_v42, %v711_v43 }
 0x120   :  { %v724_v46 = vadd.f32 %v723_v45, %v716_v44 }
 0x122   :  { %726 = vst.msk [vmem:[%s1214_s5] sm:$0xff] %vm725_vm0, %v724_v46 }

// kernel: mimo_ts_encoder_moe_forward.8
= control target key start
LH: loop header
LB: loop body
LE: loop exit
PB: predicated region body
PF: predicated region fallthrough
CT: control target
= control target key end

     0   :  { %v498_v1 = vmov 0   ;;  %vm381_vm0 = vcmask 64512   ;;  %s649_s1 = inlined_call_operand.vmem [shape: bf16[512,8], index: 1, kind: input, shape index: {}]   ;;  %s650_s0 = inlined_call_operand.vmem [shape: f32[8,512], index: 0, kind: input, shape index: {}]   ;;  %s651_s3 = inlined_call_operand.vmem [shape: f32[8,1], index: 3, kind: input, shape index: {}]   ;;  %s652_s2 = inlined_call_operand.vmem [shape: f32[1,8], index: 2, kind: input, shape index: {}]   ;;  %s653_s4 = inlined_call_operand.vmem [shape: f32[8,8], index: 4, kind: input, shape index: {}, may-alias: {4,5}]   ;;  %s654_s5 = inlined_call_operand.vmem [shape: f32[8,8], index: 5, kind: output, shape index: {}, may-alias: {4,5}]  }
   0x1   :  { %v466_v0 = vld [vmem:[%s649_s1 + $0x40] sm:$0xff]   ;;  %465 = vset.pattern.permute.xlu0 %v498_v1  ;;  %v470_v5 = vld [vmem:[%s649_s1 + $0x48] sm:$0xff]   ;;  %v474_v9 = vld [vmem:[%s649_s1 + $0x50] sm:$0xff]  }
   0x2   :  { %v467_v2 = vld [vmem:[%s649_s1 + $0xc0] sm:$0xff]   ;;  %420 = vmatprep.subr.bf16.mxu0 %v466_v0  ;;  %v471_v6 = vld [vmem:[%s649_s1 + $0xc8] sm:$0xff]   ;;  %v475_v10 = vld [vmem:[%s649_s1 + $0xd0] sm:$0xff]  }
   0x3   :  { %v468_v3 = vld [vmem:[%s649_s1] sm:$0xff]   ;;  %442 = vmatprep.subr.bf16.mxu1 %v467_v2  ;;  %v472_v7 = vld [vmem:[%s649_s1 + $0x8] sm:$0xff]   ;;  %v476_v11 = vld [vmem:[%s649_s1 + $0x10] sm:$0xff]  }
   0x4   :  { %v469_v4 = vld [vmem:[%s649_s1 + $0x80] sm:$0xff]   ;;  %421 = vmatpush3.bf16.msra.mxu0 %v468_v3  ;;  %v473_v8 = vld [vmem:[%s649_s1 + $0x88] sm:$0xff]   ;;  %v477_v12 = vld [vmem:[%s649_s1 + $0x90] sm:$0xff]  }
   0x5   :  { %443 = vmatpush3.bf16.msra.mxu1 %v469_v4  ;;  %422 = vmatprep.subr.bf16.mxu0 %v470_v5  ;;  %v478_v13 = vld [vmem:[%s649_s1 + $0x58] sm:$0xff]   ;;  %v482_v17 = vld [vmem:[%s649_s1 + $0x60] sm:$0xff]   ;;  %v486_v21 = vld [vmem:[%s649_s1 + $0x68] sm:$0xff]  }
   0x6   :  { %444 = vmatprep.subr.bf16.mxu1 %v471_v6  ;;  %v479_v14 = vld [vmem:[%s649_s1 + $0xd8] sm:$0xff]   ;;  %v483_v18 = vld [vmem:[%s649_s1 + $0xe0] sm:$0xff]   ;;  %v487_v22 = vld [vmem:[%s649_s1 + $0xe8] sm:$0xff]  }
   0x7   :  { %v480_v15 = vld [vmem:[%s649_s1 + $0x18] sm:$0xff]   ;;  %v484_v19 = vld [vmem:[%s649_s1 + $0x20] sm:$0xff]   ;;  %v488_v23 = vld [vmem:[%s649_s1 + $0x28] sm:$0xff]  }
   0x8   :  { %423 = vmatpush3.bf16.msra.mxu0 %v472_v7  ;;  %v481_v16 = vld [vmem:[%s649_s1 + $0x98] sm:$0xff]   ;;  %v485_v20 = vld [vmem:[%s649_s1 + $0xa0] sm:$0xff]   ;;  %v489_v24 = vld [vmem:[%s649_s1 + $0xa8] sm:$0xff]  }
   0x9   :  { %445 = vmatpush3.bf16.msra.mxu1 %v473_v8  ;;  %424 = vmatprep.subr.bf16.mxu0 %v474_v9  ;;  %v490_v25 = vld [vmem:[%s649_s1 + $0x70] sm:$0xff]   ;;  %v494_v29 = vld [vmem:[%s649_s1 + $0x78] sm:$0xff]   ;;  %v22_v33 = vld [vmem:[%s650_s0 + $0x8] sm:$0xff] }
   0xa   :  { %446 = vmatprep.subr.bf16.mxu1 %v475_v10  ;;  %v491_v26 = vld [vmem:[%s649_s1 + $0xf0] sm:$0xff]   ;;  %v495_v30 = vld [vmem:[%s649_s1 + $0xf8] sm:$0xff]   ;;  %v21_v35 = vld [vmem:[%s650_s0] sm:$0xff]  ;;  %v26_v36 = vpack.c.bf16 %v22_v33, %v22_v33 }
   0xb   :  { %v492_v27 = vld [vmem:[%s649_s1 + $0x30] sm:$0xff]   ;;  %v496_v31 = vld [vmem:[%s649_s1 + $0x38] sm:$0xff]   ;;  %v25_v38 = vpack.c.bf16 %v21_v35, %v21_v35  ;;  %v373_v40 = vld [vmem:[%s651_s3] sm:$0xff] }
   0xc   :  { %425 = vmatpush3.bf16.msra.mxu0 %v476_v11  ;;  %v493_v28 = vld [vmem:[%s649_s1 + $0xb0] sm:$0xff]   ;;  %v497_v32 = vld [vmem:[%s649_s1 + $0xb8] sm:$0xff]   ;;  %376 = vperm.xlu0 %465, %v373_v40   ;;  %v387_v44 = vld [vmem:[%s652_s2] ss:$0 sm:$0xff] }
   0xd   :  { %447 = vmatpush3.bf16.msra.mxu1 %v477_v12  ;;  %426 = vmatprep.subr.bf16.mxu0 %v478_v13  ;;  %v24_v34 = vld [vmem:[%s650_s0 + $0x18] sm:$0xff]  ;;  %v23_v39 = vld [vmem:[%s650_s0 + $0x10] sm:$0xff]  ;;  %v372_v56 = vld [vmem:[%s653_s4] sm:$0xff] }
   0xe   :  { %448 = vmatprep.subr.bf16.mxu1 %v479_v14  ;;  %v28_v37 = vpack.c.bf16 %v24_v34, %v24_v34  ;;  %v27_v41 = vpack.c.bf16 %v23_v39, %v23_v39  ;;  %324 = vmatprep.mubr.bf16.mxu0 %v26_v36 }
  0x10   :  { %427 = vmatpush3.bf16.msra.mxu0 %v480_v15  ;;  %364 = vmatprep.mubr.bf16.mxu1 %v28_v37 }
  0x11   :  { %449 = vmatpush3.bf16.msra.mxu1 %v481_v16  ;;  %428 = vmatprep.subr.bf16.mxu0 %v482_v17 }
  0x12   :  { %450 = vmatprep.subr.bf16.mxu1 %v483_v18 }
  0x14   :  { %429 = vmatpush3.bf16.msra.mxu0 %v484_v19 }
  0x15   :  { %451 = vmatpush3.bf16.msra.mxu1 %v485_v20  ;;  %430 = vmatprep.subr.bf16.mxu0 %v486_v21 }
  0x16   :  { %452 = vmatprep.subr.bf16.mxu1 %v487_v22 }
  0x18   :  { %431 = vmatpush3.bf16.msra.mxu0 %v488_v23 }
  0x19   :  { %453 = vmatpush3.bf16.msra.mxu1 %v489_v24  ;;  %432 = vmatprep.subr.bf16.mxu0 %v490_v25 }
  0x1a   :  { %454 = vmatprep.subr.bf16.mxu1 %v491_v26 }
  0x1c   :  { %433 = vmatpush3.bf16.msra.mxu0 %v492_v27 }
  0x1d   :  { %455 = vmatpush3.bf16.msra.mxu1 %v493_v28  ;;  %434 = vmatprep.subr.bf16.mxu0 %v494_v29 }
  0x1e   :  { %456 = vmatprep.subr.bf16.mxu1 %v495_v30 }
  0x20   :  { %435 = vmatpush3.bf16.msra.mxu0 %v496_v31 }
  0x21   :  { %457 = vmatpush3.bf16.msra.mxu1 %v497_v32 }
  0x23   :  { %325 = vmatmul.mubr.bf16.vlgmr.msra.gmra.mrb[0].mxu0 %v25_v38 }
  0x24   :  { %365 = vmatmul.mubr.bf16.vlgmr.msra.gmra.mrb[0].mxu1 %v27_v41 }
  0x8b   :  { %v377_v54 = vpop.permute.xlu0 %376 }
  0xf6   :  { %v436_v42 = vpop.f32.mrb[0].mxu0 }
  0xf7   :  { %v458_v43 = vpop.f32.mrb[0].mxu1  ;;  %v437_v45 = vpop.f32.mrb[1].mxu0 }
  0xf8   :  { %v459_v46 = vpop.f32.mrb[1].mxu1  ;;  %v438_v47 = vadd.f32 %v437_v45, %v436_v42  ;;  %v439_v49 = vpop.f32.mrb[2].mxu0 }
  0xf9   :  { %v460_v48 = vadd.f32 %v459_v46, %v458_v43  ;;  %v461_v50 = vpop.f32.mrb[2].mxu1  ;;  %v440_v51 = vpop.f32.mrb[3].mxu0 }
  0xfa   :  { %v462_v52 = vpop.f32.mrb[3].mxu1  ;;  %v327_v53 = vadd.f32 %v438_v47, %v387_v44 }
  0xfc   :  { %v367_v55 = vadd.f32 %v460_v48, %v327_v53 }
  0xfe   :  { %v379_v57 = vmul.f32 %v377_v54, %v367_v55 }
 0x100   :  { %v380_v58 = vadd.f32 %v379_v57, %v372_v56 }
 0x102   :  { %382 = vst.msk [vmem:[%s654_s5] sm:$0xff] %vm381_vm0, %v380_v58 }

// kernel: mimo_ts_encoder_moe_forward.9
= control target key start
LH: loop header
LB: loop body
LE: loop exit
PB: predicated region body
PF: predicated region fallthrough
CT: control target
= control target key end

     0   :  { %vm32_vm0 = vcmask 1043456   ;;  %vm25_vm1 = vcmask 31744   ;;  %s215_s0 = inlined_call_operand.vmem [shape: f32[16,4], index: 0, kind: input, shape index: {}]   ;;  %s216_s1 = inlined_call_operand.vmem [shape: f32[4,128], index: 1, kind: input, shape index: {}]   ;;  %s217_s2 = inlined_call_operand.vmem [shape: f32[1,128], index: 2, kind: input, shape index: {}]   ;;  %s218_s3 = inlined_call_operand.hbm [shape: f32[16,128], index: 3, kind: output, shape index: {}]  }
   0x1   :  { %v17_v0 = vld [vmem:[%s216_s1] sm:$0xf]  ;;  %v16_v2 = vld [vmem:[%s215_s0 + $0x8] sm:$0xff] }
   0x2   :  { %v15_v1 = vld [vmem:[%s215_s0] sm:$0xff]  ;;  %136 = vmatprep.subr.msk.mxu0 %vm32_vm0, %v17_v0 }
   0x3   :  { %138 = vmatprep.mubr.msk.f32.mxu0 %vm25_vm1, %v15_v1 }
   0x4   :  { %8 = vsyncpa [#allocation3], 0  ;;  %137 = vmatpush3.msk.msra.mxu0 %vm32_vm0, %v17_v0  ;;  %v129_v3 = vld [vmem:[%s217_s2] ss:$0 sm:$0xff]  ;;  %s168_s1 = smov [#allocation2]  }
   0x5   :  { %139 = vmatmul.mubr.msk.f32.vlgmr.msra.gmra.mrb[0].mxu0 %vm25_vm1, %v16_v2  ;;  %s118_s20 = sshll.u32 %s168_s1, 4  ;;  %s119_s20 = int_to_ptr.vmem [resolvable:$true] %s118_s20 }
   0x6   :  { %s144_s21 = scalar_lea.vmem %s119_s20, 256  ;;  %p149_p1 = scmp.lt.s32.totalorder %s119_s20, %s119_s20 }
   0x7   :  { %p145_p0 = scmp.ne.s32.totalorder %s119_s20, %s144_s21  ;;  %p150_p2 = scmp.lt.s32.totalorder %s144_s21, %s144_s21 }
   0x9   :  { %p151_p3 = por %p150_p2, %p149_p1 }
   0xb   :  { %p152_p4 = pnand %p151_p3, %p145_p0 }
  0xd8   :  { %v140_v4 = vpop.f32.mrb[0].mxu0 }
  0xd9   :  { %v108_v5 = vadd.f32 %v140_v4, %v129_v3  ;;  %v102_v6 = vpop.f32.mrb[1].mxu0 }
  0xda   :  { %v103_v7 = vadd.f32 %v129_v3, %v102_v6 }
  0xdb   :  { %112 = vst [vmem:[#allocation2 + $0x8] sm:$0xff] %v108_v5 }
  0xdc   :  { %111 = vst [vmem:[#allocation2] sm:$0xff] %v103_v7 }
  0xdd   :  { %155 = shalt.err (!%p152_p4)
}
  0xde   :  { %s156_s2 = scalar_lea.hbm %s218_s3, 256 }
  0xdf   :  { %p157_p5 = scmp.ne.s32.totalorder %s218_s3, %s156_s2  ;;  %p160_p6 = scmp.lt.u32.totalorder %s156_s2, %s218_s3 }
  0xe1   :  { %p162_p7 = pnand %p160_p6, %p157_p5 }
  0xe3   :  { %165 = shalt.err (!%p162_p7)
}
  0xe4   :  { %s169_s27 = smov 128   ;;  %s170_s28 = smov 8  }
  0xe5   :  { %124 = dma.vmem_to_hbm [thread:$0]  %s119_s20, 256, %s218_s3, [#allocation3], %s169_s27, %s169_s27, %s170_s28  }
  0xe6   :  { %166 = dma.done.wait [#allocation3], 256  }
  0xe7   :  { %167 = vsyncadd [#allocation3], 4294967040 }
  0xe8   :  { %128 = vsyncpa [#allocation3], 1 }

// kernel: mimo_ts_encoder_moe_forward.7
= control target key start
LH: loop header
LB: loop body
LE: loop exit
PB: predicated region body
PF: predicated region fallthrough
CT: control target
= control target key end

     0   :  { %s4464_s0 = inlined_call_operand.hbm [shape: f32[32,8], index: 0, kind: input, shape index: {}]   ;;  %s4465_s1 = inlined_call_operand.hbm [shape: f32[32,128], index: 1, kind: input, shape index: {}]   ;;  %s4466_s2 = inlined_call_operand.hbm [shape: bf16[8,128], index: 2, kind: input, shape index: {}]   ;;  %s4467_s3 = inlined_call_operand.hbm [shape: bf16[128,384], index: 3, kind: input, shape index: {}]   ;;  %s4468_s4 = inlined_call_operand.hbm [shape: f32[1,128], index: 4, kind: input, shape index: {}]   ;;  %s4469_s5 = inlined_call_operand.hbm [shape: bf16[128,384], index: 5, kind: input, shape index: {}]   ;;  %s4470_s6 = inlined_call_operand.hbm [shape: f32[1,128], index: 6, kind: input, shape index: {}]   ;;  %s4471_s7 = inlined_call_operand.hbm [shape: bf16[128,384], index: 7, kind: input, shape index: {}]   ;;  %s4472_s8 = inlined_call_operand.hbm [shape: f32[1,128], index: 8, kind: input, shape index: {}]   ;;  %s4473_s9 = inlined_call_operand.hbm [shape: bf16[128,384], index: 9, kind: input, shape index: {}]   ;;  %s4474_s10 = inlined_call_operand.hbm [shape: f32[1,128], index: 10, kind: input, shape index: {}]   ;;  %s4475_s11 = inlined_call_operand.hbm [shape: bf16[128,384], index: 11, kind: input, shape index: {}]   ;;  %s4476_s12 = inlined_call_operand.hbm [shape: f32[1,128], index: 12, kind: input, shape index: {}]   ;;  %s4477_s13 = inlined_call_operand.hbm [shape: bf16[128,384], index: 13, kind: input, shape index: {}]   ;;  %s4478_s14 = inlined_call_operand.hbm [shape: f32[1,128], index: 14, kind: input, shape index: {}]   ;;  %s4479_s15 = inlined_call_operand.hbm [shape: bf16[128,384], index: 15, kind: input, shape index: {}]   ;;  %s4480_s16 = inlined_call_operand.hbm [shape: f32[1,128], index: 16, kind: input, shape index: {}]   ;;  %s4481_s17 = inlined_call_operand.hbm [shape: bf16[128,384], index: 17, kind: input, shape index: {}]   ;;  %s4482_s18 = inlined_call_operand.hbm [shape: f32[1,128], index: 18, kind: input, shape index: {}]   ;;  %s4483_s19 = inlined_call_operand.hbm [shape: bf16[128,128], index: 19, kind: input, shape index: {}]   ;;  %s4484_s20 = inlined_call_operand.hbm [shape: f32[1,128], index: 20, kind: input, shape index: {}]   ;;  %s4485_s21 = inlined_call_operand.hbm [shape: f32[32,128], index: 21, kind: output, shape index: {}]  }
   0x1   :  { %4499 = sst [smem:[#allocation48_spill]] %s4464_s0 }
   0x2   :  { %4500 = sst [smem:[#allocation49_spill]] %s4465_s1 }
   0x3   :  { %4501 = sst [smem:[#allocation50_spill]] %s4466_s2 }
   0x4   :  { %4502 = sst [smem:[#allocation51_spill]] %s4467_s3 }
   0x5   :  { %4503 = sst [smem:[#allocation52_spill]] %s4468_s4 }
   0x6   :  { %4504 = sst [smem:[#allocation53_spill]] %s4469_s5 }
   0x7   :  { %4505 = sst [smem:[#allocation54_spill]] %s4482_s18 }
   0x8   :  { %4506 = sst [smem:[#allocation55_spill]] %s4484_s20 }
   0x9   :  { %4507 = sst [smem:[#allocation56_spill]] %s4485_s21 }
   0xa   :  { %26 = vsyncpa [#allocation3], 0 }
   0xb   :  { %27 = vsyncpa [#allocation6], 0 }
   0xc   :  { %28 = vsyncpa [#allocation9], 0 }
   0xd   :  { %29 = vsyncpa [#allocation12], 0 }
   0xe   :  { %30 = vsyncpa [#allocation15], 0 }
   0xf   :  { %31 = vsyncpa [#allocation18], 0 }
  0x10   :  { %32 = vsyncpa [#allocation21], 0 }
  0x11   :  { %33 = vsyncpa [#allocation24], 0 }
  0x12   :  { %34 = vsyncpa [#allocation27], 0 }
  0x13   :  { %35 = vsyncpa [#allocation30], 0 }
  0x14   :  { %36 = vsyncpa [#allocation33], 0 }
  0x15   :  { %37 = vsyncpa [#allocation4], 0  ;;  %s3763_s2 = smov [#allocation5]   ;;  %s3764_s26 = smov [#allocation8]  }
  0x16   :  { %s55_s25 = sshll.u32 %s3763_s2, 4  ;;  %s77_s27 = sshll.u32 %s3764_s26, 4  ;;  %s56_s25 = int_to_ptr.vmem [resolvable:$true] %s55_s25  ;;  %s3902_s27 = int_to_ptr.vmem [resolvable:$true] %s77_s27 }
  0x17   :  { %s4508_s29 = sld [smem:[#allocation49_spill]] }
  0x1d   :  { %s3255_s0 = scalar_lea.hbm %s4508_s29, 512 }
  0x1e   :  { %p3256_p0 = scmp.ne.s32.totalorder %s4508_s29, %s3255_s0  ;;  %p3259_p1 = scmp.lt.u32.totalorder %s3255_s0, %s4508_s29 }
  0x20   :  { %p3261_p2 = pnand %p3259_p1, %p3256_p0 }
  0x22   :  { %3264 = shalt.err (!%p3261_p2)
}
  0x23   :  { %s3265_s23 = scalar_lea.vmem %s56_s25, 512  ;;  %p3270_p4 = scmp.lt.s32.totalorder %s56_s25, %s56_s25 }
  0x24   :  { %p3266_p3 = scmp.ne.s32.totalorder %s56_s25, %s3265_s23  ;;  %p3271_p5 = scmp.lt.s32.totalorder %s3265_s23, %s3265_s23 }
  0x26   :  { %p3272_p6 = por %p3271_p5, %p3270_p4 }
  0x28   :  { %p3273_p7 = pnand %p3272_p6, %p3266_p3 }
  0x2a   :  { %3276 = shalt.err (!%p3273_p7)
}
  0x2b   :  { %s4493_s1 = smov 128   ;;  %s4495_s24 = smov 8  }
  0x2c   :  { %61 = dma.hbm_to_vmem [thread:$0]  %s4508_s29, 512, %s56_s25, [#allocation6], %s4493_s1, %s4493_s1, %s4495_s24  }
  0x2d   :  { %s4509_s0 = sld [smem:[#allocation51_spill]] }
  0x33   :  { %s3277_s4 = scalar_lea.hbm %s4509_s0, 3072 }
  0x34   :  { %p3278_p8 = scmp.ne.s32.totalorder %s4509_s0, %s3277_s4  ;;  %p3281_p9 = scmp.lt.u32.totalorder %s3277_s4, %s4509_s0 }
  0x36   :  { %p3283_p10 = pnand %p3281_p9, %p3278_p8 }
  0x38   :  { %3286 = shalt.err (!%p3283_p10)
}
  0x39   :  { %s3287_s21 = scalar_lea.vmem %s3902_s27, 3072  ;;  %p3292_p12 = scmp.lt.s32.totalorder %s3902_s27, %s3902_s27 }
  0x3a   :  { %p3288_p11 = scmp.ne.s32.totalorder %s3902_s27, %s3287_s21  ;;  %p3293_p13 = scmp.lt.s32.totalorder %s3287_s21, %s3287_s21 }
  0x3c   :  { %p3294_p0 = por %p3293_p13, %p3292_p12 }
  0x3e   :  { %p3295_p1 = pnand %p3294_p0, %p3288_p11 }
  0x40   :  { %3298 = shalt.err (!%p3295_p1)
}
  0x41   :  { %s3767_s25 = smov 192   ;;  %s3768_s29 = smov 12  }
  0x42   :  { %83 = dma.hbm_to_vmem [thread:$0]  %s4509_s0, 3072, %s3902_s27, [#allocation9], %s3767_s25, %s3767_s25, %s3768_s29  }
  0x43   :  { %s3769_s3 = smov [#allocation11]   ;;  %s3770_s4 = smov [#allocation14]  }
  0x44   :  { %s99_s28 = sshll.u32 %s3769_s3, 4  ;;  %s121_s30 = sshll.u32 %s3770_s4, 4  ;;  %s100_s28 = int_to_ptr.vmem [resolvable:$true] %s99_s28  ;;  %s3939_s30 = int_to_ptr.vmem [resolvable:$true] %s121_s30 }
  0x45   :  { %s4510_s22 = sld [smem:[#allocation53_spill]] }
  0x4b   :  { %s3299_s23 = scalar_lea.hbm %s4510_s22, 3072 }
  0x4c   :  { %p3300_p2 = scmp.ne.s32.totalorder %s4510_s22, %s3299_s23  ;;  %p3303_p3 = scmp.lt.u32.totalorder %s3299_s23, %s4510_s22 }
  0x4e   :  { %p3305_p4 = pnand %p3303_p3, %p3300_p2 }
  0x50   :  { %3308 = shalt.err (!%p3305_p4)
}
  0x51   :  { %s3309_s27 = scalar_lea.vmem %s100_s28, 3072  ;;  %p3314_p6 = scmp.lt.s32.totalorder %s100_s28, %s100_s28 }
  0x52   :  { %p3310_p5 = scmp.ne.s32.totalorder %s100_s28, %s3309_s27  ;;  %p3315_p7 = scmp.lt.s32.totalorder %s3309_s27, %s3309_s27 }
  0x54   :  { %p3316_p8 = por %p3315_p7, %p3314_p6 }
  0x56   :  { %p3317_p9 = pnand %p3316_p8, %p3310_p5 }
  0x58   :  { %3320 = shalt.err (!%p3317_p9)
}
  0x59   :  { %105 = dma.hbm_to_vmem [thread:$0]  %s4510_s22, 3072, %s100_s28, [#allocation12], %s3767_s25, %s3767_s25, %s3768_s29  }
  0x5a   :  { %s3321_s18 = scalar_lea.hbm %s4471_s7, 3072 }
  0x5b   :  { %p3322_p10 = scmp.ne.s32.totalorder %s4471_s7, %s3321_s18  ;;  %p3325_p11 = scmp.lt.u32.totalorder %s3321_s18, %s4471_s7 }
  0x5d   :  { %p3327_p12 = pnand %p3325_p11, %p3322_p10 }
  0x5f   :  { %3330 = shalt.err (!%p3327_p12)
}
  0x60   :  { %s3331_s21 = scalar_lea.vmem %s3939_s30, 3072  ;;  %p3336_p0 = scmp.lt.s32.totalorder %s3939_s30, %s3939_s30 }
  0x61   :  { %p3332_p13 = scmp.ne.s32.totalorder %s3939_s30, %s3331_s21  ;;  %p3337_p1 = scmp.lt.s32.totalorder %s3331_s21, %s3331_s21 }
  0x63   :  { %p3338_p2 = por %p3337_p1, %p3336_p0 }
  0x65   :  { %p3339_p3 = pnand %p3338_p2, %p3332_p13 }
  0x67   :  { %3342 = shalt.err (!%p3339_p3)
}
  0x68   :  { %127 = dma.hbm_to_vmem [thread:$0]  %s4471_s7, 3072, %s3939_s30, [#allocation15], %s3767_s25, %s3767_s25, %s3768_s29  }
  0x69   :  { %s3771_s22 = smov [#allocation17]   ;;  %s3772_s27 = smov [#allocation20]  }
  0x6a   :  { %s143_s23 = sshll.u32 %s3771_s22, 4  ;;  %s165_s0 = sshll.u32 %s3772_s27, 4  ;;  %s144_s23 = int_to_ptr.vmem [resolvable:$true] %s143_s23  ;;  %s3976_s0 = int_to_ptr.vmem [resolvable:$true] %s165_s0 }
  0x6b   :  { %s3343_s24 = scalar_lea.hbm %s4473_s9, 3072 }
  0x6c   :  { %p3344_p4 = scmp.ne.s32.totalorder %s4473_s9, %s3343_s24  ;;  %p3347_p5 = scmp.lt.u32.totalorder %s3343_s24, %s4473_s9 }
  0x6e   :  { %p3349_p6 = pnand %p3347_p5, %p3344_p4 }
  0x70   :  { %3352 = shalt.err (!%p3349_p6)
}
  0x71   :  { %s3353_s7 = scalar_lea.vmem %s144_s23, 3072  ;;  %p3358_p8 = scmp.lt.s32.totalorder %s144_s23, %s144_s23 }
  0x72   :  { %p3354_p7 = scmp.ne.s32.totalorder %s144_s23, %s3353_s7  ;;  %p3359_p9 = scmp.lt.s32.totalorder %s3353_s7, %s3353_s7 }
  0x74   :  { %p3360_p10 = por %p3359_p9, %p3358_p8 }
  0x76   :  { %p3361_p11 = pnand %p3360_p10, %p3354_p7 }
  0x78   :  { %3364 = shalt.err (!%p3361_p11)
}
  0x79   :  { %149 = dma.hbm_to_vmem [thread:$0]  %s4473_s9, 3072, %s144_s23, [#allocation18], %s3767_s25, %s3767_s25, %s3768_s29  }
  0x7a   :  { %s3365_s5 = scalar_lea.hbm %s4475_s11, 3072 }
  0x7b   :  { %p3366_p12 = scmp.ne.s32.totalorder %s4475_s11, %s3365_s5  ;;  %p3369_p13 = scmp.lt.u32.totalorder %s3365_s5, %s4475_s11 }
  0x7d   :  { %p3371_p0 = pnand %p3369_p13, %p3366_p12 }
  0x7f   :  { %3374 = shalt.err (!%p3371_p0)
}
  0x80   :  { %s3375_s24 = scalar_lea.vmem %s3976_s0, 3072  ;;  %p3380_p2 = scmp.lt.s32.totalorder %s3976_s0, %s3976_s0 }
  0x81   :  { %p3376_p1 = scmp.ne.s32.totalorder %s3976_s0, %s3375_s24  ;;  %p3381_p3 = scmp.lt.s32.totalorder %s3375_s24, %s3375_s24 }
  0x83   :  { %p3382_p4 = por %p3381_p3, %p3380_p2 }
  0x85   :  { %p3383_p5 = pnand %p3382_p4, %p3376_p1 }
  0x87   :  { %3386 = shalt.err (!%p3383_p5)
}
  0x88   :  { %171 = dma.hbm_to_vmem [thread:$0]  %s4475_s11, 3072, %s3976_s0, [#allocation21], %s3767_s25, %s3767_s25, %s3768_s29  }
  0x89   :  { %s3773_s18 = smov [#allocation23]   ;;  %s3774_s26 = smov [#allocation26]  }
  0x8a   :  { %s187_s20 = sshll.u32 %s3773_s18, 4  ;;  %s209_s3 = sshll.u32 %s3774_s26, 4  ;;  %s188_s20 = int_to_ptr.vmem [resolvable:$true] %s187_s20  ;;  %s4013_s3 = int_to_ptr.vmem [resolvable:$true] %s209_s3 }
  0x8b   :  { %s3387_s4 = scalar_lea.hbm %s4477_s13, 3072 }
  0x8c   :  { %p3388_p6 = scmp.ne.s32.totalorder %s4477_s13, %s3387_s4  ;;  %p3391_p7 = scmp.lt.u32.totalorder %s3387_s4, %s4477_s13 }
  0x8e   :  { %p3393_p8 = pnand %p3391_p7, %p3388_p6 }
  0x90   :  { %3396 = shalt.err (!%p3393_p8)
}
  0x91   :  { %s3397_s11 = scalar_lea.vmem %s188_s20, 3072  ;;  %p3402_p10 = scmp.lt.s32.totalorder %s188_s20, %s188_s20 }
  0x92   :  { %p3398_p9 = scmp.ne.s32.totalorder %s188_s20, %s3397_s11  ;;  %p3403_p11 = scmp.lt.s32.totalorder %s3397_s11, %s3397_s11 }
  0x94   :  { %p3404_p12 = por %p3403_p11, %p3402_p10 }
  0x96   :  { %p3405_p13 = pnand %p3404_p12, %p3398_p9 }
  0x98   :  { %3408 = shalt.err (!%p3405_p13)
}
  0x99   :  { %193 = dma.hbm_to_vmem [thread:$0]  %s4477_s13, 3072, %s188_s20, [#allocation24], %s3767_s25, %s3767_s25, %s3768_s29  }
  0x9a   :  { %s3409_s24 = scalar_lea.hbm %s4479_s15, 3072 }
  0x9b   :  { %p3410_p0 = scmp.ne.s32.totalorder %s4479_s15, %s3409_s24  ;;  %p3413_p1 = scmp.lt.u32.totalorder %s3409_s24, %s4479_s15 }
  0x9d   :  { %p3415_p2 = pnand %p3413_p1, %p3410_p0 }
  0x9f   :  { %3418 = shalt.err (!%p3415_p2)
}
  0xa0   :  { %s3419_s7 = scalar_lea.vmem %s4013_s3, 3072  ;;  %p3424_p4 = scmp.lt.s32.totalorder %s4013_s3, %s4013_s3 }
  0xa1   :  { %p3420_p3 = scmp.ne.s32.totalorder %s4013_s3, %s3419_s7  ;;  %p3425_p5 = scmp.lt.s32.totalorder %s3419_s7, %s3419_s7 }
  0xa3   :  { %p3426_p6 = por %p3425_p5, %p3424_p4 }
  0xa5   :  { %p3427_p7 = pnand %p3426_p6, %p3420_p3 }
  0xa7   :  { %3430 = shalt.err (!%p3427_p7)
}
  0xa8   :  { %215 = dma.hbm_to_vmem [thread:$0]  %s4479_s15, 3072, %s4013_s3, [#allocation27], %s3767_s25, %s3767_s25, %s3768_s29  }
  0xa9   :  { %s3775_s30 = smov [#allocation29]   ;;  %s3776_s21 = smov [#allocation32]  }
  0xaa   :  { %s231_s4 = sshll.u32 %s3775_s30, 4  ;;  %s253_s28 = sshll.u32 %s3776_s21, 4  ;;  %s232_s4 = int_to_ptr.vmem [resolvable:$true] %s231_s4  ;;  %s4050_s28 = int_to_ptr.vmem [resolvable:$true] %s253_s28 }
  0xab   :  { %s3431_s11 = scalar_lea.hbm %s4481_s17, 3072 }
  0xac   :  { %p3432_p8 = scmp.ne.s32.totalorder %s4481_s17, %s3431_s11  ;;  %p3435_p9 = scmp.lt.u32.totalorder %s3431_s11, %s4481_s17 }
  0xae   :  { %p3437_p10 = pnand %p3435_p9, %p3432_p8 }
  0xb0   :  { %3440 = shalt.err (!%p3437_p10)
}
  0xb1   :  { %s3441_s15 = scalar_lea.vmem %s232_s4, 3072  ;;  %p3446_p12 = scmp.lt.s32.totalorder %s232_s4, %s232_s4 }
  0xb2   :  { %p3442_p11 = scmp.ne.s32.totalorder %s232_s4, %s3441_s15  ;;  %p3447_p13 = scmp.lt.s32.totalorder %s3441_s15, %s3441_s15 }
  0xb4   :  { %p3448_p0 = por %p3447_p13, %p3446_p12 }
  0xb6   :  { %p3449_p1 = pnand %p3448_p0, %p3442_p11 }
  0xb8   :  { %3452 = shalt.err (!%p3449_p1)
}
  0xb9   :  { %237 = dma.hbm_to_vmem [thread:$0]  %s4481_s17, 3072, %s232_s4, [#allocation30], %s3767_s25, %s3767_s25, %s3768_s29  }
  0xba   :  { %s3453_s18 = scalar_lea.hbm %s4483_s19, 1024 }
  0xbb   :  { %p3454_p2 = scmp.ne.s32.totalorder %s4483_s19, %s3453_s18  ;;  %p3457_p3 = scmp.lt.u32.totalorder %s3453_s18, %s4483_s19 }
  0xbd   :  { %p3459_p4 = pnand %p3457_p3, %p3454_p2 }
  0xbf   :  { %3462 = shalt.err (!%p3459_p4)
}
  0xc0   :  { %s3463_s30 = scalar_lea.vmem %s4050_s28, 1024  ;;  %p3468_p6 = scmp.lt.s32.totalorder %s4050_s28, %s4050_s28 }
  0xc1   :  { %p3464_p5 = scmp.ne.s32.totalorder %s4050_s28, %s3463_s30  ;;  %p3469_p7 = scmp.lt.s32.totalorder %s3463_s30, %s3463_s30 }
  0xc3   :  { %p3470_p8 = por %p3469_p7, %p3468_p6 }
  0xc5   :  { %p3471_p9 = pnand %p3470_p8, %p3464_p5 }
  0xc7   :  { %3474 = shalt.err (!%p3471_p9)
}
  0xc8   :  { %s3777_s17 = smov 64   ;;  %s3778_s25 = smov 4  }
  0xc9   :  { %259 = dma.hbm_to_vmem [thread:$0]  %s4483_s19, 1024, %s4050_s28, [#allocation33], %s3777_s17, %s3777_s17, %s3778_s25  }
  0xca   :  { %s3779_s21 = smov [#allocation2]   ;;  %s3780_s22 = smov [#allocation7]  }
  0xcb   :  { %s43_s5 = sshll.u32 %s3779_s21, 4  ;;  %s68_s11 = sshll.u32 %s3780_s22, 4  ;;  %s44_s5 = int_to_ptr.vmem [resolvable:$true] %s43_s5  ;;  %s69_s11 = int_to_ptr.vmem [resolvable:$true] %s68_s11 }
  0xcc   :  { %s4511_s2 = sld [smem:[#allocation48_spill]] }
  0xd2   :  { %s3475_s1 = scalar_lea.hbm %s4511_s2, 512 }
  0xd3   :  { %p3476_p10 = scmp.ne.s32.totalorder %s4511_s2, %s3475_s1  ;;  %p3479_p11 = scmp.lt.u32.totalorder %s3475_s1, %s4511_s2 }
  0xd5   :  { %p3481_p12 = pnand %p3479_p11, %p3476_p10 }
  0xd7   :  { %3484 = shalt.err (!%p3481_p12)
}
  0xd8   :  { %s3485_s19 = scalar_lea.vmem %s44_s5, 512  ;;  %p3490_p0 = scmp.lt.s32.totalorder %s44_s5, %s44_s5 }
  0xd9   :  { %p3486_p13 = scmp.ne.s32.totalorder %s44_s5, %s3485_s19  ;;  %p3491_p1 = scmp.lt.s32.totalorder %s3485_s19, %s3485_s19 }
  0xdb   :  { %p3492_p2 = por %p3491_p1, %p3490_p0 }
  0xdd   :  { %p3493_p3 = pnand %p3492_p2, %p3486_p13 }
  0xdf   :  { %3496 = shalt.err (!%p3493_p3)
}
  0xe0   :  { %s4512_s28 = smov 8   ;;  %s4513_s23 = smov 128  }
  0xe1   :  { %49 = dma.hbm_to_vmem [thread:$0]  %s4511_s2, 512, %s44_s5, [#allocation3], %s4513_s23, %s4513_s23, %s4512_s28  }
  0xe2   :  { %s4514_s20 = sld [smem:[#allocation50_spill]] }
  0xe8   :  { %s3497_s30 = scalar_lea.hbm %s4514_s20, 64 }
  0xe9   :  { %p3498_p4 = scmp.ne.s32.totalorder %s4514_s20, %s3497_s30  ;;  %p3501_p5 = scmp.lt.u32.totalorder %s3497_s30, %s4514_s20 }
  0xeb   :  { %p3503_p6 = pnand %p3501_p5, %p3498_p4 }
  0xed   :  { %3506 = shalt.err (!%p3503_p6)
}
  0xee   :  { %s3507_s21 = scalar_lea.vmem %s69_s11, 64  ;;  %p3512_p8 = scmp.lt.s32.totalorder %s69_s11, %s69_s11 }
  0xef   :  { %p3508_p7 = scmp.ne.s32.totalorder %s69_s11, %s3507_s21  ;;  %p3513_p9 = scmp.lt.s32.totalorder %s3507_s21, %s3507_s21 }
  0xf1   :  { %p3514_p10 = por %p3513_p9, %p3512_p8 }
  0xf3   :  { %p3515_p11 = pnand %p3514_p10, %p3508_p7 }
  0xf5   :  { %3518 = shalt.err (!%p3515_p11)
}
  0xf6   :  { %71 = dma.hbm_to_vmem [thread:$0]  %s4514_s20, 64, %s69_s11, [#allocation6]  }
  0xf7   :  { %s3781_s0 = smov [#allocation10]   ;;  %s3782_s2 = smov [#allocation13]  }
  0xf8   :  { %s90_s27 = sshll.u32 %s3781_s0, 4  ;;  %s112_s1 = sshll.u32 %s3782_s2, 4  ;;  %s91_s27 = int_to_ptr.vmem [resolvable:$true] %s90_s27  ;;  %s113_s1 = int_to_ptr.vmem [resolvable:$true] %s112_s1 }
  0xf9   :  { %s4515_s24 = sld [smem:[#allocation52_spill]] }
  0xff   :  { %s3519_s9 = scalar_lea.hbm %s4515_s24, 16 }
 0x100   :  { %p3520_p12 = scmp.ne.s32.totalorder %s4515_s24, %s3519_s9  ;;  %p3523_p13 = scmp.lt.u32.totalorder %s3519_s9, %s4515_s24 }
 0x102   :  { %p3525_p0 = pnand %p3523_p13, %p3520_p12 }
 0x104   :  { %3528 = shalt.err (!%p3525_p0)
}
 0x105   :  { %s3529_s11 = scalar_lea.vmem %s91_s27, 16  ;;  %s3533_s13 = scalar_lea.vmem %s91_s27, 32 }
 0x106   :  { %p3530_p1 = scmp.ne.s32.totalorder %s91_s27, %s3529_s11  ;;  %p3534_p2 = scmp.lt.s32.totalorder %s91_s27, %s91_s27 }
 0x107   :  { %p3535_p3 = scmp.lt.s32.totalorder %s3533_s13, %s3529_s11 }
 0x109   :  { %p3536_p4 = por %p3535_p3, %p3534_p2 }
 0x10b   :  { %p3537_p5 = pnand %p3536_p4, %p3530_p1 }
 0x10d   :  { %3540 = shalt.err (!%p3537_p5)
}
 0x10e   :  { %93 = dma.hbm_to_vmem [thread:$0]  %s4515_s24, 16, %s91_s27, [#allocation9]  }
 0x10f   :  { %s3541_s29 = scalar_lea.hbm %s4470_s6, 16 }
 0x110   :  { %p3542_p6 = scmp.ne.s32.totalorder %s4470_s6, %s3541_s29  ;;  %p3545_p7 = scmp.lt.u32.totalorder %s3541_s29, %s4470_s6 }
 0x112   :  { %p3547_p8 = pnand %p3545_p7, %p3542_p6 }
 0x114   :  { %3550 = shalt.err (!%p3547_p8)
}
 0x115   :  { %s3551_s0 = scalar_lea.vmem %s113_s1, 16  ;;  %s3555_s2 = scalar_lea.vmem %s113_s1, 32 }
 0x116   :  { %p3552_p9 = scmp.ne.s32.totalorder %s113_s1, %s3551_s0  ;;  %p3556_p10 = scmp.lt.s32.totalorder %s113_s1, %s113_s1 }
 0x117   :  { %p3557_p11 = scmp.lt.s32.totalorder %s3555_s2, %s3551_s0 }
 0x119   :  { %p3558_p12 = por %p3557_p11, %p3556_p10 }
 0x11b   :  { %p3559_p13 = pnand %p3558_p12, %p3552_p9 }
 0x11d   :  { %3562 = shalt.err (!%p3559_p13)
}
 0x11e   :  { %115 = dma.hbm_to_vmem [thread:$0]  %s4470_s6, 16, %s113_s1, [#allocation12]  }
 0x11f   :  { %s3783_s3 = smov [#allocation16]   ;;  %s3784_s9 = smov [#allocation19]  }
 0x120   :  { %s134_s24 = sshll.u32 %s3783_s3, 4  ;;  %s156_s19 = sshll.u32 %s3784_s9, 4  ;;  %s135_s24 = int_to_ptr.vmem [resolvable:$true] %s134_s24  ;;  %s157_s19 = int_to_ptr.vmem [resolvable:$true] %s156_s19 }
 0x121   :  { %s3563_s7 = scalar_lea.hbm %s4472_s8, 16 }
 0x122   :  { %p3564_p0 = scmp.ne.s32.totalorder %s4472_s8, %s3563_s7  ;;  %p3567_p1 = scmp.lt.u32.totalorder %s3563_s7, %s4472_s8 }
 0x124   :  { %p3569_p2 = pnand %p3567_p1, %p3564_p0 }
 0x126   :  { %3572 = shalt.err (!%p3569_p2)
}
 0x127   :  { %s3573_s6 = scalar_lea.vmem %s135_s24, 16  ;;  %s3577_s1 = scalar_lea.vmem %s135_s24, 32 }
 0x128   :  { %p3574_p3 = scmp.ne.s32.totalorder %s135_s24, %s3573_s6  ;;  %p3578_p4 = scmp.lt.s32.totalorder %s135_s24, %s135_s24 }
 0x129   :  { %p3579_p5 = scmp.lt.s32.totalorder %s3577_s1, %s3573_s6 }
 0x12b   :  { %p3580_p6 = por %p3579_p5, %p3578_p4 }
 0x12d   :  { %p3581_p7 = pnand %p3580_p6, %p3574_p3 }
 0x12f   :  { %3584 = shalt.err (!%p3581_p7)
}
 0x130   :  { %137 = dma.hbm_to_vmem [thread:$0]  %s4472_s8, 16, %s135_s24, [#allocation15]  }
 0x131   :  { %s3585_s21 = scalar_lea.hbm %s4474_s10, 16 }
 0x132   :  { %p3586_p8 = scmp.ne.s32.totalorder %s4474_s10, %s3585_s21  ;;  %p3589_p9 = scmp.lt.u32.totalorder %s3585_s21, %s4474_s10 }
 0x134   :  { %p3591_p10 = pnand %p3589_p9, %p3586_p8 }
 0x136   :  { %3594 = shalt.err (!%p3591_p10)
}
 0x137   :  { %s3595_s27 = scalar_lea.vmem %s157_s19, 16  ;;  %s3599_s15 = scalar_lea.vmem %s157_s19, 32 }
 0x138   :  { %p3596_p11 = scmp.ne.s32.totalorder %s157_s19, %s3595_s27  ;;  %p3600_p12 = scmp.lt.s32.totalorder %s157_s19, %s157_s19 }
 0x139   :  { %p3601_p13 = scmp.lt.s32.totalorder %s3599_s15, %s3595_s27 }
 0x13b   :  { %p3602_p0 = por %p3601_p13, %p3600_p12 }
 0x13d   :  { %p3603_p1 = pnand %p3602_p0, %p3596_p11 }
 0x13f   :  { %3606 = shalt.err (!%p3603_p1)
}
 0x140   :  { %159 = dma.hbm_to_vmem [thread:$0]  %s4474_s10, 16, %s157_s19, [#allocation18]  }
 0x141   :  { %s3785_s24 = smov [#allocation22]   ;;  %s3786_s18 = smov [#allocation25]  }
 0x142   :  { %s178_s9 = sshll.u32 %s3785_s24, 4  ;;  %s200_s26 = sshll.u32 %s3786_s18, 4  ;;  %s179_s9 = int_to_ptr.vmem [resolvable:$true] %s178_s9  ;;  %s201_s26 = int_to_ptr.vmem [resolvable:$true] %s200_s26 }
 0x143   :  { %s3607_s13 = scalar_lea.hbm %s4476_s12, 16 }
 0x144   :  { %p3608_p2 = scmp.ne.s32.totalorder %s4476_s12, %s3607_s13  ;;  %p3611_p3 = scmp.lt.u32.totalorder %s3607_s13, %s4476_s12 }
 0x146   :  { %p3613_p4 = pnand %p3611_p3, %p3608_p2 }
 0x148   :  { %3616 = shalt.err (!%p3613_p4)
}
 0x149   :  { %s3617_s10 = scalar_lea.vmem %s179_s9, 16  ;;  %s3621_s19 = scalar_lea.vmem %s179_s9, 32 }
 0x14a   :  { %p3618_p5 = scmp.ne.s32.totalorder %s179_s9, %s3617_s10  ;;  %p3622_p6 = scmp.lt.s32.totalorder %s179_s9, %s179_s9 }
 0x14b   :  { %p3623_p7 = scmp.lt.s32.totalorder %s3621_s19, %s3617_s10 }
 0x14d   :  { %p3624_p8 = por %p3623_p7, %p3622_p6 }
 0x14f   :  { %p3625_p9 = pnand %p3624_p8, %p3618_p5 }
 0x151   :  { %3628 = shalt.err (!%p3625_p9)
}
 0x152   :  { %181 = dma.hbm_to_vmem [thread:$0]  %s4476_s12, 16, %s179_s9, [#allocation21]  }
 0x153   :  { %s3629_s21 = scalar_lea.hbm %s4478_s14, 16 }
 0x154   :  { %p3630_p10 = scmp.ne.s32.totalorder %s4478_s14, %s3629_s21  ;;  %p3633_p11 = scmp.lt.u32.totalorder %s3629_s21, %s4478_s14 }
 0x156   :  { %p3635_p12 = pnand %p3633_p11, %p3630_p10 }
 0x158   :  { %3638 = shalt.err (!%p3635_p12)
}
 0x159   :  { %s3639_s27 = scalar_lea.vmem %s201_s26, 16  ;;  %s3643_s15 = scalar_lea.vmem %s201_s26, 32 }
 0x15a   :  { %p3640_p13 = scmp.ne.s32.totalorder %s201_s26, %s3639_s27  ;;  %p3644_p0 = scmp.lt.s32.totalorder %s201_s26, %s201_s26 }
 0x15b   :  { %p3645_p1 = scmp.lt.s32.totalorder %s3643_s15, %s3639_s27 }
 0x15d   :  { %p3646_p2 = por %p3645_p1, %p3644_p0 }
 0x15f   :  { %p3647_p3 = pnand %p3646_p2, %p3640_p13 }
 0x161   :  { %3650 = shalt.err (!%p3647_p3)
}
 0x162   :  { %203 = dma.hbm_to_vmem [thread:$0]  %s4478_s14, 16, %s201_s26, [#allocation24]  }
 0x163   :  { %s3787_s3 = smov [#allocation28]   ;;  %s3788_s9 = smov [#allocation31]  }
 0x164   :  { %s222_s24 = sshll.u32 %s3787_s3, 4  ;;  %s244_s18 = sshll.u32 %s3788_s9, 4  ;;  %s223_s24 = int_to_ptr.vmem [resolvable:$true] %s222_s24  ;;  %s245_s18 = int_to_ptr.vmem [resolvable:$true] %s244_s18 }
 0x165   :  { %s3651_s13 = scalar_lea.hbm %s4480_s16, 16 }
 0x166   :  { %p3652_p4 = scmp.ne.s32.totalorder %s4480_s16, %s3651_s13  ;;  %p3655_p5 = scmp.lt.u32.totalorder %s3651_s13, %s4480_s16 }
 0x168   :  { %p3657_p6 = pnand %p3655_p5, %p3652_p4 }
 0x16a   :  { %3660 = shalt.err (!%p3657_p6)
}
 0x16b   :  { %s3661_s14 = scalar_lea.vmem %s223_s24, 16  ;;  %s3665_s26 = scalar_lea.vmem %s223_s24, 32 }
 0x16c   :  { %p3662_p7 = scmp.ne.s32.totalorder %s223_s24, %s3661_s14  ;;  %p3666_p8 = scmp.lt.s32.totalorder %s223_s24, %s223_s24 }
 0x16d   :  { %p3667_p9 = scmp.lt.s32.totalorder %s3665_s26, %s3661_s14 }
 0x16f   :  { %p3668_p10 = por %p3667_p9, %p3666_p8 }
 0x171   :  { %p3669_p11 = pnand %p3668_p10, %p3662_p7 }
 0x173   :  { %3672 = shalt.err (!%p3669_p11)
}
 0x174   :  { %225 = dma.hbm_to_vmem [thread:$0]  %s4480_s16, 16, %s223_s24, [#allocation27]  }
 0x175   :  { %s4516_s29 = sld [smem:[#allocation54_spill]] }
 0x17b   :  { %s3673_s4 = scalar_lea.hbm %s4516_s29, 16 }
 0x17c   :  { %p3674_p12 = scmp.ne.s32.totalorder %s4516_s29, %s3673_s4  ;;  %p3677_p13 = scmp.lt.u32.totalorder %s3673_s4, %s4516_s29 }
 0x17e   :  { %p3679_p0 = pnand %p3677_p13, %p3674_p12 }
 0x180   :  { %3682 = shalt.err (!%p3679_p0)
}
 0x181   :  { %s3683_s2 = scalar_lea.vmem %s245_s18, 16  ;;  %s3687_s27 = scalar_lea.vmem %s245_s18, 32 }
 0x182   :  { %p3684_p1 = scmp.ne.s32.totalorder %s245_s18, %s3683_s2  ;;  %p3688_p2 = scmp.lt.s32.totalorder %s245_s18, %s245_s18 }
 0x183   :  { %p3689_p3 = scmp.lt.s32.totalorder %s3687_s27, %s3683_s2 }
 0x185   :  { %p3690_p4 = por %p3689_p3, %p3688_p2 }
 0x187   :  { %p3691_p5 = pnand %p3690_p4, %p3684_p1 }
 0x189   :  { %3694 = shalt.err (!%p3691_p5)
}
 0x18a   :  { %247 = dma.hbm_to_vmem [thread:$0]  %s4516_s29, 16, %s245_s18, [#allocation30]  }
 0x18b   :  { %s3789_s12 = smov [#allocation34]   ;;  %s4517_s9 = sld [smem:[#allocation55_spill]] }
 0x18c   :  { %s266_s8 = sshll.u32 %s3789_s12, 4  ;;  %s267_s8 = int_to_ptr.vmem [resolvable:$true] %s266_s8 }
 0x191   :  { %s3695_s7 = scalar_lea.hbm %s4517_s9, 16 }
 0x192   :  { %p3696_p6 = scmp.ne.s32.totalorder %s4517_s9, %s3695_s7  ;;  %p3699_p7 = scmp.lt.u32.totalorder %s3695_s7, %s4517_s9 }
 0x194   :  { %p3701_p8 = pnand %p3699_p7, %p3696_p6 }
 0x196   :  { %3704 = shalt.err (!%p3701_p8)
}
 0x197   :  { %s3705_s6 = scalar_lea.vmem %s267_s8, 16  ;;  %s3709_s18 = scalar_lea.vmem %s267_s8, 32 }
 0x198   :  { %p3706_p9 = scmp.ne.s32.totalorder %s267_s8, %s3705_s6  ;;  %p3710_p10 = scmp.lt.s32.totalorder %s267_s8, %s267_s8 }
 0x199   :  { %p3711_p11 = scmp.lt.s32.totalorder %s3709_s18, %s3705_s6 }
 0x19b   :  { %p3712_p12 = por %p3711_p11, %p3710_p10 }
 0x19d   :  { %p3713_p13 = pnand %p3712_p12, %p3706_p9 }
 0x19f   :  { %3716 = shalt.err (!%p3713_p13)
}
 0x1a0   :  { %269 = dma.hbm_to_vmem [thread:$0]  %s4517_s9, 16, %s267_s8, [#allocation33]  }
 0x1a1   :  { %3739 = dma.done.wait [#allocation3], 512  }
 0x1a2   :  { %3740 = vsyncadd [#allocation3], 4294966784 }
 0x1a3   :  { %3741 = dma.done.wait [#allocation6], 576  }
 0x1a4   :  { %3742 = vsyncadd [#allocation6], 4294966720 }
 0x1a5   :  { %3743 = dma.done.wait [#allocation9], 3088  }
 0x1a6   :  { %3744 = vsyncadd [#allocation9], 4294964208 }
 0x1a7   :  { %3745 = dma.done.wait [#allocation12], 3088  }
 0x1a8   :  { %3746 = vsyncadd [#allocation12], 4294964208 }
 0x1a9   :  { %3747 = dma.done.wait [#allocation15], 3088  }
 0x1aa   :  { %3748 = vsyncadd [#allocation15], 4294964208 }
 0x1ab   :  { %3749 = dma.done.wait [#allocation18], 3088  }
 0x1ac   :  { %3750 = vsyncadd [#allocation18], 4294964208 }
 0x1ad   :  { %3751 = dma.done.wait [#allocation21], 3088  }
 0x1ae   :  { %3752 = vsyncadd [#allocation21], 4294964208 }
 0x1af   :  { %3753 = dma.done.wait [#allocation24], 3088  }
 0x1b0   :  { %3754 = vsyncadd [#allocation24], 4294964208 }
 0x1b1   :  { %3755 = dma.done.wait [#allocation27], 3088  }
 0x1b2   :  { %3756 = vsyncadd [#allocation27], 4294964208 }
 0x1b3   :  { %3757 = dma.done.wait [#allocation30], 3088  }
 0x1b4   :  { %3758 = vsyncadd [#allocation30], 4294964208 }
 0x1b5   :  { %3759 = dma.done.wait [#allocation33], 1040  }
 0x1b6   :  { %3760 = vsyncadd [#allocation33], 4294966256  ;;  %vm405_vm0 = vcmask 1043456   ;;  %v391_v0 = vld [vmem:[#allocation7] sm:$0xf]  ;;  %v388_v2 = vld [vmem:[#allocation2 + $0x8] sm:$0xff] }
 0x1b7   :  { %v387_v1 = vld [vmem:[#allocation2] sm:$0xff]  ;;  %vm398_vm1 = vcmask 64512   ;;  %2993 = vmatprep.subr.msk.bf16.mxu0 %vm405_vm0, %v391_v0  ;;  %v407_v3 = vsel %vm405_vm0, %v391_v0, 0  ;;  %v389_v5 = vld [vmem:[#allocation2 + $0x10] sm:$0xff]  ;;  %v390_v6 = vld [vmem:[#allocation2 + $0x18] sm:$0xff]  ;;  %v3790_v32 = vmov 0  }
 0x1b8   :  { %v392_v4 = vpack.c.bf16 %v388_v2, %v387_v1  ;;  %2796 = vmatpush3.bf16.msra.mxu0 %v407_v3  ;;  %v393_v7 = vpack.c.bf16 %v390_v6, %v389_v5  ;;  %v3023_v8 = vld [vmem:[#allocation8 + $0x4] ss:$12 sps:$4 sm:$0xff]   ;;  %v3025_v9 = vld [vmem:[#allocation8] ss:$12 sps:$4 sm:$0xff]   ;;  %v3026_v10 = vld [vmem:[#allocation8 + $0x8] ss:$12 sps:$4 sm:$0xff]   ;;  %672 = vmatprep.mubr.bf16.mxu1 %v3790_v32 }
 0x1b9   :  { %640 = vmatprep.subr.bf16.mxu1 %v3023_v8  ;;  %v3027_v11 = vld [vmem:[#allocation8 + $0x1c] ss:$12 sps:$4 sm:$0xff]   ;;  %v3029_v12 = vld [vmem:[#allocation8 + $0x18] ss:$12 sps:$4 sm:$0xff]   ;;  %2801 = vmatprep.subr.bf16.mxu0 %v3026_v10  ;;  %v3030_v13 = vld [vmem:[#allocation8 + $0x20] ss:$12 sps:$4 sm:$0xff]  }
 0x1ba   :  { %2797 = vmatprep.mubr.msk.bf16.mxu0 %vm398_vm1, %v392_v4  ;;  %641 = vmatpush1.bf16.msra.mxu1 %v3025_v9  ;;  %v3031_v14 = vld [vmem:[#allocation8 + $0x34] ss:$12 sps:$4 sm:$0xff]   ;;  %v3033_v15 = vld [vmem:[#allocation8 + $0x30] ss:$12 sps:$4 sm:$0xff]   ;;  %v3034_v16 = vld [vmem:[#allocation8 + $0x38] ss:$12 sps:$4 sm:$0xff]  }
 0x1bb   :  { %2798 = vmatmul.mubr.msk.bf16.vlgmr.msra.gmra.mrb[0].mxu0 %vm398_vm1, %v393_v7  ;;  %642 = vmatprep.subr.bf16.mxu1 %v3027_v11  ;;  %v3035_v17 = vld [vmem:[#allocation8 + $0x4c] ss:$12 sps:$4 sm:$0xff]   ;;  %v3037_v18 = vld [vmem:[#allocation8 + $0x48] ss:$12 sps:$4 sm:$0xff]   ;;  %v3038_v19 = vld [vmem:[#allocation8 + $0x50] ss:$12 sps:$4 sm:$0xff]  }
 0x1bc   :  { %2802 = vmatpush3.bf16.msra.mxu0 %v3026_v10  ;;  %v3039_v20 = vld [vmem:[#allocation8 + $0x64] ss:$12 sps:$4 sm:$0xff]   ;;  %v3041_v21 = vld [vmem:[#allocation8 + $0x60] ss:$12 sps:$4 sm:$0xff]   ;;  %v3042_v22 = vld [vmem:[#allocation8 + $0x68] ss:$12 sps:$4 sm:$0xff]  }
 0x1bd   :  { %2803 = vmatprep.subr.bf16.mxu0 %v3030_v13  ;;  %v3043_v23 = vld [vmem:[#allocation8 + $0x7c] ss:$12 sps:$4 sm:$0xff]   ;;  %v3045_v24 = vld [vmem:[#allocation8 + $0x78] ss:$12 sps:$4 sm:$0xff]   ;;  %v3046_v25 = vld [vmem:[#allocation8 + $0x80] ss:$12 sps:$4 sm:$0xff]  }
 0x1be   :  { %643 = vmatpush1.bf16.msra.mxu1 %v3029_v12  ;;  %v3047_v26 = vld [vmem:[#allocation8 + $0x94] ss:$12 sps:$4 sm:$0xff]   ;;  %v3049_v27 = vld [vmem:[#allocation8 + $0x90] ss:$12 sps:$4 sm:$0xff]   ;;  %v3050_v28 = vld [vmem:[#allocation8 + $0x98] ss:$12 sps:$4 sm:$0xff]  }
 0x1bf   :  { %644 = vmatprep.subr.bf16.mxu1 %v3031_v14  ;;  %v3051_v29 = vld [vmem:[#allocation8 + $0xac] ss:$12 sps:$4 sm:$0xff]   ;;  %v3053_v30 = vld [vmem:[#allocation8 + $0xa8] ss:$12 sps:$4 sm:$0xff]   ;;  %v3054_v31 = vld [vmem:[#allocation8 + $0xb0] ss:$12 sps:$4 sm:$0xff]  }
 0x1c0   :  { %2804 = vmatpush3.bf16.msra.mxu0 %v3030_v13  ;;  %v396_v33 = vld [vmem:[#allocation5 + $0x10] sm:$0xff]  ;;  %v394_v34 = vld [vmem:[#allocation5] sm:$0xff]  ;;  %v397_v36 = vld [vmem:[#allocation5 + $0x18] sm:$0xff]  ;;  %s3791_s26 = smov [#allocation35]  }
 0x1c1   :  { %2805 = vmatprep.subr.bf16.mxu0 %v3034_v16  ;;  %v395_v39 = vld [vmem:[#allocation5 + $0x8] sm:$0xff]  ;;  %v3063_v10 = vld [vmem:[#allocation11 + $0x30] ss:$12 sps:$4 sm:$0xff]   ;;  %v3069_v12 = vld [vmem:[#allocation11 + $0x4c] ss:$12 sps:$4 sm:$0xff]   ;;  %s2533_s10 = sshll.u32 %s3791_s26, 4  ;;  %s2534_s10 = int_to_ptr.vmem [resolvable:$true] %s2533_s10 }
 0x1c2   :  { %645 = vmatpush1.bf16.msra.mxu1 %v3033_v15  ;;  %v3057_v3 = vld [vmem:[#allocation11 + $0x4] ss:$12 sps:$4 sm:$0xff]   ;;  %v3055_v4 = vld [vmem:[#allocation11] ss:$12 sps:$4 sm:$0xff]   ;;  %v3058_v5 = vld [vmem:[#allocation11 + $0x8] ss:$12 sps:$4 sm:$0xff]   ;;  %p3722_p1 = scmp.lt.s32.totalorder %s2534_s10, %s2534_s10 }
 0x1c3   :  { %646 = vmatprep.subr.bf16.mxu1 %v3035_v17  ;;  %v3061_v6 = vld [vmem:[#allocation11 + $0x1c] ss:$12 sps:$4 sm:$0xff]   ;;  %v3059_v7 = vld [vmem:[#allocation11 + $0x18] ss:$12 sps:$4 sm:$0xff]   ;;  %v3062_v8 = vld [vmem:[#allocation11 + $0x20] ss:$12 sps:$4 sm:$0xff]  }
 0x1c4   :  { %2806 = vmatpush3.bf16.msra.mxu0 %v3034_v16  ;;  %v3065_v9 = vld [vmem:[#allocation11 + $0x34] ss:$12 sps:$4 sm:$0xff]   ;;  %v3066_v11 = vld [vmem:[#allocation11 + $0x38] ss:$12 sps:$4 sm:$0xff]   ;;  %v3070_v14 = vld [vmem:[#allocation11 + $0x50] ss:$12 sps:$4 sm:$0xff]  }
 0x1c5   :  { %2807 = vmatprep.subr.bf16.mxu0 %v3038_v19  ;;  %v3067_v13 = vld [vmem:[#allocation11 + $0x48] ss:$12 sps:$4 sm:$0xff]   ;;  %v3073_v15 = vld [vmem:[#allocation11 + $0x64] ss:$12 sps:$4 sm:$0xff]   ;;  %v3071_v16 = vld [vmem:[#allocation11 + $0x60] ss:$12 sps:$4 sm:$0xff]  }
 0x1c6   :  { %647 = vmatpush1.bf16.msra.mxu1 %v3037_v18  ;;  %v3074_v17 = vld [vmem:[#allocation11 + $0x68] ss:$12 sps:$4 sm:$0xff]   ;;  %s3717_s19 = scalar_lea.vmem %s2534_s10, 512 }
 0x1c7   :  { %648 = vmatprep.subr.bf16.mxu1 %v3039_v20  ;;  %v3077_v18 = vld [vmem:[#allocation11 + $0x7c] ss:$12 sps:$4 sm:$0xff]   ;;  %v3078_v20 = vld [vmem:[#allocation11 + $0x80] ss:$12 sps:$4 sm:$0xff]   ;;  %p3718_p0 = scmp.ne.s32.totalorder %s2534_s10, %s3717_s19  ;;  %p3723_p2 = scmp.lt.s32.totalorder %s3717_s19, %s3717_s19 }
 0x1c8   :  { %2808 = vmatpush3.bf16.msra.mxu0 %v3038_v19  ;;  %v3075_v19 = vld [vmem:[#allocation11 + $0x78] ss:$12 sps:$4 sm:$0xff]  }
 0x1c9   :  { %2809 = vmatprep.subr.bf16.mxu0 %v3042_v22  ;;  %p3724_p3 = por %p3723_p2, %p3722_p1 }
 0x1ca   :  { %649 = vmatpush1.bf16.msra.mxu1 %v3041_v21  ;;  %v3081_v21 = vld [vmem:[#allocation11 + $0x94] ss:$12 sps:$4 sm:$0xff]  }
 0x1cb   :  { %650 = vmatprep.subr.bf16.mxu1 %v3043_v23  ;;  %v3082_v23 = vld [vmem:[#allocation11 + $0x98] ss:$12 sps:$4 sm:$0xff]   ;;  %p3725_p4 = pnand %p3724_p3, %p3718_p0 }
 0x1cc   :  { %2810 = vmatpush3.bf16.msra.mxu0 %v3042_v22  ;;  %v3079_v22 = vld [vmem:[#allocation11 + $0x90] ss:$12 sps:$4 sm:$0xff]  }
 0x1cd   :  { %2811 = vmatprep.subr.bf16.mxu0 %v3046_v25 }
 0x1ce   :  { %651 = vmatpush1.bf16.msra.mxu1 %v3045_v24  ;;  %v3085_v24 = vld [vmem:[#allocation11 + $0xac] ss:$12 sps:$4 sm:$0xff]  }
 0x1cf   :  { %652 = vmatprep.subr.bf16.mxu1 %v3047_v26  ;;  %v3086_v26 = vld [vmem:[#allocation11 + $0xb0] ss:$12 sps:$4 sm:$0xff]  }
 0x1d0   :  { %2812 = vmatpush3.bf16.msra.mxu0 %v3046_v25  ;;  %v3083_v25 = vld [vmem:[#allocation11 + $0xa8] ss:$12 sps:$4 sm:$0xff]  }
 0x1d1   :  { %2813 = vmatprep.subr.bf16.mxu0 %v3050_v28 }
 0x1d2   :  { %653 = vmatpush1.bf16.msra.mxu1 %v3049_v27  ;;  %v334_v27 = vlaneseq }
 0x1d3   :  { %654 = vmatprep.subr.bf16.mxu1 %v3051_v29 }
 0x1d4   :  { %2814 = vmatpush3.bf16.msra.mxu0 %v3050_v28  ;;  %v4238_v28 = vshrl.u32 %v334_v27, 7 }
 0x1d5   :  { %2815 = vmatprep.subr.bf16.mxu0 %v3054_v31 }
 0x1d6   :  { %655 = vmatpush1.bf16.msra.mxu1 %v3053_v30  ;;  %v336_v29 = vadd.s32 8, %v4238_v28  ;;  %vm750_vm3 = vcmp.lt.s32.totalorder %v4238_v28, 1  ;;  %vm775_vm4 = vcmp.lt.s32.totalorder %v4238_v28, 7  ;;  %vm1434_vm13 = vcmp.lt.s32.totalorder %v4238_v28, 2 }
 0x1d7   :  { %993 = vmatprep.subr.bf16.mxu1 %v3057_v3  ;;  %vm1459_vm14 = vcmp.lt.s32.totalorder %v4238_v28, 6 }
 0x1d8   :  { %2816 = vmatpush3.bf16.msra.mxu0 %v3054_v31  ;;  %v4241_v30 = vand.u32 3, %v336_v29 }
 0x1d9   :  { %2821 = vmatprep.subr.bf16.mxu0 %v3058_v5 }
 0x1da   :  { %vm743_vm2 = vcmp.ge.s32.totalorder %v4241_v30, 1  ;;  %vm768_vm5 = vcmp.lt.s32.totalorder %v4241_v30, 3  ;;  %vm1427_vm12 = vcmp.ge.s32.totalorder %v4241_v30, 2  ;;  %vm1452_vm15 = vcmp.lt.s32.totalorder %v4241_v30, 2 }
 0x28e   :  { %v2799_v35 = vpop.f32.mrb[0].mxu0 }
 0x28f   :  { %v4220_v37 = vadd.f32 %v2799_v35, %v396_v33  ;;  %v443_v38 = vpop.f32.mrb[1].mxu0 }
 0x290   :  { %v4222_v40 = vadd.f32 %v443_v38, %v394_v34  ;;  %v2800_v41 = vpop.f32.mrb[2].mxu0  ;;  %v337_v38 = vadd.s32 16, %v4238_v28 }
 0x291   :  { %v464_v42 = vmul.f32 0.70710677, %v4220_v37  ;;  %v4225_v43 = vadd.f32 %v2800_v41, %v397_v36  ;;  %v446_v44 = vpop.f32.mrb[3].mxu0  ;;  %v460_v60 = vmul.f32 0.5, %v4220_v37 }
 0x292   :  { %v462_v45 = vmul.f32 0.70710677, %v4222_v40  ;;  %v4228_v46 = vadd.f32 %v446_v44, %v395_v39  ;;  %v458_v57 = vmul.f32 0.5, %v4222_v40 }
 0x293   :  { %3191 = verf.f32 %v464_v42  ;;  %v465_v47 = vmul.f32 0.70710677, %v4225_v43  ;;  %v461_v55 = vmul.f32 0.5, %v4225_v43 }
 0x294   :  { %3193 = verf.f32 %v462_v45  ;;  %v463_v48 = vmul.f32 0.70710677, %v4228_v46  ;;  %v459_v58 = vmul.f32 0.5, %v4228_v46 }
 0x295   :  { %3195 = verf.f32 %v465_v47 }
 0x296   :  { %3197 = verf.f32 %v463_v48 }
 0x29d   :  { %v3192_v49 = vpop.eup %3191 }
 0x29e   :  { %v3194_v50 = vpop.eup %3193  ;;  %v472_v54 = vadd.f32 1.0, %v3192_v49 }
 0x29f   :  { %v3196_v51 = vpop.eup %3195  ;;  %v470_v52 = vadd.f32 1.0, %v3194_v50 }
 0x2a0   :  { %v3198_v53 = vpop.eup %3197  ;;  %v473_v56 = vadd.f32 1.0, %v3196_v51  ;;  %v476_v0 = vmul.f32 %v472_v54, %v460_v60  ;;  %v4253_v54 = vand.u32 3, %v337_v38 }
 0x2a1   :  { %v471_v59 = vadd.f32 1.0, %v3198_v53  ;;  %v474_v62 = vmul.f32 %v470_v52, %v458_v57  ;;  %v338_v52 = vadd.s32 24, %v4238_v28 }
 0x2a2   :  { %v477_v61 = vmul.f32 %v473_v56, %v461_v55  ;;  %vm744_vm6 = vcmp.ge.s32.totalorder %v4253_v54, 1  ;;  %vm769_vm7 = vcmp.lt.s32.totalorder %v4253_v54, 3  ;;  %vm1428_vm0 = vcmp.ge.s32.totalorder %v4253_v54, 2 }
 0x2a3   :  { %v475_v63 = vmul.f32 %v471_v59, %v459_v58  ;;  %vm1453_vm1 = vcmp.lt.s32.totalorder %v4253_v54, 2 }
 0x2a4   :  { %v511_v2 = vpack.c.bf16 %v477_v61, %v476_v0 }
 0x2a5   :  { %v510_v1 = vpack.c.bf16 %v475_v63, %v474_v62  ;;  %v2581_v62 = vld [vmem:[#allocation10] ss:$0 sm:$0xff]  ;;  %v4266_v63 = vand.u32 3, %v4238_v28 }
 0x2a7   :  { %673 = vmatmul.mubr.bf16.vlgmr.msra.gmra.mrb[0].mxu1 %v510_v1  ;;  %2817 = vmatprep.mubr.bf16.mxu0 %v510_v1  ;;  %vm742_vm8 = vcmp.ge.s32.totalorder %v4266_v63, 1  ;;  %vm767_vm10 = vcmp.lt.s32.totalorder %v4266_v63, 3 }
 0x2a8   :  { %2818 = vmatmul.mubr.bf16.vlgmr.msra.gmra.mrb[4].mxu0 %v511_v2  ;;  %682 = vmatprep.mubr.bf16.mxu1 %v3790_v32 }
 0x2a9   :  { %994 = vmatpush1.bf16.msra.mxu1 %v3055_v4  ;;  %2822 = vmatpush3.bf16.msra.mxu0 %v3058_v5  ;;  %v4270_v4 = vand.u32 3, %v338_v52 }
 0x2aa   :  { %995 = vmatprep.subr.bf16.mxu1 %v3061_v6  ;;  %2823 = vmatprep.subr.bf16.mxu0 %v3062_v8 }
 0x2ab   :  { %vm745_vm9 = vcmp.ge.s32.totalorder %v4270_v4, 1  ;;  %vm770_vm11 = vcmp.lt.s32.totalorder %v4270_v4, 3 }
 0x2ad   :  { %996 = vmatpush1.bf16.msra.mxu1 %v3059_v7  ;;  %2824 = vmatpush3.bf16.msra.mxu0 %v3062_v8 }
 0x2ae   :  { %997 = vmatprep.subr.bf16.mxu1 %v3065_v9  ;;  %2825 = vmatprep.subr.bf16.mxu0 %v3066_v11 }
 0x2af   :  { %683 = vmatmul.mubr.bf16.gmra.mrb[4].mxu1 %v511_v2 }
 0x2b0   :  { %1025 = vmatprep.mubr.bf16.mxu1 %v3790_v32 }
 0x2b1   :  { %998 = vmatpush1.bf16.msra.mxu1 %v3063_v10  ;;  %2826 = vmatpush3.bf16.msra.mxu0 %v3066_v11 }
 0x2b2   :  { %999 = vmatprep.subr.bf16.mxu1 %v3069_v12  ;;  %2827 = vmatprep.subr.bf16.mxu0 %v3070_v14 }
 0x2b5   :  { %1000 = vmatpush1.bf16.msra.mxu1 %v3067_v13  ;;  %2828 = vmatpush3.bf16.msra.mxu0 %v3070_v14 }
 0x2b6   :  { %1001 = vmatprep.subr.bf16.mxu1 %v3073_v15  ;;  %2829 = vmatprep.subr.bf16.mxu0 %v3074_v17 }
 0x2b9   :  { %1002 = vmatpush1.bf16.msra.mxu1 %v3071_v16  ;;  %2830 = vmatpush3.bf16.msra.mxu0 %v3074_v17 }
 0x2ba   :  { %1003 = vmatprep.subr.bf16.mxu1 %v3077_v18  ;;  %2831 = vmatprep.subr.bf16.mxu0 %v3078_v20 }
 0x2bd   :  { %1004 = vmatpush1.bf16.msra.mxu1 %v3075_v19  ;;  %2832 = vmatpush3.bf16.msra.mxu0 %v3078_v20 }
 0x2be   :  { %1005 = vmatprep.subr.bf16.mxu1 %v3081_v21  ;;  %2833 = vmatprep.subr.bf16.mxu0 %v3082_v23 }
 0x2c1   :  { %1006 = vmatpush1.bf16.msra.mxu1 %v3079_v22  ;;  %2834 = vmatpush3.bf16.msra.mxu0 %v3082_v23 }
 0x2c2   :  { %1007 = vmatprep.subr.bf16.mxu1 %v3085_v24  ;;  %2835 = vmatprep.subr.bf16.mxu0 %v3086_v26 }
 0x2c5   :  { %1008 = vmatpush1.bf16.msra.mxu1 %v3083_v25  ;;  %2836 = vmatpush3.bf16.msra.mxu0 %v3086_v26 }
 0x37a   :  { %v674_v31 = vpop.f32.mrb[0].mxu1 }
 0x37b   :  { %v676_v33 = vpop.f32.mrb[1].mxu1  ;;  %v2819_v34 = vpop.f32.mrb[4].mxu0  ;;  %v746_v39 = vrot.slane %v674_v31, 7 }
 0x37c   :  { %v678_v35 = vpop.f32.mrb[2].mxu1  ;;  %v727_v36 = vpop.f32.mrb[5].mxu0  ;;  %v773_v47 = vrot.slane %v2819_v34, 1 }
 0x37d   :  { %v747_v41 = vrot.slane %v678_v35, 7  ;;  %v771_v42 = vrot.slane %v727_v36, 1  ;;  %v680_v44 = vpop.f32.mrb[3].mxu1  ;;  %v2820_v45 = vpop.f32.mrb[6].mxu0 }
 0x37e   :  { %v774_v48 = vrot.slane %v2820_v45, 1  ;;  %v730_v49 = vpop.f32.mrb[7].mxu0 }
 0x37f   :  { %v753_v50 = vsel %vm750_vm3, %v746_v39, %v747_v41  ;;  %v772_v51 = vrot.slane %v730_v49, 1 }
 0x380   :  { %v764_v53 = vsel %vm743_vm2, %v753_v50, 0.0  ;;  %v776_v55 = vsel %vm775_vm4, %v773_v47, %v774_v48  ;;  %v779_v56 = vsel %vm775_vm4, %v774_v48, %v771_v42 }
 0x381   :  { %v793_v57 = vadd.f32 %v764_v53, %v680_v44  ;;  %v777_v58 = vsel %vm775_vm4, %v772_v51, %v773_v47  ;;  %v778_v59 = vsel %vm775_vm4, %v771_v42, %v772_v51  ;;  %v790_v12 = vsel %vm769_vm7, %v776_v55, 0.0 }
 0x382   :  { %v789_v60 = vsel %vm768_vm5, %v777_v58, 0.0  ;;  %v684_v61 = vpop.f32.mrb[4].mxu1  ;;  %v788_v19 = vsel %vm767_vm10, %v778_v59, 0.0  ;;  %v791_v23 = vsel %vm770_vm11, %v779_v56, 0.0  ;;  %v3089_v56 = vld [vmem:[#allocation14 + $0x4] ss:$12 sps:$4 sm:$0xff]  }
 0x383   :  { %v797_v0 = vadd.f32 %v793_v57, %v789_v60  ;;  %v748_v1 = vrot.slane %v684_v61, 7  ;;  %v686_v2 = vpop.f32.mrb[5].mxu1  ;;  %v3087_v57 = vld [vmem:[#allocation14] ss:$12 sps:$4 sm:$0xff]   ;;  %v3090_v58 = vld [vmem:[#allocation14 + $0x8] ss:$12 sps:$4 sm:$0xff]   ;;  %1324 = vmatprep.subr.bf16.mxu1 %v3089_v56 }
 0x384   :  { %v688_v3 = vpop.f32.mrb[6].mxu1  ;;  %2841 = vmatprep.subr.bf16.mxu0 %v3090_v58  ;;  %v3093_v59 = vld [vmem:[#allocation14 + $0x1c] ss:$12 sps:$4 sm:$0xff]   ;;  %v3091_v60 = vld [vmem:[#allocation14 + $0x18] ss:$12 sps:$4 sm:$0xff]  }
 0x385   :  { %v752_v5 = vsel %vm750_vm3, %v747_v41, %v748_v1  ;;  %v808_v6 = vadd.f32 %v2581_v62, %v797_v0  ;;  %v749_v7 = vrot.slane %v688_v3, 7  ;;  %v690_v8 = vpop.f32.mrb[7].mxu1  ;;  %v3094_v61 = vld [vmem:[#allocation14 + $0x20] ss:$12 sps:$4 sm:$0xff]   ;;  %v3095_v0 = vld [vmem:[#allocation14 + $0x30] ss:$12 sps:$4 sm:$0xff]  }
 0x386   :  { %v765_v9 = vsel %vm744_vm6, %v752_v5, 0.0  ;;  %v3099_v3 = vld [vmem:[#allocation14 + $0x48] ss:$12 sps:$4 sm:$0xff]   ;;  %v3102_v5 = vld [vmem:[#allocation14 + $0x50] ss:$12 sps:$4 sm:$0xff]  }
 0x387   :  { %v794_v10 = vadd.f32 %v765_v9, %v686_v2  ;;  %v754_v11 = vsel %vm750_vm3, %v749_v7, %v746_v39  ;;  %v751_v14 = vsel %vm750_vm3, %v748_v1, %v749_v7  ;;  %v816_v16 = vmul.f32 0.70710677, %v808_v6  ;;  %v3098_v1 = vld [vmem:[#allocation14 + $0x38] ss:$12 sps:$4 sm:$0xff]   ;;  %v3103_v7 = vld [vmem:[#allocation14 + $0x60] ss:$12 sps:$4 sm:$0xff]  }
 0x388   :  { %v763_v13 = vsel %vm742_vm8, %v754_v11, 0.0  ;;  %v766_v18 = vsel %vm745_vm9, %v751_v14, 0.0  ;;  %v812_v41 = vmul.f32 0.5, %v808_v6  ;;  %v3101_v2 = vld [vmem:[#allocation14 + $0x4c] ss:$12 sps:$4 sm:$0xff]  }
 0x389   :  { %v798_v15 = vadd.f32 %v794_v10, %v790_v12  ;;  %v792_v17 = vadd.f32 %v763_v13, %v676_v33  ;;  %v795_v20 = vadd.f32 %v766_v18, %v690_v8  ;;  %3199 = verf.f32 %v816_v16  ;;  %v3105_v6 = vld [vmem:[#allocation14 + $0x64] ss:$12 sps:$4 sm:$0xff]   ;;  %v3106_v8 = vld [vmem:[#allocation14 + $0x68] ss:$12 sps:$4 sm:$0xff]   ;;  %v3110_v10 = vld [vmem:[#allocation14 + $0x80] ss:$12 sps:$4 sm:$0xff]  }
 0x38a   :  { %v3109_v9 = vld [vmem:[#allocation14 + $0x7c] ss:$12 sps:$4 sm:$0xff]   ;;  %v3107_v11 = vld [vmem:[#allocation14 + $0x78] ss:$12 sps:$4 sm:$0xff]   ;;  %v3113_v12 = vld [vmem:[#allocation14 + $0x94] ss:$12 sps:$4 sm:$0xff]  }
 0x38b   :  { %v809_v21 = vadd.f32 %v2581_v62, %v798_v15  ;;  %v796_v22 = vadd.f32 %v792_v17, %v788_v19  ;;  %v799_v24 = vadd.f32 %v795_v20, %v791_v23  ;;  %v3114_v13 = vld [vmem:[#allocation14 + $0x98] ss:$12 sps:$4 sm:$0xff]   ;;  %v3111_v14 = vld [vmem:[#allocation14 + $0x90] ss:$12 sps:$4 sm:$0xff]   ;;  %v3115_v17 = vld [vmem:[#allocation14 + $0xa8] ss:$12 sps:$4 sm:$0xff]  }
 0x38c   :  { %v3117_v15 = vld [vmem:[#allocation14 + $0xac] ss:$12 sps:$4 sm:$0xff]   ;;  %v3118_v16 = vld [vmem:[#allocation14 + $0xb0] ss:$12 sps:$4 sm:$0xff]  }
 0x38d   :  { %v817_v25 = vmul.f32 0.70710677, %v809_v21  ;;  %v807_v26 = vadd.f32 %v2581_v62, %v796_v22  ;;  %v810_v27 = vadd.f32 %v2581_v62, %v799_v24  ;;  %v813_v45 = vmul.f32 0.5, %v809_v21  ;;  %v3097_v62 = vld [vmem:[#allocation14 + $0x34] ss:$12 sps:$4 sm:$0xff]  }
 0x38f   :  { %3201 = verf.f32 %v817_v25  ;;  %v815_v29 = vmul.f32 0.70710677, %v807_v26  ;;  %v818_v31 = vmul.f32 0.70710677, %v810_v27  ;;  %v811_v42 = vmul.f32 0.5, %v807_v26 }
 0x390   :  { %v814_v47 = vmul.f32 0.5, %v810_v27 }
 0x391   :  { %3203 = verf.f32 %v815_v29 }
 0x392   :  { %3205 = verf.f32 %v818_v31 }
 0x393   :  { %v3200_v33 = vpop.eup %3199 }
 0x394   :  { %v824_v35 = vadd.f32 1.0, %v3200_v33 }
 0x396   :  { %v828_v50 = vmul.f32 %v824_v35, %v812_v41 }
 0x399   :  { %v3202_v34 = vpop.eup %3201 }
 0x39a   :  { %v825_v38 = vadd.f32 1.0, %v3202_v34 }
 0x39b   :  { %v3204_v36 = vpop.eup %3203 }
 0x39c   :  { %v3206_v39 = vpop.eup %3205  ;;  %v823_v44 = vadd.f32 1.0, %v3204_v36  ;;  %v829_v51 = vmul.f32 %v825_v38, %v813_v45 }
 0x39d   :  { %v826_v48 = vadd.f32 1.0, %v3206_v39 }
 0x39e   :  { %v827_v49 = vmul.f32 %v823_v44, %v811_v42 }
 0x39f   :  { %v830_v52 = vmul.f32 %v826_v48, %v814_v47  ;;  %v2606_v48 = vld [vmem:[#allocation13] ss:$0 sm:$0xff] }
 0x3a0   :  { %v863_v53 = vpack.c.bf16 %v828_v50, %v827_v49 }
 0x3a1   :  { %v864_v55 = vpack.c.bf16 %v830_v52, %v829_v51 }
 0x3a2   :  { %1026 = vmatmul.mubr.bf16.vlgmr.msra.gmra.mrb[8].mxu1 %v863_v53  ;;  %2837 = vmatprep.mubr.bf16.mxu0 %v863_v53 }
 0x3a3   :  { %2838 = vmatmul.mubr.bf16.vlgmr.msra.gmra.mrb[8].mxu0 %v864_v55  ;;  %1035 = vmatprep.mubr.bf16.mxu1 %v3790_v32 }
 0x3a4   :  { %1325 = vmatpush1.bf16.msra.mxu1 %v3087_v57  ;;  %2842 = vmatpush3.bf16.msra.mxu0 %v3090_v58 }
 0x3a5   :  { %1326 = vmatprep.subr.bf16.mxu1 %v3093_v59  ;;  %2843 = vmatprep.subr.bf16.mxu0 %v3094_v61 }
 0x3a8   :  { %1327 = vmatpush1.bf16.msra.mxu1 %v3091_v60  ;;  %2844 = vmatpush3.bf16.msra.mxu0 %v3094_v61 }
 0x3a9   :  { %1328 = vmatprep.subr.bf16.mxu1 %v3097_v62  ;;  %2845 = vmatprep.subr.bf16.mxu0 %v3098_v1 }
 0x3aa   :  { %1036 = vmatmul.mubr.bf16.gmra.mrb[12].mxu1 %v864_v55 }
 0x3ab   :  { %1356 = vmatprep.mubr.bf16.mxu1 %v3790_v32 }
 0x3ac   :  { %1329 = vmatpush1.bf16.msra.mxu1 %v3095_v0  ;;  %2846 = vmatpush3.bf16.msra.mxu0 %v3098_v1 }
 0x3ad   :  { %1330 = vmatprep.subr.bf16.mxu1 %v3101_v2  ;;  %2847 = vmatprep.subr.bf16.mxu0 %v3102_v5 }
 0x3b0   :  { %1331 = vmatpush1.bf16.msra.mxu1 %v3099_v3  ;;  %2848 = vmatpush3.bf16.msra.mxu0 %v3102_v5 }
 0x3b1   :  { %1332 = vmatprep.subr.bf16.mxu1 %v3105_v6  ;;  %2849 = vmatprep.subr.bf16.mxu0 %v3106_v8 }
 0x3b4   :  { %1333 = vmatpush1.bf16.msra.mxu1 %v3103_v7  ;;  %2850 = vmatpush3.bf16.msra.mxu0 %v3106_v8 }
 0x3b5   :  { %1334 = vmatprep.subr.bf16.mxu1 %v3109_v9  ;;  %2851 = vmatprep.subr.bf16.mxu0 %v3110_v10 }
 0x3b8   :  { %1335 = vmatpush1.bf16.msra.mxu1 %v3107_v11  ;;  %2852 = vmatpush3.bf16.msra.mxu0 %v3110_v10 }
 0x3b9   :  { %1336 = vmatprep.subr.bf16.mxu1 %v3113_v12  ;;  %2853 = vmatprep.subr.bf16.mxu0 %v3114_v13 }
 0x3bc   :  { %1337 = vmatpush1.bf16.msra.mxu1 %v3111_v14  ;;  %2854 = vmatpush3.bf16.msra.mxu0 %v3114_v13 }
 0x3bd   :  { %1338 = vmatprep.subr.bf16.mxu1 %v3117_v15  ;;  %2855 = vmatprep.subr.bf16.mxu0 %v3118_v16 }
 0x3c0   :  { %1339 = vmatpush1.bf16.msra.mxu1 %v3115_v17  ;;  %2856 = vmatpush3.bf16.msra.mxu0 %v3118_v16 }
 0x475   :  { %v1027_v18 = vpop.f32.mrb[8].mxu1 }
 0x476   :  { %v1029_v19 = vpop.f32.mrb[9].mxu1  ;;  %v2839_v20 = vpop.f32.mrb[8].mxu0  ;;  %v1095_v23 = vrot.slane %v1027_v18, 7 }
 0x477   :  { %v1031_v21 = vpop.f32.mrb[10].mxu1  ;;  %v1080_v22 = vpop.f32.mrb[9].mxu0  ;;  %v1109_v29 = vrot.slane %v2839_v20, 1 }
 0x478   :  { %v1096_v24 = vrot.slane %v1031_v21, 7  ;;  %v1107_v25 = vrot.slane %v1080_v22, 1  ;;  %v1033_v26 = vpop.f32.mrb[11].mxu1  ;;  %v2840_v27 = vpop.f32.mrb[10].mxu0 }
 0x479   :  { %v1110_v31 = vrot.slane %v2840_v27, 1  ;;  %v1083_v33 = vpop.f32.mrb[11].mxu0 }
 0x47a   :  { %v1101_v34 = vsel %vm750_vm3, %v1095_v23, %v1096_v24  ;;  %v1108_v35 = vrot.slane %v1083_v33, 1 }
 0x47b   :  { %v1104_v36 = vsel %vm743_vm2, %v1101_v34, 0.0  ;;  %v1111_v38 = vsel %vm775_vm4, %v1109_v29, %v1110_v31  ;;  %v1114_v39 = vsel %vm775_vm4, %v1110_v31, %v1107_v25  ;;  %vm1426_vm2 = vcmp.ge.s32.totalorder %v4266_v63, 2 }
 0x47c   :  { %v1120_v41 = vadd.f32 %v1104_v36, %v1033_v26  ;;  %v1112_v42 = vsel %vm775_vm4, %v1108_v35, %v1109_v29  ;;  %v1113_v44 = vsel %vm775_vm4, %v1107_v25, %v1108_v35  ;;  %v1117_v0 = vsel %vm769_vm7, %v1111_v38, 0.0 }
 0x47d   :  { %v1116_v45 = vsel %vm768_vm5, %v1112_v42, 0.0  ;;  %v1037_v47 = vpop.f32.mrb[12].mxu1  ;;  %v1118_v7 = vsel %vm770_vm11, %v1114_v39, 0.0  ;;  %v3121_v39 = vld [vmem:[#allocation17 + $0x4] ss:$12 sps:$4 sm:$0xff]   ;;  %vm1451_vm4 = vcmp.lt.s32.totalorder %v4266_v63, 2 }
 0x47e   :  { %v1124_v49 = vadd.f32 %v1120_v41, %v1116_v45  ;;  %v1097_v50 = vrot.slane %v1037_v47, 7  ;;  %v1039_v51 = vpop.f32.mrb[13].mxu1  ;;  %v3119_v41 = vld [vmem:[#allocation17] ss:$12 sps:$4 sm:$0xff]   ;;  %v3122_v42 = vld [vmem:[#allocation17 + $0x8] ss:$12 sps:$4 sm:$0xff]   ;;  %1677 = vmatprep.subr.bf16.mxu1 %v3121_v39 }
 0x47f   :  { %v1041_v52 = vpop.f32.mrb[14].mxu1  ;;  %2861 = vmatprep.subr.bf16.mxu0 %v3122_v42  ;;  %v3123_v45 = vld [vmem:[#allocation17 + $0x18] ss:$12 sps:$4 sm:$0xff]   ;;  %v3126_v47 = vld [vmem:[#allocation17 + $0x20] ss:$12 sps:$4 sm:$0xff]   ;;  %vm1454_vm5 = vcmp.lt.s32.totalorder %v4270_v4, 2 }
 0x480   :  { %v1100_v53 = vsel %vm750_vm3, %v1096_v24, %v1097_v50  ;;  %v1135_v55 = vadd.f32 %v2606_v48, %v1124_v49  ;;  %v1098_v56 = vrot.slane %v1041_v52, 7  ;;  %v1043_v57 = vpop.f32.mrb[15].mxu1  ;;  %v3127_v49 = vld [vmem:[#allocation17 + $0x30] ss:$12 sps:$4 sm:$0xff]   ;;  %v3131_v52 = vld [vmem:[#allocation17 + $0x48] ss:$12 sps:$4 sm:$0xff]  }
 0x481   :  { %v1105_v58 = vsel %vm744_vm6, %v1100_v53, 0.0  ;;  %v3134_v53 = vld [vmem:[#allocation17 + $0x50] ss:$12 sps:$4 sm:$0xff]  }
 0x482   :  { %v1121_v59 = vadd.f32 %v1105_v58, %v1039_v51  ;;  %v4315_v60 = vadd.f32 %v1135_v55, %v4228_v46  ;;  %v1102_v61 = vsel %vm750_vm3, %v1098_v56, %v1095_v23  ;;  %v1099_v62 = vsel %vm750_vm3, %v1097_v50, %v1098_v56  ;;  %v3130_v50 = vld [vmem:[#allocation17 + $0x38] ss:$12 sps:$4 sm:$0xff]   ;;  %v3135_v56 = vld [vmem:[#allocation17 + $0x60] ss:$12 sps:$4 sm:$0xff]   ;;  %v3141_v58 = vld [vmem:[#allocation17 + $0x7c] ss:$12 sps:$4 sm:$0xff]  }
 0x483   :  { %v1103_v1 = vsel %vm742_vm8, %v1102_v61, 0.0  ;;  %v1106_v2 = vsel %vm745_vm9, %v1099_v62, 0.0  ;;  %v1115_v46 = vsel %vm767_vm10, %v1113_v44, 0.0  ;;  %v3125_v44 = vld [vmem:[#allocation17 + $0x1c] ss:$12 sps:$4 sm:$0xff]   ;;  %vm1429_vm3 = vcmp.ge.s32.totalorder %v4270_v4, 2 }
 0x484   :  { %v1125_v3 = vadd.f32 %v1121_v59, %v1117_v0  ;;  %v1119_v5 = vadd.f32 %v1103_v1, %v1029_v19  ;;  %v1122_v6 = vadd.f32 %v1106_v2, %v1043_v57  ;;  %v1147_v9 = vmul.f32 0.70710677, %v4315_v60  ;;  %v3133_v51 = vld [vmem:[#allocation17 + $0x4c] ss:$12 sps:$4 sm:$0xff]   ;;  %v3137_v55 = vld [vmem:[#allocation17 + $0x64] ss:$12 sps:$4 sm:$0xff]  }
 0x485   :  { %v1143_v25 = vmul.f32 0.5, %v4315_v60  ;;  %v3138_v57 = vld [vmem:[#allocation17 + $0x68] ss:$12 sps:$4 sm:$0xff]   ;;  %v3139_v59 = vld [vmem:[#allocation17 + $0x78] ss:$12 sps:$4 sm:$0xff]  }
 0x486   :  { %v1136_v8 = vadd.f32 %v2606_v48, %v1125_v3  ;;  %v1123_v10 = vadd.f32 %v1119_v5, %v1115_v46  ;;  %v1126_v11 = vadd.f32 %v1122_v6, %v1118_v7  ;;  %3207 = verf.f32 %v1147_v9  ;;  %v3142_v61 = vld [vmem:[#allocation17 + $0x80] ss:$12 sps:$4 sm:$0xff]   ;;  %v3143_v0 = vld [vmem:[#allocation17 + $0x90] ss:$12 sps:$4 sm:$0xff]   ;;  %v3146_v1 = vld [vmem:[#allocation17 + $0x98] ss:$12 sps:$4 sm:$0xff]  }
 0x487   :  { %v3145_v62 = vld [vmem:[#allocation17 + $0x94] ss:$12 sps:$4 sm:$0xff]   ;;  %v3149_v2 = vld [vmem:[#allocation17 + $0xac] ss:$12 sps:$4 sm:$0xff]   ;;  %v3150_v5 = vld [vmem:[#allocation17 + $0xb0] ss:$12 sps:$4 sm:$0xff]  }
 0x488   :  { %v4333_v12 = vadd.f32 %v1136_v8, %v4220_v37  ;;  %v1134_v13 = vadd.f32 %v2606_v48, %v1123_v10  ;;  %v1137_v14 = vadd.f32 %v2606_v48, %v1126_v11  ;;  %v3129_v48 = vld [vmem:[#allocation17 + $0x34] ss:$12 sps:$4 sm:$0xff]  }
 0x489   :  { %v3147_v3 = vld [vmem:[#allocation17 + $0xa8] ss:$12 sps:$4 sm:$0xff]  }
 0x48a   :  { %v1148_v15 = vmul.f32 0.70710677, %v4333_v12  ;;  %v4337_v16 = vadd.f32 %v1134_v13, %v4222_v40  ;;  %v4340_v17 = vadd.f32 %v1137_v14, %v4225_v43  ;;  %v1144_v26 = vmul.f32 0.5, %v4333_v12 }
 0x48c   :  { %3209 = verf.f32 %v1148_v15  ;;  %v1146_v18 = vmul.f32 0.70710677, %v4337_v16  ;;  %v1149_v19 = vmul.f32 0.70710677, %v4340_v17  ;;  %v1142_v40 = vmul.f32 0.5, %v4337_v16 }
 0x48d   :  { %v1145_v27 = vmul.f32 0.5, %v4340_v17 }
 0x48e   :  { %3211 = verf.f32 %v1146_v18 }
 0x48f   :  { %3213 = verf.f32 %v1149_v19 }
 0x490   :  { %v3208_v37 = vpop.eup %3207 }
 0x491   :  { %v1155_v21 = vadd.f32 1.0, %v3208_v37 }
 0x493   :  { %v1159_v33 = vmul.f32 %v1155_v21, %v1143_v25 }
 0x496   :  { %v3210_v20 = vpop.eup %3209 }
 0x497   :  { %v1156_v23 = vadd.f32 1.0, %v3210_v20 }
 0x498   :  { %v3212_v22 = vpop.eup %3211 }
 0x499   :  { %v3214_v24 = vpop.eup %3213  ;;  %v1154_v43 = vadd.f32 1.0, %v3212_v22  ;;  %v1160_v34 = vmul.f32 %v1156_v23, %v1144_v26 }
 0x49a   :  { %v1157_v29 = vadd.f32 1.0, %v3214_v24 }
 0x49b   :  { %v1158_v31 = vmul.f32 %v1154_v43, %v1142_v40 }
 0x49c   :  { %v1161_v35 = vmul.f32 %v1157_v29, %v1145_v27  ;;  %v2631_v29 = vld [vmem:[#allocation16] ss:$0 sm:$0xff] }
 0x49d   :  { %v1194_v36 = vpack.c.bf16 %v1159_v33, %v1158_v31 }
 0x49e   :  { %v1195_v38 = vpack.c.bf16 %v1161_v35, %v1160_v34 }
 0x49f   :  { %1357 = vmatmul.mubr.bf16.vlgmr.msra.gmra.mrb[16].mxu1 %v1194_v36  ;;  %2857 = vmatprep.mubr.bf16.mxu0 %v1194_v36 }
 0x4a0   :  { %2858 = vmatmul.mubr.bf16.vlgmr.msra.gmra.mrb[12].mxu0 %v1195_v38  ;;  %1366 = vmatprep.mubr.bf16.mxu1 %v3790_v32 }
 0x4a1   :  { %1678 = vmatpush1.bf16.msra.mxu1 %v3119_v41  ;;  %2862 = vmatpush3.bf16.msra.mxu0 %v3122_v42 }
 0x4a2   :  { %1679 = vmatprep.subr.bf16.mxu1 %v3125_v44  ;;  %2863 = vmatprep.subr.bf16.mxu0 %v3126_v47 }
 0x4a5   :  { %1680 = vmatpush1.bf16.msra.mxu1 %v3123_v45  ;;  %2864 = vmatpush3.bf16.msra.mxu0 %v3126_v47 }
 0x4a6   :  { %1681 = vmatprep.subr.bf16.mxu1 %v3129_v48  ;;  %2865 = vmatprep.subr.bf16.mxu0 %v3130_v50 }
 0x4a7   :  { %1367 = vmatmul.mubr.bf16.gmra.mrb[20].mxu1 %v1195_v38 }
 0x4a8   :  { %1709 = vmatprep.mubr.bf16.mxu1 %v3790_v32 }
 0x4a9   :  { %1682 = vmatpush1.bf16.msra.mxu1 %v3127_v49  ;;  %2866 = vmatpush3.bf16.msra.mxu0 %v3130_v50 }
 0x4aa   :  { %1683 = vmatprep.subr.bf16.mxu1 %v3133_v51  ;;  %2867 = vmatprep.subr.bf16.mxu0 %v3134_v53 }
 0x4ad   :  { %1684 = vmatpush1.bf16.msra.mxu1 %v3131_v52  ;;  %2868 = vmatpush3.bf16.msra.mxu0 %v3134_v53 }
 0x4ae   :  { %1685 = vmatprep.subr.bf16.mxu1 %v3137_v55  ;;  %2869 = vmatprep.subr.bf16.mxu0 %v3138_v57 }
 0x4b1   :  { %1686 = vmatpush1.bf16.msra.mxu1 %v3135_v56  ;;  %2870 = vmatpush3.bf16.msra.mxu0 %v3138_v57 }
 0x4b2   :  { %1687 = vmatprep.subr.bf16.mxu1 %v3141_v58  ;;  %2871 = vmatprep.subr.bf16.mxu0 %v3142_v61 }
 0x4b5   :  { %1688 = vmatpush1.bf16.msra.mxu1 %v3139_v59  ;;  %2872 = vmatpush3.bf16.msra.mxu0 %v3142_v61 }
 0x4b6   :  { %1689 = vmatprep.subr.bf16.mxu1 %v3145_v62  ;;  %2873 = vmatprep.subr.bf16.mxu0 %v3146_v1 }
 0x4b9   :  { %1690 = vmatpush1.bf16.msra.mxu1 %v3143_v0  ;;  %2874 = vmatpush3.bf16.msra.mxu0 %v3146_v1 }
 0x4ba   :  { %1691 = vmatprep.subr.bf16.mxu1 %v3149_v2  ;;  %2875 = vmatprep.subr.bf16.mxu0 %v3150_v5 }
 0x4bd   :  { %1692 = vmatpush1.bf16.msra.mxu1 %v3147_v3  ;;  %2876 = vmatpush3.bf16.msra.mxu0 %v3150_v5 }
 0x572   :  { %v1358_v6 = vpop.f32.mrb[16].mxu1 }
 0x573   :  { %v1360_v46 = vpop.f32.mrb[17].mxu1  ;;  %v2859_v7 = vpop.f32.mrb[12].mxu0  ;;  %v1430_v10 = vrot.slane %v1358_v6, 6 }
 0x574   :  { %v1362_v8 = vpop.f32.mrb[18].mxu1  ;;  %v1411_v9 = vpop.f32.mrb[13].mxu0  ;;  %v1457_v18 = vrot.slane %v2859_v7, 2 }
 0x575   :  { %v1431_v11 = vrot.slane %v1362_v8, 6  ;;  %v1455_v13 = vrot.slane %v1411_v9, 2  ;;  %v1364_v14 = vpop.f32.mrb[19].mxu1  ;;  %v2860_v15 = vpop.f32.mrb[14].mxu0 }
 0x576   :  { %v1458_v19 = vrot.slane %v2860_v15, 2  ;;  %v1414_v37 = vpop.f32.mrb[15].mxu0 }
 0x577   :  { %v1437_v20 = vsel %vm1434_vm13, %v1430_v10, %v1431_v11  ;;  %v1456_v21 = vrot.slane %v1414_v37, 2 }
 0x578   :  { %v1448_v22 = vsel %vm1427_vm12, %v1437_v20, 0.0  ;;  %v1460_v23 = vsel %vm1459_vm14, %v1457_v18, %v1458_v19  ;;  %v1463_v24 = vsel %vm1459_vm14, %v1458_v19, %v1455_v13 }
 0x579   :  { %v1477_v40 = vadd.f32 %v1448_v22, %v1364_v14  ;;  %v1461_v25 = vsel %vm1459_vm14, %v1456_v21, %v1457_v18  ;;  %v1462_v43 = vsel %vm1459_vm14, %v1455_v13, %v1456_v21  ;;  %v1474_v47 = vsel %vm1453_vm1, %v1460_v23, 0.0 }
 0x57a   :  { %v1473_v26 = vsel %vm1452_vm15, %v1461_v25, 0.0  ;;  %v1368_v27 = vpop.f32.mrb[20].mxu1  ;;  %v1472_v55 = vsel %vm1451_vm4, %v1462_v43, 0.0  ;;  %v1475_v59 = vsel %vm1454_vm5, %v1463_v24, 0.0  ;;  %v3151_v24 = vld [vmem:[#allocation20 + $0x4] ss:$12 sps:$4 sm:$0xff]  }
 0x57b   :  { %v1481_v31 = vadd.f32 %v1477_v40, %v1473_v26  ;;  %v1432_v33 = vrot.slane %v1368_v27, 6  ;;  %v1370_v34 = vpop.f32.mrb[21].mxu1  ;;  %2881 = vmatprep.subr.bf16.mxu1 %v3151_v24  ;;  %v3152_v40 = vld [vmem:[#allocation20 + $0x1c] ss:$12 sps:$4 sm:$0xff]   ;;  %v3153_v25 = vld [vmem:[#allocation20 + $0x34] ss:$12 sps:$4 sm:$0xff]  }
 0x57c   :  { %v1372_v35 = vpop.f32.mrb[22].mxu1  ;;  %v3154_v43 = vld [vmem:[#allocation20 + $0x4c] ss:$12 sps:$4 sm:$0xff]   ;;  %v3155_v26 = vld [vmem:[#allocation20 + $0x64] ss:$12 sps:$4 sm:$0xff]  }
 0x57d   :  { %v1436_v36 = vsel %vm1434_vm13, %v1431_v11, %v1432_v33  ;;  %v1492_v38 = vadd.f32 %v2631_v29, %v1481_v31  ;;  %v1433_v39 = vrot.slane %v1372_v35, 6  ;;  %v1374_v41 = vpop.f32.mrb[23].mxu1  ;;  %v3156_v27 = vld [vmem:[#allocation20 + $0x7c] ss:$12 sps:$4 sm:$0xff]  }
 0x57e   :  { %v1449_v42 = vsel %vm1428_vm0, %v1436_v36, 0.0  ;;  %v3159_v31 = vld [vmem:[#allocation23 + $0x4] ss:$12 sps:$4 sm:$0xff]  }
 0x57f   :  { %v1478_v44 = vadd.f32 %v1449_v42, %v1370_v34  ;;  %v1438_v45 = vsel %vm1434_vm13, %v1433_v39, %v1430_v10  ;;  %v1435_v49 = vsel %vm1434_vm13, %v1432_v33, %v1433_v39  ;;  %v1500_v51 = vmul.f32 0.70710677, %v1492_v38  ;;  %v3160_v33 = vld [vmem:[#allocation23 + $0x1c] ss:$12 sps:$4 sm:$0xff]   ;;  %2901 = vmatprep.subr.bf16.mxu0 %v3159_v31 }
 0x580   :  { %v1447_v48 = vsel %vm1426_vm2, %v1438_v45, 0.0  ;;  %v1450_v53 = vsel %vm1429_vm3, %v1435_v49, 0.0  ;;  %v1496_v10 = vmul.f32 0.5, %v1492_v38 }
 0x581   :  { %v1482_v50 = vadd.f32 %v1478_v44, %v1474_v47  ;;  %v1476_v52 = vadd.f32 %v1447_v48, %v1360_v46  ;;  %v1479_v56 = vadd.f32 %v1450_v53, %v1374_v41  ;;  %3215 = verf.f32 %v1500_v51 }
 0x583   :  { %v1493_v57 = vadd.f32 %v2631_v29, %v1482_v50  ;;  %v1480_v58 = vadd.f32 %v1476_v52, %v1472_v55  ;;  %v1483_v61 = vadd.f32 %v1479_v56, %v1475_v59 }
 0x585   :  { %v1501_v62 = vmul.f32 0.70710677, %v1493_v57  ;;  %v1491_v0 = vadd.f32 %v2631_v29, %v1480_v58  ;;  %v1494_v1 = vadd.f32 %v2631_v29, %v1483_v61  ;;  %v1497_v14 = vmul.f32 0.5, %v1493_v57  ;;  %v3158_v29 = vld [vmem:[#allocation20 + $0xac] ss:$12 sps:$4 sm:$0xff]  }
 0x587   :  { %3217 = verf.f32 %v1501_v62  ;;  %v1499_v2 = vmul.f32 0.70710677, %v1491_v0  ;;  %v1502_v3 = vmul.f32 0.70710677, %v1494_v1  ;;  %v1495_v11 = vmul.f32 0.5, %v1491_v0 }
 0x588   :  { %v1498_v15 = vmul.f32 0.5, %v1494_v1  ;;  %v2656_v0 = vld [vmem:[#allocation19] ss:$0 sm:$0xff] }
 0x589   :  { %3219 = verf.f32 %v1499_v2 }
 0x58a   :  { %3221 = verf.f32 %v1502_v3 }
 0x58b   :  { %v3216_v5 = vpop.eup %3215 }
 0x58c   :  { %v1508_v46 = vadd.f32 1.0, %v3216_v5 }
 0x58e   :  { %v1512_v37 = vmul.f32 %v1508_v46, %v1496_v10 }
 0x591   :  { %v3218_v6 = vpop.eup %3217 }
 0x592   :  { %v1509_v8 = vadd.f32 1.0, %v3218_v6 }
 0x593   :  { %v3220_v7 = vpop.eup %3219 }
 0x594   :  { %v3222_v9 = vpop.eup %3221  ;;  %v1507_v13 = vadd.f32 1.0, %v3220_v7  ;;  %v1513_v20 = vmul.f32 %v1509_v8, %v1497_v14 }
 0x595   :  { %v1510_v18 = vadd.f32 1.0, %v3222_v9 }
 0x596   :  { %v1511_v19 = vmul.f32 %v1507_v13, %v1495_v11 }
 0x597   :  { %v1514_v21 = vmul.f32 %v1510_v18, %v1498_v15 }
 0x598   :  { %v1547_v22 = vpack.c.bf16 %v1512_v37, %v1511_v19 }
 0x599   :  { %v1548_v23 = vpack.c.bf16 %v1514_v21, %v1513_v20 }
 0x59a   :  { %1710 = vmatmul.mubr.bf16.vlgmr.msra.gmra.mrb[24].mxu1 %v1547_v22  ;;  %2877 = vmatprep.mubr.bf16.mxu0 %v1547_v22 }
 0x59b   :  { %2878 = vmatmul.mubr.bf16.vlgmr.msra.gmra.mrb[16].mxu0 %v1548_v23  ;;  %1719 = vmatprep.mubr.bf16.mxu1 %v3790_v32  ;;  %v3157_v32 = vld [vmem:[#allocation20 + $0x94] ss:$12 sps:$4 sm:$0xff]  }
 0x59c   :  { %2882 = vmatpush3.bf16.msra.mxu1 %v3151_v24  ;;  %2902 = vmatpush3.bf16.msra.mxu0 %v3159_v31 }
 0x59d   :  { %2883 = vmatprep.subr.bf16.mxu1 %v3152_v40  ;;  %2903 = vmatprep.subr.bf16.mxu0 %v3160_v33 }
 0x5a0   :  { %2884 = vmatpush3.bf16.msra.mxu1 %v3152_v40  ;;  %2904 = vmatpush3.bf16.msra.mxu0 %v3160_v33 }
 0x5a1   :  { %2885 = vmatprep.subr.bf16.mxu1 %v3153_v25 }
 0x5a2   :  { %1720 = vmatmul.mubr.bf16.gmra.mrb[28].mxu1 %v1548_v23 }
 0x5a4   :  { %2886 = vmatpush3.bf16.msra.mxu1 %v3153_v25 }
 0x5a5   :  { %2887 = vmatprep.subr.bf16.mxu1 %v3154_v43 }
 0x5a8   :  { %2888 = vmatpush3.bf16.msra.mxu1 %v3154_v43 }
 0x5a9   :  { %2889 = vmatprep.subr.bf16.mxu1 %v3155_v26 }
 0x5ac   :  { %2890 = vmatpush3.bf16.msra.mxu1 %v3155_v26 }
 0x5ad   :  { %2891 = vmatprep.subr.bf16.mxu1 %v3156_v27 }
 0x5b0   :  { %2892 = vmatpush3.bf16.msra.mxu1 %v3156_v27 }
 0x5b1   :  { %2893 = vmatprep.subr.bf16.mxu1 %v3157_v32 }
 0x5b4   :  { %2894 = vmatpush3.bf16.msra.mxu1 %v3157_v32 }
 0x5b5   :  { %2895 = vmatprep.subr.bf16.mxu1 %v3158_v29 }
 0x5b8   :  { %2896 = vmatpush3.bf16.msra.mxu1 %v3158_v29 }
 0x66d   :  { %v1711_v34 = vpop.f32.mrb[24].mxu1 }
 0x66e   :  { %v1713_v35 = vpop.f32.mrb[25].mxu1  ;;  %v2879_v36 = vpop.f32.mrb[16].mxu0  ;;  %v1779_v41 = vrot.slane %v1711_v34, 6 }
 0x66f   :  { %v1715_v38 = vpop.f32.mrb[26].mxu1  ;;  %v1764_v39 = vpop.f32.mrb[17].mxu0  ;;  %v1793_v48 = vrot.slane %v2879_v36, 2 }
 0x670   :  { %v1780_v42 = vrot.slane %v1715_v38, 6  ;;  %v1791_v44 = vrot.slane %v1764_v39, 2  ;;  %v1717_v45 = vpop.f32.mrb[27].mxu1  ;;  %v2880_v47 = vpop.f32.mrb[18].mxu0 }
 0x671   :  { %v1794_v49 = vrot.slane %v2880_v47, 2  ;;  %v1767_v50 = vpop.f32.mrb[19].mxu0 }
 0x672   :  { %v1785_v51 = vsel %vm1434_vm13, %v1779_v41, %v1780_v42  ;;  %v1792_v52 = vrot.slane %v1767_v50, 2  ;;  %v3162_v50 = vld [vmem:[#allocation23 + $0x4c] ss:$12 sps:$4 sm:$0xff]  }
 0x673   :  { %v1788_v53 = vsel %vm1427_vm12, %v1785_v51, 0.0  ;;  %v1795_v55 = vsel %vm1459_vm14, %v1793_v48, %v1794_v49  ;;  %v1798_v56 = vsel %vm1459_vm14, %v1794_v49, %v1791_v44  ;;  %v3161_v49 = vld [vmem:[#allocation23 + $0x34] ss:$12 sps:$4 sm:$0xff]   ;;  %v3163_v51 = vld [vmem:[#allocation23 + $0x64] ss:$12 sps:$4 sm:$0xff]  }
 0x674   :  { %v1804_v57 = vadd.f32 %v1788_v53, %v1717_v45  ;;  %v1796_v58 = vsel %vm1459_vm14, %v1792_v52, %v1793_v48  ;;  %v1797_v59 = vsel %vm1459_vm14, %v1791_v44, %v1792_v52  ;;  %v1801_v13 = vsel %vm1453_vm1, %v1795_v55, 0.0  ;;  %2905 = vmatprep.subr.bf16.mxu0 %v3161_v49  ;;  %v3164_v52 = vld [vmem:[#allocation23 + $0x7c] ss:$12 sps:$4 sm:$0xff]   ;;  %v3165_v53 = vld [vmem:[#allocation23 + $0x94] ss:$12 sps:$4 sm:$0xff]  }
 0x675   :  { %v1800_v61 = vsel %vm1452_vm15, %v1796_v58, 0.0  ;;  %v1721_v62 = vpop.f32.mrb[28].mxu1  ;;  %v1799_v21 = vsel %vm1451_vm4, %v1797_v59, 0.0  ;;  %v1802_v28 = vsel %vm1454_vm5, %v1798_v56, 0.0  ;;  %2906 = vmatpush3.bf16.msra.mxu0 %v3161_v49  ;;  %v3166_v55 = vld [vmem:[#allocation23 + $0xac] ss:$12 sps:$4 sm:$0xff]  }
 0x676   :  { %v1808_v1 = vadd.f32 %v1804_v57, %v1800_v61  ;;  %v1781_v2 = vrot.slane %v1721_v62, 6  ;;  %v1723_v3 = vpop.f32.mrb[29].mxu1  ;;  %2907 = vmatprep.subr.bf16.mxu0 %v3162_v50  ;;  %v3167_v56 = vld [vmem:[#allocation32] sm:$0xff]   ;;  %v3168_v57 = vld [vmem:[#allocation32 + $0x8] sm:$0xff]   ;;  %v3169_v59 = vld [vmem:[#allocation32 + $0x10] sm:$0xff]  }
 0x677   :  { %v1725_v5 = vpop.f32.mrb[30].mxu1  ;;  %v3172_v58 = vld [vmem:[#allocation26 + $0x4] ss:$12 sps:$4 sm:$0xff]   ;;  %2921 = vmatprep.subr.bf16.mxu1 %v3167_v56  ;;  %v3170_v61 = vld [vmem:[#allocation32 + $0x18] sm:$0xff]  }
 0x678   :  { %v1784_v6 = vsel %vm1434_vm13, %v1780_v42, %v1781_v2  ;;  %v1819_v46 = vadd.f32 %v2656_v0, %v1808_v1  ;;  %v1782_v7 = vrot.slane %v1725_v5, 6  ;;  %v1727_v8 = vpop.f32.mrb[31].mxu1  ;;  %v3171_v62 = vld [vmem:[#allocation32 + $0x20] sm:$0xff]   ;;  %v2657_v1 = vld [vmem:[#allocation22] ss:$0 sm:$0xff] }
 0x679   :  { %v1789_v9 = vsel %vm1428_vm0, %v1784_v6, 0.0  ;;  %2908 = vmatpush3.bf16.msra.mxu0 %v3162_v50 }
 0x67a   :  { %v1805_v10 = vadd.f32 %v1789_v9, %v1723_v3  ;;  %v1786_v30 = vsel %vm1434_vm13, %v1782_v7, %v1779_v41  ;;  %v1783_v11 = vsel %vm1434_vm13, %v1781_v2, %v1782_v7  ;;  %v4422_v18 = vadd.f32 %v1819_v46, %v4315_v60  ;;  %2909 = vmatprep.subr.bf16.mxu0 %v3163_v51 }
 0x67b   :  { %v1787_v14 = vsel %vm1426_vm2, %v1786_v30, 0.0  ;;  %v1790_v15 = vsel %vm1429_vm3, %v1783_v11, 0.0 }
 0x67c   :  { %v1809_v19 = vadd.f32 %v1805_v10, %v1801_v13  ;;  %v1803_v37 = vadd.f32 %v1787_v14, %v1713_v35  ;;  %v1806_v20 = vadd.f32 %v1790_v15, %v1727_v8  ;;  %v1831_v24 = vmul.f32 0.70710677, %v4422_v18 }
 0x67d   :  { %v1827_v38 = vmul.f32 0.5, %v4422_v18  ;;  %2910 = vmatpush3.bf16.msra.mxu0 %v3163_v51 }
 0x67e   :  { %v1820_v54 = vadd.f32 %v2656_v0, %v1809_v19  ;;  %v1807_v22 = vadd.f32 %v1803_v37, %v1799_v21  ;;  %v1810_v23 = vadd.f32 %v1806_v20, %v1802_v28  ;;  %3223 = verf.f32 %v1831_v24  ;;  %2911 = vmatprep.subr.bf16.mxu0 %v3164_v52 }
 0x680   :  { %v4430_v40 = vadd.f32 %v1820_v54, %v4333_v12  ;;  %v1818_v25 = vadd.f32 %v2656_v0, %v1807_v22  ;;  %v1821_v60 = vadd.f32 %v2656_v0, %v1810_v23  ;;  %v3173_v0 = vld [vmem:[#allocation32 + $0x28] sm:$0xff]  }
 0x681   :  { %2912 = vmatpush3.bf16.msra.mxu0 %v3164_v52 }
 0x682   :  { %v1832_v43 = vmul.f32 0.70710677, %v4430_v40  ;;  %v4434_v26 = vadd.f32 %v1821_v60, %v4340_v17  ;;  %v4437_v63 = vadd.f32 %v1818_v25, %v4337_v16  ;;  %v1828_v17 = vmul.f32 0.5, %v4430_v40  ;;  %2913 = vmatprep.subr.bf16.mxu0 %v3165_v53 }
 0x684   :  { %3225 = verf.f32 %v1832_v43  ;;  %v1833_v4 = vmul.f32 0.70710677, %v4434_v26  ;;  %v1830_v27 = vmul.f32 0.70710677, %v4437_v63  ;;  %v1829_v35 = vmul.f32 0.5, %v4434_v26 }
 0x685   :  { %v1826_v36 = vmul.f32 0.5, %v4437_v63  ;;  %2914 = vmatpush3.bf16.msra.mxu0 %v3165_v53 }
 0x686   :  { %3227 = verf.f32 %v1833_v4  ;;  %2915 = vmatprep.subr.bf16.mxu0 %v3166_v55 }
 0x687   :  { %3229 = verf.f32 %v1830_v27 }
 0x688   :  { %v3224_v12 = vpop.eup %3223 }
 0x689   :  { %v1839_v33 = vadd.f32 1.0, %v3224_v12  ;;  %2916 = vmatpush3.bf16.msra.mxu0 %v3166_v55 }
 0x68a   :  { %2941 = vmatprep.subr.bf16.mxu0 %v3172_v58 }
 0x68b   :  { %v1843_v45 = vmul.f32 %v1839_v33, %v1827_v38  ;;  %v3176_v33 = vld [vmem:[#allocation26 + $0x34] ss:$12 sps:$4 sm:$0xff]   ;;  %v3182_v38 = vld [vmem:[#allocation26 + $0xac] ss:$12 sps:$4 sm:$0xff]  }
 0x68e   :  { %v3226_v32 = vpop.eup %3225 }
 0x68f   :  { %v1840_v29 = vadd.f32 1.0, %v3226_v32 }
 0x690   :  { %v3228_v31 = vpop.eup %3227 }
 0x691   :  { %v3230_v34 = vpop.eup %3229  ;;  %v1841_v16 = vadd.f32 1.0, %v3228_v31  ;;  %v1844_v41 = vmul.f32 %v1840_v29, %v1828_v17  ;;  %v3174_v29 = vld [vmem:[#allocation26 + $0x1c] ss:$12 sps:$4 sm:$0xff]   ;;  %v3175_v31 = vld [vmem:[#allocation32 + $0x30] sm:$0xff]  }
 0x692   :  { %v1838_v39 = vadd.f32 1.0, %v3230_v34  ;;  %v3177_v34 = vld [vmem:[#allocation32 + $0x38] sm:$0xff]   ;;  %v3178_v17 = vld [vmem:[#allocation26 + $0x4c] ss:$12 sps:$4 sm:$0xff]  }
 0x693   :  { %v1845_v42 = vmul.f32 %v1841_v16, %v1829_v35  ;;  %v3179_v35 = vld [vmem:[#allocation26 + $0x64] ss:$12 sps:$4 sm:$0xff]   ;;  %v3180_v16 = vld [vmem:[#allocation26 + $0x7c] ss:$12 sps:$4 sm:$0xff]  }
 0x694   :  { %v1842_v44 = vmul.f32 %v1838_v39, %v1826_v36  ;;  %v3181_v36 = vld [vmem:[#allocation26 + $0x94] ss:$12 sps:$4 sm:$0xff]  }
 0x695   :  { %v1863_v47 = vpack.c.bf16 %v1845_v42, %v1844_v41  ;;  %v3183_v39 = vld [vmem:[#allocation29 + $0x4] ss:$12 sps:$4 sm:$0xff]   ;;  %v2666_v41 = vld [vmem:[#allocation25] ss:$0 sm:$0xff] }
 0x696   :  { %v1862_v48 = vpack.c.bf16 %v1843_v45, %v1842_v44 }
 0x698   :  { %2897 = vmatprep.mubr.bf16.mxu1 %v1862_v48 }
 0x699   :  { %2898 = vmatmul.mubr.bf16.vlgmr.msra.gmra.mrb[32].mxu1 %v1863_v47 }
 0x69a   :  { %2922 = vmatpush3.bf16.msra.mxu1 %v3167_v56 }
 0x69b   :  { %2923 = vmatprep.subr.bf16.mxu1 %v3168_v57 }
 0x69e   :  { %2924 = vmatpush3.bf16.msra.mxu1 %v3168_v57 }
 0x69f   :  { %2925 = vmatprep.subr.bf16.mxu1 %v3169_v59 }
 0x6a2   :  { %2926 = vmatpush3.bf16.msra.mxu1 %v3169_v59 }
 0x6a3   :  { %2927 = vmatprep.subr.bf16.mxu1 %v3170_v61 }
 0x6a6   :  { %2928 = vmatpush3.bf16.msra.mxu1 %v3170_v61 }
 0x6a7   :  { %2929 = vmatprep.subr.bf16.mxu1 %v3171_v62 }
 0x6aa   :  { %2930 = vmatpush3.bf16.msra.mxu1 %v3171_v62 }
 0x6ab   :  { %2931 = vmatprep.subr.bf16.mxu1 %v3173_v0 }
 0x6ae   :  { %2932 = vmatpush3.bf16.msra.mxu1 %v3173_v0 }
 0x6af   :  { %2933 = vmatprep.subr.bf16.mxu1 %v3175_v31 }
 0x6b2   :  { %2934 = vmatpush3.bf16.msra.mxu1 %v3175_v31 }
 0x6b3   :  { %2935 = vmatprep.subr.bf16.mxu1 %v3177_v34 }
 0x6b6   :  { %2936 = vmatpush3.bf16.msra.mxu1 %v3177_v34 }
 0x6b7   :  { %2961 = vmatprep.subr.bf16.mxu1 %v3183_v39 }
 0x76c   :  { %v2899_v2 = vpop.f32.mrb[32].mxu1 }
 0x76d   :  { %v1962_v3 = vadd.f32 %v2899_v2, %v2657_v1  ;;  %v1953_v5 = vpop.f32.mrb[33].mxu1 }
 0x76e   :  { %v1954_v6 = vadd.f32 %v2657_v1, %v1953_v5  ;;  %v2900_v46 = vpop.f32.mrb[34].mxu1 }
 0x76f   :  { %v1974_v7 = vmul.f32 0.70710677, %v1962_v3  ;;  %v1965_v8 = vadd.f32 %v2900_v46, %v2657_v1  ;;  %v1956_v9 = vpop.f32.mrb[35].mxu1  ;;  %v1970_v28 = vmul.f32 0.5, %v1962_v3 }
 0x770   :  { %v1972_v10 = vmul.f32 0.70710677, %v1954_v6  ;;  %v1957_v30 = vadd.f32 %v2657_v1, %v1956_v9  ;;  %v1968_v23 = vmul.f32 0.5, %v1954_v6  ;;  %v3184_v1 = vld [vmem:[#allocation29 + $0x1c] ss:$12 sps:$4 sm:$0xff]  }
 0x771   :  { %3231 = verf.f32 %v1974_v7  ;;  %v1975_v11 = vmul.f32 0.70710677, %v1965_v8  ;;  %v1971_v54 = vmul.f32 0.5, %v1965_v8 }
 0x772   :  { %3233 = verf.f32 %v1972_v10  ;;  %v1973_v13 = vmul.f32 0.70710677, %v1957_v30  ;;  %v1969_v24 = vmul.f32 0.5, %v1957_v30 }
 0x773   :  { %3235 = verf.f32 %v1975_v11 }
 0x774   :  { %3237 = verf.f32 %v1973_v13 }
 0x77b   :  { %v3232_v14 = vpop.eup %3231 }
 0x77c   :  { %v3234_v15 = vpop.eup %3233  ;;  %v1982_v19 = vadd.f32 1.0, %v3232_v14 }
 0x77d   :  { %v3236_v37 = vpop.eup %3235  ;;  %v1980_v20 = vadd.f32 1.0, %v3234_v15 }
 0x77e   :  { %v3238_v21 = vpop.eup %3237  ;;  %v1983_v22 = vadd.f32 1.0, %v3236_v37  ;;  %v1986_v60 = vmul.f32 %v1982_v19, %v1970_v28  ;;  %v3185_v19 = vld [vmem:[#allocation29 + $0x34] ss:$12 sps:$4 sm:$0xff]   ;;  %v3186_v37 = vld [vmem:[#allocation29 + $0x4c] ss:$12 sps:$4 sm:$0xff]  }
 0x77f   :  { %v1981_v25 = vadd.f32 1.0, %v3238_v21  ;;  %v1984_v4 = vmul.f32 %v1980_v20, %v1968_v23  ;;  %v3187_v20 = vld [vmem:[#allocation29 + $0x64] ss:$12 sps:$4 sm:$0xff]   ;;  %v3188_v21 = vld [vmem:[#allocation29 + $0x7c] ss:$12 sps:$4 sm:$0xff]  }
 0x780   :  { %v1987_v43 = vmul.f32 %v1983_v22, %v1971_v54  ;;  %v3189_v28 = vld [vmem:[#allocation29 + $0x94] ss:$12 sps:$4 sm:$0xff]   ;;  %v3190_v54 = vld [vmem:[#allocation29 + $0xac] ss:$12 sps:$4 sm:$0xff]   ;;  %v2684_v22 = vld [vmem:[#allocation28] ss:$0 sm:$0xff] }
 0x781   :  { %v1985_v27 = vmul.f32 %v1981_v25, %v1969_v24 }
 0x782   :  { %v2005_v12 = vpack.c.bf16 %v1987_v43, %v1986_v60 }
 0x783   :  { %v2004_v32 = vpack.c.bf16 %v1985_v27, %v1984_v4 }
 0x785   :  { %2917 = vmatprep.mubr.bf16.mxu0 %v2004_v32 }
 0x786   :  { %2918 = vmatmul.mubr.bf16.vlgmr.msra.gmra.mrb[20].mxu0 %v2005_v12 }
 0x787   :  { %2942 = vmatpush3.bf16.msra.mxu0 %v3172_v58 }
 0x788   :  { %2943 = vmatprep.subr.bf16.mxu0 %v3174_v29 }
 0x78b   :  { %2944 = vmatpush3.bf16.msra.mxu0 %v3174_v29 }
 0x78c   :  { %2945 = vmatprep.subr.bf16.mxu0 %v3176_v33 }
 0x78f   :  { %2946 = vmatpush3.bf16.msra.mxu0 %v3176_v33 }
 0x790   :  { %2947 = vmatprep.subr.bf16.mxu0 %v3178_v17 }
 0x793   :  { %2948 = vmatpush3.bf16.msra.mxu0 %v3178_v17 }
 0x794   :  { %2949 = vmatprep.subr.bf16.mxu0 %v3179_v35 }
 0x797   :  { %2950 = vmatpush3.bf16.msra.mxu0 %v3179_v35 }
 0x798   :  { %2951 = vmatprep.subr.bf16.mxu0 %v3180_v16 }
 0x79b   :  { %2952 = vmatpush3.bf16.msra.mxu0 %v3180_v16 }
 0x79c   :  { %2953 = vmatprep.subr.bf16.mxu0 %v3181_v36 }
 0x79f   :  { %2954 = vmatpush3.bf16.msra.mxu0 %v3181_v36 }
 0x7a0   :  { %2955 = vmatprep.subr.bf16.mxu0 %v3182_v38 }
 0x7a3   :  { %2956 = vmatpush3.bf16.msra.mxu0 %v3182_v38 }
 0x859   :  { %v2919_v42 = vpop.f32.mrb[20].mxu0 }
 0x85a   :  { %v2104_v44 = vadd.f32 %v2919_v42, %v2666_v41  ;;  %v2095_v45 = vpop.f32.mrb[21].mxu0 }
 0x85b   :  { %v2096_v47 = vadd.f32 %v2666_v41, %v2095_v45  ;;  %v2920_v48 = vpop.f32.mrb[22].mxu0 }
 0x85c   :  { %v2112_v49 = vadd.f32 %v2104_v44, %v4430_v40  ;;  %v2107_v50 = vadd.f32 %v2920_v48, %v2666_v41  ;;  %v2098_v51 = vpop.f32.mrb[23].mxu0 }
 0x85d   :  { %v2110_v52 = vadd.f32 %v2096_v47, %v4437_v63  ;;  %v2099_v53 = vadd.f32 %v2666_v41, %v2098_v51 }
 0x85e   :  { %v2242_v55 = vmul.f32 0.70710677, %v2112_v49  ;;  %v2113_v56 = vadd.f32 %v2107_v50, %v4434_v26  ;;  %v2238_v5 = vmul.f32 0.5, %v2112_v49 }
 0x85f   :  { %v2240_v57 = vmul.f32 0.70710677, %v2110_v52  ;;  %v2111_v58 = vadd.f32 %v2099_v53, %v4422_v18  ;;  %v2236_v7 = vmul.f32 0.5, %v2110_v52 }
 0x860   :  { %3239 = verf.f32 %v2242_v55  ;;  %v2131_v59 = vpack.c.bf16 %v2113_v56, %v2112_v49  ;;  %v2243_v61 = vmul.f32 0.70710677, %v2113_v56  ;;  %v2239_v6 = vmul.f32 0.5, %v2113_v56  ;;  %v2675_v55 = vld [vmem:[#allocation34] ss:$0 sm:$0xff] }
 0x861   :  { %3241 = verf.f32 %v2240_v57  ;;  %v2241_v62 = vmul.f32 0.70710677, %v2111_v58  ;;  %v2130_v0 = vpack.c.bf16 %v2111_v58, %v2110_v52  ;;  %v2237_v8 = vmul.f32 0.5, %v2111_v58  ;;  %v2693_v56 = vld [vmem:[#allocation31] ss:$0 sm:$0xff] }
 0x862   :  { %3243 = verf.f32 %v2243_v61  ;;  %v2987_v57 = vadd.f32 %v2693_v56, %v2675_v55 }
 0x863   :  { %3245 = verf.f32 %v2241_v62  ;;  %2937 = vmatprep.mubr.bf16.mxu1 %v2130_v0 }
 0x864   :  { %2938 = vmatmul.mubr.bf16.vlgmr.msra.gmra.mrb[36].mxu1 %v2131_v59 }
 0x865   :  { %2962 = vmatpush3.bf16.msra.mxu1 %v3183_v39 }
 0x866   :  { %2963 = vmatprep.subr.bf16.mxu1 %v3184_v1 }
 0x869   :  { %2964 = vmatpush3.bf16.msra.mxu1 %v3184_v1 }
 0x86a   :  { %v3240_v40 = vpop.eup %3239  ;;  %2965 = vmatprep.subr.bf16.mxu1 %v3185_v19 }
 0x86b   :  { %v3242_v63 = vpop.eup %3241  ;;  %v2250_v26 = vadd.f32 1.0, %v3240_v40 }
 0x86c   :  { %v3244_v2 = vpop.eup %3243  ;;  %v2248_v3 = vadd.f32 1.0, %v3242_v63 }
 0x86d   :  { %v3246_v18 = vpop.eup %3245  ;;  %v2251_v46 = vadd.f32 1.0, %v3244_v2  ;;  %v2254_v10 = vmul.f32 %v2250_v26, %v2238_v5  ;;  %2966 = vmatpush3.bf16.msra.mxu1 %v3185_v19 }
 0x86e   :  { %v2249_v9 = vadd.f32 1.0, %v3246_v18  ;;  %v2252_v11 = vmul.f32 %v2248_v3, %v2236_v7  ;;  %2967 = vmatprep.subr.bf16.mxu1 %v3186_v37 }
 0x86f   :  { %v2255_v30 = vmul.f32 %v2251_v46, %v2239_v6 }
 0x870   :  { %v2253_v13 = vmul.f32 %v2249_v9, %v2237_v8 }
 0x871   :  { %v2273_v14 = vpack.c.bf16 %v2255_v30, %v2254_v10  ;;  %2968 = vmatpush3.bf16.msra.mxu1 %v3186_v37 }
 0x872   :  { %v2272_v15 = vpack.c.bf16 %v2253_v13, %v2252_v11  ;;  %2969 = vmatprep.subr.bf16.mxu1 %v3187_v20 }
 0x874   :  { %2957 = vmatprep.mubr.bf16.mxu0 %v2272_v15 }
 0x875   :  { %2958 = vmatmul.mubr.bf16.vlgmr.msra.gmra.mrb[24].mxu0 %v2273_v14  ;;  %2970 = vmatpush3.bf16.msra.mxu1 %v3187_v20 }
 0x876   :  { %2971 = vmatprep.subr.bf16.mxu1 %v3188_v21 }
 0x879   :  { %2972 = vmatpush3.bf16.msra.mxu1 %v3188_v21 }
 0x87a   :  { %2973 = vmatprep.subr.bf16.mxu1 %v3189_v28 }
 0x87d   :  { %2974 = vmatpush3.bf16.msra.mxu1 %v3189_v28 }
 0x87e   :  { %2975 = vmatprep.subr.bf16.mxu1 %v3190_v54 }
 0x881   :  { %2976 = vmatpush3.bf16.msra.mxu1 %v3190_v54 }
 0x948   :  { %v2959_v23 = vpop.f32.mrb[24].mxu0 }
 0x949   :  { %v2372_v24 = vadd.f32 %v2959_v23, %v2684_v22  ;;  %v2363_v25 = vpop.f32.mrb[25].mxu0 }
 0x94a   :  { %v2364_v60 = vadd.f32 %v2684_v22, %v2363_v25  ;;  %v2960_v43 = vpop.f32.mrb[26].mxu0 }
 0x94b   :  { %v2384_v4 = vmul.f32 0.70710677, %v2372_v24  ;;  %v2375_v27 = vadd.f32 %v2960_v43, %v2684_v22  ;;  %v2366_v12 = vpop.f32.mrb[27].mxu0  ;;  %v2380_v39 = vmul.f32 0.5, %v2372_v24 }
 0x94c   :  { %v2382_v32 = vmul.f32 0.70710677, %v2364_v60  ;;  %v2367_v29 = vadd.f32 %v2684_v22, %v2366_v12  ;;  %v2378_v44 = vmul.f32 0.5, %v2364_v60 }
 0x94d   :  { %3247 = verf.f32 %v2384_v4  ;;  %v2385_v31 = vmul.f32 0.70710677, %v2375_v27  ;;  %v2381_v41 = vmul.f32 0.5, %v2375_v27 }
 0x94e   :  { %3249 = verf.f32 %v2382_v32  ;;  %v2383_v33 = vmul.f32 0.70710677, %v2367_v29  ;;  %v2379_v45 = vmul.f32 0.5, %v2367_v29 }
 0x94f   :  { %3251 = verf.f32 %v2385_v31 }
 0x950   :  { %3253 = verf.f32 %v2383_v33 }
 0x957   :  { %v3248_v34 = vpop.eup %3247 }
 0x958   :  { %v3250_v17 = vpop.eup %3249  ;;  %v2392_v35 = vadd.f32 1.0, %v3248_v34 }
 0x959   :  { %v3252_v16 = vpop.eup %3251  ;;  %v2390_v36 = vadd.f32 1.0, %v3250_v17 }
 0x95a   :  { %v3254_v38 = vpop.eup %3253  ;;  %v2393_v42 = vadd.f32 1.0, %v3252_v16  ;;  %v2396_v48 = vmul.f32 %v2392_v35, %v2380_v39 }
 0x95b   :  { %v2391_v47 = vadd.f32 1.0, %v3254_v38  ;;  %v2394_v50 = vmul.f32 %v2390_v36, %v2378_v44 }
 0x95c   :  { %v2397_v49 = vmul.f32 %v2393_v42, %v2381_v41 }
 0x95d   :  { %v2395_v51 = vmul.f32 %v2391_v47, %v2379_v45 }
 0x95e   :  { %v2415_v52 = vpack.c.bf16 %v2397_v49, %v2396_v48 }
 0x95f   :  { %v2414_v53 = vpack.c.bf16 %v2395_v51, %v2394_v50 }
 0x961   :  { %2977 = vmatprep.mubr.bf16.mxu1 %v2414_v53 }
 0x962   :  { %2978 = vmatmul.mubr.bf16.vlgmr.msra.gmra.mrb[36].mxu1 %v2415_v52 }
 0xa35   :  { %v2979_v58 = vpop.f32.mrb[36].mxu1 }
 0xa36   :  { %v2981_v59 = vadd.f32 %v2979_v58, %v2675_v55  ;;  %v2505_v61 = vpop.f32.mrb[37].mxu1 }
 0xa37   :  { %v2983_v62 = vadd.f32 %v2675_v55, %v2505_v61  ;;  %v2980_v0 = vpop.f32.mrb[38].mxu1 }
 0xa38   :  { %v2982_v1 = vadd.f32 %v2981_v59, %v2693_v56  ;;  %v2986_v40 = vadd.f32 %v2987_v57, %v2980_v0  ;;  %v2508_v63 = vpop.f32.mrb[39].mxu1 }
 0xa39   :  { %v2984_v26 = vadd.f32 %v2983_v62, %v2693_v56  ;;  %v2988_v2 = vadd.f32 %v2987_v57, %v2508_v63 }
 0xa3a   :  { %2526 = vst [vmem:[#allocation35 + $0x10] sm:$0xff] %v2982_v1  ;;  %2527 = vst [vmem:[#allocation35 + $0x18] sm:$0xff] %v2986_v40 }
 0xa3b   :  { %2524 = vst [vmem:[#allocation35] sm:$0xff] %v2984_v26  ;;  %2525 = vst [vmem:[#allocation35 + $0x8] sm:$0xff] %v2988_v2 }
 0xa3c   :  { %3728 = shalt.err (!%p3725_p4)
}
 0xa3d   :  { %s4518_s29 = sld [smem:[#allocation56_spill]] }
 0xa43   :  { %s3729_s4 = scalar_lea.hbm %s4518_s29, 512 }
 0xa44   :  { %p3730_p5 = scmp.ne.s32.totalorder %s4518_s29, %s3729_s4  ;;  %p3733_p6 = scmp.lt.u32.totalorder %s3729_s4, %s4518_s29 }
 0xa46   :  { %p3735_p7 = pnand %p3733_p6, %p3730_p5 }
 0xa48   :  { %3738 = shalt.err (!%p3735_p7)
}
 0xa49   :  { %2539 = dma.vmem_to_hbm [thread:$0]  %s2534_s10, 512, %s4518_s29, [#allocation4], %s4513_s23, %s4513_s23, %s4512_s28  }
 0xa4a   :  { %3761 = dma.done.wait [#allocation4], 512  }
 0xa4b   :  { %3762 = vsyncadd [#allocation4], 4294966784 }
 0xa4c   :  { %2543 = vsyncpa [#allocation3], 1 }
 0xa4d   :  { %2544 = vsyncpa [#allocation6], 1 }
 0xa4e   :  { %2545 = vsyncpa [#allocation9], 1 }
 0xa4f   :  { %2546 = vsyncpa [#allocation12], 1 }
 0xa50   :  { %2547 = vsyncpa [#allocation15], 1 }
 0xa51   :  { %2548 = vsyncpa [#allocation18], 1 }
 0xa52   :  { %2549 = vsyncpa [#allocation21], 1 }
 0xa53   :  { %2550 = vsyncpa [#allocation24], 1 }
 0xa54   :  { %2551 = vsyncpa [#allocation27], 1 }
 0xa55   :  { %2552 = vsyncpa [#allocation30], 1 }
 0xa56   :  { %2553 = vsyncpa [#allocation33], 1 }
 0xa57   :  { %2554 = vsyncpa [#allocation4], 1 }

// kernel: mimo_ts_encoder_moe_forward.5
= control target key start
LH: loop header
LB: loop body
LE: loop exit
PB: predicated region body
PF: predicated region fallthrough
CT: control target
= control target key end

     0   :  { %s6481_s0 = inlined_call_operand.hbm [shape: f32[64,4], index: 0, kind: input, shape index: {}]   ;;  %s6482_s1 = inlined_call_operand.hbm [shape: f32[64,128], index: 1, kind: input, shape index: {}]   ;;  %s6483_s2 = inlined_call_operand.hbm [shape: bf16[4,128], index: 2, kind: input, shape index: {}]   ;;  %s6484_s3 = inlined_call_operand.hbm [shape: bf16[128,384], index: 3, kind: input, shape index: {}]   ;;  %s6485_s4 = inlined_call_operand.hbm [shape: f32[1,128], index: 4, kind: input, shape index: {}]   ;;  %s6486_s5 = inlined_call_operand.hbm [shape: bf16[128,384], index: 5, kind: input, shape index: {}]   ;;  %s6487_s6 = inlined_call_operand.hbm [shape: f32[1,128], index: 6, kind: input, shape index: {}]   ;;  %s6488_s7 = inlined_call_operand.hbm [shape: bf16[128,384], index: 7, kind: input, shape index: {}]   ;;  %s6489_s8 = inlined_call_operand.hbm [shape: f32[1,128], index: 8, kind: input, shape index: {}]   ;;  %s6490_s9 = inlined_call_operand.hbm [shape: bf16[128,384], index: 9, kind: input, shape index: {}]   ;;  %s6491_s10 = inlined_call_operand.hbm [shape: f32[1,128], index: 10, kind: input, shape index: {}]   ;;  %s6492_s11 = inlined_call_operand.hbm [shape: bf16[128,384], index: 11, kind: input, shape index: {}]   ;;  %s6493_s12 = inlined_call_operand.hbm [shape: f32[1,128], index: 12, kind: input, shape index: {}]   ;;  %s6494_s13 = inlined_call_operand.hbm [shape: bf16[128,384], index: 13, kind: input, shape index: {}]   ;;  %s6495_s14 = inlined_call_operand.hbm [shape: f32[1,128], index: 14, kind: input, shape index: {}]   ;;  %s6496_s15 = inlined_call_operand.hbm [shape: bf16[128,384], index: 15, kind: input, shape index: {}]   ;;  %s6497_s16 = inlined_call_operand.hbm [shape: f32[1,128], index: 16, kind: input, shape index: {}]   ;;  %s6498_s17 = inlined_call_operand.hbm [shape: bf16[128,384], index: 17, kind: input, shape index: {}]   ;;  %s6499_s18 = inlined_call_operand.hbm [shape: f32[1,128], index: 18, kind: input, shape index: {}]   ;;  %s6500_s19 = inlined_call_operand.hbm [shape: bf16[128,128], index: 19, kind: input, shape index: {}]   ;;  %s6501_s20 = inlined_call_operand.hbm [shape: f32[1,128], index: 20, kind: input, shape index: {}]   ;;  %s6502_s21 = inlined_call_operand.hbm [shape: f32[64,128], index: 21, kind: output, shape index: {}]  }
   0x1   :  { %6521 = sst [smem:[#allocation48_spill]] %s6481_s0 }
   0x2   :  { %6522 = sst [smem:[#allocation49_spill]] %s6482_s1 }
   0x3   :  { %6523 = sst [smem:[#allocation50_spill]] %s6483_s2 }
   0x4   :  { %6524 = sst [smem:[#allocation51_spill]] %s6484_s3 }
   0x5   :  { %6525 = sst [smem:[#allocation52_spill]] %s6485_s4 }
   0x6   :  { %6526 = sst [smem:[#allocation53_spill]] %s6486_s5 }
   0x7   :  { %6527 = sst [smem:[#allocation54_spill]] %s6499_s18 }
   0x8   :  { %6528 = sst [smem:[#allocation55_spill]] %s6501_s20 }
   0x9   :  { %6529 = sst [smem:[#allocation56_spill]] %s6502_s21 }
   0xa   :  { %26 = vsyncpa [#allocation3], 0 }
   0xb   :  { %27 = vsyncpa [#allocation6], 0 }
   0xc   :  { %28 = vsyncpa [#allocation9], 0 }
   0xd   :  { %29 = vsyncpa [#allocation12], 0 }
   0xe   :  { %30 = vsyncpa [#allocation15], 0 }
   0xf   :  { %31 = vsyncpa [#allocation18], 0 }
  0x10   :  { %32 = vsyncpa [#allocation21], 0 }
  0x11   :  { %33 = vsyncpa [#allocation24], 0 }
  0x12   :  { %34 = vsyncpa [#allocation27], 0 }
  0x13   :  { %35 = vsyncpa [#allocation30], 0 }
  0x14   :  { %36 = vsyncpa [#allocation33], 0 }
  0x15   :  { %37 = vsyncpa [#allocation4], 0  ;;  %s5226_s2 = smov [#allocation5]   ;;  %s5227_s26 = smov [#allocation8]  }
  0x16   :  { %s55_s25 = sshll.u32 %s5226_s2, 4  ;;  %s77_s27 = sshll.u32 %s5227_s26, 4  ;;  %s56_s25 = int_to_ptr.vmem [resolvable:$true] %s55_s25  ;;  %s5365_s27 = int_to_ptr.vmem [resolvable:$true] %s77_s27 }
  0x17   :  { %s6530_s29 = sld [smem:[#allocation49_spill]] }
  0x1d   :  { %s4718_s0 = scalar_lea.hbm %s6530_s29, 1024 }
  0x1e   :  { %p4719_p0 = scmp.ne.s32.totalorder %s6530_s29, %s4718_s0  ;;  %p4722_p1 = scmp.lt.u32.totalorder %s4718_s0, %s6530_s29 }
  0x20   :  { %p4724_p2 = pnand %p4722_p1, %p4719_p0 }
  0x22   :  { %4727 = shalt.err (!%p4724_p2)
}
  0x23   :  { %s4728_s23 = scalar_lea.vmem %s56_s25, 1024  ;;  %p4733_p4 = scmp.lt.s32.totalorder %s56_s25, %s56_s25 }
  0x24   :  { %p4729_p3 = scmp.ne.s32.totalorder %s56_s25, %s4728_s23  ;;  %p4734_p5 = scmp.lt.s32.totalorder %s4728_s23, %s4728_s23 }
  0x26   :  { %p4735_p6 = por %p4734_p5, %p4733_p4 }
  0x28   :  { %p4736_p7 = pnand %p4735_p6, %p4729_p3 }
  0x2a   :  { %4739 = shalt.err (!%p4736_p7)
}
  0x2b   :  { %s6510_s1 = smov 128   ;;  %s6512_s24 = smov 8  }
  0x2c   :  { %61 = dma.hbm_to_vmem [thread:$0]  %s6530_s29, 1024, %s56_s25, [#allocation6], %s6510_s1, %s6510_s1, %s6512_s24  }
  0x2d   :  { %s6531_s0 = sld [smem:[#allocation51_spill]] }
  0x33   :  { %s4740_s4 = scalar_lea.hbm %s6531_s0, 3072 }
  0x34   :  { %p4741_p8 = scmp.ne.s32.totalorder %s6531_s0, %s4740_s4  ;;  %p4744_p9 = scmp.lt.u32.totalorder %s4740_s4, %s6531_s0 }
  0x36   :  { %p4746_p10 = pnand %p4744_p9, %p4741_p8 }
  0x38   :  { %4749 = shalt.err (!%p4746_p10)
}
  0x39   :  { %s4750_s21 = scalar_lea.vmem %s5365_s27, 3072  ;;  %p4755_p12 = scmp.lt.s32.totalorder %s5365_s27, %s5365_s27 }
  0x3a   :  { %p4751_p11 = scmp.ne.s32.totalorder %s5365_s27, %s4750_s21  ;;  %p4756_p13 = scmp.lt.s32.totalorder %s4750_s21, %s4750_s21 }
  0x3c   :  { %p4757_p0 = por %p4756_p13, %p4755_p12 }
  0x3e   :  { %p4758_p1 = pnand %p4757_p0, %p4751_p11 }
  0x40   :  { %4761 = shalt.err (!%p4758_p1)
}
  0x41   :  { %s5230_s25 = smov 192   ;;  %s5231_s29 = smov 12  }
  0x42   :  { %83 = dma.hbm_to_vmem [thread:$0]  %s6531_s0, 3072, %s5365_s27, [#allocation9], %s5230_s25, %s5230_s25, %s5231_s29  }
  0x43   :  { %s5232_s3 = smov [#allocation11]   ;;  %s5233_s4 = smov [#allocation14]  }
  0x44   :  { %s99_s28 = sshll.u32 %s5232_s3, 4  ;;  %s121_s30 = sshll.u32 %s5233_s4, 4  ;;  %s100_s28 = int_to_ptr.vmem [resolvable:$true] %s99_s28  ;;  %s5402_s30 = int_to_ptr.vmem [resolvable:$true] %s121_s30 }
  0x45   :  { %s6532_s22 = sld [smem:[#allocation53_spill]] }
  0x4b   :  { %s4762_s23 = scalar_lea.hbm %s6532_s22, 3072 }
  0x4c   :  { %p4763_p2 = scmp.ne.s32.totalorder %s6532_s22, %s4762_s23  ;;  %p4766_p3 = scmp.lt.u32.totalorder %s4762_s23, %s6532_s22 }
  0x4e   :  { %p4768_p4 = pnand %p4766_p3, %p4763_p2 }
  0x50   :  { %4771 = shalt.err (!%p4768_p4)
}
  0x51   :  { %s4772_s27 = scalar_lea.vmem %s100_s28, 3072  ;;  %p4777_p6 = scmp.lt.s32.totalorder %s100_s28, %s100_s28 }
  0x52   :  { %p4773_p5 = scmp.ne.s32.totalorder %s100_s28, %s4772_s27  ;;  %p4778_p7 = scmp.lt.s32.totalorder %s4772_s27, %s4772_s27 }
  0x54   :  { %p4779_p8 = por %p4778_p7, %p4777_p6 }
  0x56   :  { %p4780_p9 = pnand %p4779_p8, %p4773_p5 }
  0x58   :  { %4783 = shalt.err (!%p4780_p9)
}
  0x59   :  { %105 = dma.hbm_to_vmem [thread:$0]  %s6532_s22, 3072, %s100_s28, [#allocation12], %s5230_s25, %s5230_s25, %s5231_s29  }
  0x5a   :  { %s4784_s18 = scalar_lea.hbm %s6488_s7, 3072 }
  0x5b   :  { %p4785_p10 = scmp.ne.s32.totalorder %s6488_s7, %s4784_s18  ;;  %p4788_p11 = scmp.lt.u32.totalorder %s4784_s18, %s6488_s7 }
  0x5d   :  { %p4790_p12 = pnand %p4788_p11, %p4785_p10 }
  0x5f   :  { %4793 = shalt.err (!%p4790_p12)
}
  0x60   :  { %s4794_s21 = scalar_lea.vmem %s5402_s30, 3072  ;;  %p4799_p0 = scmp.lt.s32.totalorder %s5402_s30, %s5402_s30 }
  0x61   :  { %p4795_p13 = scmp.ne.s32.totalorder %s5402_s30, %s4794_s21  ;;  %p4800_p1 = scmp.lt.s32.totalorder %s4794_s21, %s4794_s21 }
  0x63   :  { %p4801_p2 = por %p4800_p1, %p4799_p0 }
  0x65   :  { %p4802_p3 = pnand %p4801_p2, %p4795_p13 }
  0x67   :  { %4805 = shalt.err (!%p4802_p3)
}
  0x68   :  { %127 = dma.hbm_to_vmem [thread:$0]  %s6488_s7, 3072, %s5402_s30, [#allocation15], %s5230_s25, %s5230_s25, %s5231_s29  }
  0x69   :  { %s5234_s22 = smov [#allocation17]   ;;  %s5235_s27 = smov [#allocation20]  }
  0x6a   :  { %s143_s23 = sshll.u32 %s5234_s22, 4  ;;  %s165_s0 = sshll.u32 %s5235_s27, 4  ;;  %s144_s23 = int_to_ptr.vmem [resolvable:$true] %s143_s23  ;;  %s5439_s0 = int_to_ptr.vmem [resolvable:$true] %s165_s0 }
  0x6b   :  { %s4806_s24 = scalar_lea.hbm %s6490_s9, 3072 }
  0x6c   :  { %p4807_p4 = scmp.ne.s32.totalorder %s6490_s9, %s4806_s24  ;;  %p4810_p5 = scmp.lt.u32.totalorder %s4806_s24, %s6490_s9 }
  0x6e   :  { %p4812_p6 = pnand %p4810_p5, %p4807_p4 }
  0x70   :  { %4815 = shalt.err (!%p4812_p6)
}
  0x71   :  { %s4816_s7 = scalar_lea.vmem %s144_s23, 3072  ;;  %p4821_p8 = scmp.lt.s32.totalorder %s144_s23, %s144_s23 }
  0x72   :  { %p4817_p7 = scmp.ne.s32.totalorder %s144_s23, %s4816_s7  ;;  %p4822_p9 = scmp.lt.s32.totalorder %s4816_s7, %s4816_s7 }
  0x74   :  { %p4823_p10 = por %p4822_p9, %p4821_p8 }
  0x76   :  { %p4824_p11 = pnand %p4823_p10, %p4817_p7 }
  0x78   :  { %4827 = shalt.err (!%p4824_p11)
}
  0x79   :  { %149 = dma.hbm_to_vmem [thread:$0]  %s6490_s9, 3072, %s144_s23, [#allocation18], %s5230_s25, %s5230_s25, %s5231_s29  }
  0x7a   :  { %s4828_s5 = scalar_lea.hbm %s6492_s11, 3072 }
  0x7b   :  { %p4829_p12 = scmp.ne.s32.totalorder %s6492_s11, %s4828_s5  ;;  %p4832_p13 = scmp.lt.u32.totalorder %s4828_s5, %s6492_s11 }
  0x7d   :  { %p4834_p0 = pnand %p4832_p13, %p4829_p12 }
  0x7f   :  { %4837 = shalt.err (!%p4834_p0)
}
  0x80   :  { %s4838_s24 = scalar_lea.vmem %s5439_s0, 3072  ;;  %p4843_p2 = scmp.lt.s32.totalorder %s5439_s0, %s5439_s0 }
  0x81   :  { %p4839_p1 = scmp.ne.s32.totalorder %s5439_s0, %s4838_s24  ;;  %p4844_p3 = scmp.lt.s32.totalorder %s4838_s24, %s4838_s24 }
  0x83   :  { %p4845_p4 = por %p4844_p3, %p4843_p2 }
  0x85   :  { %p4846_p5 = pnand %p4845_p4, %p4839_p1 }
  0x87   :  { %4849 = shalt.err (!%p4846_p5)
}
  0x88   :  { %171 = dma.hbm_to_vmem [thread:$0]  %s6492_s11, 3072, %s5439_s0, [#allocation21], %s5230_s25, %s5230_s25, %s5231_s29  }
  0x89   :  { %s5236_s18 = smov [#allocation23]   ;;  %s5237_s26 = smov [#allocation26]  }
  0x8a   :  { %s187_s20 = sshll.u32 %s5236_s18, 4  ;;  %s209_s3 = sshll.u32 %s5237_s26, 4  ;;  %s188_s20 = int_to_ptr.vmem [resolvable:$true] %s187_s20  ;;  %s5476_s3 = int_to_ptr.vmem [resolvable:$true] %s209_s3 }
  0x8b   :  { %s4850_s4 = scalar_lea.hbm %s6494_s13, 3072 }
  0x8c   :  { %p4851_p6 = scmp.ne.s32.totalorder %s6494_s13, %s4850_s4  ;;  %p4854_p7 = scmp.lt.u32.totalorder %s4850_s4, %s6494_s13 }
  0x8e   :  { %p4856_p8 = pnand %p4854_p7, %p4851_p6 }
  0x90   :  { %4859 = shalt.err (!%p4856_p8)
}
  0x91   :  { %s4860_s11 = scalar_lea.vmem %s188_s20, 3072  ;;  %p4865_p10 = scmp.lt.s32.totalorder %s188_s20, %s188_s20 }
  0x92   :  { %p4861_p9 = scmp.ne.s32.totalorder %s188_s20, %s4860_s11  ;;  %p4866_p11 = scmp.lt.s32.totalorder %s4860_s11, %s4860_s11 }
  0x94   :  { %p4867_p12 = por %p4866_p11, %p4865_p10 }
  0x96   :  { %p4868_p13 = pnand %p4867_p12, %p4861_p9 }
  0x98   :  { %4871 = shalt.err (!%p4868_p13)
}
  0x99   :  { %193 = dma.hbm_to_vmem [thread:$0]  %s6494_s13, 3072, %s188_s20, [#allocation24], %s5230_s25, %s5230_s25, %s5231_s29  }
  0x9a   :  { %s4872_s24 = scalar_lea.hbm %s6496_s15, 3072 }
  0x9b   :  { %p4873_p0 = scmp.ne.s32.totalorder %s6496_s15, %s4872_s24  ;;  %p4876_p1 = scmp.lt.u32.totalorder %s4872_s24, %s6496_s15 }
  0x9d   :  { %p4878_p2 = pnand %p4876_p1, %p4873_p0 }
  0x9f   :  { %4881 = shalt.err (!%p4878_p2)
}
  0xa0   :  { %s4882_s7 = scalar_lea.vmem %s5476_s3, 3072  ;;  %p4887_p4 = scmp.lt.s32.totalorder %s5476_s3, %s5476_s3 }
  0xa1   :  { %p4883_p3 = scmp.ne.s32.totalorder %s5476_s3, %s4882_s7  ;;  %p4888_p5 = scmp.lt.s32.totalorder %s4882_s7, %s4882_s7 }
  0xa3   :  { %p4889_p6 = por %p4888_p5, %p4887_p4 }
  0xa5   :  { %p4890_p7 = pnand %p4889_p6, %p4883_p3 }
  0xa7   :  { %4893 = shalt.err (!%p4890_p7)
}
  0xa8   :  { %215 = dma.hbm_to_vmem [thread:$0]  %s6496_s15, 3072, %s5476_s3, [#allocation27], %s5230_s25, %s5230_s25, %s5231_s29  }
  0xa9   :  { %s5238_s30 = smov [#allocation29]   ;;  %s5239_s21 = smov [#allocation32]  }
  0xaa   :  { %s231_s4 = sshll.u32 %s5238_s30, 4  ;;  %s253_s28 = sshll.u32 %s5239_s21, 4  ;;  %s232_s4 = int_to_ptr.vmem [resolvable:$true] %s231_s4  ;;  %s5513_s28 = int_to_ptr.vmem [resolvable:$true] %s253_s28 }
  0xab   :  { %s4894_s11 = scalar_lea.hbm %s6498_s17, 3072 }
  0xac   :  { %p4895_p8 = scmp.ne.s32.totalorder %s6498_s17, %s4894_s11  ;;  %p4898_p9 = scmp.lt.u32.totalorder %s4894_s11, %s6498_s17 }
  0xae   :  { %p4900_p10 = pnand %p4898_p9, %p4895_p8 }
  0xb0   :  { %4903 = shalt.err (!%p4900_p10)
}
  0xb1   :  { %s4904_s15 = scalar_lea.vmem %s232_s4, 3072  ;;  %p4909_p12 = scmp.lt.s32.totalorder %s232_s4, %s232_s4 }
  0xb2   :  { %p4905_p11 = scmp.ne.s32.totalorder %s232_s4, %s4904_s15  ;;  %p4910_p13 = scmp.lt.s32.totalorder %s4904_s15, %s4904_s15 }
  0xb4   :  { %p4911_p0 = por %p4910_p13, %p4909_p12 }
  0xb6   :  { %p4912_p1 = pnand %p4911_p0, %p4905_p11 }
  0xb8   :  { %4915 = shalt.err (!%p4912_p1)
}
  0xb9   :  { %237 = dma.hbm_to_vmem [thread:$0]  %s6498_s17, 3072, %s232_s4, [#allocation30], %s5230_s25, %s5230_s25, %s5231_s29  }
  0xba   :  { %s4916_s18 = scalar_lea.hbm %s6500_s19, 1024 }
  0xbb   :  { %p4917_p2 = scmp.ne.s32.totalorder %s6500_s19, %s4916_s18  ;;  %p4920_p3 = scmp.lt.u32.totalorder %s4916_s18, %s6500_s19 }
  0xbd   :  { %p4922_p4 = pnand %p4920_p3, %p4917_p2 }
  0xbf   :  { %4925 = shalt.err (!%p4922_p4)
}
  0xc0   :  { %s4926_s30 = scalar_lea.vmem %s5513_s28, 1024  ;;  %p4931_p6 = scmp.lt.s32.totalorder %s5513_s28, %s5513_s28 }
  0xc1   :  { %p4927_p5 = scmp.ne.s32.totalorder %s5513_s28, %s4926_s30  ;;  %p4932_p7 = scmp.lt.s32.totalorder %s4926_s30, %s4926_s30 }
  0xc3   :  { %p4933_p8 = por %p4932_p7, %p4931_p6 }
  0xc5   :  { %p4934_p9 = pnand %p4933_p8, %p4927_p5 }
  0xc7   :  { %4937 = shalt.err (!%p4934_p9)
}
  0xc8   :  { %s5240_s17 = smov 64   ;;  %s5241_s25 = smov 4  }
  0xc9   :  { %259 = dma.hbm_to_vmem [thread:$0]  %s6500_s19, 1024, %s5513_s28, [#allocation33], %s5240_s17, %s5240_s17, %s5241_s25  }
  0xca   :  { %s5242_s21 = smov [#allocation2]   ;;  %s5243_s22 = smov [#allocation7]  }
  0xcb   :  { %s43_s5 = sshll.u32 %s5242_s21, 4  ;;  %s68_s11 = sshll.u32 %s5243_s22, 4  ;;  %s44_s5 = int_to_ptr.vmem [resolvable:$true] %s43_s5  ;;  %s69_s11 = int_to_ptr.vmem [resolvable:$true] %s68_s11 }
  0xcc   :  { %s6533_s2 = sld [smem:[#allocation48_spill]] }
  0xd2   :  { %s4938_s1 = scalar_lea.hbm %s6533_s2, 1024 }
  0xd3   :  { %p4939_p10 = scmp.ne.s32.totalorder %s6533_s2, %s4938_s1  ;;  %p4942_p11 = scmp.lt.u32.totalorder %s4938_s1, %s6533_s2 }
  0xd5   :  { %p4944_p12 = pnand %p4942_p11, %p4939_p10 }
  0xd7   :  { %4947 = shalt.err (!%p4944_p12)
}
  0xd8   :  { %s4948_s19 = scalar_lea.vmem %s44_s5, 1024  ;;  %p4953_p0 = scmp.lt.s32.totalorder %s44_s5, %s44_s5 }
  0xd9   :  { %p4949_p13 = scmp.ne.s32.totalorder %s44_s5, %s4948_s19  ;;  %p4954_p1 = scmp.lt.s32.totalorder %s4948_s19, %s4948_s19 }
  0xdb   :  { %p4955_p2 = por %p4954_p1, %p4953_p0 }
  0xdd   :  { %p4956_p3 = pnand %p4955_p2, %p4949_p13 }
  0xdf   :  { %4959 = shalt.err (!%p4956_p3)
}
  0xe0   :  { %s6534_s28 = smov 8   ;;  %s6535_s23 = smov 128  }
  0xe1   :  { %49 = dma.hbm_to_vmem [thread:$0]  %s6533_s2, 1024, %s44_s5, [#allocation3], %s6535_s23, %s6535_s23, %s6534_s28  }
  0xe2   :  { %s6536_s20 = sld [smem:[#allocation50_spill]] }
  0xe8   :  { %s4960_s30 = scalar_lea.hbm %s6536_s20, 32 }
  0xe9   :  { %p4961_p4 = scmp.ne.s32.totalorder %s6536_s20, %s4960_s30  ;;  %p4964_p5 = scmp.lt.u32.totalorder %s4960_s30, %s6536_s20 }
  0xeb   :  { %p4966_p6 = pnand %p4964_p5, %p4961_p4 }
  0xed   :  { %4969 = shalt.err (!%p4966_p6)
}
  0xee   :  { %s4970_s21 = scalar_lea.vmem %s69_s11, 32  ;;  %p4975_p8 = scmp.lt.s32.totalorder %s69_s11, %s69_s11 }
  0xef   :  { %p4971_p7 = scmp.ne.s32.totalorder %s69_s11, %s4970_s21  ;;  %p4976_p9 = scmp.lt.s32.totalorder %s4970_s21, %s4970_s21 }
  0xf1   :  { %p4977_p10 = por %p4976_p9, %p4975_p8 }
  0xf3   :  { %p4978_p11 = pnand %p4977_p10, %p4971_p7 }
  0xf5   :  { %4981 = shalt.err (!%p4978_p11)
}
  0xf6   :  { %71 = dma.hbm_to_vmem [thread:$0]  %s6536_s20, 32, %s69_s11, [#allocation6]  }
  0xf7   :  { %s5244_s0 = smov [#allocation10]   ;;  %s5245_s2 = smov [#allocation13]  }
  0xf8   :  { %s90_s27 = sshll.u32 %s5244_s0, 4  ;;  %s112_s1 = sshll.u32 %s5245_s2, 4  ;;  %s91_s27 = int_to_ptr.vmem [resolvable:$true] %s90_s27  ;;  %s113_s1 = int_to_ptr.vmem [resolvable:$true] %s112_s1 }
  0xf9   :  { %s6537_s24 = sld [smem:[#allocation52_spill]] }
  0xff   :  { %s4982_s9 = scalar_lea.hbm %s6537_s24, 16 }
 0x100   :  { %p4983_p12 = scmp.ne.s32.totalorder %s6537_s24, %s4982_s9  ;;  %p4986_p13 = scmp.lt.u32.totalorder %s4982_s9, %s6537_s24 }
 0x102   :  { %p4988_p0 = pnand %p4986_p13, %p4983_p12 }
 0x104   :  { %4991 = shalt.err (!%p4988_p0)
}
 0x105   :  { %s4992_s11 = scalar_lea.vmem %s91_s27, 16  ;;  %s4996_s13 = scalar_lea.vmem %s91_s27, 32 }
 0x106   :  { %p4993_p1 = scmp.ne.s32.totalorder %s91_s27, %s4992_s11  ;;  %p4997_p2 = scmp.lt.s32.totalorder %s91_s27, %s91_s27 }
 0x107   :  { %p4998_p3 = scmp.lt.s32.totalorder %s4996_s13, %s4992_s11 }
 0x109   :  { %p4999_p4 = por %p4998_p3, %p4997_p2 }
 0x10b   :  { %p5000_p5 = pnand %p4999_p4, %p4993_p1 }
 0x10d   :  { %5003 = shalt.err (!%p5000_p5)
}
 0x10e   :  { %93 = dma.hbm_to_vmem [thread:$0]  %s6537_s24, 16, %s91_s27, [#allocation9]  }
 0x10f   :  { %s5004_s29 = scalar_lea.hbm %s6487_s6, 16 }
 0x110   :  { %p5005_p6 = scmp.ne.s32.totalorder %s6487_s6, %s5004_s29  ;;  %p5008_p7 = scmp.lt.u32.totalorder %s5004_s29, %s6487_s6 }
 0x112   :  { %p5010_p8 = pnand %p5008_p7, %p5005_p6 }
 0x114   :  { %5013 = shalt.err (!%p5010_p8)
}
 0x115   :  { %s5014_s0 = scalar_lea.vmem %s113_s1, 16  ;;  %s5018_s2 = scalar_lea.vmem %s113_s1, 32 }
 0x116   :  { %p5015_p9 = scmp.ne.s32.totalorder %s113_s1, %s5014_s0  ;;  %p5019_p10 = scmp.lt.s32.totalorder %s113_s1, %s113_s1 }
 0x117   :  { %p5020_p11 = scmp.lt.s32.totalorder %s5018_s2, %s5014_s0 }
 0x119   :  { %p5021_p12 = por %p5020_p11, %p5019_p10 }
 0x11b   :  { %p5022_p13 = pnand %p5021_p12, %p5015_p9 }
 0x11d   :  { %5025 = shalt.err (!%p5022_p13)
}
 0x11e   :  { %115 = dma.hbm_to_vmem [thread:$0]  %s6487_s6, 16, %s113_s1, [#allocation12]  }
 0x11f   :  { %s5246_s3 = smov [#allocation16]   ;;  %s5247_s9 = smov [#allocation19]  }
 0x120   :  { %s134_s24 = sshll.u32 %s5246_s3, 4  ;;  %s156_s19 = sshll.u32 %s5247_s9, 4  ;;  %s135_s24 = int_to_ptr.vmem [resolvable:$true] %s134_s24  ;;  %s157_s19 = int_to_ptr.vmem [resolvable:$true] %s156_s19 }
 0x121   :  { %s5026_s7 = scalar_lea.hbm %s6489_s8, 16 }
 0x122   :  { %p5027_p0 = scmp.ne.s32.totalorder %s6489_s8, %s5026_s7  ;;  %p5030_p1 = scmp.lt.u32.totalorder %s5026_s7, %s6489_s8 }
 0x124   :  { %p5032_p2 = pnand %p5030_p1, %p5027_p0 }
 0x126   :  { %5035 = shalt.err (!%p5032_p2)
}
 0x127   :  { %s5036_s6 = scalar_lea.vmem %s135_s24, 16  ;;  %s5040_s1 = scalar_lea.vmem %s135_s24, 32 }
 0x128   :  { %p5037_p3 = scmp.ne.s32.totalorder %s135_s24, %s5036_s6  ;;  %p5041_p4 = scmp.lt.s32.totalorder %s135_s24, %s135_s24 }
 0x129   :  { %p5042_p5 = scmp.lt.s32.totalorder %s5040_s1, %s5036_s6 }
 0x12b   :  { %p5043_p6 = por %p5042_p5, %p5041_p4 }
 0x12d   :  { %p5044_p7 = pnand %p5043_p6, %p5037_p3 }
 0x12f   :  { %5047 = shalt.err (!%p5044_p7)
}
 0x130   :  { %137 = dma.hbm_to_vmem [thread:$0]  %s6489_s8, 16, %s135_s24, [#allocation15]  }
 0x131   :  { %s5048_s21 = scalar_lea.hbm %s6491_s10, 16 }
 0x132   :  { %p5049_p8 = scmp.ne.s32.totalorder %s6491_s10, %s5048_s21  ;;  %p5052_p9 = scmp.lt.u32.totalorder %s5048_s21, %s6491_s10 }
 0x134   :  { %p5054_p10 = pnand %p5052_p9, %p5049_p8 }
 0x136   :  { %5057 = shalt.err (!%p5054_p10)
}
 0x137   :  { %s5058_s27 = scalar_lea.vmem %s157_s19, 16  ;;  %s5062_s15 = scalar_lea.vmem %s157_s19, 32 }
 0x138   :  { %p5059_p11 = scmp.ne.s32.totalorder %s157_s19, %s5058_s27  ;;  %p5063_p12 = scmp.lt.s32.totalorder %s157_s19, %s157_s19 }
 0x139   :  { %p5064_p13 = scmp.lt.s32.totalorder %s5062_s15, %s5058_s27 }
 0x13b   :  { %p5065_p0 = por %p5064_p13, %p5063_p12 }
 0x13d   :  { %p5066_p1 = pnand %p5065_p0, %p5059_p11 }
 0x13f   :  { %5069 = shalt.err (!%p5066_p1)
}
 0x140   :  { %159 = dma.hbm_to_vmem [thread:$0]  %s6491_s10, 16, %s157_s19, [#allocation18]  }
 0x141   :  { %s5248_s24 = smov [#allocation22]   ;;  %s5249_s18 = smov [#allocation25]  }
 0x142   :  { %s178_s9 = sshll.u32 %s5248_s24, 4  ;;  %s200_s26 = sshll.u32 %s5249_s18, 4  ;;  %s179_s9 = int_to_ptr.vmem [resolvable:$true] %s178_s9  ;;  %s201_s26 = int_to_ptr.vmem [resolvable:$true] %s200_s26 }
 0x143   :  { %s5070_s13 = scalar_lea.hbm %s6493_s12, 16 }
 0x144   :  { %p5071_p2 = scmp.ne.s32.totalorder %s6493_s12, %s5070_s13  ;;  %p5074_p3 = scmp.lt.u32.totalorder %s5070_s13, %s6493_s12 }
 0x146   :  { %p5076_p4 = pnand %p5074_p3, %p5071_p2 }
 0x148   :  { %5079 = shalt.err (!%p5076_p4)
}
 0x149   :  { %s5080_s10 = scalar_lea.vmem %s179_s9, 16  ;;  %s5084_s19 = scalar_lea.vmem %s179_s9, 32 }
 0x14a   :  { %p5081_p5 = scmp.ne.s32.totalorder %s179_s9, %s5080_s10  ;;  %p5085_p6 = scmp.lt.s32.totalorder %s179_s9, %s179_s9 }
 0x14b   :  { %p5086_p7 = scmp.lt.s32.totalorder %s5084_s19, %s5080_s10 }
 0x14d   :  { %p5087_p8 = por %p5086_p7, %p5085_p6 }
 0x14f   :  { %p5088_p9 = pnand %p5087_p8, %p5081_p5 }
 0x151   :  { %5091 = shalt.err (!%p5088_p9)
}
 0x152   :  { %181 = dma.hbm_to_vmem [thread:$0]  %s6493_s12, 16, %s179_s9, [#allocation21]  }
 0x153   :  { %s5092_s21 = scalar_lea.hbm %s6495_s14, 16 }
 0x154   :  { %p5093_p10 = scmp.ne.s32.totalorder %s6495_s14, %s5092_s21  ;;  %p5096_p11 = scmp.lt.u32.totalorder %s5092_s21, %s6495_s14 }
 0x156   :  { %p5098_p12 = pnand %p5096_p11, %p5093_p10 }
 0x158   :  { %5101 = shalt.err (!%p5098_p12)
}
 0x159   :  { %s5102_s27 = scalar_lea.vmem %s201_s26, 16  ;;  %s5106_s15 = scalar_lea.vmem %s201_s26, 32 }
 0x15a   :  { %p5103_p13 = scmp.ne.s32.totalorder %s201_s26, %s5102_s27  ;;  %p5107_p0 = scmp.lt.s32.totalorder %s201_s26, %s201_s26 }
 0x15b   :  { %p5108_p1 = scmp.lt.s32.totalorder %s5106_s15, %s5102_s27 }
 0x15d   :  { %p5109_p2 = por %p5108_p1, %p5107_p0 }
 0x15f   :  { %p5110_p3 = pnand %p5109_p2, %p5103_p13 }
 0x161   :  { %5113 = shalt.err (!%p5110_p3)
}
 0x162   :  { %203 = dma.hbm_to_vmem [thread:$0]  %s6495_s14, 16, %s201_s26, [#allocation24]  }
 0x163   :  { %s5250_s3 = smov [#allocation28]   ;;  %s5251_s9 = smov [#allocation31]  }
 0x164   :  { %s222_s24 = sshll.u32 %s5250_s3, 4  ;;  %s244_s18 = sshll.u32 %s5251_s9, 4  ;;  %s223_s24 = int_to_ptr.vmem [resolvable:$true] %s222_s24  ;;  %s245_s18 = int_to_ptr.vmem [resolvable:$true] %s244_s18 }
 0x165   :  { %s5114_s13 = scalar_lea.hbm %s6497_s16, 16 }
 0x166   :  { %p5115_p4 = scmp.ne.s32.totalorder %s6497_s16, %s5114_s13  ;;  %p5118_p5 = scmp.lt.u32.totalorder %s5114_s13, %s6497_s16 }
 0x168   :  { %p5120_p6 = pnand %p5118_p5, %p5115_p4 }
 0x16a   :  { %5123 = shalt.err (!%p5120_p6)
}
 0x16b   :  { %s5124_s14 = scalar_lea.vmem %s223_s24, 16  ;;  %s5128_s26 = scalar_lea.vmem %s223_s24, 32 }
 0x16c   :  { %p5125_p7 = scmp.ne.s32.totalorder %s223_s24, %s5124_s14  ;;  %p5129_p8 = scmp.lt.s32.totalorder %s223_s24, %s223_s24 }
 0x16d   :  { %p5130_p9 = scmp.lt.s32.totalorder %s5128_s26, %s5124_s14 }
 0x16f   :  { %p5131_p10 = por %p5130_p9, %p5129_p8 }
 0x171   :  { %p5132_p11 = pnand %p5131_p10, %p5125_p7 }
 0x173   :  { %5135 = shalt.err (!%p5132_p11)
}
 0x174   :  { %225 = dma.hbm_to_vmem [thread:$0]  %s6497_s16, 16, %s223_s24, [#allocation27]  }
 0x175   :  { %s6538_s29 = sld [smem:[#allocation54_spill]] }
 0x17b   :  { %s5136_s4 = scalar_lea.hbm %s6538_s29, 16 }
 0x17c   :  { %p5137_p12 = scmp.ne.s32.totalorder %s6538_s29, %s5136_s4  ;;  %p5140_p13 = scmp.lt.u32.totalorder %s5136_s4, %s6538_s29 }
 0x17e   :  { %p5142_p0 = pnand %p5140_p13, %p5137_p12 }
 0x180   :  { %5145 = shalt.err (!%p5142_p0)
}
 0x181   :  { %s5146_s2 = scalar_lea.vmem %s245_s18, 16  ;;  %s5150_s27 = scalar_lea.vmem %s245_s18, 32 }
 0x182   :  { %p5147_p1 = scmp.ne.s32.totalorder %s245_s18, %s5146_s2  ;;  %p5151_p2 = scmp.lt.s32.totalorder %s245_s18, %s245_s18 }
 0x183   :  { %p5152_p3 = scmp.lt.s32.totalorder %s5150_s27, %s5146_s2 }
 0x185   :  { %p5153_p4 = por %p5152_p3, %p5151_p2 }
 0x187   :  { %p5154_p5 = pnand %p5153_p4, %p5147_p1 }
 0x189   :  { %5157 = shalt.err (!%p5154_p5)
}
 0x18a   :  { %247 = dma.hbm_to_vmem [thread:$0]  %s6538_s29, 16, %s245_s18, [#allocation30]  }
 0x18b   :  { %s5252_s12 = smov [#allocation34]   ;;  %s6539_s9 = sld [smem:[#allocation55_spill]] }
 0x18c   :  { %s266_s8 = sshll.u32 %s5252_s12, 4  ;;  %s267_s8 = int_to_ptr.vmem [resolvable:$true] %s266_s8 }
 0x191   :  { %s5158_s7 = scalar_lea.hbm %s6539_s9, 16 }
 0x192   :  { %p5159_p6 = scmp.ne.s32.totalorder %s6539_s9, %s5158_s7  ;;  %p5162_p7 = scmp.lt.u32.totalorder %s5158_s7, %s6539_s9 }
 0x194   :  { %p5164_p8 = pnand %p5162_p7, %p5159_p6 }
 0x196   :  { %5167 = shalt.err (!%p5164_p8)
}
 0x197   :  { %s5168_s6 = scalar_lea.vmem %s267_s8, 16  ;;  %s5172_s18 = scalar_lea.vmem %s267_s8, 32 }
 0x198   :  { %p5169_p9 = scmp.ne.s32.totalorder %s267_s8, %s5168_s6  ;;  %p5173_p10 = scmp.lt.s32.totalorder %s267_s8, %s267_s8 }
 0x199   :  { %p5174_p11 = scmp.lt.s32.totalorder %s5172_s18, %s5168_s6 }
 0x19b   :  { %p5175_p12 = por %p5174_p11, %p5173_p10 }
 0x19d   :  { %p5176_p13 = pnand %p5175_p12, %p5169_p9 }
 0x19f   :  { %5179 = shalt.err (!%p5176_p13)
}
 0x1a0   :  { %269 = dma.hbm_to_vmem [thread:$0]  %s6539_s9, 16, %s267_s8, [#allocation33]  }
 0x1a1   :  { %5202 = dma.done.wait [#allocation3], 1024  }
 0x1a2   :  { %5203 = vsyncadd [#allocation3], 4294966272 }
 0x1a3   :  { %5204 = dma.done.wait [#allocation6], 1056  }
 0x1a4   :  { %5205 = vsyncadd [#allocation6], 4294966240 }
 0x1a5   :  { %5206 = dma.done.wait [#allocation9], 3088  }
 0x1a6   :  { %5207 = vsyncadd [#allocation9], 4294964208 }
 0x1a7   :  { %5208 = dma.done.wait [#allocation12], 3088  }
 0x1a8   :  { %5209 = vsyncadd [#allocation12], 4294964208 }
 0x1a9   :  { %5210 = dma.done.wait [#allocation15], 3088  }
 0x1aa   :  { %5211 = vsyncadd [#allocation15], 4294964208 }
 0x1ab   :  { %5212 = dma.done.wait [#allocation18], 3088  }
 0x1ac   :  { %5213 = vsyncadd [#allocation18], 4294964208 }
 0x1ad   :  { %5214 = dma.done.wait [#allocation21], 3088  }
 0x1ae   :  { %5215 = vsyncadd [#allocation21], 4294964208 }
 0x1af   :  { %5216 = dma.done.wait [#allocation24], 3088  }
 0x1b0   :  { %5217 = vsyncadd [#allocation24], 4294964208 }
 0x1b1   :  { %5218 = dma.done.wait [#allocation27], 3088  }
 0x1b2   :  { %5219 = vsyncadd [#allocation27], 4294964208 }
 0x1b3   :  { %5220 = dma.done.wait [#allocation30], 3088  }
 0x1b4   :  { %5221 = vsyncadd [#allocation30], 4294964208 }
 0x1b5   :  { %5222 = dma.done.wait [#allocation33], 1040  }
 0x1b6   :  { %5223 = vsyncadd [#allocation33], 4294966256  ;;  %vm473_vm0 = vcmask 1041408   ;;  %v447_v0 = vld [vmem:[#allocation7] sm:$0x3]  ;;  %v440_v2 = vld [vmem:[#allocation2 + $0x8] sm:$0xff] }
 0x1b7   :  { %v439_v1 = vld [vmem:[#allocation2] sm:$0xff]  ;;  %vm460_vm1 = vcmask 31744   ;;  %4344 = vmatprep.subr.msk.bf16.mxu0 %vm473_vm0, %v447_v0  ;;  %v475_v3 = vsel %vm473_vm0, %v447_v0, 0  ;;  %v441_v5 = vld [vmem:[#allocation2 + $0x10] sm:$0xff]  ;;  %v442_v6 = vld [vmem:[#allocation2 + $0x18] sm:$0xff]  ;;  %v5253_v38 = vmov 0  }
 0x1b8   :  { %v448_v4 = vpack.c.bf16 %v440_v2, %v439_v1  ;;  %v443_v7 = vld [vmem:[#allocation2 + $0x20] sm:$0xff]  ;;  %4079 = vmatpush3.bf16.msra.mxu0 %v475_v3  ;;  %v449_v8 = vpack.c.bf16 %v442_v6, %v441_v5  ;;  %v444_v9 = vld [vmem:[#allocation2 + $0x28] sm:$0xff]  ;;  %v445_v12 = vld [vmem:[#allocation2 + $0x30] sm:$0xff]  ;;  %778 = vmatprep.mubr.bf16.mxu1 %v5253_v38  ;;  %s5254_s26 = smov [#allocation35]  }
 0x1b9   :  { %v450_v10 = vpack.c.bf16 %v444_v9, %v443_v7  ;;  %v4374_v11 = vld [vmem:[#allocation8 + $0x4] ss:$12 sps:$4 sm:$0xff]   ;;  %v446_v13 = vld [vmem:[#allocation2 + $0x38] sm:$0xff]  ;;  %v4376_v14 = vld [vmem:[#allocation8] ss:$12 sps:$4 sm:$0xff]   ;;  %s3762_s10 = sshll.u32 %s5254_s26, 4  ;;  %s3763_s10 = int_to_ptr.vmem [resolvable:$true] %s3762_s10 }
 0x1ba   :  { %4080 = vmatprep.mubr.msk.bf16.mxu0 %vm460_vm1, %v448_v4  ;;  %746 = vmatprep.subr.bf16.mxu1 %v4374_v11  ;;  %v4377_v15 = vld [vmem:[#allocation8 + $0x8] ss:$12 sps:$4 sm:$0xff]   ;;  %v4380_v17 = vld [vmem:[#allocation8 + $0x18] ss:$12 sps:$4 sm:$0xff]   ;;  %v4381_v18 = vld [vmem:[#allocation8 + $0x20] ss:$12 sps:$4 sm:$0xff]   ;;  %v451_v19 = vpack.c.bf16 %v446_v13, %v445_v12  ;;  %p5185_p1 = scmp.lt.s32.totalorder %s3763_s10, %s3763_s10 }
 0x1bb   :  { %4081 = vmatmul.mubr.msk.bf16.vlgmr.msra.gmra.mrb[0].mxu0 %vm460_vm1, %v449_v8  ;;  %747 = vmatpush1.bf16.msra.mxu1 %v4376_v14  ;;  %v4378_v16 = vld [vmem:[#allocation8 + $0x1c] ss:$12 sps:$4 sm:$0xff]   ;;  %v4382_v20 = vld [vmem:[#allocation8 + $0x34] ss:$12 sps:$4 sm:$0xff]   ;;  %v4385_v22 = vld [vmem:[#allocation8 + $0x38] ss:$12 sps:$4 sm:$0xff]  }
 0x1bc   :  { %4084 = vmatprep.mubr.msk.bf16.mxu0 %vm460_vm1, %v450_v10  ;;  %4088 = vmatprep.subr.bf16.mxu0 %v4377_v15  ;;  %v4384_v21 = vld [vmem:[#allocation8 + $0x30] ss:$12 sps:$4 sm:$0xff]   ;;  %v4386_v23 = vld [vmem:[#allocation8 + $0x4c] ss:$12 sps:$4 sm:$0xff]   ;;  %v4388_v24 = vld [vmem:[#allocation8 + $0x48] ss:$12 sps:$4 sm:$0xff]  }
 0x1bd   :  { %4089 = vmatpush3.bf16.msra.mxu0 %v4377_v15  ;;  %748 = vmatprep.subr.bf16.mxu1 %v4378_v16  ;;  %v4389_v25 = vld [vmem:[#allocation8 + $0x50] ss:$12 sps:$4 sm:$0xff]   ;;  %v4392_v27 = vld [vmem:[#allocation8 + $0x60] ss:$12 sps:$4 sm:$0xff]   ;;  %v4393_v28 = vld [vmem:[#allocation8 + $0x68] ss:$12 sps:$4 sm:$0xff]  }
 0x1be   :  { %4090 = vmatprep.subr.bf16.mxu0 %v4381_v18  ;;  %v4390_v26 = vld [vmem:[#allocation8 + $0x64] ss:$12 sps:$4 sm:$0xff]   ;;  %v4394_v29 = vld [vmem:[#allocation8 + $0x7c] ss:$12 sps:$4 sm:$0xff]   ;;  %v4397_v31 = vld [vmem:[#allocation8 + $0x80] ss:$12 sps:$4 sm:$0xff]  }
 0x1bf   :  { %749 = vmatpush1.bf16.msra.mxu1 %v4380_v17  ;;  %v4396_v30 = vld [vmem:[#allocation8 + $0x78] ss:$12 sps:$4 sm:$0xff]   ;;  %v4398_v32 = vld [vmem:[#allocation8 + $0x94] ss:$12 sps:$4 sm:$0xff]   ;;  %v4400_v33 = vld [vmem:[#allocation8 + $0x90] ss:$12 sps:$4 sm:$0xff]  }
 0x1c0   :  { %750 = vmatprep.subr.bf16.mxu1 %v4382_v20  ;;  %v4401_v34 = vld [vmem:[#allocation8 + $0x98] ss:$12 sps:$4 sm:$0xff]   ;;  %v4404_v36 = vld [vmem:[#allocation8 + $0xa8] ss:$12 sps:$4 sm:$0xff]   ;;  %v4405_v37 = vld [vmem:[#allocation8 + $0xb0] ss:$12 sps:$4 sm:$0xff]  }
 0x1c1   :  { %4091 = vmatpush3.bf16.msra.mxu0 %v4381_v18  ;;  %v4402_v35 = vld [vmem:[#allocation8 + $0xac] ss:$12 sps:$4 sm:$0xff]   ;;  %v452_v40 = vld [vmem:[#allocation5] sm:$0xff]  ;;  %s5180_s19 = scalar_lea.vmem %s3763_s10, 1024 }
 0x1c2   :  { %4092 = vmatprep.subr.bf16.mxu0 %v4385_v22  ;;  %v454_v39 = vld [vmem:[#allocation5 + $0x10] sm:$0xff]  ;;  %v455_v42 = vld [vmem:[#allocation5 + $0x18] sm:$0xff]  ;;  %v453_v45 = vld [vmem:[#allocation5 + $0x8] sm:$0xff]  ;;  %p5181_p0 = scmp.ne.s32.totalorder %s3763_s10, %s5180_s19  ;;  %p5186_p2 = scmp.lt.s32.totalorder %s5180_s19, %s5180_s19 }
 0x1c3   :  { %4085 = vmatmul.mubr.msk.bf16.gmra.mrb[4].mxu0 %vm460_vm1, %v451_v19  ;;  %751 = vmatpush1.bf16.msra.mxu1 %v4384_v21  ;;  %v458_v55 = vld [vmem:[#allocation5 + $0x30] sm:$0xff]  ;;  %v456_v56 = vld [vmem:[#allocation5 + $0x20] sm:$0xff]  ;;  %v459_v58 = vld [vmem:[#allocation5 + $0x38] sm:$0xff] }
 0x1c4   :  { %752 = vmatprep.subr.bf16.mxu1 %v4386_v23  ;;  %v457_v61 = vld [vmem:[#allocation5 + $0x28] sm:$0xff]  ;;  %p5187_p3 = por %p5186_p2, %p5185_p1 }
 0x1c5   :  { %4093 = vmatpush3.bf16.msra.mxu0 %v4385_v22 }
 0x1c6   :  { %4094 = vmatprep.subr.bf16.mxu0 %v4389_v25  ;;  %p5188_p4 = pnand %p5187_p3, %p5181_p0 }
 0x1c7   :  { %753 = vmatpush1.bf16.msra.mxu1 %v4388_v24 }
 0x1c8   :  { %754 = vmatprep.subr.bf16.mxu1 %v4390_v26 }
 0x1c9   :  { %4095 = vmatpush3.bf16.msra.mxu0 %v4389_v25 }
 0x1ca   :  { %4096 = vmatprep.subr.bf16.mxu0 %v4393_v28 }
 0x1cb   :  { %755 = vmatpush1.bf16.msra.mxu1 %v4392_v27 }
 0x1cc   :  { %756 = vmatprep.subr.bf16.mxu1 %v4394_v29 }
 0x1cd   :  { %4097 = vmatpush3.bf16.msra.mxu0 %v4393_v28 }
 0x1ce   :  { %4098 = vmatprep.subr.bf16.mxu0 %v4397_v31 }
 0x1cf   :  { %757 = vmatpush1.bf16.msra.mxu1 %v4396_v30 }
 0x1d0   :  { %758 = vmatprep.subr.bf16.mxu1 %v4398_v32 }
 0x1d1   :  { %4099 = vmatpush3.bf16.msra.mxu0 %v4397_v31 }
 0x1d2   :  { %4100 = vmatprep.subr.bf16.mxu0 %v4401_v34 }
 0x1d3   :  { %759 = vmatpush1.bf16.msra.mxu1 %v4400_v33 }
 0x1d4   :  { %760 = vmatprep.subr.bf16.mxu1 %v4402_v35 }
 0x1d5   :  { %4101 = vmatpush3.bf16.msra.mxu0 %v4401_v34 }
 0x1d6   :  { %4102 = vmatprep.subr.bf16.mxu0 %v4405_v37 }
 0x1d7   :  { %761 = vmatpush1.bf16.msra.mxu1 %v4404_v36 }
 0x1d9   :  { %4103 = vmatpush3.bf16.msra.mxu0 %v4405_v37 }
 0x28e   :  { %v4082_v41 = vpop.f32.mrb[0].mxu0 }
 0x28f   :  { %v5687_v43 = vadd.f32 %v4082_v41, %v454_v39  ;;  %v511_v44 = vpop.f32.mrb[1].mxu0 }
 0x290   :  { %v5689_v46 = vadd.f32 %v511_v44, %v452_v40  ;;  %v4083_v47 = vpop.f32.mrb[2].mxu0 }
 0x291   :  { %v552_v48 = vmul.f32 0.70710677, %v5687_v43  ;;  %v5692_v49 = vadd.f32 %v4083_v47, %v455_v42  ;;  %v514_v50 = vpop.f32.mrb[3].mxu0  ;;  %v544_v18 = vmul.f32 0.5, %v5687_v43  ;;  %v4406_v47 = vld [vmem:[#allocation11] ss:$12 sps:$4 sm:$0xff]  }
 0x292   :  { %v550_v51 = vmul.f32 0.70710677, %v5689_v46  ;;  %v5695_v52 = vadd.f32 %v514_v50, %v453_v45  ;;  %v542_v15 = vmul.f32 0.5, %v5689_v46  ;;  %v4408_v45 = vld [vmem:[#allocation11 + $0x4] ss:$12 sps:$4 sm:$0xff]  }
 0x293   :  { %4590 = verf.f32 %v552_v48  ;;  %v553_v53 = vmul.f32 0.70710677, %v5692_v49  ;;  %v545_v13 = vmul.f32 0.5, %v5692_v49  ;;  %v4409_v48 = vld [vmem:[#allocation11 + $0x8] ss:$12 sps:$4 sm:$0xff]   ;;  %1217 = vmatprep.subr.bf16.mxu1 %v4408_v45 }
 0x294   :  { %4592 = verf.f32 %v550_v51  ;;  %v551_v54 = vmul.f32 0.70710677, %v5695_v52  ;;  %v543_v16 = vmul.f32 0.5, %v5695_v52  ;;  %4112 = vmatprep.subr.bf16.mxu0 %v4409_v48  ;;  %v4412_v50 = vld [vmem:[#allocation11 + $0x1c] ss:$12 sps:$4 sm:$0xff]  }
 0x295   :  { %4594 = verf.f32 %v553_v53  ;;  %v4410_v51 = vld [vmem:[#allocation11 + $0x18] ss:$12 sps:$4 sm:$0xff]   ;;  %v4413_v53 = vld [vmem:[#allocation11 + $0x20] ss:$12 sps:$4 sm:$0xff]  }
 0x296   :  { %4596 = verf.f32 %v551_v54  ;;  %v4086_v57 = vpop.f32.mrb[4].mxu0  ;;  %v4416_v54 = vld [vmem:[#allocation11 + $0x34] ss:$12 sps:$4 sm:$0xff]  }
 0x297   :  { %v5699_v59 = vadd.f32 %v4086_v57, %v458_v55  ;;  %v527_v60 = vpop.f32.mrb[5].mxu0  ;;  %v4414_v55 = vld [vmem:[#allocation11 + $0x30] ss:$12 sps:$4 sm:$0xff]   ;;  %v4420_v57 = vld [vmem:[#allocation11 + $0x4c] ss:$12 sps:$4 sm:$0xff]  }
 0x298   :  { %v5701_v62 = vadd.f32 %v527_v60, %v456_v56  ;;  %v4087_v63 = vpop.f32.mrb[6].mxu0  ;;  %v4417_v56 = vld [vmem:[#allocation11 + $0x38] ss:$12 sps:$4 sm:$0xff]   ;;  %v4421_v60 = vld [vmem:[#allocation11 + $0x50] ss:$12 sps:$4 sm:$0xff]  }
 0x299   :  { %v556_v0 = vmul.f32 0.70710677, %v5699_v59  ;;  %v5704_v1 = vadd.f32 %v4087_v63, %v459_v58  ;;  %v530_v2 = vpop.f32.mrb[7].mxu0  ;;  %v548_v36 = vmul.f32 0.5, %v5699_v59  ;;  %v4418_v58 = vld [vmem:[#allocation11 + $0x48] ss:$12 sps:$4 sm:$0xff]  }
 0x29a   :  { %v554_v3 = vmul.f32 0.70710677, %v5701_v62  ;;  %v5707_v4 = vadd.f32 %v530_v2, %v457_v61  ;;  %v546_v33 = vmul.f32 0.5, %v5701_v62  ;;  %v4422_v61 = vld [vmem:[#allocation11 + $0x60] ss:$12 sps:$4 sm:$0xff]  }
 0x29b   :  { %4598 = verf.f32 %v556_v0  ;;  %v557_v5 = vmul.f32 0.70710677, %v5704_v1  ;;  %v549_v30 = vmul.f32 0.5, %v5704_v1  ;;  %v4424_v63 = vld [vmem:[#allocation11 + $0x64] ss:$12 sps:$4 sm:$0xff]  }
 0x29c   :  { %4600 = verf.f32 %v554_v3  ;;  %v555_v6 = vmul.f32 0.70710677, %v5707_v4  ;;  %v547_v34 = vmul.f32 0.5, %v5707_v4  ;;  %v4425_v0 = vld [vmem:[#allocation11 + $0x68] ss:$12 sps:$4 sm:$0xff]  }
 0x29d   :  { %v4591_v7 = vpop.eup %4590  ;;  %4602 = verf.f32 %v557_v5  ;;  %v4428_v2 = vld [vmem:[#allocation11 + $0x7c] ss:$12 sps:$4 sm:$0xff]   ;;  %v4429_v3 = vld [vmem:[#allocation11 + $0x80] ss:$12 sps:$4 sm:$0xff]   ;;  %v4426_v5 = vld [vmem:[#allocation11 + $0x78] ss:$12 sps:$4 sm:$0xff]  }
 0x29e   :  { %v4593_v8 = vpop.eup %4592  ;;  %4604 = verf.f32 %v555_v6  ;;  %v568_v12 = vadd.f32 1.0, %v4591_v7  ;;  %v4432_v6 = vld [vmem:[#allocation11 + $0x94] ss:$12 sps:$4 sm:$0xff]   ;;  %v4433_v7 = vld [vmem:[#allocation11 + $0x98] ss:$12 sps:$4 sm:$0xff]  }
 0x29f   :  { %v4595_v9 = vpop.eup %4594  ;;  %v566_v10 = vadd.f32 1.0, %v4593_v8  ;;  %v4430_v8 = vld [vmem:[#allocation11 + $0x90] ss:$12 sps:$4 sm:$0xff]  }
 0x2a0   :  { %v4597_v11 = vpop.eup %4596  ;;  %v569_v14 = vadd.f32 1.0, %v4595_v9  ;;  %v576_v22 = vmul.f32 %v568_v12, %v544_v18  ;;  %v4436_v9 = vld [vmem:[#allocation11 + $0xac] ss:$12 sps:$4 sm:$0xff]   ;;  %v334_v12 = vlaneseq }
 0x2a1   :  { %v567_v17 = vadd.f32 1.0, %v4597_v11  ;;  %v574_v20 = vmul.f32 %v566_v10, %v542_v15  ;;  %v4437_v10 = vld [vmem:[#allocation11 + $0xb0] ss:$12 sps:$4 sm:$0xff]   ;;  %v4434_v11 = vld [vmem:[#allocation11 + $0xa8] ss:$12 sps:$4 sm:$0xff]  }
 0x2a2   :  { %v577_v19 = vmul.f32 %v569_v14, %v545_v13  ;;  %v5723_v13 = vshrl.u32 %v334_v12, 7 }
 0x2a3   :  { %v575_v21 = vmul.f32 %v567_v17, %v543_v16 }
 0x2a4   :  { %v615_v26 = vpack.c.bf16 %v577_v19, %v576_v22  ;;  %v336_v14 = vadd.s32 8, %v5723_v13  ;;  %vm900_vm3 = vcmp.lt.s32.totalorder %v5723_v13, 1  ;;  %vm949_vm4 = vcmp.lt.s32.totalorder %v5723_v13, 7 }
 0x2a5   :  { %v4599_v23 = vpop.eup %4598  ;;  %v614_v24 = vpack.c.bf16 %v575_v21, %v574_v20  ;;  %v337_v21 = vadd.s32 16, %v5723_v13 }
 0x2a6   :  { %v4601_v25 = vpop.eup %4600  ;;  %v572_v31 = vadd.f32 1.0, %v4599_v23  ;;  %v5726_v15 = vand.u32 7, %v336_v14 }
 0x2a7   :  { %v4603_v27 = vpop.eup %4602  ;;  %779 = vmatmul.mubr.bf16.vlgmr.msra.gmra.mrb[0].mxu1 %v614_v24  ;;  %4104 = vmatprep.mubr.bf16.mxu0 %v614_v24  ;;  %v570_v28 = vadd.f32 1.0, %v4601_v25 }
 0x2a8   :  { %v4605_v29 = vpop.eup %4604  ;;  %4105 = vmatmul.mubr.bf16.vlgmr.msra.gmra.mrb[8].mxu0 %v615_v26  ;;  %788 = vmatprep.mubr.bf16.mxu1 %v5253_v38  ;;  %v573_v32 = vadd.f32 1.0, %v4603_v27  ;;  %v580_v41 = vmul.f32 %v572_v31, %v548_v36  ;;  %vm885_vm2 = vcmp.ge.s32.totalorder %v5726_v15, 1  ;;  %vm934_vm5 = vcmp.lt.s32.totalorder %v5726_v15, 7 }
 0x2a9   :  { %v571_v35 = vadd.f32 1.0, %v4605_v29  ;;  %v578_v39 = vmul.f32 %v570_v28, %v546_v33  ;;  %1218 = vmatpush1.bf16.msra.mxu1 %v4406_v47  ;;  %4113 = vmatpush3.bf16.msra.mxu0 %v4409_v48 }
 0x2aa   :  { %v581_v37 = vmul.f32 %v573_v32, %v549_v30  ;;  %1219 = vmatprep.subr.bf16.mxu1 %v4412_v50  ;;  %4114 = vmatprep.subr.bf16.mxu0 %v4413_v53 }
 0x2ab   :  { %v579_v40 = vmul.f32 %v571_v35, %v547_v34  ;;  %v5748_v34 = vand.u32 7, %v337_v21 }
 0x2ac   :  { %v617_v44 = vpack.c.bf16 %v581_v37, %v580_v41 }
 0x2ad   :  { %v616_v42 = vpack.c.bf16 %v579_v40, %v578_v39  ;;  %1220 = vmatpush1.bf16.msra.mxu1 %v4410_v51  ;;  %4115 = vmatpush3.bf16.msra.mxu0 %v4413_v53  ;;  %vm886_vm6 = vcmp.ge.s32.totalorder %v5748_v34, 1  ;;  %vm935_vm7 = vcmp.lt.s32.totalorder %v5748_v34, 7  ;;  %v339_v53 = vadd.s32 32, %v5723_v13 }
 0x2ae   :  { %1221 = vmatprep.subr.bf16.mxu1 %v4416_v54  ;;  %4116 = vmatprep.subr.bf16.mxu0 %v4417_v56 }
 0x2af   :  { %789 = vmatmul.mubr.bf16.gmra.mrb[4].mxu1 %v615_v26  ;;  %4108 = vmatprep.mubr.bf16.mxu0 %v616_v42  ;;  %v338_v26 = vadd.s32 24, %v5723_v13  ;;  %v5786_v14 = vand.u32 7, %v339_v53 }
 0x2b0   :  { %4109 = vmatmul.mubr.bf16.gmra.mrb[12].mxu0 %v617_v44  ;;  %798 = vmatprep.mubr.bf16.mxu1 %v5253_v38 }
 0x2b1   :  { %1222 = vmatpush1.bf16.msra.mxu1 %v4414_v55  ;;  %4117 = vmatpush3.bf16.msra.mxu0 %v4417_v56  ;;  %v5758_v40 = vand.u32 7, %v338_v26  ;;  %vm888_vm10 = vcmp.ge.s32.totalorder %v5786_v14, 1  ;;  %vm937_vm11 = vcmp.lt.s32.totalorder %v5786_v14, 7 }
 0x2b2   :  { %1223 = vmatprep.subr.bf16.mxu1 %v4420_v57  ;;  %4118 = vmatprep.subr.bf16.mxu0 %v4421_v60 }
 0x2b3   :  { %vm887_vm8 = vcmp.ge.s32.totalorder %v5758_v40, 1  ;;  %vm936_vm9 = vcmp.lt.s32.totalorder %v5758_v40, 7 }
 0x2b5   :  { %1224 = vmatpush1.bf16.msra.mxu1 %v4418_v58  ;;  %4119 = vmatpush3.bf16.msra.mxu0 %v4421_v60 }
 0x2b6   :  { %1225 = vmatprep.subr.bf16.mxu1 %v4424_v63  ;;  %4120 = vmatprep.subr.bf16.mxu0 %v4425_v0 }
 0x2b7   :  { %799 = vmatmul.mubr.bf16.gmra.mrb[8].mxu1 %v616_v42 }
 0x2b8   :  { %808 = vmatprep.mubr.bf16.mxu1 %v5253_v38 }
 0x2b9   :  { %1226 = vmatpush1.bf16.msra.mxu1 %v4422_v61  ;;  %4121 = vmatpush3.bf16.msra.mxu0 %v4425_v0 }
 0x2ba   :  { %1227 = vmatprep.subr.bf16.mxu1 %v4428_v2  ;;  %4122 = vmatprep.subr.bf16.mxu0 %v4429_v3  ;;  %v340_v2 = vadd.s32 40, %v5723_v13 }
 0x2bd   :  { %1228 = vmatpush1.bf16.msra.mxu1 %v4426_v5  ;;  %4123 = vmatpush3.bf16.msra.mxu0 %v4429_v3 }
 0x2be   :  { %1229 = vmatprep.subr.bf16.mxu1 %v4432_v6  ;;  %4124 = vmatprep.subr.bf16.mxu0 %v4433_v7 }
 0x2bf   :  { %809 = vmatmul.mubr.bf16.gmra.mrb[12].mxu1 %v617_v44 }
 0x2c0   :  { %1249 = vmatprep.mubr.bf16.mxu1 %v5253_v38 }
 0x2c1   :  { %1230 = vmatpush1.bf16.msra.mxu1 %v4430_v8  ;;  %4125 = vmatpush3.bf16.msra.mxu0 %v4433_v7 }
 0x2c2   :  { %1231 = vmatprep.subr.bf16.mxu1 %v4436_v9  ;;  %4126 = vmatprep.subr.bf16.mxu0 %v4437_v10 }
 0x2c5   :  { %1232 = vmatpush1.bf16.msra.mxu1 %v4434_v11  ;;  %4127 = vmatpush3.bf16.msra.mxu0 %v4437_v10 }
 0x37a   :  { %v5728_v16 = vpop.f32.mrb[0].mxu1 }
 0x37b   :  { %v5730_v17 = vpop.f32.mrb[1].mxu1  ;;  %v4106_v18 = vpop.f32.mrb[8].mxu0  ;;  %v892_v22 = vrot.slane %v5728_v16, 7 }
 0x37c   :  { %v784_v19 = vpop.f32.mrb[2].mxu1  ;;  %v5732_v20 = vpop.f32.mrb[9].mxu0  ;;  %v943_v27 = vrot.slane %v4106_v18, 1  ;;  %v5788_v18 = vld [vmem:[#allocation10] ss:$0 sm:$0xff] }
 0x37d   :  { %v893_v23 = vrot.slane %v784_v19, 7  ;;  %v786_v24 = vpop.f32.mrb[3].mxu1  ;;  %v4107_v25 = vpop.f32.mrb[10].mxu0  ;;  %v941_v30 = vrot.slane %v5732_v20, 1 }
 0x37e   :  { %v944_v28 = vrot.slane %v4107_v25, 1  ;;  %v856_v29 = vpop.f32.mrb[11].mxu0 }
 0x37f   :  { %v907_v31 = vsel %vm900_vm3, %v892_v22, %v893_v23  ;;  %v942_v32 = vrot.slane %v856_v29, 1 }
 0x380   :  { %v926_v33 = vsel %vm885_vm2, %v907_v31, 0.0  ;;  %v954_v35 = vsel %vm949_vm4, %v943_v27, %v944_v28  ;;  %v5804_v31 = vand.u32 7, %v340_v2 }
 0x381   :  { %v983_v36 = vadd.f32 %v926_v33, %v786_v24  ;;  %v955_v37 = vsel %vm949_vm4, %v942_v32, %v943_v27  ;;  %v5756_v39 = vsel %vm949_vm4, %v941_v30, %v942_v32  ;;  %v976_v3 = vsel %vm935_vm7, %v954_v35, 0.0 }
 0x382   :  { %v975_v41 = vsel %vm934_vm5, %v955_v37, 0.0  ;;  %v790_v42 = vpop.f32.mrb[4].mxu1  ;;  %v341_v32 = vadd.s32 48, %v5723_v13  ;;  %vm6517_vm12 = vcmp.ge.s32.totalorder %v5804_v31, 1  ;;  %vm6516_vm13 = vcmp.lt.s32.totalorder %v5804_v31, 7 }
 0x383   :  { %v5762_v44 = vadd.f32 %v983_v36, %v975_v41  ;;  %v894_v45 = vrot.slane %v790_v42, 7  ;;  %v792_v47 = vpop.f32.mrb[5].mxu1  ;;  %v4110_v48 = vpop.f32.mrb[12].mxu0  ;;  %v342_v42 = vadd.s32 56, %v5723_v13 }
 0x384   :  { %v794_v50 = vpop.f32.mrb[6].mxu1  ;;  %v869_v51 = vpop.f32.mrb[13].mxu0  ;;  %v947_v61 = vrot.slane %v4110_v48, 1 }
 0x385   :  { %v906_v54 = vsel %vm900_vm3, %v893_v23, %v894_v45  ;;  %v895_v55 = vrot.slane %v794_v50, 7  ;;  %v945_v56 = vrot.slane %v869_v51, 1  ;;  %v796_v57 = vpop.f32.mrb[7].mxu1  ;;  %v4111_v58 = vpop.f32.mrb[14].mxu0  ;;  %v5821_v51 = vand.u32 7, %v341_v32 }
 0x386   :  { %v927_v60 = vsel %vm886_vm6, %v906_v54, 0.0  ;;  %v948_v63 = vrot.slane %v4111_v58, 1  ;;  %v872_v0 = vpop.f32.mrb[15].mxu0  ;;  %v5828_v58 = vand.u32 7, %v342_v42 }
 0x387   :  { %v984_v5 = vadd.f32 %v927_v60, %v792_v47  ;;  %v905_v6 = vsel %vm900_vm3, %v894_v45, %v895_v55  ;;  %v953_v8 = vsel %vm949_vm4, %v944_v28, %v945_v56  ;;  %v946_v9 = vrot.slane %v872_v0, 1 }
 0x388   :  { %v928_v7 = vsel %vm887_vm8, %v905_v6, 0.0  ;;  %v5784_v10 = vsel %vm949_vm4, %v947_v61, %v948_v63  ;;  %v977_v19 = vsel %vm936_vm9, %v953_v8, 0.0  ;;  %v5798_v24 = vsel %vm949_vm4, %v948_v63, %v941_v30 }
 0x389   :  { %v992_v11 = vadd.f32 %v984_v5, %v976_v3  ;;  %v985_v12 = vadd.f32 %v928_v7, %v796_v57  ;;  %v952_v21 = vsel %vm949_vm4, %v945_v56, %v946_v9  ;;  %v951_v23 = vsel %vm949_vm4, %v946_v9, %v947_v61 }
 0x38a   :  { %v800_v20 = vpop.f32.mrb[8].mxu1  ;;  %v978_v48 = vsel %vm937_vm11, %v952_v21, 0.0  ;;  %v979_v61 = vsel %vm6516_vm13, %v951_v23, 0.0  ;;  %vm890_vm14 = vcmp.ge.s32.totalorder %v5821_v51, 1  ;;  %vm939_vm15 = vcmp.lt.s32.totalorder %v5821_v51, 7 }
 0x38b   :  { %v5801_v25 = vadd.f32 %v5788_v18, %v992_v11  ;;  %v993_v26 = vadd.f32 %v985_v12, %v977_v19  ;;  %v896_v27 = vrot.slane %v800_v20, 7  ;;  %v802_v28 = vpop.f32.mrb[9].mxu1  ;;  %vm891_vm1 = vcmp.ge.s32.totalorder %v5828_v58, 1 }
 0x38c   :  { %v804_v29 = vpop.f32.mrb[10].mxu1  ;;  %v1006_v5 = vadd.f32 %v5788_v18, %v5762_v44  ;;  %v980_v23 = vsel %vm939_vm15, %v5784_v10, 0.0 }
 0x38d   :  { %v1023_v33 = vmul.f32 0.70710677, %v5801_v25  ;;  %v1008_v35 = vadd.f32 %v5788_v18, %v993_v26  ;;  %v904_v30 = vsel %vm900_vm3, %v895_v55, %v896_v27  ;;  %v806_v36 = vpop.f32.mrb[11].mxu1  ;;  %v897_v41 = vrot.slane %v804_v29, 7 }
 0x38e   :  { %v929_v37 = vsel %vm888_vm10, %v904_v30, 0.0  ;;  %v5826_v55 = vand.u32 7, %v5723_v13  ;;  %v1022_v29 = vmul.f32 0.70710677, %v1006_v5 }
 0x38f   :  { %4606 = verf.f32 %v1023_v33  ;;  %v1024_v45 = vmul.f32 0.70710677, %v1008_v35  ;;  %v986_v47 = vadd.f32 %v929_v37, %v802_v28  ;;  %v903_v50 = vsel %vm900_vm3, %v896_v27, %v897_v41 }
 0x390   :  { %v930_v54 = vsel %vm6517_vm12, %v903_v50, 0.0  ;;  %vm884_vm0 = vcmp.ge.s32.totalorder %v5826_v55, 1  ;;  %vm933_vm13 = vcmp.lt.s32.totalorder %v5826_v55, 7  ;;  %vm940_vm12 = vcmp.lt.s32.totalorder %v5828_v58, 7 }
 0x391   :  { %4608 = verf.f32 %v1024_v45  ;;  %v994_v53 = vadd.f32 %v986_v47, %v978_v48  ;;  %v987_v56 = vadd.f32 %v930_v54, %v806_v36  ;;  %v974_v33 = vsel %vm933_vm13, %v5756_v39, 0.0 }
 0x392   :  { %v810_v57 = vpop.f32.mrb[12].mxu1  ;;  %v981_v10 = vsel %vm940_vm12, %v5798_v24, 0.0  ;;  %v1015_v45 = vmul.f32 0.5, %v5801_v25  ;;  %v1016_v47 = vmul.f32 0.5, %v1008_v35 }
 0x393   :  { %v1009_v60 = vadd.f32 %v5788_v18, %v994_v53  ;;  %v898_v63 = vrot.slane %v810_v57, 7  ;;  %v812_v0 = vpop.f32.mrb[13].mxu1  ;;  %v995_v2 = vadd.f32 %v987_v56, %v979_v61 }
 0x394   :  { %v814_v3 = vpop.f32.mrb[14].mxu1 }
 0x395   :  { %v1025_v6 = vmul.f32 0.70710677, %v1009_v60  ;;  %v902_v7 = vsel %vm900_vm3, %v897_v41, %v898_v63  ;;  %v899_v8 = vrot.slane %v814_v3, 7  ;;  %v816_v9 = vpop.f32.mrb[15].mxu1  ;;  %v1010_v11 = vadd.f32 %v5788_v18, %v995_v2 }
 0x396   :  { %v931_v12 = vsel %vm890_vm14, %v902_v7, 0.0  ;;  %v1017_v25 = vmul.f32 0.5, %v1009_v60 }
 0x397   :  { %4610 = verf.f32 %v1025_v6  ;;  %v988_v19 = vadd.f32 %v931_v12, %v812_v0  ;;  %v908_v44 = vsel %vm900_vm3, %v899_v8, %v892_v22  ;;  %v901_v20 = vsel %vm900_vm3, %v898_v63, %v899_v8 }
 0x398   :  { %v1026_v21 = vmul.f32 0.70710677, %v1010_v11  ;;  %v925_v26 = vsel %vm884_vm0, %v908_v44, 0.0  ;;  %v932_v27 = vsel %vm891_vm1, %v901_v20, 0.0  ;;  %v1018_v35 = vmul.f32 0.5, %v1010_v11 }
 0x399   :  { %v4607_v28 = vpop.eup %4606  ;;  %v996_v16 = vadd.f32 %v988_v19, %v980_v23  ;;  %v982_v32 = vadd.f32 %v925_v26, %v5730_v17  ;;  %v989_v22 = vadd.f32 %v932_v27, %v816_v9  ;;  %v1014_v20 = vmul.f32 0.5, %v1006_v5  ;;  %v4440_v5 = vld [vmem:[#allocation14 + $0x4] ss:$12 sps:$4 sm:$0xff]  }
 0x39a   :  { %v1039_v30 = vadd.f32 1.0, %v4607_v28  ;;  %4612 = verf.f32 %v1026_v21  ;;  %1646 = vmatprep.subr.bf16.mxu1 %v4440_v5 }
 0x39b   :  { %v4609_v36 = vpop.eup %4608  ;;  %v1011_v37 = vadd.f32 %v5788_v18, %v996_v16  ;;  %v990_v41 = vadd.f32 %v982_v32, %v974_v33  ;;  %v997_v42 = vadd.f32 %v989_v22, %v981_v10  ;;  %4614 = verf.f32 %v1022_v29  ;;  %v4438_v33 = vld [vmem:[#allocation14] ss:$12 sps:$4 sm:$0xff]   ;;  %v4444_v10 = vld [vmem:[#allocation14 + $0x1c] ss:$12 sps:$4 sm:$0xff]  }
 0x39c   :  { %v1040_v17 = vadd.f32 1.0, %v4609_v36  ;;  %v1047_v53 = vmul.f32 %v1039_v30, %v1015_v45  ;;  %v4441_v30 = vld [vmem:[#allocation14 + $0x8] ss:$12 sps:$4 sm:$0xff]   ;;  %v4442_v36 = vld [vmem:[#allocation14 + $0x18] ss:$12 sps:$4 sm:$0xff]  }
 0x39d   :  { %v1027_v48 = vmul.f32 0.70710677, %v1011_v37  ;;  %v1005_v50 = vadd.f32 %v5788_v18, %v990_v41  ;;  %v1012_v39 = vadd.f32 %v5788_v18, %v997_v42  ;;  %v1019_v26 = vmul.f32 0.5, %v1011_v37  ;;  %4136 = vmatprep.subr.bf16.mxu0 %v4441_v30  ;;  %v4445_v37 = vld [vmem:[#allocation14 + $0x20] ss:$12 sps:$4 sm:$0xff]  }
 0x39e   :  { %v1048_v54 = vmul.f32 %v1040_v17, %v1016_v47  ;;  %v4448_v41 = vld [vmem:[#allocation14 + $0x34] ss:$12 sps:$4 sm:$0xff]   ;;  %v4446_v42 = vld [vmem:[#allocation14 + $0x30] ss:$12 sps:$4 sm:$0xff]   ;;  %v4449_v45 = vld [vmem:[#allocation14 + $0x38] ss:$12 sps:$4 sm:$0xff]  }
 0x39f   :  { %4616 = verf.f32 %v1027_v48  ;;  %v1021_v56 = vmul.f32 0.70710677, %v1005_v50  ;;  %v1028_v57 = vmul.f32 0.70710677, %v1012_v39  ;;  %v1013_v21 = vmul.f32 0.5, %v1005_v50 }
 0x3a0   :  { %v1086_v24 = vpack.c.bf16 %v1048_v54, %v1047_v53  ;;  %v1020_v27 = vmul.f32 0.5, %v1012_v39  ;;  %v4452_v47 = vld [vmem:[#allocation14 + $0x4c] ss:$12 sps:$4 sm:$0xff]   ;;  %v4450_v17 = vld [vmem:[#allocation14 + $0x48] ss:$12 sps:$4 sm:$0xff]  }
 0x3a1   :  { %v4611_v61 = vpop.eup %4610  ;;  %4618 = verf.f32 %v1021_v56  ;;  %v4453_v48 = vld [vmem:[#allocation14 + $0x50] ss:$12 sps:$4 sm:$0xff]   ;;  %v4457_v39 = vld [vmem:[#allocation14 + $0x68] ss:$12 sps:$4 sm:$0xff]   ;;  %v4454_v53 = vld [vmem:[#allocation14 + $0x60] ss:$12 sps:$4 sm:$0xff]  }
 0x3a2   :  { %4620 = verf.f32 %v1028_v57  ;;  %v1041_v63 = vadd.f32 1.0, %v4611_v61  ;;  %v4456_v50 = vld [vmem:[#allocation14 + $0x64] ss:$12 sps:$4 sm:$0xff]   ;;  %v4460_v54 = vld [vmem:[#allocation14 + $0x7c] ss:$12 sps:$4 sm:$0xff]  }
 0x3a3   :  { %v4461_v56 = vld [vmem:[#allocation14 + $0x80] ss:$12 sps:$4 sm:$0xff]   ;;  %v4465_v61 = vld [vmem:[#allocation14 + $0x98] ss:$12 sps:$4 sm:$0xff]  }
 0x3a4   :  { %v4613_v0 = vpop.eup %4612  ;;  %v1049_v6 = vmul.f32 %v1041_v63, %v1017_v25  ;;  %v4464_v57 = vld [vmem:[#allocation14 + $0x94] ss:$12 sps:$4 sm:$0xff]   ;;  %v4462_v63 = vld [vmem:[#allocation14 + $0x90] ss:$12 sps:$4 sm:$0xff]  }
 0x3a5   :  { %v1042_v2 = vadd.f32 1.0, %v4613_v0  ;;  %v4615_v3 = vpop.eup %4614  ;;  %v4468_v0 = vld [vmem:[#allocation14 + $0xac] ss:$12 sps:$4 sm:$0xff]   ;;  %v4469_v25 = vld [vmem:[#allocation14 + $0xb0] ss:$12 sps:$4 sm:$0xff]  }
 0x3a6   :  { %v1038_v18 = vadd.f32 1.0, %v4615_v3 }
 0x3a7   :  { %v1050_v7 = vmul.f32 %v1042_v2, %v1018_v35  ;;  %v4466_v35 = vld [vmem:[#allocation14 + $0xa8] ss:$12 sps:$4 sm:$0xff]  }
 0x3a8   :  { %v1046_v29 = vmul.f32 %v1038_v18, %v1014_v20 }
 0x3a9   :  { %v4617_v8 = vpop.eup %4616  ;;  %v1087_v9 = vpack.c.bf16 %v1050_v7, %v1049_v6 }
 0x3aa   :  { %v1043_v19 = vadd.f32 1.0, %v4617_v8 }
 0x3ab   :  { %v4619_v12 = vpop.eup %4618 }
 0x3ac   :  { %v4621_v44 = vpop.eup %4620  ;;  %v1037_v23 = vadd.f32 1.0, %v4619_v12  ;;  %v1051_v60 = vmul.f32 %v1043_v19, %v1019_v26 }
 0x3ad   :  { %v1044_v28 = vadd.f32 1.0, %v4621_v44 }
 0x3ae   :  { %v1045_v16 = vmul.f32 %v1037_v23, %v1013_v21 }
 0x3af   :  { %v1052_v11 = vmul.f32 %v1044_v28, %v1020_v27 }
 0x3b0   :  { %v1085_v32 = vpack.c.bf16 %v1046_v29, %v1045_v16 }
 0x3b1   :  { %v1088_v22 = vpack.c.bf16 %v1052_v11, %v1051_v60 }
 0x3b2   :  { %1250 = vmatmul.mubr.bf16.vlgmr.msra.gmra.mrb[16].mxu1 %v1085_v32  ;;  %4128 = vmatprep.mubr.bf16.mxu0 %v1085_v32 }
 0x3b3   :  { %4129 = vmatmul.mubr.bf16.vlgmr.msra.gmra.mrb[16].mxu0 %v1086_v24  ;;  %1259 = vmatprep.mubr.bf16.mxu1 %v5253_v38 }
 0x3b4   :  { %4132 = vmatprep.mubr.bf16.mxu0 %v1087_v9  ;;  %1647 = vmatpush1.bf16.msra.mxu1 %v4438_v33 }
 0x3b5   :  { %4137 = vmatpush3.bf16.msra.mxu0 %v4441_v30  ;;  %1648 = vmatprep.subr.bf16.mxu1 %v4444_v10 }
 0x3b6   :  { %4138 = vmatprep.subr.bf16.mxu0 %v4445_v37 }
 0x3b8   :  { %1649 = vmatpush1.bf16.msra.mxu1 %v4442_v36 }
 0x3b9   :  { %4139 = vmatpush3.bf16.msra.mxu0 %v4445_v37  ;;  %1650 = vmatprep.subr.bf16.mxu1 %v4448_v41 }
 0x3ba   :  { %1260 = vmatmul.mubr.bf16.gmra.mrb[20].mxu1 %v1086_v24  ;;  %4140 = vmatprep.subr.bf16.mxu0 %v4449_v45  ;;  %v4458_v24 = vld [vmem:[#allocation14 + $0x78] ss:$12 sps:$4 sm:$0xff]  }
 0x3bb   :  { %4133 = vmatmul.mubr.bf16.gmra.mrb[20].mxu0 %v1088_v22  ;;  %1269 = vmatprep.mubr.bf16.mxu1 %v5253_v38 }
 0x3bc   :  { %1651 = vmatpush1.bf16.msra.mxu1 %v4446_v42 }
 0x3bd   :  { %4141 = vmatpush3.bf16.msra.mxu0 %v4449_v45  ;;  %1652 = vmatprep.subr.bf16.mxu1 %v4452_v47 }
 0x3be   :  { %4142 = vmatprep.subr.bf16.mxu0 %v4453_v48 }
 0x3c0   :  { %1653 = vmatpush1.bf16.msra.mxu1 %v4450_v17 }
 0x3c1   :  { %4143 = vmatpush3.bf16.msra.mxu0 %v4453_v48  ;;  %1654 = vmatprep.subr.bf16.mxu1 %v4456_v50 }
 0x3c2   :  { %1270 = vmatmul.mubr.bf16.gmra.mrb[24].mxu1 %v1087_v9  ;;  %4144 = vmatprep.subr.bf16.mxu0 %v4457_v39 }
 0x3c3   :  { %1279 = vmatprep.mubr.bf16.mxu1 %v5253_v38 }
 0x3c4   :  { %1655 = vmatpush1.bf16.msra.mxu1 %v4454_v53 }
 0x3c5   :  { %4145 = vmatpush3.bf16.msra.mxu0 %v4457_v39  ;;  %1656 = vmatprep.subr.bf16.mxu1 %v4460_v54 }
 0x3c6   :  { %4146 = vmatprep.subr.bf16.mxu0 %v4461_v56 }
 0x3c8   :  { %1657 = vmatpush1.bf16.msra.mxu1 %v4458_v24 }
 0x3c9   :  { %4147 = vmatpush3.bf16.msra.mxu0 %v4461_v56  ;;  %1658 = vmatprep.subr.bf16.mxu1 %v4464_v57 }
 0x3ca   :  { %1280 = vmatmul.mubr.bf16.gmra.mrb[28].mxu1 %v1088_v22  ;;  %4148 = vmatprep.subr.bf16.mxu0 %v4465_v61 }
 0x3cb   :  { %1678 = vmatprep.mubr.bf16.mxu1 %v5253_v38 }
 0x3cc   :  { %1659 = vmatpush1.bf16.msra.mxu1 %v4462_v63 }
 0x3cd   :  { %4149 = vmatpush3.bf16.msra.mxu0 %v4465_v61  ;;  %1660 = vmatprep.subr.bf16.mxu1 %v4468_v0 }
 0x3ce   :  { %4150 = vmatprep.subr.bf16.mxu0 %v4469_v25 }
 0x3d0   :  { %1661 = vmatpush1.bf16.msra.mxu1 %v4466_v35 }
 0x3d1   :  { %4151 = vmatpush3.bf16.msra.mxu0 %v4469_v25 }
 0x485   :  { %v5874_v2 = vpop.f32.mrb[16].mxu1 }
 0x486   :  { %v5876_v3 = vpop.f32.mrb[17].mxu1  ;;  %v4130_v6 = vpop.f32.mrb[16].mxu0  ;;  %v1355_v9 = vrot.slane %v5874_v2, 7 }
 0x487   :  { %v1255_v7 = vpop.f32.mrb[18].mxu1  ;;  %v1324_v8 = vpop.f32.mrb[17].mxu0  ;;  %v1381_v44 = vrot.slane %v4130_v6, 1 }
 0x488   :  { %v1356_v18 = vrot.slane %v1255_v7, 7  ;;  %v1257_v12 = vpop.f32.mrb[19].mxu1  ;;  %v4131_v19 = vpop.f32.mrb[18].mxu0  ;;  %v1379_v23 = vrot.slane %v1324_v8, 1 }
 0x489   :  { %v1382_v20 = vrot.slane %v4131_v19, 1  ;;  %v1327_v21 = vpop.f32.mrb[19].mxu0  ;;  %v3837_v19 = vld [vmem:[#allocation13] ss:$0 sm:$0xff] }
 0x48a   :  { %v1369_v26 = vsel %vm900_vm3, %v1355_v9, %v1356_v18  ;;  %v1380_v27 = vrot.slane %v1327_v21, 1 }
 0x48b   :  { %v1372_v28 = vsel %vm885_vm2, %v1369_v26, 0.0  ;;  %v1391_v29 = vsel %vm949_vm4, %v1381_v44, %v1382_v20  ;;  %vm6540_vm2 = vcmp.ge.s32.totalorder %v5804_v31, 1 }
 0x48c   :  { %v1404_v16 = vadd.f32 %v1372_v28, %v1257_v12  ;;  %v1392_v60 = vsel %vm949_vm4, %v1380_v27, %v1381_v44  ;;  %v5891_v11 = vsel %vm949_vm4, %v1379_v23, %v1380_v27  ;;  %v1397_v57 = vsel %vm935_vm7, %v1391_v29, 0.0 }
 0x48d   :  { %v1396_v32 = vsel %vm934_vm5, %v1392_v60, 0.0  ;;  %v1261_v22 = vpop.f32.mrb[20].mxu1  ;;  %vm1785_vm5 = vcmp.ge.s32.totalorder %v5726_v15, 2  ;;  %vm1834_vm7 = vcmp.lt.s32.totalorder %v5726_v15, 6 }
 0x48e   :  { %v1412_v5 = vadd.f32 %v1404_v16, %v1396_v32  ;;  %v1357_v33 = vrot.slane %v1261_v22, 7  ;;  %v1263_v30 = vpop.f32.mrb[21].mxu1  ;;  %v4134_v10 = vpop.f32.mrb[20].mxu0 }
 0x48f   :  { %v1265_v36 = vpop.f32.mrb[22].mxu1  ;;  %v1340_v37 = vpop.f32.mrb[21].mxu0  ;;  %v1385_v50 = vrot.slane %v4134_v10, 1 }
 0x490   :  { %v1368_v41 = vsel %vm900_vm3, %v1356_v18, %v1357_v33  ;;  %v1358_v42 = vrot.slane %v1265_v36, 7  ;;  %v1383_v45 = vrot.slane %v1340_v37, 1  ;;  %v1267_v47 = vpop.f32.mrb[23].mxu1  ;;  %v4135_v17 = vpop.f32.mrb[22].mxu0  ;;  %v1427_v16 = vadd.f32 %v3837_v19, %v1412_v5 }
 0x491   :  { %v1373_v48 = vsel %vm886_vm6, %v1368_v41, 0.0  ;;  %v1386_v39 = vrot.slane %v4135_v17, 1  ;;  %v1343_v53 = vpop.f32.mrb[23].mxu0  ;;  %vm1849_vm6 = vcmp.lt.s32.totalorder %v5723_v13, 6 }
 0x492   :  { %v1405_v54 = vadd.f32 %v1373_v48, %v1263_v30  ;;  %v1367_v56 = vsel %vm900_vm3, %v1357_v33, %v1358_v42  ;;  %v1390_v24 = vsel %vm949_vm4, %v1382_v20, %v1383_v45  ;;  %v1384_v63 = vrot.slane %v1343_v53, 1 }
 0x493   :  { %v1374_v61 = vsel %vm887_vm8, %v1367_v56, 0.0  ;;  %v1387_v0 = vsel %vm949_vm4, %v1385_v50, %v1386_v39  ;;  %v1398_v6 = vsel %vm936_vm9, %v1390_v24, 0.0  ;;  %v1394_v12 = vsel %vm949_vm4, %v1386_v39, %v1379_v23 }
 0x494   :  { %v1413_v25 = vadd.f32 %v1405_v54, %v1397_v57  ;;  %v1406_v35 = vadd.f32 %v1374_v61, %v1267_v47  ;;  %v1389_v8 = vsel %vm949_vm4, %v1383_v45, %v1384_v63  ;;  %v1388_v18 = vsel %vm949_vm4, %v1384_v63, %v1385_v50 }
 0x495   :  { %v1271_v7 = vpop.f32.mrb[24].mxu1  ;;  %v1399_v22 = vsel %vm937_vm11, %v1389_v8, 0.0  ;;  %v5926_v30 = vadd.f32 %v1427_v16, %v5695_v52  ;;  %vm6541_vm4 = vcmp.lt.s32.totalorder %v5804_v31, 7  ;;  %v1401_v61 = vsel %vm939_vm15, %v1387_v0, 0.0 }
 0x496   :  { %v1414_v44 = vadd.f32 %v1406_v35, %v1398_v6  ;;  %v1359_v20 = vrot.slane %v1271_v7, 7  ;;  %v1273_v21 = vpop.f32.mrb[25].mxu1  ;;  %v1428_v45 = vadd.f32 %v3837_v19, %v1413_v25  ;;  %v1400_v17 = vsel %vm6541_vm4, %v1388_v18, 0.0 }
 0x497   :  { %v1275_v26 = vpop.f32.mrb[26].mxu1  ;;  %v1451_v54 = vmul.f32 0.70710677, %v5926_v30  ;;  %vm1786_vm8 = vcmp.ge.s32.totalorder %v5748_v34, 2  ;;  %vm1835_vm9 = vcmp.lt.s32.totalorder %v5748_v34, 6  ;;  %vm1836_vm11 = vcmp.lt.s32.totalorder %v5758_v40, 6 }
 0x498   :  { %v1366_v27 = vsel %vm900_vm3, %v1358_v42, %v1359_v20  ;;  %v1360_v28 = vrot.slane %v1275_v26, 7  ;;  %v1277_v29 = vpop.f32.mrb[27].mxu1  ;;  %v1429_v10 = vadd.f32 %v3837_v19, %v1414_v44  ;;  %v5947_v35 = vadd.f32 %v1428_v45, %v5687_v43 }
 0x499   :  { %v1375_v60 = vsel %vm888_vm10, %v1366_v27, 0.0  ;;  %v1395_v43 = vsel %vm933_vm13, %v5891_v11, 0.0  ;;  %4622 = verf.f32 %v1451_v54  ;;  %vm1787_vm10 = vcmp.ge.s32.totalorder %v5758_v40, 2 }
 0x49a   :  { %v1407_v32 = vadd.f32 %v1375_v60, %v1273_v21  ;;  %v1365_v23 = vsel %vm900_vm3, %v1359_v20, %v1360_v28  ;;  %v5936_v56 = vadd.f32 %v1429_v10, %v5692_v49  ;;  %v1452_v21 = vmul.f32 0.70710677, %v5947_v35 }
 0x49b   :  { %v1376_v36 = vsel %vm6540_vm2, %v1365_v23, 0.0  ;;  %vm1837_vm13 = vcmp.lt.s32.totalorder %v5786_v14, 6  ;;  %vm6518_vm15 = vcmp.lt.s32.totalorder %v5804_v31, 6  ;;  %vm1784_vm2 = vcmp.ge.s32.totalorder %v5826_v55, 2 }
 0x49c   :  { %v1415_v33 = vadd.f32 %v1407_v32, %v1399_v22  ;;  %v1408_v5 = vadd.f32 %v1376_v36, %v1277_v29  ;;  %vm1791_vm4 = vcmp.ge.s32.totalorder %v5828_v58, 2 }
 0x49d   :  { %v1281_v37 = vpop.f32.mrb[28].mxu1 }
 0x49e   :  { %v1361_v41 = vrot.slane %v1281_v37, 7  ;;  %v1283_v42 = vpop.f32.mrb[29].mxu1  ;;  %v1430_v47 = vadd.f32 %v3837_v19, %v1415_v33  ;;  %v1416_v50 = vadd.f32 %v1408_v5, %v1400_v17  ;;  %v1443_v5 = vmul.f32 0.5, %v5926_v30 }
 0x49f   :  { %v1285_v48 = vpop.f32.mrb[30].mxu1 }
 0x4a0   :  { %v1364_v39 = vsel %vm900_vm3, %v1360_v28, %v1361_v41  ;;  %v1362_v52 = vrot.slane %v1285_v48, 7  ;;  %v1287_v53 = vpop.f32.mrb[31].mxu1  ;;  %v1431_v57 = vadd.f32 %v3837_v19, %v1416_v50  ;;  %v5950_v6 = vadd.f32 %v1430_v47, %v5701_v62 }
 0x4a1   :  { %v1377_v24 = vsel %vm890_vm14, %v1364_v39, 0.0  ;;  %v1453_v62 = vmul.f32 0.70710677, %v5936_v56  ;;  %v1444_v50 = vmul.f32 0.5, %v5947_v35  ;;  %vm6519_vm14 = vcmp.ge.s32.totalorder %v5804_v31, 2 }
 0x4a2   :  { %v1409_v63 = vadd.f32 %v1377_v24, %v1283_v42  ;;  %v1370_v25 = vsel %vm900_vm3, %v1362_v52, %v1355_v9  ;;  %v1363_v7 = vsel %vm900_vm3, %v1361_v41, %v1362_v52  ;;  %v5957_v0 = vadd.f32 %v1431_v57, %v5707_v4 }
 0x4a3   :  { %v1371_v49 = vsel %vm884_vm0, %v1370_v25, 0.0  ;;  %v1378_v9 = vsel %vm891_vm1, %v1363_v7, 0.0  ;;  %v1402_v4 = vsel %vm940_vm12, %v1394_v12, 0.0  ;;  %v1454_v27 = vmul.f32 0.70710677, %v5950_v6 }
 0x4a4   :  { %v1417_v8 = vadd.f32 %v1409_v63, %v1401_v61  ;;  %v1403_v2 = vadd.f32 %v1371_v49, %v5876_v3  ;;  %v1410_v18 = vadd.f32 %v1378_v9, %v1287_v53  ;;  %v1455_v44 = vmul.f32 0.70710677, %v5957_v0 }
 0x4a5   :  { %4624 = verf.f32 %v1453_v62  ;;  %v1445_v42 = vmul.f32 0.5, %v5936_v56  ;;  %v1447_v17 = vmul.f32 0.5, %v5957_v0  ;;  %v1446_v24 = vmul.f32 0.5, %v5950_v6 }
 0x4a6   :  { %v1411_v20 = vadd.f32 %v1403_v2, %v1395_v43  ;;  %v1432_v26 = vadd.f32 %v3837_v19, %v1417_v8  ;;  %v1418_v3 = vadd.f32 %v1410_v18, %v1402_v4  ;;  %4626 = verf.f32 %v1455_v44  ;;  %v4472_v4 = vld [vmem:[#allocation17 + $0x4] ss:$12 sps:$4 sm:$0xff]  }
 0x4a7   :  { %4628 = verf.f32 %v1452_v21  ;;  %v4470_v21 = vld [vmem:[#allocation17] ss:$12 sps:$4 sm:$0xff]   ;;  %2117 = vmatprep.subr.bf16.mxu1 %v4472_v4  ;;  %vm1800_vm3 = vcmp.lt.s32.totalorder %v5723_v13, 2  ;;  %vm1788_vm12 = vcmp.ge.s32.totalorder %v5786_v14, 2  ;;  %vm1790_vm0 = vcmp.ge.s32.totalorder %v5821_v51, 2 }
 0x4a8   :  { %v1426_v28 = vadd.f32 %v3837_v19, %v1411_v20  ;;  %v1433_v29 = vadd.f32 %v3837_v19, %v1418_v3  ;;  %v5975_v16 = vadd.f32 %v1432_v26, %v5699_v59  ;;  %4630 = verf.f32 %v1454_v27  ;;  %v4623_v19 = vpop.eup %4622  ;;  %v4473_v26 = vld [vmem:[#allocation17 + $0x8] ss:$12 sps:$4 sm:$0xff]   ;;  %v4474_v27 = vld [vmem:[#allocation17 + $0x18] ss:$12 sps:$4 sm:$0xff]  }
 0x4a9   :  { %v1467_v36 = vadd.f32 1.0, %v4623_v19  ;;  %4160 = vmatprep.subr.bf16.mxu0 %v4473_v26  ;;  %v4476_v3 = vld [vmem:[#allocation17 + $0x1c] ss:$12 sps:$4 sm:$0xff]   ;;  %vm1839_vm1 = vcmp.lt.s32.totalorder %v5821_v51, 6 }
 0x4aa   :  { %v5972_v11 = vadd.f32 %v1426_v28, %v5689_v46  ;;  %v5978_v12 = vadd.f32 %v1433_v29, %v5704_v1  ;;  %v1456_v22 = vmul.f32 0.70710677, %v5975_v16  ;;  %v1448_v62 = vmul.f32 0.5, %v5975_v16  ;;  %v4477_v28 = vld [vmem:[#allocation17 + $0x20] ss:$12 sps:$4 sm:$0xff]  }
 0x4ab   :  { %v1475_v54 = vmul.f32 %v1467_v36, %v1443_v5  ;;  %v4480_v29 = vld [vmem:[#allocation17 + $0x34] ss:$12 sps:$4 sm:$0xff]   ;;  %v4497_v5 = vld [vmem:[#allocation17 + $0x98] ss:$12 sps:$4 sm:$0xff]  }
 0x4ac   :  { %v1450_v60 = vmul.f32 0.70710677, %v5972_v11  ;;  %v1457_v32 = vmul.f32 0.70710677, %v5978_v12  ;;  %v1442_v45 = vmul.f32 0.5, %v5972_v11  ;;  %v1449_v9 = vmul.f32 0.5, %v5978_v12 }
 0x4ad   :  { %v4482_v19 = vld [vmem:[#allocation17 + $0x48] ss:$12 sps:$4 sm:$0xff]   ;;  %v4493_v36 = vld [vmem:[#allocation17 + $0x80] ss:$12 sps:$4 sm:$0xff]  }
 0x4ae   :  { %4632 = verf.f32 %v1450_v60  ;;  %v4478_v60 = vld [vmem:[#allocation17 + $0x30] ss:$12 sps:$4 sm:$0xff]  }
 0x4af   :  { %4634 = verf.f32 %v1457_v32  ;;  %v4625_v46 = vpop.eup %4624  ;;  %v4481_v32 = vld [vmem:[#allocation17 + $0x38] ss:$12 sps:$4 sm:$0xff]  }
 0x4b0   :  { %4636 = verf.f32 %v1456_v22  ;;  %v4627_v23 = vpop.eup %4626  ;;  %v1469_v59 = vadd.f32 1.0, %v4625_v46  ;;  %v4484_v22 = vld [vmem:[#allocation17 + $0x4c] ss:$12 sps:$4 sm:$0xff]   ;;  %v4485_v46 = vld [vmem:[#allocation17 + $0x50] ss:$12 sps:$4 sm:$0xff]  }
 0x4b1   :  { %v4629_v33 = vpop.eup %4628  ;;  %v1471_v37 = vadd.f32 1.0, %v4627_v23  ;;  %v4486_v23 = vld [vmem:[#allocation17 + $0x60] ss:$12 sps:$4 sm:$0xff]  }
 0x4b2   :  { %v4631_v10 = vpop.eup %4630  ;;  %v1468_v41 = vadd.f32 1.0, %v4629_v33  ;;  %v1477_v39 = vmul.f32 %v1469_v59, %v1445_v42  ;;  %v4488_v33 = vld [vmem:[#allocation17 + $0x64] ss:$12 sps:$4 sm:$0xff]   ;;  %v4492_v59 = vld [vmem:[#allocation17 + $0x7c] ss:$12 sps:$4 sm:$0xff]  }
 0x4b3   :  { %v1470_v48 = vadd.f32 1.0, %v4631_v10  ;;  %v1479_v57 = vmul.f32 %v1471_v37, %v1447_v17  ;;  %v4489_v10 = vld [vmem:[#allocation17 + $0x68] ss:$12 sps:$4 sm:$0xff]   ;;  %v4490_v37 = vld [vmem:[#allocation17 + $0x78] ss:$12 sps:$4 sm:$0xff]  }
 0x4b4   :  { %v1476_v61 = vmul.f32 %v1468_v41, %v1444_v50  ;;  %v4494_v41 = vld [vmem:[#allocation17 + $0x90] ss:$12 sps:$4 sm:$0xff]   ;;  %v4500_v42 = vld [vmem:[#allocation17 + $0xac] ss:$12 sps:$4 sm:$0xff]  }
 0x4b5   :  { %v1478_v49 = vmul.f32 %v1470_v48, %v1446_v24 }
 0x4b6   :  { %v1515_v7 = vpack.c.bf16 %v1477_v39, %v1476_v61 }
 0x4b7   :  { %v1516_v2 = vpack.c.bf16 %v1479_v57, %v1478_v49 }
 0x4b8   :  { %v4633_v1 = vpop.eup %4632 }
 0x4b9   :  { %v1466_v47 = vadd.f32 1.0, %v4633_v1  ;;  %v4635_v52 = vpop.eup %4634  ;;  %v4496_v1 = vld [vmem:[#allocation17 + $0x94] ss:$12 sps:$4 sm:$0xff]  }
 0x4ba   :  { %v4637_v63 = vpop.eup %4636  ;;  %v1473_v8 = vadd.f32 1.0, %v4635_v52 }
 0x4bb   :  { %v1474_v53 = vmul.f32 %v1466_v47, %v1442_v45  ;;  %v1472_v43 = vadd.f32 1.0, %v4637_v63  ;;  %v4501_v45 = vld [vmem:[#allocation17 + $0xb0] ss:$12 sps:$4 sm:$0xff]   ;;  %v4498_v47 = vld [vmem:[#allocation17 + $0xa8] ss:$12 sps:$4 sm:$0xff]  }
 0x4bc   :  { %v1481_v18 = vmul.f32 %v1473_v8, %v1449_v9 }
 0x4bd   :  { %v1514_v25 = vpack.c.bf16 %v1475_v54, %v1474_v53  ;;  %v1480_v44 = vmul.f32 %v1472_v43, %v1448_v62 }
 0x4bf   :  { %1679 = vmatmul.mubr.bf16.vlgmr.msra.gmra.mrb[32].mxu1 %v1514_v25  ;;  %4152 = vmatprep.mubr.bf16.mxu0 %v1514_v25  ;;  %v1517_v20 = vpack.c.bf16 %v1481_v18, %v1480_v44 }
 0x4c0   :  { %4153 = vmatmul.mubr.bf16.vlgmr.msra.gmra.mrb[24].mxu0 %v1515_v7  ;;  %1688 = vmatprep.mubr.bf16.mxu1 %v5253_v38 }
 0x4c1   :  { %4156 = vmatprep.mubr.bf16.mxu0 %v1516_v2  ;;  %2118 = vmatpush1.bf16.msra.mxu1 %v4470_v21 }
 0x4c2   :  { %4161 = vmatpush3.bf16.msra.mxu0 %v4473_v26  ;;  %2119 = vmatprep.subr.bf16.mxu1 %v4476_v3 }
 0x4c3   :  { %4162 = vmatprep.subr.bf16.mxu0 %v4477_v28 }
 0x4c5   :  { %2120 = vmatpush1.bf16.msra.mxu1 %v4474_v27 }
 0x4c6   :  { %4163 = vmatpush3.bf16.msra.mxu0 %v4477_v28  ;;  %2121 = vmatprep.subr.bf16.mxu1 %v4480_v29 }
 0x4c7   :  { %1689 = vmatmul.mubr.bf16.gmra.mrb[36].mxu1 %v1515_v7  ;;  %4164 = vmatprep.subr.bf16.mxu0 %v4481_v32 }
 0x4c8   :  { %4157 = vmatmul.mubr.bf16.gmra.mrb[28].mxu0 %v1517_v20  ;;  %1698 = vmatprep.mubr.bf16.mxu1 %v5253_v38 }
 0x4c9   :  { %2122 = vmatpush1.bf16.msra.mxu1 %v4478_v60 }
 0x4ca   :  { %4165 = vmatpush3.bf16.msra.mxu0 %v4481_v32  ;;  %2123 = vmatprep.subr.bf16.mxu1 %v4484_v22 }
 0x4cb   :  { %4166 = vmatprep.subr.bf16.mxu0 %v4485_v46 }
 0x4cd   :  { %2124 = vmatpush1.bf16.msra.mxu1 %v4482_v19 }
 0x4ce   :  { %4167 = vmatpush3.bf16.msra.mxu0 %v4485_v46  ;;  %2125 = vmatprep.subr.bf16.mxu1 %v4488_v33 }
 0x4cf   :  { %1699 = vmatmul.mubr.bf16.gmra.mrb[40].mxu1 %v1516_v2  ;;  %4168 = vmatprep.subr.bf16.mxu0 %v4489_v10 }
 0x4d0   :  { %1708 = vmatprep.mubr.bf16.mxu1 %v5253_v38 }
 0x4d1   :  { %2126 = vmatpush1.bf16.msra.mxu1 %v4486_v23 }
 0x4d2   :  { %4169 = vmatpush3.bf16.msra.mxu0 %v4489_v10  ;;  %2127 = vmatprep.subr.bf16.mxu1 %v4492_v59 }
 0x4d3   :  { %4170 = vmatprep.subr.bf16.mxu0 %v4493_v36 }
 0x4d5   :  { %2128 = vmatpush1.bf16.msra.mxu1 %v4490_v37 }
 0x4d6   :  { %4171 = vmatpush3.bf16.msra.mxu0 %v4493_v36  ;;  %2129 = vmatprep.subr.bf16.mxu1 %v4496_v1 }
 0x4d7   :  { %1709 = vmatmul.mubr.bf16.gmra.mrb[44].mxu1 %v1517_v20  ;;  %4172 = vmatprep.subr.bf16.mxu0 %v4497_v5 }
 0x4d8   :  { %2149 = vmatprep.mubr.bf16.mxu1 %v5253_v38 }
 0x4d9   :  { %2130 = vmatpush1.bf16.msra.mxu1 %v4494_v41 }
 0x4da   :  { %4173 = vmatpush3.bf16.msra.mxu0 %v4497_v5  ;;  %2131 = vmatprep.subr.bf16.mxu1 %v4500_v42 }
 0x4db   :  { %4174 = vmatprep.subr.bf16.mxu0 %v4501_v45 }
 0x4dd   :  { %2132 = vmatpush1.bf16.msra.mxu1 %v4498_v47 }
 0x4de   :  { %4175 = vmatpush3.bf16.msra.mxu0 %v4501_v45 }
 0x592   :  { %v5995_v17 = vpop.f32.mrb[32].mxu1 }
 0x593   :  { %v5997_v48 = vpop.f32.mrb[33].mxu1  ;;  %v4154_v50 = vpop.f32.mrb[24].mxu0  ;;  %v1792_v53 = vrot.slane %v5995_v17, 6 }
 0x594   :  { %v1684_v39 = vpop.f32.mrb[34].mxu1  ;;  %v1753_v52 = vpop.f32.mrb[25].mxu0  ;;  %v1843_v61 = vrot.slane %v4154_v50, 2  ;;  %v6040_v50 = vld [vmem:[#allocation16] ss:$0 sm:$0xff] }
 0x595   :  { %v1793_v54 = vrot.slane %v1684_v39, 6  ;;  %v1686_v24 = vpop.f32.mrb[35].mxu1  ;;  %v4155_v57 = vpop.f32.mrb[26].mxu0  ;;  %v1841_v49 = vrot.slane %v1753_v52, 2 }
 0x596   :  { %v1844_v63 = vrot.slane %v4155_v57, 2  ;;  %v1756_v25 = vpop.f32.mrb[27].mxu0 }
 0x597   :  { %v1807_v7 = vsel %vm1800_vm3, %v1792_v53, %v1793_v54  ;;  %v1842_v8 = vrot.slane %v1756_v25, 2 }
 0x598   :  { %v1826_v2 = vsel %vm1785_vm5, %v1807_v7, 0.0  ;;  %v1854_v9 = vsel %vm1849_vm6, %v1843_v61, %v1844_v63 }
 0x599   :  { %v1883_v43 = vadd.f32 %v1826_v2, %v1686_v24  ;;  %v1855_v62 = vsel %vm1849_vm6, %v1842_v8, %v1843_v61  ;;  %v6016_v18 = vsel %vm1849_vm6, %v1841_v49, %v1842_v8  ;;  %v1876_v59 = vsel %vm1835_vm9, %v1854_v9, 0.0 }
 0x59a   :  { %v1875_v44 = vsel %vm1834_vm7, %v1855_v62, 0.0  ;;  %v1690_v20 = vpop.f32.mrb[36].mxu1 }
 0x59b   :  { %v6020_v4 = vadd.f32 %v1883_v43, %v1875_v44  ;;  %v1794_v21 = vrot.slane %v1690_v20, 6  ;;  %v1692_v26 = vpop.f32.mrb[37].mxu1  ;;  %v4158_v3 = vpop.f32.mrb[28].mxu0 }
 0x59c   :  { %v1694_v27 = vpop.f32.mrb[38].mxu1  ;;  %v1769_v28 = vpop.f32.mrb[29].mxu0  ;;  %v1847_v23 = vrot.slane %v4158_v3, 2 }
 0x59d   :  { %v1806_v29 = vsel %vm1800_vm3, %v1793_v54, %v1794_v21  ;;  %v1795_v60 = vrot.slane %v1694_v27, 6  ;;  %v1845_v32 = vrot.slane %v1769_v28, 2  ;;  %v1696_v22 = vpop.f32.mrb[39].mxu1  ;;  %v4159_v19 = vpop.f32.mrb[30].mxu0 }
 0x59e   :  { %v1827_v46 = vsel %vm1786_vm8, %v1806_v29, 0.0  ;;  %v1848_v33 = vrot.slane %v4159_v19, 2  ;;  %v1772_v10 = vpop.f32.mrb[31].mxu0 }
 0x59f   :  { %v1884_v36 = vadd.f32 %v1827_v46, %v1692_v26  ;;  %v1805_v37 = vsel %vm1800_vm3, %v1794_v21, %v1795_v60  ;;  %v1853_v5 = vsel %vm1849_vm6, %v1844_v63, %v1845_v32  ;;  %v1846_v41 = vrot.slane %v1772_v10, 2 }
 0x5a0   :  { %v1828_v1 = vsel %vm1787_vm10, %v1805_v37, 0.0  ;;  %v1850_v42 = vsel %vm1849_vm6, %v1847_v23, %v1848_v33  ;;  %v1877_v39 = vsel %vm1836_vm11, %v1853_v5, 0.0  ;;  %v1857_v57 = vsel %vm1849_vm6, %v1848_v33, %v1841_v49 }
 0x5a1   :  { %v1892_v45 = vadd.f32 %v1884_v36, %v1876_v59  ;;  %v1885_v47 = vadd.f32 %v1828_v1, %v1696_v22  ;;  %v1852_v54 = vsel %vm1849_vm6, %v1845_v32, %v1846_v41  ;;  %v1851_v24 = vsel %vm1849_vm6, %v1846_v41, %v1847_v23 }
 0x5a2   :  { %v1700_v52 = vpop.f32.mrb[40].mxu1  ;;  %v1878_v26 = vsel %vm1837_vm13, %v1852_v54, 0.0  ;;  %v1879_v22 = vsel %vm6518_vm15, %v1851_v24, 0.0  ;;  %v1906_v10 = vadd.f32 %v6040_v50, %v6020_v4  ;;  %vm1833_vm15 = vcmp.lt.s32.totalorder %v5826_v55, 6 }
 0x5a3   :  { %v6051_v61 = vadd.f32 %v6040_v50, %v1892_v45  ;;  %v1893_v63 = vadd.f32 %v1885_v47, %v1877_v39  ;;  %v1796_v25 = vrot.slane %v1700_v52, 6  ;;  %v1702_v7 = vpop.f32.mrb[41].mxu1  ;;  %v1880_v52 = vsel %vm1839_vm1, %v1850_v42, 0.0 }
 0x5a4   :  { %v1704_v8 = vpop.f32.mrb[42].mxu1 }
 0x5a5   :  { %v1923_v2 = vmul.f32 0.70710677, %v6051_v61  ;;  %v1908_v9 = vadd.f32 %v6040_v50, %v1893_v63  ;;  %v1804_v43 = vsel %vm1800_vm3, %v1795_v60, %v1796_v25  ;;  %v1706_v62 = vpop.f32.mrb[43].mxu1  ;;  %v1797_v44 = vrot.slane %v1704_v8, 6 }
 0x5a6   :  { %v1829_v49 = vsel %vm1788_vm12, %v1804_v43, 0.0 }
 0x5a7   :  { %4638 = verf.f32 %v1923_v2  ;;  %v1924_v20 = vmul.f32 0.70710677, %v1908_v9  ;;  %v1886_v21 = vadd.f32 %v1829_v49, %v1702_v7  ;;  %v1803_v3 = vsel %vm1800_vm3, %v1796_v25, %v1797_v44 }
 0x5a8   :  { %v1830_v28 = vsel %vm6519_vm14, %v1803_v3, 0.0  ;;  %vm1840_vm14 = vcmp.lt.s32.totalorder %v5828_v58, 6  ;;  %v1922_v25 = vmul.f32 0.70710677, %v1906_v10 }
 0x5a9   :  { %4640 = verf.f32 %v1924_v20  ;;  %v1894_v27 = vadd.f32 %v1886_v21, %v1878_v26  ;;  %v1887_v29 = vadd.f32 %v1830_v28, %v1706_v62  ;;  %v1881_v42 = vsel %vm1840_vm14, %v1857_v57, 0.0 }
 0x5aa   :  { %v1710_v60 = vpop.f32.mrb[44].mxu1  ;;  %v1915_v20 = vmul.f32 0.5, %v6051_v61  ;;  %v1916_v21 = vmul.f32 0.5, %v1908_v9 }
 0x5ab   :  { %v1909_v32 = vadd.f32 %v6040_v50, %v1894_v27  ;;  %v1798_v19 = vrot.slane %v1710_v60, 6  ;;  %v1712_v46 = vpop.f32.mrb[45].mxu1  ;;  %v1895_v23 = vadd.f32 %v1887_v29, %v1879_v22 }
 0x5ac   :  { %v1714_v33 = vpop.f32.mrb[46].mxu1 }
 0x5ad   :  { %v1925_v59 = vmul.f32 0.70710677, %v1909_v32  ;;  %v1802_v36 = vsel %vm1800_vm3, %v1797_v44, %v1798_v19  ;;  %v1799_v37 = vrot.slane %v1714_v33, 6  ;;  %v1716_v1 = vpop.f32.mrb[47].mxu1  ;;  %v1910_v5 = vadd.f32 %v6040_v50, %v1895_v23 }
 0x5ae   :  { %v1831_v41 = vsel %vm1790_vm0, %v1802_v36, 0.0  ;;  %v1917_v61 = vmul.f32 0.5, %v1909_v32 }
 0x5af   :  { %4642 = verf.f32 %v1925_v59  ;;  %v1888_v45 = vadd.f32 %v1831_v41, %v1712_v46  ;;  %v1808_v4 = vsel %vm1800_vm3, %v1799_v37, %v1792_v53  ;;  %v1801_v47 = vsel %vm1800_vm3, %v1798_v19, %v1799_v37 }
 0x5b0   :  { %v1926_v39 = vmul.f32 0.70710677, %v1910_v5  ;;  %v1825_v54 = vsel %vm1784_vm2, %v1808_v4, 0.0  ;;  %v1832_v24 = vsel %vm1791_vm4, %v1801_v47, 0.0  ;;  %v1874_v53 = vsel %vm1833_vm15, %v6016_v18, 0.0 }
 0x5b1   :  { %v4639_v63 = vpop.eup %4638  ;;  %v1896_v7 = vadd.f32 %v1888_v45, %v1880_v52  ;;  %v1882_v17 = vadd.f32 %v1825_v54, %v5997_v48  ;;  %v1889_v8 = vadd.f32 %v1832_v24, %v1716_v1  ;;  %v1918_v9 = vmul.f32 0.5, %v1910_v5 }
 0x5b2   :  { %v1939_v2 = vadd.f32 1.0, %v4639_v63  ;;  %4644 = verf.f32 %v1926_v39  ;;  %v1914_v47 = vmul.f32 0.5, %v1906_v10  ;;  %v4504_v10 = vld [vmem:[#allocation20 + $0x4] ss:$12 sps:$4 sm:$0xff]  }
 0x5b3   :  { %v4641_v43 = vpop.eup %4640  ;;  %v1911_v62 = vadd.f32 %v6040_v50, %v1896_v7  ;;  %v1890_v49 = vadd.f32 %v1882_v17, %v1874_v53  ;;  %v1897_v44 = vadd.f32 %v1889_v8, %v1881_v42  ;;  %4646 = verf.f32 %v1922_v25  ;;  %v4502_v53 = vld [vmem:[#allocation20] ss:$12 sps:$4 sm:$0xff]   ;;  %2546 = vmatprep.subr.bf16.mxu1 %v4504_v10  ;;  %v4508_v42 = vld [vmem:[#allocation20 + $0x1c] ss:$12 sps:$4 sm:$0xff]  }
 0x5b4   :  { %v1940_v26 = vadd.f32 1.0, %v4641_v43  ;;  %v1947_v27 = vmul.f32 %v1939_v2, %v1915_v20  ;;  %v4505_v2 = vld [vmem:[#allocation20 + $0x8] ss:$12 sps:$4 sm:$0xff]   ;;  %v4506_v43 = vld [vmem:[#allocation20 + $0x18] ss:$12 sps:$4 sm:$0xff]  }
 0x5b5   :  { %v1927_v48 = vmul.f32 0.70710677, %v1911_v62  ;;  %v1905_v3 = vadd.f32 %v6040_v50, %v1890_v49  ;;  %v1912_v18 = vadd.f32 %v6040_v50, %v1897_v44  ;;  %v1919_v54 = vmul.f32 0.5, %v1911_v62  ;;  %4184 = vmatprep.subr.bf16.mxu0 %v4505_v2  ;;  %v4509_v62 = vld [vmem:[#allocation20 + $0x20] ss:$12 sps:$4 sm:$0xff]  }
 0x5b6   :  { %v1948_v28 = vmul.f32 %v1940_v26, %v1916_v21  ;;  %v4512_v49 = vld [vmem:[#allocation20 + $0x34] ss:$12 sps:$4 sm:$0xff]   ;;  %v4510_v44 = vld [vmem:[#allocation20 + $0x30] ss:$12 sps:$4 sm:$0xff]   ;;  %v4513_v20 = vld [vmem:[#allocation20 + $0x38] ss:$12 sps:$4 sm:$0xff]  }
 0x5b7   :  { %4648 = verf.f32 %v1927_v48  ;;  %v1921_v29 = vmul.f32 0.70710677, %v1905_v3  ;;  %v1928_v60 = vmul.f32 0.70710677, %v1912_v18  ;;  %v1913_v39 = vmul.f32 0.5, %v1905_v3 }
 0x5b8   :  { %v1986_v57 = vpack.c.bf16 %v1948_v28, %v1947_v27  ;;  %v1920_v24 = vmul.f32 0.5, %v1912_v18  ;;  %v4516_v21 = vld [vmem:[#allocation20 + $0x4c] ss:$12 sps:$4 sm:$0xff]   ;;  %v4514_v26 = vld [vmem:[#allocation20 + $0x48] ss:$12 sps:$4 sm:$0xff]  }
 0x5b9   :  { %v4643_v22 = vpop.eup %4642  ;;  %4650 = verf.f32 %v1921_v29  ;;  %v4517_v48 = vld [vmem:[#allocation20 + $0x50] ss:$12 sps:$4 sm:$0xff]   ;;  %v4521_v18 = vld [vmem:[#allocation20 + $0x68] ss:$12 sps:$4 sm:$0xff]   ;;  %v4518_v27 = vld [vmem:[#allocation20 + $0x60] ss:$12 sps:$4 sm:$0xff]  }
 0x5ba   :  { %4652 = verf.f32 %v1928_v60  ;;  %v1941_v19 = vadd.f32 1.0, %v4643_v22  ;;  %v4520_v3 = vld [vmem:[#allocation20 + $0x64] ss:$12 sps:$4 sm:$0xff]   ;;  %v4524_v28 = vld [vmem:[#allocation20 + $0x7c] ss:$12 sps:$4 sm:$0xff]  }
 0x5bb   :  { %v4525_v29 = vld [vmem:[#allocation20 + $0x80] ss:$12 sps:$4 sm:$0xff]   ;;  %v4529_v22 = vld [vmem:[#allocation20 + $0x98] ss:$12 sps:$4 sm:$0xff]  }
 0x5bc   :  { %v4645_v46 = vpop.eup %4644  ;;  %v1949_v59 = vmul.f32 %v1941_v19, %v1917_v61  ;;  %v4528_v60 = vld [vmem:[#allocation20 + $0x94] ss:$12 sps:$4 sm:$0xff]   ;;  %v4526_v19 = vld [vmem:[#allocation20 + $0x90] ss:$12 sps:$4 sm:$0xff]  }
 0x5bd   :  { %v1942_v23 = vadd.f32 1.0, %v4645_v46  ;;  %v4647_v33 = vpop.eup %4646  ;;  %v4532_v46 = vld [vmem:[#allocation20 + $0xac] ss:$12 sps:$4 sm:$0xff]   ;;  %v4533_v61 = vld [vmem:[#allocation20 + $0xb0] ss:$12 sps:$4 sm:$0xff]  }
 0x5be   :  { %v1938_v50 = vadd.f32 1.0, %v4647_v33 }
 0x5bf   :  { %v1950_v36 = vmul.f32 %v1942_v23, %v1918_v9  ;;  %v4530_v9 = vld [vmem:[#allocation20 + $0xa8] ss:$12 sps:$4 sm:$0xff]  }
 0x5c0   :  { %v1946_v25 = vmul.f32 %v1938_v50, %v1914_v47 }
 0x5c1   :  { %v4649_v37 = vpop.eup %4648  ;;  %v1987_v1 = vpack.c.bf16 %v1950_v36, %v1949_v59 }
 0x5c2   :  { %v1943_v45 = vadd.f32 1.0, %v4649_v37 }
 0x5c3   :  { %v4651_v41 = vpop.eup %4650 }
 0x5c4   :  { %v4653_v4 = vpop.eup %4652  ;;  %v1937_v52 = vadd.f32 1.0, %v4651_v41  ;;  %v1951_v32 = vmul.f32 %v1943_v45, %v1919_v54 }
 0x5c5   :  { %v1944_v63 = vadd.f32 1.0, %v4653_v4 }
 0x5c6   :  { %v1945_v7 = vmul.f32 %v1937_v52, %v1913_v39 }
 0x5c7   :  { %v1952_v5 = vmul.f32 %v1944_v63, %v1920_v24 }
 0x5c8   :  { %v1985_v17 = vpack.c.bf16 %v1946_v25, %v1945_v7 }
 0x5c9   :  { %v1988_v8 = vpack.c.bf16 %v1952_v5, %v1951_v32 }
 0x5ca   :  { %2150 = vmatmul.mubr.bf16.vlgmr.msra.gmra.mrb[48].mxu1 %v1985_v17  ;;  %4176 = vmatprep.mubr.bf16.mxu0 %v1985_v17 }
 0x5cb   :  { %4177 = vmatmul.mubr.bf16.vlgmr.msra.gmra.mrb[32].mxu0 %v1986_v57  ;;  %2159 = vmatprep.mubr.bf16.mxu1 %v5253_v38 }
 0x5cc   :  { %4180 = vmatprep.mubr.bf16.mxu0 %v1987_v1  ;;  %2547 = vmatpush1.bf16.msra.mxu1 %v4502_v53 }
 0x5cd   :  { %4185 = vmatpush3.bf16.msra.mxu0 %v4505_v2  ;;  %2548 = vmatprep.subr.bf16.mxu1 %v4508_v42 }
 0x5ce   :  { %4186 = vmatprep.subr.bf16.mxu0 %v4509_v62 }
 0x5d0   :  { %2549 = vmatpush1.bf16.msra.mxu1 %v4506_v43 }
 0x5d1   :  { %4187 = vmatpush3.bf16.msra.mxu0 %v4509_v62  ;;  %2550 = vmatprep.subr.bf16.mxu1 %v4512_v49 }
 0x5d2   :  { %2160 = vmatmul.mubr.bf16.gmra.mrb[52].mxu1 %v1986_v57  ;;  %4188 = vmatprep.subr.bf16.mxu0 %v4513_v20  ;;  %v4522_v57 = vld [vmem:[#allocation20 + $0x78] ss:$12 sps:$4 sm:$0xff]  }
 0x5d3   :  { %4181 = vmatmul.mubr.bf16.gmra.mrb[36].mxu0 %v1988_v8  ;;  %2169 = vmatprep.mubr.bf16.mxu1 %v5253_v38 }
 0x5d4   :  { %2551 = vmatpush1.bf16.msra.mxu1 %v4510_v44 }
 0x5d5   :  { %4189 = vmatpush3.bf16.msra.mxu0 %v4513_v20  ;;  %2552 = vmatprep.subr.bf16.mxu1 %v4516_v21 }
 0x5d6   :  { %4190 = vmatprep.subr.bf16.mxu0 %v4517_v48 }
 0x5d8   :  { %2553 = vmatpush1.bf16.msra.mxu1 %v4514_v26 }
 0x5d9   :  { %4191 = vmatpush3.bf16.msra.mxu0 %v4517_v48  ;;  %2554 = vmatprep.subr.bf16.mxu1 %v4520_v3 }
 0x5da   :  { %2170 = vmatmul.mubr.bf16.gmra.mrb[56].mxu1 %v1987_v1  ;;  %4192 = vmatprep.subr.bf16.mxu0 %v4521_v18 }
 0x5db   :  { %2179 = vmatprep.mubr.bf16.mxu1 %v5253_v38 }
 0x5dc   :  { %2555 = vmatpush1.bf16.msra.mxu1 %v4518_v27 }
 0x5dd   :  { %4193 = vmatpush3.bf16.msra.mxu0 %v4521_v18  ;;  %2556 = vmatprep.subr.bf16.mxu1 %v4524_v28 }
 0x5de   :  { %4194 = vmatprep.subr.bf16.mxu0 %v4525_v29 }
 0x5e0   :  { %2557 = vmatpush1.bf16.msra.mxu1 %v4522_v57 }
 0x5e1   :  { %4195 = vmatpush3.bf16.msra.mxu0 %v4525_v29  ;;  %2558 = vmatprep.subr.bf16.mxu1 %v4528_v60 }
 0x5e2   :  { %2180 = vmatmul.mubr.bf16.gmra.mrb[60].mxu1 %v1988_v8  ;;  %4196 = vmatprep.subr.bf16.mxu0 %v4529_v22 }
 0x5e3   :  { %2578 = vmatprep.mubr.bf16.mxu1 %v5253_v38 }
 0x5e4   :  { %2559 = vmatpush1.bf16.msra.mxu1 %v4526_v19 }
 0x5e5   :  { %4197 = vmatpush3.bf16.msra.mxu0 %v4529_v22  ;;  %2560 = vmatprep.subr.bf16.mxu1 %v4532_v46 }
 0x5e6   :  { %4198 = vmatprep.subr.bf16.mxu0 %v4533_v61 }
 0x5e8   :  { %2561 = vmatpush1.bf16.msra.mxu1 %v4530_v9 }
 0x5e9   :  { %4199 = vmatpush3.bf16.msra.mxu0 %v4533_v61 }
 0x69d   :  { %v6111_v23 = vpop.f32.mrb[48].mxu1 }
 0x69e   :  { %v6113_v33 = vpop.f32.mrb[49].mxu1  ;;  %v4178_v59 = vpop.f32.mrb[32].mxu0  ;;  %v2255_v1 = vrot.slane %v6111_v23, 6 }
 0x69f   :  { %v2155_v36 = vpop.f32.mrb[50].mxu1  ;;  %v2224_v37 = vpop.f32.mrb[33].mxu0  ;;  %v2281_v4 = vrot.slane %v4178_v59, 2 }
 0x6a0   :  { %v2256_v50 = vrot.slane %v2155_v36, 6  ;;  %v2157_v41 = vpop.f32.mrb[51].mxu1  ;;  %v4179_v45 = vpop.f32.mrb[34].mxu0  ;;  %v2279_v52 = vrot.slane %v2224_v37, 2 }
 0x6a1   :  { %v2282_v47 = vrot.slane %v4179_v45, 2  ;;  %v2227_v39 = vpop.f32.mrb[35].mxu0  ;;  %v3887_v45 = vld [vmem:[#allocation19] ss:$0 sm:$0xff] }
 0x6a2   :  { %v2269_v54 = vsel %vm1800_vm3, %v2255_v1, %v2256_v50  ;;  %v2280_v24 = vrot.slane %v2227_v39, 2 }
 0x6a3   :  { %v2272_v63 = vsel %vm1785_vm5, %v2269_v54, 0.0  ;;  %v2291_v25 = vsel %vm1849_vm6, %v2281_v4, %v2282_v47  ;;  %vm6542_vm5 = vcmp.ge.s32.totalorder %v5804_v31, 2 }
 0x6a4   :  { %v2304_v7 = vadd.f32 %v2272_v63, %v2157_v41  ;;  %v2292_v32 = vsel %vm1849_vm6, %v2280_v24, %v2281_v4  ;;  %v6128_v5 = vsel %vm1849_vm6, %v2279_v52, %v2280_v24  ;;  %v2297_v60 = vsel %vm1835_vm9, %v2291_v25, 0.0 }
 0x6a5   :  { %v2296_v17 = vsel %vm1834_vm7, %v2292_v32, 0.0  ;;  %v2161_v8 = vpop.f32.mrb[52].mxu1  ;;  %vm2685_vm7 = vcmp.ge.s32.totalorder %v5726_v15, 4  ;;  %vm2686_vm9 = vcmp.ge.s32.totalorder %v5748_v34, 4 }
 0x6a6   :  { %v2312_v10 = vadd.f32 %v2304_v7, %v2296_v17  ;;  %v2257_v53 = vrot.slane %v2161_v8, 6  ;;  %v2163_v2 = vpop.f32.mrb[53].mxu1  ;;  %v4182_v42 = vpop.f32.mrb[36].mxu0 }
 0x6a7   :  { %v2165_v43 = vpop.f32.mrb[54].mxu1  ;;  %v2240_v62 = vpop.f32.mrb[37].mxu0  ;;  %v2285_v3 = vrot.slane %v4182_v42, 2 }
 0x6a8   :  { %v2268_v49 = vsel %vm1800_vm3, %v2256_v50, %v2257_v53  ;;  %v2258_v44 = vrot.slane %v2165_v43, 6  ;;  %v2283_v20 = vrot.slane %v2240_v62, 2  ;;  %v2167_v21 = vpop.f32.mrb[55].mxu1  ;;  %v4183_v26 = vpop.f32.mrb[38].mxu0  ;;  %v2327_v7 = vadd.f32 %v3887_v45, %v2312_v10 }
 0x6a9   :  { %v2273_v48 = vsel %vm1786_vm8, %v2268_v49, 0.0  ;;  %v2286_v18 = vrot.slane %v4183_v26, 2  ;;  %v2243_v27 = vpop.f32.mrb[39].mxu0  ;;  %vm2734_vm8 = vcmp.lt.s32.totalorder %v5726_v15, 4 }
 0x6aa   :  { %v2305_v28 = vadd.f32 %v2273_v48, %v2163_v2  ;;  %v2267_v29 = vsel %vm1800_vm3, %v2257_v53, %v2258_v44  ;;  %v2290_v57 = vsel %vm1849_vm6, %v2282_v47, %v2283_v20  ;;  %v2284_v19 = vrot.slane %v2243_v27, 2 }
 0x6ab   :  { %v2274_v22 = vsel %vm1787_vm10, %v2267_v29, 0.0  ;;  %v2287_v46 = vsel %vm1849_vm6, %v2285_v3, %v2286_v18  ;;  %v2298_v59 = vsel %vm1836_vm11, %v2290_v57, 0.0  ;;  %v2294_v41 = vsel %vm1849_vm6, %v2286_v18, %v2279_v52 }
 0x6ac   :  { %v2313_v61 = vadd.f32 %v2305_v28, %v2297_v60  ;;  %v2306_v9 = vadd.f32 %v2274_v22, %v2167_v21  ;;  %v2289_v37 = vsel %vm1849_vm6, %v2283_v20, %v2284_v19  ;;  %v2288_v50 = vsel %vm1849_vm6, %v2284_v19, %v2285_v3 }
 0x6ad   :  { %v2171_v36 = vpop.f32.mrb[56].mxu1  ;;  %v2299_v8 = vsel %vm1837_vm13, %v2289_v37, 0.0  ;;  %v6163_v2 = vadd.f32 %v2327_v7, %v5926_v30  ;;  %vm6543_vm6 = vcmp.lt.s32.totalorder %v5804_v31, 6  ;;  %v2301_v22 = vsel %vm1839_vm1, %v2287_v46, 0.0 }
 0x6ae   :  { %v2314_v4 = vadd.f32 %v2306_v9, %v2298_v59  ;;  %v2259_v47 = vrot.slane %v2171_v36, 6  ;;  %v2173_v39 = vpop.f32.mrb[57].mxu1  ;;  %v2328_v20 = vadd.f32 %v3887_v45, %v2313_v61  ;;  %v2300_v26 = vsel %vm6543_vm6, %v2288_v50, 0.0 }
 0x6af   :  { %v2175_v54 = vpop.f32.mrb[58].mxu1  ;;  %v2351_v28 = vmul.f32 0.70710677, %v6163_v2  ;;  %vm2735_vm10 = vcmp.lt.s32.totalorder %v5748_v34, 4  ;;  %vm2687_vm11 = vcmp.ge.s32.totalorder %v5758_v40, 4  ;;  %vm2688_vm13 = vcmp.ge.s32.totalorder %v5786_v14, 4 }
 0x6b0   :  { %v2266_v24 = vsel %vm1800_vm3, %v2258_v44, %v2259_v47  ;;  %v2260_v63 = vrot.slane %v2175_v54, 6  ;;  %v2177_v25 = vpop.f32.mrb[59].mxu1  ;;  %v2329_v42 = vadd.f32 %v3887_v45, %v2314_v4  ;;  %v6184_v9 = vadd.f32 %v2328_v20, %v5947_v35 }
 0x6b1   :  { %v2275_v32 = vsel %vm1788_vm12, %v2266_v24, 0.0  ;;  %v2295_v35 = vsel %vm1833_vm15, %v6128_v5, 0.0  ;;  %4654 = verf.f32 %v2351_v28  ;;  %vm2736_vm12 = vcmp.lt.s32.totalorder %v5758_v40, 4 }
 0x6b2   :  { %v2307_v17 = vadd.f32 %v2275_v32, %v2173_v39  ;;  %v2265_v52 = vsel %vm1800_vm3, %v2259_v47, %v2260_v63  ;;  %v6173_v29 = vadd.f32 %v2329_v42, %v5936_v56  ;;  %v2352_v39 = vmul.f32 0.70710677, %v6184_v9 }
 0x6b3   :  { %v2276_v43 = vsel %vm6542_vm5, %v2265_v52, 0.0  ;;  %vm2689_vm15 = vcmp.ge.s32.totalorder %v5804_v31, 4  ;;  %vm2690_vm1 = vcmp.ge.s32.totalorder %v5821_v51, 4  ;;  %vm2691_vm5 = vcmp.ge.s32.totalorder %v5828_v58, 4 }
 0x6b4   :  { %v2315_v53 = vadd.f32 %v2307_v17, %v2299_v8  ;;  %v2308_v10 = vadd.f32 %v2276_v43, %v2177_v25  ;;  %vm2733_vm6 = vcmp.lt.s32.totalorder %v5826_v55, 4 }
 0x6b5   :  { %v2181_v62 = vpop.f32.mrb[60].mxu1 }
 0x6b6   :  { %v2261_v49 = vrot.slane %v2181_v62, 6  ;;  %v2183_v44 = vpop.f32.mrb[61].mxu1  ;;  %v2330_v21 = vadd.f32 %v3887_v45, %v2315_v53  ;;  %v2316_v3 = vadd.f32 %v2308_v10, %v2300_v26  ;;  %v2343_v10 = vmul.f32 0.5, %v6163_v2 }
 0x6b7   :  { %v2185_v48 = vpop.f32.mrb[62].mxu1 }
 0x6b8   :  { %v2264_v18 = vsel %vm1800_vm3, %v2260_v63, %v2261_v49  ;;  %v2262_v30 = vrot.slane %v2185_v48, 6  ;;  %v2187_v27 = vpop.f32.mrb[63].mxu1  ;;  %v2331_v60 = vadd.f32 %v3887_v45, %v2316_v3  ;;  %v6187_v59 = vadd.f32 %v2330_v21, %v5950_v6 }
 0x6b9   :  { %v2277_v57 = vsel %vm1790_vm0, %v2264_v18, 0.0  ;;  %v2353_v6 = vmul.f32 0.70710677, %v6173_v29  ;;  %v2344_v3 = vmul.f32 0.5, %v6184_v9  ;;  %vm6520_vm0 = vcmp.lt.s32.totalorder %v5804_v31, 4 }
 0x6ba   :  { %v2309_v19 = vadd.f32 %v2277_v57, %v2183_v44  ;;  %v2270_v61 = vsel %vm1800_vm3, %v2262_v30, %v2255_v1  ;;  %v2263_v36 = vsel %vm1800_vm3, %v2261_v49, %v2262_v30  ;;  %v6194_v46 = vadd.f32 %v2331_v60, %v5957_v0 }
 0x6bb   :  { %v2271_v56 = vsel %vm1784_vm2, %v2270_v61, 0.0  ;;  %v2278_v1 = vsel %vm1791_vm4, %v2263_v36, 0.0  ;;  %v2302_v0 = vsel %vm1840_vm14, %v2294_v41, 0.0  ;;  %v2354_v24 = vmul.f32 0.70710677, %v6187_v59 }
 0x6bc   :  { %v2317_v37 = vadd.f32 %v2309_v19, %v2301_v22  ;;  %v2303_v23 = vadd.f32 %v2271_v56, %v6113_v33  ;;  %v2310_v50 = vadd.f32 %v2278_v1, %v2187_v27  ;;  %v2355_v4 = vmul.f32 0.70710677, %v6194_v46 }
 0x6bd   :  { %4656 = verf.f32 %v2353_v6  ;;  %v2345_v44 = vmul.f32 0.5, %v6173_v29  ;;  %v2347_v26 = vmul.f32 0.5, %v6194_v46  ;;  %v2346_v57 = vmul.f32 0.5, %v6187_v59 }
 0x6be   :  { %v2311_v47 = vadd.f32 %v2303_v23, %v2295_v35  ;;  %v2332_v54 = vadd.f32 %v3887_v45, %v2317_v37  ;;  %v2318_v33 = vadd.f32 %v2310_v50, %v2302_v0  ;;  %4658 = verf.f32 %v2355_v4  ;;  %v4536_v0 = vld [vmem:[#allocation23 + $0x4] ss:$12 sps:$4 sm:$0xff]  }
 0x6bf   :  { %4660 = verf.f32 %v2352_v39  ;;  %v4534_v39 = vld [vmem:[#allocation23] ss:$12 sps:$4 sm:$0xff]   ;;  %3016 = vmatprep.subr.bf16.mxu1 %v4536_v0  ;;  %vm2700_vm3 = vcmp.lt.s32.totalorder %v5723_v13, 4  ;;  %vm2737_vm14 = vcmp.lt.s32.totalorder %v5786_v14, 4  ;;  %vm2739_vm2 = vcmp.lt.s32.totalorder %v5821_v51, 4 }
 0x6c0   :  { %v2326_v63 = vadd.f32 %v3887_v45, %v2311_v47  ;;  %v2333_v25 = vadd.f32 %v3887_v45, %v2318_v33  ;;  %v6212_v7 = vadd.f32 %v2332_v54, %v5975_v16  ;;  %4662 = verf.f32 %v2354_v24  ;;  %v4655_v45 = vpop.eup %4654  ;;  %v4537_v54 = vld [vmem:[#allocation23 + $0x8] ss:$12 sps:$4 sm:$0xff]   ;;  %v4538_v24 = vld [vmem:[#allocation23 + $0x18] ss:$12 sps:$4 sm:$0xff]  }
 0x6c1   :  { %v2367_v43 = vadd.f32 1.0, %v4655_v45  ;;  %4208 = vmatprep.subr.bf16.mxu0 %v4537_v54  ;;  %v4540_v33 = vld [vmem:[#allocation23 + $0x1c] ss:$12 sps:$4 sm:$0xff]   ;;  %vm2684_vm4 = vcmp.ge.s32.totalorder %v5826_v55, 4 }
 0x6c2   :  { %v6209_v5 = vadd.f32 %v2326_v63, %v5972_v11  ;;  %v6215_v41 = vadd.f32 %v2333_v25, %v5978_v12  ;;  %v2356_v8 = vmul.f32 0.70710677, %v6212_v7  ;;  %v2348_v6 = vmul.f32 0.5, %v6212_v7  ;;  %v4541_v63 = vld [vmem:[#allocation23 + $0x20] ss:$12 sps:$4 sm:$0xff]  }
 0x6c3   :  { %v2375_v28 = vmul.f32 %v2367_v43, %v2343_v10  ;;  %v4544_v25 = vld [vmem:[#allocation23 + $0x34] ss:$12 sps:$4 sm:$0xff]   ;;  %v4561_v10 = vld [vmem:[#allocation23 + $0x98] ss:$12 sps:$4 sm:$0xff]  }
 0x6c4   :  { %v2350_v32 = vmul.f32 0.70710677, %v6209_v5  ;;  %v2357_v17 = vmul.f32 0.70710677, %v6215_v41  ;;  %v2342_v20 = vmul.f32 0.5, %v6209_v5  ;;  %v2349_v1 = vmul.f32 0.5, %v6215_v41 }
 0x6c5   :  { %v4546_v45 = vld [vmem:[#allocation23 + $0x48] ss:$12 sps:$4 sm:$0xff]   ;;  %v4557_v43 = vld [vmem:[#allocation23 + $0x80] ss:$12 sps:$4 sm:$0xff]  }
 0x6c6   :  { %4664 = verf.f32 %v2350_v32  ;;  %v4542_v32 = vld [vmem:[#allocation23 + $0x30] ss:$12 sps:$4 sm:$0xff]  }
 0x6c7   :  { %4666 = verf.f32 %v2357_v17  ;;  %v4657_v11 = vpop.eup %4656  ;;  %v4545_v17 = vld [vmem:[#allocation23 + $0x38] ss:$12 sps:$4 sm:$0xff]  }
 0x6c8   :  { %4668 = verf.f32 %v2356_v8  ;;  %v4659_v52 = vpop.eup %4658  ;;  %v2369_v16 = vadd.f32 1.0, %v4657_v11  ;;  %v4548_v8 = vld [vmem:[#allocation23 + $0x4c] ss:$12 sps:$4 sm:$0xff]   ;;  %v4549_v11 = vld [vmem:[#allocation23 + $0x50] ss:$12 sps:$4 sm:$0xff]  }
 0x6c9   :  { %v4661_v53 = vpop.eup %4660  ;;  %v2371_v62 = vadd.f32 1.0, %v4659_v52  ;;  %v4550_v52 = vld [vmem:[#allocation23 + $0x60] ss:$12 sps:$4 sm:$0xff]  }
 0x6ca   :  { %v4663_v42 = vpop.eup %4662  ;;  %v2368_v49 = vadd.f32 1.0, %v4661_v53  ;;  %v2377_v18 = vmul.f32 %v2369_v16, %v2345_v44  ;;  %v4552_v53 = vld [vmem:[#allocation23 + $0x64] ss:$12 sps:$4 sm:$0xff]   ;;  %v4556_v16 = vld [vmem:[#allocation23 + $0x7c] ss:$12 sps:$4 sm:$0xff]  }
 0x6cb   :  { %v2370_v48 = vadd.f32 1.0, %v4663_v42  ;;  %v2379_v60 = vmul.f32 %v2371_v62, %v2347_v26  ;;  %v4553_v42 = vld [vmem:[#allocation23 + $0x68] ss:$12 sps:$4 sm:$0xff]   ;;  %v4554_v62 = vld [vmem:[#allocation23 + $0x78] ss:$12 sps:$4 sm:$0xff]  }
 0x6cc   :  { %v2376_v22 = vmul.f32 %v2368_v49, %v2344_v3  ;;  %v4558_v49 = vld [vmem:[#allocation23 + $0x90] ss:$12 sps:$4 sm:$0xff]   ;;  %v4564_v44 = vld [vmem:[#allocation23 + $0xac] ss:$12 sps:$4 sm:$0xff]  }
 0x6cd   :  { %v2378_v56 = vmul.f32 %v2370_v48, %v2346_v57 }
 0x6ce   :  { %v2415_v36 = vpack.c.bf16 %v2377_v18, %v2376_v22 }
 0x6cf   :  { %v2416_v23 = vpack.c.bf16 %v2379_v60, %v2378_v56 }
 0x6d0   :  { %v4665_v12 = vpop.eup %4664 }
 0x6d1   :  { %v2366_v21 = vadd.f32 1.0, %v4665_v12  ;;  %v4667_v30 = vpop.eup %4666  ;;  %v4560_v12 = vld [vmem:[#allocation23 + $0x94] ss:$12 sps:$4 sm:$0xff]  }
 0x6d2   :  { %v4669_v19 = vpop.eup %4668  ;;  %v2373_v37 = vadd.f32 1.0, %v4667_v30 }
 0x6d3   :  { %v2374_v27 = vmul.f32 %v2366_v21, %v2342_v20  ;;  %v2372_v35 = vadd.f32 1.0, %v4669_v19  ;;  %v4565_v20 = vld [vmem:[#allocation23 + $0xb0] ss:$12 sps:$4 sm:$0xff]   ;;  %v4562_v21 = vld [vmem:[#allocation23 + $0xa8] ss:$12 sps:$4 sm:$0xff]  }
 0x6d4   :  { %v2381_v50 = vmul.f32 %v2373_v37, %v2349_v1 }
 0x6d5   :  { %v2414_v61 = vpack.c.bf16 %v2375_v28, %v2374_v27  ;;  %v2380_v4 = vmul.f32 %v2372_v35, %v2348_v6 }
 0x6d7   :  { %2579 = vmatmul.mubr.bf16.vlgmr.msra.gmra.mrb[64].mxu1 %v2414_v61  ;;  %4200 = vmatprep.mubr.bf16.mxu0 %v2414_v61  ;;  %v2417_v47 = vpack.c.bf16 %v2381_v50, %v2380_v4 }
 0x6d8   :  { %4201 = vmatmul.mubr.bf16.vlgmr.msra.gmra.mrb[40].mxu0 %v2415_v36  ;;  %2588 = vmatprep.mubr.bf16.mxu1 %v5253_v38 }
 0x6d9   :  { %4204 = vmatprep.mubr.bf16.mxu0 %v2416_v23  ;;  %3017 = vmatpush1.bf16.msra.mxu1 %v4534_v39 }
 0x6da   :  { %4209 = vmatpush3.bf16.msra.mxu0 %v4537_v54  ;;  %3018 = vmatprep.subr.bf16.mxu1 %v4540_v33 }
 0x6db   :  { %4210 = vmatprep.subr.bf16.mxu0 %v4541_v63 }
 0x6dd   :  { %3019 = vmatpush1.bf16.msra.mxu1 %v4538_v24 }
 0x6de   :  { %4211 = vmatpush3.bf16.msra.mxu0 %v4541_v63  ;;  %3020 = vmatprep.subr.bf16.mxu1 %v4544_v25 }
 0x6df   :  { %2589 = vmatmul.mubr.bf16.gmra.mrb[68].mxu1 %v2415_v36  ;;  %4212 = vmatprep.subr.bf16.mxu0 %v4545_v17 }
 0x6e0   :  { %4205 = vmatmul.mubr.bf16.gmra.mrb[44].mxu0 %v2417_v47  ;;  %2598 = vmatprep.mubr.bf16.mxu1 %v5253_v38 }
 0x6e1   :  { %3021 = vmatpush1.bf16.msra.mxu1 %v4542_v32 }
 0x6e2   :  { %4213 = vmatpush3.bf16.msra.mxu0 %v4545_v17  ;;  %3022 = vmatprep.subr.bf16.mxu1 %v4548_v8 }
 0x6e3   :  { %4214 = vmatprep.subr.bf16.mxu0 %v4549_v11 }
 0x6e5   :  { %3023 = vmatpush1.bf16.msra.mxu1 %v4546_v45 }
 0x6e6   :  { %4215 = vmatpush3.bf16.msra.mxu0 %v4549_v11  ;;  %3024 = vmatprep.subr.bf16.mxu1 %v4552_v53 }
 0x6e7   :  { %2599 = vmatmul.mubr.bf16.gmra.mrb[72].mxu1 %v2416_v23  ;;  %4216 = vmatprep.subr.bf16.mxu0 %v4553_v42 }
 0x6e8   :  { %2608 = vmatprep.mubr.bf16.mxu1 %v5253_v38 }
 0x6e9   :  { %3025 = vmatpush1.bf16.msra.mxu1 %v4550_v52 }
 0x6ea   :  { %4217 = vmatpush3.bf16.msra.mxu0 %v4553_v42  ;;  %3026 = vmatprep.subr.bf16.mxu1 %v4556_v16 }
 0x6eb   :  { %4218 = vmatprep.subr.bf16.mxu0 %v4557_v43 }
 0x6ed   :  { %3027 = vmatpush1.bf16.msra.mxu1 %v4554_v62 }
 0x6ee   :  { %4219 = vmatpush3.bf16.msra.mxu0 %v4557_v43  ;;  %3028 = vmatprep.subr.bf16.mxu1 %v4560_v12 }
 0x6ef   :  { %2609 = vmatmul.mubr.bf16.gmra.mrb[76].mxu1 %v2417_v47  ;;  %4220 = vmatprep.subr.bf16.mxu0 %v4561_v10 }
 0x6f0   :  { %3048 = vmatprep.mubr.bf16.mxu1 %v5253_v38 }
 0x6f1   :  { %3029 = vmatpush1.bf16.msra.mxu1 %v4558_v49 }
 0x6f2   :  { %4221 = vmatpush3.bf16.msra.mxu0 %v4561_v10  ;;  %3030 = vmatprep.subr.bf16.mxu1 %v4564_v44 }
 0x6f3   :  { %4222 = vmatprep.subr.bf16.mxu0 %v4565_v20 }
 0x6f5   :  { %3031 = vmatpush1.bf16.msra.mxu1 %v4562_v21 }
 0x6f6   :  { %4223 = vmatpush3.bf16.msra.mxu0 %v4565_v20 }
 0x7aa   :  { %v6232_v26 = vpop.f32.mrb[64].mxu1 }
 0x7ab   :  { %v6234_v48 = vpop.f32.mrb[65].mxu1  ;;  %v4202_v3 = vpop.f32.mrb[40].mxu0  ;;  %v2692_v27 = vrot.slane %v6232_v26, 4 }
 0x7ac   :  { %v2584_v18 = vpop.f32.mrb[66].mxu1  ;;  %v2653_v30 = vpop.f32.mrb[41].mxu0  ;;  %v2743_v22 = vrot.slane %v4202_v3, 4  ;;  %v6276_v3 = vld [vmem:[#allocation22] ss:$0 sm:$0xff] }
 0x7ad   :  { %v2693_v28 = vrot.slane %v2584_v18, 4  ;;  %v2586_v57 = vpop.f32.mrb[67].mxu1  ;;  %v4203_v60 = vpop.f32.mrb[42].mxu0  ;;  %v2741_v56 = vrot.slane %v2653_v30, 4 }
 0x7ae   :  { %v2744_v19 = vrot.slane %v4203_v60, 4  ;;  %v2656_v61 = vpop.f32.mrb[43].mxu0 }
 0x7af   :  { %v2707_v36 = vsel %vm2700_vm3, %v2692_v27, %v2693_v28  ;;  %v2742_v37 = vrot.slane %v2656_v61, 4 }
 0x7b0   :  { %v2726_v23 = vsel %vm2685_vm7, %v2707_v36, 0.0  ;;  %v2753_v1 = vsel %vm2700_vm3, %v2743_v22, %v2744_v19 }
 0x7b1   :  { %v2782_v35 = vadd.f32 %v2726_v23, %v2586_v57  ;;  %v2754_v6 = vsel %vm2700_vm3, %v2742_v37, %v2743_v22  ;;  %v6252_v50 = vsel %vm2700_vm3, %v2741_v56, %v2742_v37  ;;  %v2775_v16 = vsel %vm2735_vm10, %v2753_v1, 0.0 }
 0x7b2   :  { %v2774_v4 = vsel %vm2734_vm8, %v2754_v6, 0.0  ;;  %v2590_v47 = vpop.f32.mrb[68].mxu1 }
 0x7b3   :  { %v6256_v0 = vadd.f32 %v2782_v35, %v2774_v4  ;;  %v2694_v39 = vrot.slane %v2590_v47, 4  ;;  %v2592_v54 = vpop.f32.mrb[69].mxu1  ;;  %v4206_v33 = vpop.f32.mrb[44].mxu0 }
 0x7b4   :  { %v2594_v24 = vpop.f32.mrb[70].mxu1  ;;  %v2669_v63 = vpop.f32.mrb[45].mxu0  ;;  %v2747_v52 = vrot.slane %v4206_v33, 4 }
 0x7b5   :  { %v2706_v25 = vsel %vm2700_vm3, %v2693_v28, %v2694_v39  ;;  %v2695_v32 = vrot.slane %v2594_v24, 4  ;;  %v2745_v17 = vrot.slane %v2669_v63, 4  ;;  %v2596_v8 = vpop.f32.mrb[71].mxu1  ;;  %v4207_v45 = vpop.f32.mrb[46].mxu0 }
 0x7b6   :  { %v2727_v11 = vsel %vm2686_vm9, %v2706_v25, 0.0  ;;  %v2748_v53 = vrot.slane %v4207_v45, 4  ;;  %v2672_v42 = vpop.f32.mrb[47].mxu0 }
 0x7b7   :  { %v2783_v43 = vadd.f32 %v2727_v11, %v2592_v54  ;;  %v2705_v62 = vsel %vm2700_vm3, %v2694_v39, %v2695_v32  ;;  %v2752_v10 = vsel %vm2700_vm3, %v2744_v19, %v2745_v17  ;;  %v2746_v49 = vrot.slane %v2672_v42, 4 }
 0x7b8   :  { %v2728_v12 = vsel %vm2687_vm11, %v2705_v62, 0.0  ;;  %v2749_v44 = vsel %vm2700_vm3, %v2747_v52, %v2748_v53  ;;  %v2776_v18 = vsel %vm2736_vm12, %v2752_v10, 0.0  ;;  %v2756_v60 = vsel %vm2700_vm3, %v2748_v53, %v2741_v56 }
 0x7b9   :  { %v2791_v20 = vadd.f32 %v2783_v43, %v2775_v16  ;;  %v2784_v21 = vadd.f32 %v2728_v12, %v2596_v8  ;;  %v2751_v28 = vsel %vm2700_vm3, %v2745_v17, %v2746_v49  ;;  %v2750_v57 = vsel %vm2700_vm3, %v2746_v49, %v2747_v52 }
 0x7ba   :  { %v2600_v30 = vpop.f32.mrb[72].mxu1  ;;  %v2777_v54 = vsel %vm2737_vm14, %v2751_v28, 0.0  ;;  %v2778_v8 = vsel %vm6520_vm0, %v2750_v57, 0.0  ;;  %v2805_v42 = vadd.f32 %v6276_v3, %v6256_v0  ;;  %vm2740_vm0 = vcmp.lt.s32.totalorder %v5828_v58, 4 }
 0x7bb   :  { %v6287_v22 = vadd.f32 %v6276_v3, %v2791_v20  ;;  %v2792_v19 = vadd.f32 %v2784_v21, %v2776_v18  ;;  %v2696_v61 = vrot.slane %v2600_v30, 4  ;;  %v2602_v36 = vpop.f32.mrb[73].mxu1  ;;  %v2779_v30 = vsel %vm2739_vm2, %v2749_v44, 0.0 }
 0x7bc   :  { %v2604_v37 = vpop.f32.mrb[74].mxu1  ;;  %v2780_v44 = vsel %vm2740_vm0, %v2756_v60, 0.0 }
 0x7bd   :  { %v2822_v23 = vmul.f32 0.70710677, %v6287_v22  ;;  %v2807_v1 = vadd.f32 %v6276_v3, %v2792_v19  ;;  %v2704_v35 = vsel %vm2700_vm3, %v2695_v32, %v2696_v61  ;;  %v2606_v6 = vpop.f32.mrb[75].mxu1  ;;  %v2697_v4 = vrot.slane %v2604_v37, 4 }
 0x7be   :  { %v2729_v56 = vsel %vm2688_vm13, %v2704_v35, 0.0 }
 0x7bf   :  { %4670 = verf.f32 %v2822_v23  ;;  %v2823_v47 = vmul.f32 0.70710677, %v2807_v1  ;;  %v2785_v39 = vadd.f32 %v2729_v56, %v2602_v36  ;;  %v2703_v33 = vsel %vm2700_vm3, %v2696_v61, %v2697_v4 }
 0x7c0   :  { %v2730_v63 = vsel %vm2689_vm15, %v2703_v33, 0.0  ;;  %v2821_v61 = vmul.f32 0.70710677, %v2805_v42 }
 0x7c1   :  { %4672 = verf.f32 %v2823_v47  ;;  %v2793_v24 = vadd.f32 %v2785_v39, %v2777_v54  ;;  %v2786_v25 = vadd.f32 %v2730_v63, %v2606_v6  ;;  %v2814_v47 = vmul.f32 0.5, %v6287_v22 }
 0x7c2   :  { %v2610_v32 = vpop.f32.mrb[76].mxu1  ;;  %v2815_v39 = vmul.f32 0.5, %v2807_v1 }
 0x7c3   :  { %v2808_v17 = vadd.f32 %v6276_v3, %v2793_v24  ;;  %v2698_v45 = vrot.slane %v2610_v32, 4  ;;  %v2612_v11 = vpop.f32.mrb[77].mxu1  ;;  %v2794_v52 = vadd.f32 %v2786_v25, %v2778_v8 }
 0x7c4   :  { %v2614_v53 = vpop.f32.mrb[78].mxu1 }
 0x7c5   :  { %v2824_v16 = vmul.f32 0.70710677, %v2808_v17  ;;  %v2702_v43 = vsel %vm2700_vm3, %v2697_v4, %v2698_v45  ;;  %v2699_v62 = vrot.slane %v2614_v53, 4  ;;  %v2616_v12 = vpop.f32.mrb[79].mxu1  ;;  %v2809_v10 = vadd.f32 %v6276_v3, %v2794_v52 }
 0x7c6   :  { %v2731_v49 = vsel %vm2690_vm1, %v2702_v43, 0.0  ;;  %v2816_v22 = vmul.f32 0.5, %v2808_v17 }
 0x7c7   :  { %4674 = verf.f32 %v2824_v16  ;;  %v2787_v20 = vadd.f32 %v2731_v49, %v2612_v11  ;;  %v2708_v0 = vsel %vm2700_vm3, %v2699_v62, %v2692_v27  ;;  %v2701_v21 = vsel %vm2700_vm3, %v2698_v45, %v2699_v62 }
 0x7c8   :  { %v2825_v18 = vmul.f32 0.70710677, %v2809_v10  ;;  %v2725_v28 = vsel %vm2684_vm4, %v2708_v0, 0.0  ;;  %v2732_v57 = vsel %vm2691_vm5, %v2701_v21, 0.0  ;;  %v2773_v27 = vsel %vm2733_vm6, %v6252_v50, 0.0 }
 0x7c9   :  { %v4671_v19 = vpop.eup %4670  ;;  %v2795_v36 = vadd.f32 %v2787_v20, %v2779_v30  ;;  %v2781_v26 = vadd.f32 %v2725_v28, %v6234_v48  ;;  %v2788_v37 = vadd.f32 %v2732_v57, %v2616_v12  ;;  %v2817_v1 = vmul.f32 0.5, %v2809_v10 }
 0x7ca   :  { %v2838_v23 = vadd.f32 1.0, %v4671_v19  ;;  %4676 = verf.f32 %v2825_v18  ;;  %v2813_v21 = vmul.f32 0.5, %v2805_v42  ;;  %v4566_v42 = vld [vmem:[#allocation32] sm:$0xff]  }
 0x7cb   :  { %v4673_v35 = vpop.eup %4672  ;;  %v2810_v6 = vadd.f32 %v6276_v3, %v2795_v36  ;;  %v2789_v56 = vadd.f32 %v2781_v26, %v2773_v27  ;;  %v2796_v4 = vadd.f32 %v2788_v37, %v2780_v44  ;;  %4678 = verf.f32 %v2821_v61  ;;  %4232 = vmatprep.subr.bf16.mxu1 %v4566_v42  ;;  %v4567_v27 = vld [vmem:[#allocation32 + $0x8] sm:$0xff]   ;;  %v4569_v44 = vld [vmem:[#allocation32 + $0x18] sm:$0xff]  }
 0x7cc   :  { %v2839_v54 = vadd.f32 1.0, %v4673_v35  ;;  %v2846_v24 = vmul.f32 %v2838_v23, %v2814_v47  ;;  %v4568_v23 = vld [vmem:[#allocation32 + $0x10] sm:$0xff]   ;;  %v4570_v35 = vld [vmem:[#allocation32 + $0x20] sm:$0xff]  }
 0x7cd   :  { %v2826_v48 = vmul.f32 0.70710677, %v2810_v6  ;;  %v2804_v33 = vadd.f32 %v6276_v3, %v2789_v56  ;;  %v2811_v50 = vadd.f32 %v6276_v3, %v2796_v4  ;;  %v2818_v28 = vmul.f32 0.5, %v2810_v6  ;;  %v4571_v6 = vld [vmem:[#allocation26 + $0x4] ss:$12 sps:$4 sm:$0xff]   ;;  %v4574_v4 = vld [vmem:[#allocation32 + $0x30] sm:$0xff]  }
 0x7ce   :  { %v2847_v63 = vmul.f32 %v2839_v54, %v2815_v39  ;;  %4256 = vmatprep.subr.bf16.mxu0 %v4571_v6  ;;  %v4573_v56 = vld [vmem:[#allocation26 + $0x1c] ss:$12 sps:$4 sm:$0xff]   ;;  %v4575_v47 = vld [vmem:[#allocation26 + $0x34] ss:$12 sps:$4 sm:$0xff]   ;;  %v4577_v54 = vld [vmem:[#allocation26 + $0x4c] ss:$12 sps:$4 sm:$0xff]  }
 0x7cf   :  { %4680 = verf.f32 %v2826_v48  ;;  %v2820_v25 = vmul.f32 0.70710677, %v2804_v33  ;;  %v2827_v32 = vmul.f32 0.70710677, %v2811_v50  ;;  %v2812_v18 = vmul.f32 0.5, %v2804_v33  ;;  %v4576_v39 = vld [vmem:[#allocation32 + $0x38] sm:$0xff]  }
 0x7d0   :  { %v2885_v60 = vpack.c.bf16 %v2847_v63, %v2846_v24  ;;  %v2819_v57 = vmul.f32 0.5, %v2811_v50  ;;  %v4578_v48 = vld [vmem:[#allocation26 + $0x64] ss:$12 sps:$4 sm:$0xff]   ;;  %v4579_v33 = vld [vmem:[#allocation26 + $0x7c] ss:$12 sps:$4 sm:$0xff]  }
 0x7d1   :  { %v4675_v8 = vpop.eup %4674  ;;  %4682 = verf.f32 %v2820_v25  ;;  %v4580_v50 = vld [vmem:[#allocation26 + $0x94] ss:$12 sps:$4 sm:$0xff]   ;;  %v4581_v24 = vld [vmem:[#allocation26 + $0xac] ss:$12 sps:$4 sm:$0xff]  }
 0x7d2   :  { %4684 = verf.f32 %v2827_v32  ;;  %v2840_v45 = vadd.f32 1.0, %v4675_v8 }
 0x7d4   :  { %v4677_v11 = vpop.eup %4676  ;;  %v2848_v16 = vmul.f32 %v2840_v45, %v2816_v22 }
 0x7d5   :  { %v2841_v52 = vadd.f32 1.0, %v4677_v11  ;;  %v4679_v53 = vpop.eup %4678 }
 0x7d6   :  { %v2837_v3 = vadd.f32 1.0, %v4679_v53 }
 0x7d7   :  { %v2849_v43 = vmul.f32 %v2841_v52, %v2817_v1 }
 0x7d8   :  { %v2845_v61 = vmul.f32 %v2837_v3, %v2813_v21 }
 0x7d9   :  { %v4681_v62 = vpop.eup %4680  ;;  %v2886_v12 = vpack.c.bf16 %v2849_v43, %v2848_v16 }
 0x7da   :  { %v2842_v20 = vadd.f32 1.0, %v4681_v62 }
 0x7db   :  { %v4683_v49 = vpop.eup %4682 }
 0x7dc   :  { %v4685_v0 = vpop.eup %4684  ;;  %v2836_v30 = vadd.f32 1.0, %v4683_v49  ;;  %v2850_v17 = vmul.f32 %v2842_v20, %v2818_v28 }
 0x7dd   :  { %v2843_v19 = vadd.f32 1.0, %v4685_v0 }
 0x7de   :  { %v2844_v36 = vmul.f32 %v2836_v30, %v2812_v18 }
 0x7df   :  { %v2851_v10 = vmul.f32 %v2843_v19, %v2819_v57 }
 0x7e0   :  { %v2884_v26 = vpack.c.bf16 %v2845_v61, %v2844_v36 }
 0x7e1   :  { %v2887_v37 = vpack.c.bf16 %v2851_v10, %v2850_v17 }
 0x7e2   :  { %3049 = vmatmul.mubr.bf16.vlgmr.msra.gmra.mrb[80].mxu1 %v2884_v26  ;;  %4224 = vmatprep.mubr.bf16.mxu0 %v2884_v26 }
 0x7e3   :  { %4225 = vmatmul.mubr.bf16.vlgmr.msra.gmra.mrb[48].mxu0 %v2885_v60  ;;  %3058 = vmatprep.mubr.bf16.mxu1 %v5253_v38 }
 0x7e4   :  { %4228 = vmatprep.mubr.bf16.mxu0 %v2886_v12  ;;  %4233 = vmatpush3.bf16.msra.mxu1 %v4566_v42 }
 0x7e5   :  { %4234 = vmatprep.subr.bf16.mxu1 %v4567_v27  ;;  %4257 = vmatpush3.bf16.msra.mxu0 %v4571_v6 }
 0x7e6   :  { %4258 = vmatprep.subr.bf16.mxu0 %v4573_v56 }
 0x7e8   :  { %4235 = vmatpush3.bf16.msra.mxu1 %v4567_v27 }
 0x7e9   :  { %4236 = vmatprep.subr.bf16.mxu1 %v4568_v23  ;;  %4259 = vmatpush3.bf16.msra.mxu0 %v4573_v56 }
 0x7ea   :  { %3059 = vmatmul.mubr.bf16.gmra.mrb[84].mxu1 %v2885_v60  ;;  %4260 = vmatprep.subr.bf16.mxu0 %v4575_v47 }
 0x7eb   :  { %4229 = vmatmul.mubr.bf16.gmra.mrb[52].mxu0 %v2887_v37  ;;  %3068 = vmatprep.mubr.bf16.mxu1 %v5253_v38 }
 0x7ec   :  { %4237 = vmatpush3.bf16.msra.mxu1 %v4568_v23 }
 0x7ed   :  { %4238 = vmatprep.subr.bf16.mxu1 %v4569_v44  ;;  %4261 = vmatpush3.bf16.msra.mxu0 %v4575_v47 }
 0x7ee   :  { %4262 = vmatprep.subr.bf16.mxu0 %v4577_v54 }
 0x7f0   :  { %4239 = vmatpush3.bf16.msra.mxu1 %v4569_v44 }
 0x7f1   :  { %4240 = vmatprep.subr.bf16.mxu1 %v4570_v35  ;;  %4263 = vmatpush3.bf16.msra.mxu0 %v4577_v54 }
 0x7f2   :  { %3069 = vmatmul.mubr.bf16.gmra.mrb[88].mxu1 %v2886_v12  ;;  %4264 = vmatprep.subr.bf16.mxu0 %v4578_v48 }
 0x7f3   :  { %3078 = vmatprep.mubr.bf16.mxu1 %v5253_v38  ;;  %v4572_v38 = vld [vmem:[#allocation32 + $0x28] sm:$0xff]  }
 0x7f4   :  { %4241 = vmatpush3.bf16.msra.mxu1 %v4570_v35 }
 0x7f5   :  { %4242 = vmatprep.subr.bf16.mxu1 %v4572_v38  ;;  %4265 = vmatpush3.bf16.msra.mxu0 %v4578_v48 }
 0x7f6   :  { %4266 = vmatprep.subr.bf16.mxu0 %v4579_v33 }
 0x7f8   :  { %4243 = vmatpush3.bf16.msra.mxu1 %v4572_v38 }
 0x7f9   :  { %4244 = vmatprep.subr.bf16.mxu1 %v4574_v4  ;;  %4267 = vmatpush3.bf16.msra.mxu0 %v4579_v33 }
 0x7fa   :  { %3079 = vmatmul.mubr.bf16.gmra.mrb[92].mxu1 %v2887_v37  ;;  %4268 = vmatprep.subr.bf16.mxu0 %v4580_v50 }
 0x7fc   :  { %4245 = vmatpush3.bf16.msra.mxu1 %v4574_v4 }
 0x7fd   :  { %4246 = vmatprep.subr.bf16.mxu1 %v4576_v39  ;;  %4269 = vmatpush3.bf16.msra.mxu0 %v4580_v50 }
 0x7fe   :  { %4270 = vmatprep.subr.bf16.mxu0 %v4581_v24 }
 0x800   :  { %4247 = vmatpush3.bf16.msra.mxu1 %v4576_v39 }
 0x801   :  { %4271 = vmatpush3.bf16.msra.mxu0 %v4581_v24 }
 0x8b5   :  { %v6346_v63 = vpop.f32.mrb[80].mxu1 }
 0x8b6   :  { %v6348_v25 = vpop.f32.mrb[81].mxu1  ;;  %v4226_v60 = vpop.f32.mrb[48].mxu0  ;;  %v3154_v45 = vrot.slane %v6346_v63, 4 }
 0x8b7   :  { %v3054_v32 = vpop.f32.mrb[82].mxu1  ;;  %v3123_v8 = vpop.f32.mrb[49].mxu0  ;;  %v3180_v52 = vrot.slane %v4226_v60, 4 }
 0x8b8   :  { %v3155_v11 = vrot.slane %v3054_v32, 4  ;;  %v3056_v22 = vpop.f32.mrb[83].mxu1  ;;  %v4227_v1 = vpop.f32.mrb[50].mxu0  ;;  %v3178_v43 = vrot.slane %v3123_v8, 4  ;;  %v6387_v32 = vld [vmem:[#allocation25] ss:$0 sm:$0xff] }
 0x8b9   :  { %v3181_v53 = vrot.slane %v4227_v1, 4  ;;  %v3126_v16 = vpop.f32.mrb[51].mxu0 }
 0x8ba   :  { %v3168_v62 = vsel %vm2700_vm3, %v3154_v45, %v3155_v11  ;;  %v3179_v12 = vrot.slane %v3126_v16, 4 }
 0x8bb   :  { %v3171_v3 = vsel %vm2685_vm7, %v3168_v62, 0.0  ;;  %v3190_v49 = vsel %vm2700_vm3, %v3180_v52, %v3181_v53  ;;  %vm6544_vm7 = vcmp.lt.s32.totalorder %v5804_v31, 4 }
 0x8bc   :  { %v3203_v20 = vadd.f32 %v3171_v3, %v3056_v22  ;;  %v3191_v0 = vsel %vm2700_vm3, %v3179_v12, %v3180_v52  ;;  %v6363_v21 = vsel %vm2700_vm3, %v3178_v43, %v3179_v12  ;;  %v3196_v47 = vsel %vm2735_vm10, %v3190_v49, 0.0 }
 0x8bd   :  { %v3195_v18 = vsel %vm2734_vm8, %v3191_v0, 0.0  ;;  %v3060_v30 = vpop.f32.mrb[84].mxu1  ;;  %v3194_v13 = vsel %vm2733_vm6, %v6363_v21, 0.0 }
 0x8be   :  { %v3211_v28 = vadd.f32 %v3203_v20, %v3195_v18  ;;  %v3156_v57 = vrot.slane %v3060_v30, 4  ;;  %v3062_v19 = vpop.f32.mrb[85].mxu1  ;;  %v4230_v61 = vpop.f32.mrb[52].mxu0 }
 0x8bf   :  { %v3064_v36 = vpop.f32.mrb[86].mxu1  ;;  %v3139_v17 = vpop.f32.mrb[53].mxu0  ;;  %v3184_v44 = vrot.slane %v4230_v61, 4 }
 0x8c0   :  { %v3167_v10 = vsel %vm2700_vm3, %v3155_v11, %v3156_v57  ;;  %v3157_v26 = vrot.slane %v3064_v36, 4  ;;  %v3182_v37 = vrot.slane %v3139_v17, 4  ;;  %v3066_v42 = vpop.f32.mrb[87].mxu1  ;;  %v4231_v27 = vpop.f32.mrb[54].mxu0 }
 0x8c1   :  { %v3172_v23 = vsel %vm2686_vm9, %v3167_v10, 0.0  ;;  %v3185_v15 = vrot.slane %v4231_v27, 4  ;;  %v3142_v35 = vpop.f32.mrb[55].mxu0 }
 0x8c2   :  { %v3204_v6 = vadd.f32 %v3172_v23, %v3062_v19  ;;  %v3166_v38 = vsel %vm2700_vm3, %v3156_v57, %v3157_v26  ;;  %v3189_v56 = vsel %vm2700_vm3, %v3181_v53, %v3182_v37  ;;  %v3183_v4 = vrot.slane %v3142_v35, 4 }
 0x8c3   :  { %v3173_v39 = vsel %vm2687_vm11, %v3166_v38, 0.0  ;;  %v3186_v54 = vsel %vm2700_vm3, %v3184_v44, %v3185_v15  ;;  %v3193_v48 = vsel %vm2700_vm3, %v3185_v15, %v3178_v43  ;;  %v3197_v34 = vsel %vm2736_vm12, %v3189_v56, 0.0 }
 0x8c4   :  { %v3212_v33 = vadd.f32 %v3204_v6, %v3196_v47  ;;  %v3205_v50 = vadd.f32 %v3173_v39, %v3066_v42  ;;  %v3188_v24 = vsel %vm2700_vm3, %v3182_v37, %v3183_v4  ;;  %v3187_v60 = vsel %vm2700_vm3, %v3183_v4, %v3184_v44 }
 0x8c5   :  { %v3070_v8 = vpop.f32.mrb[88].mxu1  ;;  %v3198_v57 = vsel %vm2737_vm14, %v3188_v24, 0.0  ;;  %v3199_v42 = vsel %vm6544_vm7, %v3187_v60, 0.0 }
 0x8c6   :  { %v3227_v11 = vadd.f32 %v6387_v32, %v3212_v33  ;;  %v3213_v22 = vadd.f32 %v3205_v50, %v3197_v34  ;;  %v3158_v1 = vrot.slane %v3070_v8, 4  ;;  %v3072_v52 = vpop.f32.mrb[89].mxu1 }
 0x8c7   :  { %v3074_v53 = vpop.f32.mrb[90].mxu1 }
 0x8c8   :  { %v6393_v16 = vadd.f32 %v3227_v11, %v6184_v9  ;;  %v3228_v43 = vadd.f32 %v6387_v32, %v3213_v22  ;;  %v3165_v62 = vsel %vm2700_vm3, %v3157_v26, %v3158_v1  ;;  %v3159_v12 = vrot.slane %v3074_v53, 4  ;;  %v3076_v3 = vpop.f32.mrb[91].mxu1 }
 0x8c9   :  { %v3174_v40 = vsel %vm2688_vm13, %v3165_v62, 0.0  ;;  %v3226_v26 = vadd.f32 %v6387_v32, %v3211_v28  ;;  %v3200_v28 = vsel %vm2739_vm2, %v3186_v54, 0.0 }
 0x8ca   :  { %v3391_v49 = vmul.f32 0.70710677, %v6393_v16  ;;  %v6402_v20 = vadd.f32 %v3228_v43, %v6173_v29  ;;  %v3206_v0 = vadd.f32 %v3174_v40, %v3072_v52  ;;  %v3164_v9 = vsel %vm2700_vm3, %v3158_v1, %v3159_v12 }
 0x8cb   :  { %v3175_v61 = vsel %vm2689_vm15, %v3164_v9, 0.0  ;;  %v3234_v51 = vadd.f32 %v3226_v26, %v6163_v2  ;;  %v3383_v58 = vmul.f32 0.5, %v6393_v16 }
 0x8cc   :  { %4686 = verf.f32 %v3391_v49  ;;  %v3258_v18 = vpack.c.bf16 %v6402_v20, %v6393_v16  ;;  %v3392_v30 = vmul.f32 0.70710677, %v6402_v20  ;;  %v3214_v19 = vadd.f32 %v3206_v0, %v3198_v57 }
 0x8cd   :  { %v3080_v36 = vpop.f32.mrb[92].mxu1  ;;  %v3207_v29 = vadd.f32 %v3175_v61, %v3076_v3  ;;  %v3390_v22 = vmul.f32 0.70710677, %v3234_v51  ;;  %v3384_v21 = vmul.f32 0.5, %v6402_v20 }
 0x8ce   :  { %4688 = verf.f32 %v3392_v30  ;;  %v3160_v17 = vrot.slane %v3080_v36, 4  ;;  %v3082_v10 = vpop.f32.mrb[93].mxu1  ;;  %v3229_v37 = vadd.f32 %v6387_v32, %v3214_v19 }
 0x8cf   :  { %v3084_v27 = vpop.f32.mrb[94].mxu1  ;;  %v3215_v23 = vadd.f32 %v3207_v29, %v3199_v42 }
 0x8d0   :  { %v3163_v14 = vsel %vm2700_vm3, %v3159_v12, %v3160_v17  ;;  %v3161_v44 = vrot.slane %v3084_v27, 4  ;;  %v3086_v15 = vpop.f32.mrb[95].mxu1  ;;  %v3237_v35 = vadd.f32 %v3229_v37, %v6187_v59 }
 0x8d1   :  { %v3176_v6 = vsel %vm2690_vm1, %v3163_v14, 0.0  ;;  %v3230_v38 = vadd.f32 %v6387_v32, %v3215_v23  ;;  %v3382_v14 = vmul.f32 0.5, %v3234_v51 }
 0x8d2   :  { %v3208_v56 = vadd.f32 %v3176_v6, %v3082_v10  ;;  %v3169_v31 = vsel %vm2700_vm3, %v3161_v44, %v3154_v45  ;;  %v3162_v4 = vsel %vm2700_vm3, %v3160_v17, %v3161_v44  ;;  %v3393_v47 = vmul.f32 0.70710677, %v3237_v35 }
 0x8d3   :  { %v3170_v59 = vsel %vm2684_vm4, %v3169_v31, 0.0  ;;  %v3177_v39 = vsel %vm2691_vm5, %v3162_v4, 0.0  ;;  %v3238_v54 = vadd.f32 %v3230_v38, %v6194_v46  ;;  %v3201_v45 = vsel %vm2740_vm0, %v3193_v48, 0.0  ;;  %v4582_v31 = vld [vmem:[#allocation29 + $0x4] ss:$12 sps:$4 sm:$0xff]  }
 0x8d4   :  { %v3216_v33 = vadd.f32 %v3208_v56, %v3200_v28  ;;  %v3202_v63 = vadd.f32 %v3170_v59, %v6348_v25  ;;  %v3209_v50 = vadd.f32 %v3177_v39, %v3086_v15  ;;  %4690 = verf.f32 %v3393_v47  ;;  %v4583_v4 = vld [vmem:[#allocation29 + $0x1c] ss:$12 sps:$4 sm:$0xff]   ;;  %4280 = vmatprep.subr.bf16.mxu0 %v4582_v31  ;;  %4304 = vmatprep.subr.bf16.mxu1 %v4582_v31  ;;  %v4584_v47 = vld [vmem:[#allocation29 + $0x34] ss:$12 sps:$4 sm:$0xff]   ;;  %v4585_v59 = vld [vmem:[#allocation29 + $0x4c] ss:$12 sps:$4 sm:$0xff]  }
 0x8d5   :  { %v3394_v60 = vmul.f32 0.70710677, %v3238_v54  ;;  %v3259_v46 = vpack.c.bf16 %v3238_v54, %v3237_v35  ;;  %v3385_v30 = vmul.f32 0.5, %v3237_v35  ;;  %v3386_v57 = vmul.f32 0.5, %v3238_v54  ;;  %v4586_v39 = vld [vmem:[#allocation29 + $0x64] ss:$12 sps:$4 sm:$0xff]  }
 0x8d6   :  { %v4687_v24 = vpop.eup %4686  ;;  %v3231_v34 = vadd.f32 %v6387_v32, %v3216_v33  ;;  %v3210_v8 = vadd.f32 %v3202_v63, %v3194_v13  ;;  %v3217_v2 = vadd.f32 %v3209_v50, %v3201_v45  ;;  %v4588_v54 = vld [vmem:[#allocation29 + $0x94] ss:$12 sps:$4 sm:$0xff]   ;;  %v4589_v33 = vld [vmem:[#allocation29 + $0xac] ss:$12 sps:$4 sm:$0xff]  }
 0x8d7   :  { %v3407_v11 = vadd.f32 1.0, %v4687_v24  ;;  %4692 = verf.f32 %v3394_v60  ;;  %v3947_v24 = vld [vmem:[#allocation28] ss:$0 sm:$0xff] }
 0x8d8   :  { %v4689_v1 = vpop.eup %4688  ;;  %v3239_v25 = vadd.f32 %v3231_v34, %v6212_v7  ;;  %v3232_v52 = vadd.f32 %v6387_v32, %v3217_v2  ;;  %v3225_v55 = vadd.f32 %v6387_v32, %v3210_v8  ;;  %4694 = verf.f32 %v3390_v22 }
 0x8d9   :  { %v3408_v48 = vadd.f32 1.0, %v4689_v1  ;;  %v3415_v12 = vmul.f32 %v3407_v11, %v3383_v58 }
 0x8da   :  { %v3395_v53 = vmul.f32 0.70710677, %v3239_v25  ;;  %v3240_v43 = vadd.f32 %v3232_v52, %v6215_v41  ;;  %v3233_v62 = vadd.f32 %v3225_v55, %v6209_v5  ;;  %v3387_v23 = vmul.f32 0.5, %v3239_v25 }
 0x8db   :  { %v3416_v3 = vmul.f32 %v3408_v48, %v3384_v21 }
 0x8dc   :  { %v3396_v40 = vmul.f32 0.70710677, %v3240_v43  ;;  %v3257_v7 = vpack.c.bf16 %v3234_v51, %v3233_v62  ;;  %v3260_v49 = vpack.c.bf16 %v3240_v43, %v3239_v25  ;;  %v3389_v0 = vmul.f32 0.70710677, %v3233_v62  ;;  %v4587_v51 = vld [vmem:[#allocation29 + $0x7c] ss:$12 sps:$4 sm:$0xff]  }
 0x8dd   :  { %v3438_v9 = vpack.c.bf16 %v3416_v3, %v3415_v12  ;;  %4696 = verf.f32 %v3395_v53  ;;  %v3388_v16 = vmul.f32 0.5, %v3240_v43 }
 0x8de   :  { %4248 = vmatprep.mubr.bf16.mxu1 %v3257_v7  ;;  %4698 = verf.f32 %v3396_v40  ;;  %v4691_v32 = vpop.eup %4690 }
 0x8df   :  { %4249 = vmatmul.mubr.bf16.vlgmr.msra.gmra.mrb[96].mxu1 %v3258_v18  ;;  %4700 = verf.f32 %v3389_v0  ;;  %v3409_v41 = vadd.f32 1.0, %v4691_v32  ;;  %v3381_v18 = vmul.f32 0.5, %v3233_v62 }
 0x8e0   :  { %4252 = vmatprep.mubr.bf16.mxu1 %v3259_v46  ;;  %4312 = vmatpush3.bf16.msra.mxu1 %v4582_v31 }
 0x8e1   :  { %v4693_v5 = vpop.eup %4692  ;;  %v3417_v36 = vmul.f32 %v3409_v41, %v3385_v30  ;;  %4305 = vmatprep.subr.bf16.mxu1 %v4583_v4 }
 0x8e2   :  { %v3410_v19 = vadd.f32 1.0, %v4693_v5  ;;  %v4695_v61 = vpop.eup %4694 }
 0x8e3   :  { %v3406_v37 = vadd.f32 1.0, %v4695_v61 }
 0x8e4   :  { %v3418_v29 = vmul.f32 %v3410_v19, %v3386_v57  ;;  %4313 = vmatpush3.bf16.msra.mxu1 %v4583_v4 }
 0x8e5   :  { %v3414_v28 = vmul.f32 %v3406_v37, %v3382_v14  ;;  %4306 = vmatprep.subr.bf16.mxu1 %v4584_v47 }
 0x8e6   :  { %v3439_v10 = vpack.c.bf16 %v3418_v29, %v3417_v36 }
 0x8e7   :  { %v4697_v17 = vpop.eup %4696  ;;  %4253 = vmatmul.mubr.bf16.gmra.mrb[100].mxu1 %v3260_v49 }
 0x8e8   :  { %v4699_v26 = vpop.eup %4698  ;;  %v3411_v42 = vadd.f32 1.0, %v4697_v17  ;;  %4314 = vmatpush3.bf16.msra.mxu1 %v4584_v47 }
 0x8e9   :  { %v4701_v27 = vpop.eup %4700  ;;  %v3412_v20 = vadd.f32 1.0, %v4699_v26  ;;  %4307 = vmatprep.subr.bf16.mxu1 %v4585_v59 }
 0x8ea   :  { %v3405_v44 = vadd.f32 1.0, %v4701_v27  ;;  %v3419_v15 = vmul.f32 %v3411_v42, %v3387_v23 }
 0x8eb   :  { %v3420_v35 = vmul.f32 %v3412_v20, %v3388_v16 }
 0x8ec   :  { %v3413_v6 = vmul.f32 %v3405_v44, %v3381_v18  ;;  %4315 = vmatpush3.bf16.msra.mxu1 %v4585_v59 }
 0x8ed   :  { %v3440_v38 = vpack.c.bf16 %v3420_v35, %v3419_v15  ;;  %4308 = vmatprep.subr.bf16.mxu1 %v4586_v39 }
 0x8ee   :  { %v3437_v56 = vpack.c.bf16 %v3414_v28, %v3413_v6 }
 0x8f0   :  { %4272 = vmatprep.mubr.bf16.mxu0 %v3437_v56  ;;  %4316 = vmatpush3.bf16.msra.mxu1 %v4586_v39 }
 0x8f1   :  { %4273 = vmatmul.mubr.bf16.vlgmr.msra.gmra.mrb[56].mxu0 %v3438_v9  ;;  %4309 = vmatprep.subr.bf16.mxu1 %v4587_v51 }
 0x8f2   :  { %4276 = vmatprep.mubr.bf16.mxu0 %v3439_v10  ;;  %4281 = vmatpush3.bf16.msra.mxu0 %v4582_v31 }
 0x8f3   :  { %4282 = vmatprep.subr.bf16.mxu0 %v4583_v4 }
 0x8f4   :  { %4317 = vmatpush3.bf16.msra.mxu1 %v4587_v51 }
 0x8f5   :  { %4310 = vmatprep.subr.bf16.mxu1 %v4588_v54 }
 0x8f6   :  { %4283 = vmatpush3.bf16.msra.mxu0 %v4583_v4 }
 0x8f7   :  { %4284 = vmatprep.subr.bf16.mxu0 %v4584_v47 }
 0x8f8   :  { %4318 = vmatpush3.bf16.msra.mxu1 %v4588_v54 }
 0x8f9   :  { %4277 = vmatmul.mubr.bf16.gmra.mrb[60].mxu0 %v3440_v38  ;;  %4311 = vmatprep.subr.bf16.mxu1 %v4589_v33 }
 0x8fa   :  { %4285 = vmatpush3.bf16.msra.mxu0 %v4584_v47 }
 0x8fb   :  { %4286 = vmatprep.subr.bf16.mxu0 %v4585_v59 }
 0x8fc   :  { %4319 = vmatpush3.bf16.msra.mxu1 %v4589_v33 }
 0x8fe   :  { %4287 = vmatpush3.bf16.msra.mxu0 %v4585_v59 }
 0x8ff   :  { %4288 = vmatprep.subr.bf16.mxu0 %v4586_v39 }
 0x902   :  { %4289 = vmatpush3.bf16.msra.mxu0 %v4586_v39 }
 0x903   :  { %4290 = vmatprep.subr.bf16.mxu0 %v4587_v51 }
 0x906   :  { %4291 = vmatpush3.bf16.msra.mxu0 %v4587_v51 }
 0x907   :  { %4292 = vmatprep.subr.bf16.mxu0 %v4588_v54 }
 0x90a   :  { %4293 = vmatpush3.bf16.msra.mxu0 %v4588_v54 }
 0x90b   :  { %4294 = vmatprep.subr.bf16.mxu0 %v4589_v33 }
 0x90e   :  { %4295 = vmatpush3.bf16.msra.mxu0 %v4589_v33 }
 0x9b2   :  { %v6454_v63 = vpop.f32.mrb[96].mxu1 }
 0x9b3   :  { %v6456_v50 = vpop.f32.mrb[97].mxu1 }
 0x9b4   :  { %v6458_v13 = vpop.f32.mrb[98].mxu1 }
 0x9b5   :  { %v6460_v45 = vpop.f32.mrb[99].mxu1 }
 0x9c4   :  { %v4274_v60 = vpop.f32.mrb[56].mxu0 }
 0x9c5   :  { %v3539_v34 = vadd.f32 %v4274_v60, %v3947_v24  ;;  %v3530_v8 = vpop.f32.mrb[57].mxu0  ;;  %v3938_v60 = vld [vmem:[#allocation34] ss:$0 sm:$0xff] }
 0x9c6   :  { %v3531_v2 = vadd.f32 %v3947_v24, %v3530_v8  ;;  %v4275_v11 = vpop.f32.mrb[58].mxu0  ;;  %v3354_v8 = vadd.f32 %v3938_v60, %v6460_v45 }
 0x9c7   :  { %v3571_v46 = vmul.f32 0.70710677, %v3539_v34  ;;  %v3542_v22 = vadd.f32 %v4275_v11, %v3947_v24  ;;  %v3533_v1 = vpop.f32.mrb[59].mxu0  ;;  %v3563_v61 = vmul.f32 0.5, %v3539_v34  ;;  %v3362_v34 = vadd.f32 %v6458_v13, %v3938_v60 }
 0x9c8   :  { %v3569_v25 = vmul.f32 0.70710677, %v3531_v2  ;;  %v3534_v52 = vadd.f32 %v3947_v24, %v3533_v1  ;;  %v3561_v17 = vmul.f32 0.5, %v3531_v2  ;;  %v3956_v2 = vld [vmem:[#allocation31] ss:$0 sm:$0xff]  ;;  %v3359_v11 = vadd.f32 %v6454_v63, %v3938_v60 }
 0x9c9   :  { %4702 = verf.f32 %v3571_v46  ;;  %v3572_v55 = vmul.f32 0.70710677, %v3542_v22  ;;  %v3564_v36 = vmul.f32 0.5, %v3542_v22  ;;  %v3351_v46 = vadd.f32 %v3938_v60, %v6456_v50 }
 0x9ca   :  { %4704 = verf.f32 %v3569_v25  ;;  %v3570_v58 = vmul.f32 0.70710677, %v3534_v52  ;;  %v3562_v10 = vmul.f32 0.5, %v3534_v52  ;;  %v4327_v52 = vadd.f32 %v3956_v2, %v3362_v34 }
 0x9cb   :  { %4706 = verf.f32 %v3572_v55  ;;  %v4334_v13 = vadd.f32 %v3956_v2, %v3938_v60 }
 0x9cc   :  { %4708 = verf.f32 %v3570_v58  ;;  %v4278_v21 = vpop.f32.mrb[60].mxu0 }
 0x9cd   :  { %v3555_v48 = vadd.f32 %v4278_v21, %v3947_v24  ;;  %v3546_v53 = vpop.f32.mrb[61].mxu0  ;;  %v4330_v21 = vadd.f32 %v3956_v2, %v3354_v8 }
 0x9ce   :  { %v3547_v43 = vadd.f32 %v3947_v24, %v3546_v53  ;;  %v4279_v62 = vpop.f32.mrb[62].mxu0 }
 0x9cf   :  { %v3575_v12 = vmul.f32 0.70710677, %v3555_v48  ;;  %v3558_v3 = vadd.f32 %v4279_v62, %v3947_v24  ;;  %v3549_v40 = vpop.f32.mrb[63].mxu0  ;;  %v3567_v28 = vmul.f32 0.5, %v3555_v48 }
 0x9d0   :  { %v3573_v7 = vmul.f32 0.70710677, %v3547_v43  ;;  %v3550_v49 = vadd.f32 %v3947_v24, %v3549_v40  ;;  %v3565_v31 = vmul.f32 0.5, %v3547_v43 }
 0x9d1   :  { %4710 = verf.f32 %v3575_v12  ;;  %v3576_v0 = vmul.f32 0.70710677, %v3558_v3  ;;  %v3568_v38 = vmul.f32 0.5, %v3558_v3 }
 0x9d2   :  { %4712 = verf.f32 %v3573_v7  ;;  %v3574_v9 = vmul.f32 0.70710677, %v3550_v49  ;;  %v3566_v4 = vmul.f32 0.5, %v3550_v49 }
 0x9d3   :  { %v4703_v32 = vpop.eup %4702  ;;  %4714 = verf.f32 %v3576_v0 }
 0x9d4   :  { %v4705_v41 = vpop.eup %4704  ;;  %v3587_v5 = vadd.f32 1.0, %v4703_v32  ;;  %4716 = verf.f32 %v3574_v9 }
 0x9d5   :  { %v4707_v30 = vpop.eup %4706  ;;  %v3585_v57 = vadd.f32 1.0, %v4705_v41 }
 0x9d6   :  { %v4709_v19 = vpop.eup %4708  ;;  %v3588_v29 = vadd.f32 1.0, %v4707_v30  ;;  %v3595_v37 = vmul.f32 %v3587_v5, %v3563_v61 }
 0x9d7   :  { %v3586_v26 = vadd.f32 1.0, %v4709_v19  ;;  %v3593_v27 = vmul.f32 %v3585_v57, %v3561_v17 }
 0x9d8   :  { %v3596_v42 = vmul.f32 %v3588_v29, %v3564_v36 }
 0x9d9   :  { %v3594_v23 = vmul.f32 %v3586_v26, %v3562_v10 }
 0x9da   :  { %v3618_v16 = vpack.c.bf16 %v3596_v42, %v3595_v37 }
 0x9db   :  { %v4711_v20 = vpop.eup %4710  ;;  %v3617_v18 = vpack.c.bf16 %v3594_v23, %v3593_v27 }
 0x9dc   :  { %v4713_v14 = vpop.eup %4712  ;;  %v3591_v44 = vadd.f32 1.0, %v4711_v20 }
 0x9dd   :  { %v4715_v15 = vpop.eup %4714  ;;  %v3589_v35 = vadd.f32 1.0, %v4713_v14  ;;  %4296 = vmatprep.mubr.bf16.mxu0 %v3617_v18 }
 0x9de   :  { %v4717_v6 = vpop.eup %4716  ;;  %v3592_v56 = vadd.f32 1.0, %v4715_v15  ;;  %4297 = vmatmul.mubr.bf16.vlgmr.msra.gmra.mrb[64].mxu0 %v3618_v16  ;;  %v3599_v59 = vmul.f32 %v3591_v44, %v3567_v28 }
 0x9df   :  { %v3590_v47 = vadd.f32 1.0, %v4717_v6  ;;  %v3597_v51 = vmul.f32 %v3589_v35, %v3565_v31 }
 0x9e0   :  { %v3600_v39 = vmul.f32 %v3592_v56, %v3568_v38 }
 0x9e1   :  { %v3598_v54 = vmul.f32 %v3590_v47, %v3566_v4 }
 0x9e2   :  { %v3620_v33 = vpack.c.bf16 %v3600_v39, %v3599_v59 }
 0x9e3   :  { %v3619_v24 = vpack.c.bf16 %v3598_v54, %v3597_v51 }
 0x9e5   :  { %4300 = vmatprep.mubr.bf16.mxu1 %v3619_v24 }
 0x9e6   :  { %4301 = vmatmul.mubr.bf16.vlgmr.msra.gmra.mrb[100].mxu1 %v3620_v33 }
 0xab1   :  { %v4298_v22 = vpop.f32.mrb[64].mxu0 }
 0xab2   :  { %v4321_v1 = vadd.f32 %v4298_v22, %v3359_v11  ;;  %v3710_v25 = vpop.f32.mrb[65].mxu0 }
 0xab3   :  { %v4324_v55 = vadd.f32 %v3710_v25, %v3351_v46  ;;  %v4299_v58 = vpop.f32.mrb[66].mxu0 }
 0xab4   :  { %v4322_v48 = vadd.f32 %v4321_v1, %v3956_v2  ;;  %v4328_v53 = vadd.f32 %v4327_v52, %v4299_v58  ;;  %v3713_v43 = vpop.f32.mrb[67].mxu0 }
 0xab5   :  { %v4325_v62 = vadd.f32 %v4324_v55, %v3956_v2  ;;  %v4331_v12 = vadd.f32 %v4330_v21, %v3713_v43 }
 0xab6   :  { %3751 = vst [vmem:[#allocation35 + $0x10] sm:$0xff] %v4322_v48  ;;  %3752 = vst [vmem:[#allocation35 + $0x18] sm:$0xff] %v4328_v53 }
 0xab7   :  { %3749 = vst [vmem:[#allocation35] sm:$0xff] %v4325_v62  ;;  %3750 = vst [vmem:[#allocation35 + $0x8] sm:$0xff] %v4331_v12 }
 0xab9   :  { %v4302_v63 = vpop.f32.mrb[100].mxu1 }
 0xaba   :  { %v4333_v45 = vadd.f32 %v4334_v13, %v4302_v63  ;;  %v3726_v50 = vpop.f32.mrb[101].mxu1 }
 0xabb   :  { %v4335_v3 = vadd.f32 %v4334_v13, %v3726_v50  ;;  %v4303_v40 = vpop.f32.mrb[102].mxu1 }
 0xabc   :  { %3755 = vst [vmem:[#allocation35 + $0x30] sm:$0xff] %v4333_v45  ;;  %v4337_v7 = vadd.f32 %v4334_v13, %v4303_v40  ;;  %v3729_v49 = vpop.f32.mrb[103].mxu1 }
 0xabd   :  { %3753 = vst [vmem:[#allocation35 + $0x20] sm:$0xff] %v4335_v3  ;;  %v4339_v0 = vadd.f32 %v4334_v13, %v3729_v49 }
 0xabe   :  { %3756 = vst [vmem:[#allocation35 + $0x38] sm:$0xff] %v4337_v7 }
 0xabf   :  { %3754 = vst [vmem:[#allocation35 + $0x28] sm:$0xff] %v4339_v0 }
 0xac0   :  { %5191 = shalt.err (!%p5188_p4)
}
 0xac1   :  { %s6545_s29 = sld [smem:[#allocation56_spill]] }
 0xac7   :  { %s5192_s4 = scalar_lea.hbm %s6545_s29, 1024 }
 0xac8   :  { %p5193_p5 = scmp.ne.s32.totalorder %s6545_s29, %s5192_s4  ;;  %p5196_p6 = scmp.lt.u32.totalorder %s5192_s4, %s6545_s29 }
 0xaca   :  { %p5198_p7 = pnand %p5196_p6, %p5193_p5 }
 0xacc   :  { %5201 = shalt.err (!%p5198_p7)
}
 0xacd   :  { %3768 = dma.vmem_to_hbm [thread:$0]  %s3763_s10, 1024, %s6545_s29, [#allocation4], %s6535_s23, %s6535_s23, %s6534_s28  }
 0xace   :  { %5224 = dma.done.wait [#allocation4], 1024  }
 0xacf   :  { %5225 = vsyncadd [#allocation4], 4294966272 }
 0xad0   :  { %3772 = vsyncpa [#allocation3], 1 }
 0xad1   :  { %3773 = vsyncpa [#allocation6], 1 }
 0xad2   :  { %3774 = vsyncpa [#allocation9], 1 }
 0xad3   :  { %3775 = vsyncpa [#allocation12], 1 }
 0xad4   :  { %3776 = vsyncpa [#allocation15], 1 }
 0xad5   :  { %3777 = vsyncpa [#allocation18], 1 }
 0xad6   :  { %3778 = vsyncpa [#allocation21], 1 }
 0xad7   :  { %3779 = vsyncpa [#allocation24], 1 }
 0xad8   :  { %3780 = vsyncpa [#allocation27], 1 }
 0xad9   :  { %3781 = vsyncpa [#allocation30], 1 }
 0xada   :  { %3782 = vsyncpa [#allocation33], 1 }
 0xadb   :  { %3783 = vsyncpa [#allocation4], 1 }

</bundles_post_ra>
